<compile_context>
chip_gen: v5e
topology: v5e:2x2
jax: 0.10.0
libtpu: 0.0.40
codegen_flags: <defaults>
</compile_context>

<pallas_src>
import functools

import jax
import jax.numpy as jnp
from jax import lax
from jax.experimental import pallas as pl
from jax.experimental.pallas import tpu as pltpu


# ----------------------------------------------------------------------------
# Kernel 1: fused context path
#   modality MLPs -> concat -> *sqrt(E) -> nlayers TransformerEncoderLayers
#   -> mean over slots -> transformer_projector
# Layout inside the kernel: rows are (slot s, batch b) flattened, i.e. the
# (S, B, E) tensor that batch_first=False attention operates on (attention
# length = B per independent slot s).
# ----------------------------------------------------------------------------
def context_kernel(frames_ref, title_ref, desc_ref, audio_ref,
                   fw1_ref, fb1_ref, fw2_ref, fb2_ref,      # frames_fc
                   tw1_ref, tb1_ref, tw2_ref, tb2_ref,      # title_fc
                   dw1_ref, db1_ref, dw2_ref, db2_ref,      # description_fc
                   aw1_ref, ab1_ref, aw2_ref, ab2_ref,      # audio_fc
                   wqkv_ref, bqkv_ref, wo_ref, bo_ref,      # stacked (nlayers, ...)
                   g1_ref, be1_ref, wf1_ref, bf1_ref, wf2_ref, bf2_ref,
                   g2_ref, be2_ref,
                   pw_ref, pb_ref,                           # projector
                   o_ref, *, nhead, scale_emb):
    f32, bf16 = jnp.float32, jnp.bfloat16

    def mlp(x, w1, b1, w2, b2):
        h = jnp.dot(x.astype(bf16), w1[...], preferred_element_type=f32) + b1[...]
        h = jnp.maximum(h, 0.0)
        return jnp.dot(h.astype(bf16), w2[...], preferred_element_type=f32) + b2[...]

    def layer_norm(v, g, b, eps=1e-5):
        mu = jnp.mean(v, axis=-1, keepdims=True)
        var = jnp.mean((v - mu) ** 2, axis=-1, keepdims=True)
        return (v - mu) * jax.lax.rsqrt(var + eps) * g + b

    Lb = title_ref.shape[0]          # attention length = model batch B
    E = pw_ref.shape[0]
    nlayers = wqkv_ref.shape[0]
    D = E // nhead
    inv_sqrt_d = 1.0 / (float(D) ** 0.5)

    # --- project_modals (frames rows already arrive slot-major: (t, b)) ---
    frames_p = mlp(frames_ref[...], fw1_ref, fb1_ref, fw2_ref, fb2_ref)   # (T*B, E)
    title_p = mlp(title_ref[...], tw1_ref, tb1_ref, tw2_ref, tb2_ref)     # (B, E)
    desc_p = mlp(desc_ref[...], dw1_ref, db1_ref, dw2_ref, db2_ref)       # (B, E)
    audio_p = mlp(audio_ref[...], aw1_ref, ab1_ref, aw2_ref, ab2_ref)     # (B, E)

    # torch.cat([frames, title, description, audio], dim=1), then *= sqrt(E)
    x2 = jnp.concatenate([frames_p, title_p, desc_p, audio_p], axis=0) * scale_emb
    S = x2.shape[0] // Lb            # = T + 3 independent "slots"

    # --- transformer encoder (post-norm layers, dropout = identity) ---
    for l in range(nlayers):         # static unroll over layers
        wqkv, bqkv = wqkv_ref[l], bqkv_ref[l]
        wo, bo = wo_ref[l], bo_ref[l]
        g1, be1 = g1_ref[l], be1_ref[l]
        wf1, bf1 = wf1_ref[l], bf1_ref[l]
        wf2, bf2 = wf2_ref[l], bf2_ref[l]
        g2, be2 = g2_ref[l], be2_ref[l]

        qkv = jnp.dot(x2.astype(bf16), wqkv, preferred_element_type=f32) + bqkv
        qkv3 = qkv.reshape(S, Lb, 3 * E)

        # Per-head attention; the output projection is folded into the head loop
        # so there is no lane-dim concat of the heads.
        acc = jnp.zeros((S * Lb, E), f32)
        for h in range(nhead):       # static loop, nhead is small
            qh = qkv3[:, :, h * D:(h + 1) * D] * inv_sqrt_d
            kh = qkv3[:, :, E + h * D:E + (h + 1) * D]
            vh = qkv3[:, :, 2 * E + h * D:2 * E + (h + 1) * D]
            s = jnp.einsum('nld,nmd->nlm', qh.astype(bf16), kh.astype(bf16),
                           preferred_element_type=f32)                    # (S, B, B)
            s = s - jnp.max(s, axis=-1, keepdims=True)
            p = jnp.exp(s)
            p = p * pl.reciprocal(jnp.sum(p, axis=-1, keepdims=True), approx=True)
            oh = jnp.einsum('nlm,nmd->nld', p.astype(bf16), vh.astype(bf16),
                            preferred_element_type=f32)                   # (S, B, D)
            acc = acc + jnp.dot(oh.reshape(S * Lb, D).astype(bf16),
                                wo[h * D:(h + 1) * D, :],
                                preferred_element_type=f32)
        attn = acc + bo

        y = layer_norm(x2 + attn, g1, be1)
        ff = jnp.maximum(jnp.dot(y.astype(bf16), wf1, preferred_element_type=f32) + bf1, 0.0)
        ff = jnp.dot(ff.astype(bf16), wf2, preferred_element_type=f32) + bf2
        x2 = layer_norm(y + ff, g2, be2)

    # torch.mean(context, dim=1) == mean over the S slots, fused with projector.
    m = jnp.mean(x2.reshape(S, Lb, E), axis=0)                            # (B, E)
    anchor = jnp.dot(m.astype(bf16), pw_ref[...], preferred_element_type=f32) + pb_ref[...]
    o_ref[...] = anchor.astype(o_ref.dtype)


def context_forward(frames_tb, title, description, audio, params, *, nhead, scale_emb):
    enc = params['encoder']
    pw, pb = params['transformer_projector']
    batch = title.shape[0]
    latent = pw.shape[1]
    kern = functools.partial(context_kernel, nhead=nhead, scale_emb=scale_emb)
    return pl.pallas_call(
        kern,
        out_shape=jax.ShapeDtypeStruct((batch, latent), jnp.float32),
    )(frames_tb, title, description, audio,
      *params['frames_fc'], *params['title_fc'],
      *params['description_fc'], *params['audio_fc'],
      enc['wqkv'], enc['bqkv'], enc['wo'], enc['bo'],
      enc['ln1_g'], enc['ln1_b'], enc['wf1'], enc['bf1'],
      enc['wf2'], enc['bf2'], enc['ln2_g'], enc['ln2_b'],
      pw, pb)


# ----------------------------------------------------------------------------
# Kernel 2: fused thumbnail tower (stand-in backbone + exact replaced fc head)
#   conv-as-GEMM on patches -> ReLU -> global average pool -> 64->2048 proj
#   -> (2048 -> 2*latent -> ReLU -> latent)
# Gridded over the batch dimension; each grid step handles one video's K images.
# ----------------------------------------------------------------------------
def thumb_tower_kernel(p_ref, ws_ref, bs_ref, wp_ref, bp_ref,
                       w1_ref, b1_ref, w2_ref, b2_ref, o_ref):
    f32, bf16 = jnp.float32, jnp.bfloat16
    K, HW, P = p_ref.shape
    C = ws_ref.shape[1]

    patches = p_ref[...].reshape(K * HW, P)                               # bf16
    h = jnp.dot(patches, ws_ref[...], preferred_element_type=f32) + bs_ref[...]
    h = jnp.maximum(h, 0.0).reshape(K, HW, C)
    g = jnp.mean(h, axis=1)                                               # GAP -> (K, C)
    feats = jnp.dot(g.astype(bf16), wp_ref[...], preferred_element_type=f32) + bp_ref[...]
    hh = jnp.maximum(
        jnp.dot(feats.astype(bf16), w1_ref[...], preferred_element_type=f32) + b1_ref[...],
        0.0)
    lat = jnp.dot(hh.astype(bf16), w2_ref[...], preferred_element_type=f32) + b2_ref[...]
    o_ref[...] = lat.reshape(o_ref.shape).astype(o_ref.dtype)             # (1, K, latent)


def thumbnail_tower(patches, params, *, batch, k):
    ws, bs = params['stem']
    wp, bp = params['backbone_proj']
    w1, b1, w2, b2 = params['head_fc']
    BK, HW, P = patches.shape
    latent = w2.shape[1]
    return pl.pallas_call(
        thumb_tower_kernel,
        out_shape=jax.ShapeDtypeStruct((batch, k, latent), jnp.float32),
        grid=(batch,),
        in_specs=[
            pl.BlockSpec((k, HW, P), lambda g: (g, 0, 0)),
            pl.BlockSpec(ws.shape, lambda g: (0, 0)),
            pl.BlockSpec(bs.shape, lambda g: (0, 0)),
            pl.BlockSpec(wp.shape, lambda g: (0, 0)),
            pl.BlockSpec(bp.shape, lambda g: (0, 0)),
            pl.BlockSpec(w1.shape, lambda g: (0, 0)),
            pl.BlockSpec(b1.shape, lambda g: (0, 0)),
            pl.BlockSpec(w2.shape, lambda g: (0, 0)),
            pl.BlockSpec(b2.shape, lambda g: (0, 0)),
        ],
        out_specs=pl.BlockSpec((1, k, latent), lambda g: (g, 0, 0)),
        compiler_params=pltpu.CompilerParams(dimension_semantics=("parallel",)),
    )(patches, ws, bs, wp, bp, w1, b1, w2, b2)


# ----------------------------------------------------------------------------
# Parameters (synthetic, deterministic). Matmul weights stored in bf16 (halves
# weight DMA, MXU-native on v5e/v6e/v7x); biases / LayerNorm params stay f32.
# ----------------------------------------------------------------------------
def init_params(key, cfg):
    E = cfg['common_embed_size']
    H = cfg['hidden_size']
    L = cfg['latent_size']
    FR, AU, TX = cfg['frame_embed_size'], cfg['audio_embed_size'], cfg['text_embed_size']
    keys = iter(jax.random.split(key, 64))

    def lin(fi, fo, scale=0.05):
        k = next(keys)
        kw_, kb_ = jax.random.split(k)
        w = jax.random.normal(kw_, (fi, fo), jnp.float32) * scale
        b = jax.random.normal(kb_, (1, fo), jnp.float32) * scale
        return w.astype(jnp.bfloat16), b

    p = {}
    w1, b1 = lin(FR, 2 * E); w2, b2 = lin(2 * E, E); p['frames_fc'] = (w1, b1, w2, b2)
    w1, b1 = lin(TX, E);     w2, b2 = lin(E, E);     p['title_fc'] = (w1, b1, w2, b2)
    w1, b1 = lin(TX, E);     w2, b2 = lin(E, E);     p['description_fc'] = (w1, b1, w2, b2)
    w1, b1 = lin(AU, 2 * E); w2, b2 = lin(2 * E, E); p['audio_fc'] = (w1, b1, w2, b2)

    layers = []
    for _ in range(cfg['nlayers']):
        wqkv, bqkv = lin(E, 3 * E)
        wo, bo = lin(E, E)
        wf1, bf1 = lin(E, H)
        wf2, bf2 = lin(H, E)
        layers.append(dict(wqkv=wqkv, bqkv=bqkv, wo=wo, bo=bo,
                           ln1_g=jnp.ones((1, E), jnp.float32),
                           ln1_b=jnp.zeros((1, E), jnp.float32),
                           wf1=wf1, bf1=bf1, wf2=wf2, bf2=bf2,
                           ln2_g=jnp.ones((1, E), jnp.float32),
                           ln2_b=jnp.zeros((1, E), jnp.float32)))
    # stack per-layer params -> single ref per tensor, static in-kernel layer loop
    p['encoder'] = {k: jnp.stack([lp[k] for lp in layers]) for k in layers[0]}
    p['transformer_projector'] = lin(E, L)

    # thumbnail tower (stand-in backbone + exact replaced fc head)
    p['stem'] = lin(3 * 7 * 7, 64)
    p['backbone_proj'] = lin(64, 2048)
    w1, b1 = lin(2048, 2 * L); w2, b2 = lin(2 * L, L); p['head_fc'] = (w1, b1, w2, b2)
    return p


# ----------------------------------------------------------------------------
# Forward
# ----------------------------------------------------------------------------
def thumbnail_selector_forward(params, frames, title, description, audio, thumbnails,
                               *, nhead, common_embed_size):
    B, T, FR = frames.shape

    # Arrange frames slot-major (t, b) so the fused kernel's axis-0 concat matches
    # torch.cat([frames, title, description, audio], dim=1) under batch_first=False.
    frames_tb = jnp.transpose(frames, (1, 0, 2)).reshape(T * B, FR)
    anchor = context_forward(frames_tb, title, description, audio, params,
                             nhead=nhead,
                             scale_emb=float(common_embed_size) ** 0.5)     # (B, latent)

    # --- thumbnail tower ---
    Bt, K, C, Hh, Ww = thumbnails.shape
    imgs = thumbnails.reshape(Bt * K, C, Hh, Ww)
    # Single XLA patch-extraction op (replaces the 49-slice im2col glue).
    patches = lax.conv_general_dilated_patches(
        imgs, filter_shape=(7, 7), window_strides=(2, 2), padding=((3, 3), (3, 3)))
    BK, P, Ho, Wo = patches.shape
    patches = jnp.transpose(patches, (0, 2, 3, 1)).reshape(BK, Ho * Wo, P)
    patches = patches.astype(jnp.bfloat16)          # halves DMA into the tower kernel

    lat = thumbnail_tower(patches, params, batch=Bt, k=K)                   # (B, K, latent)
    positive = lat[:, 0]
    negatives = lat[:, 1:]
    return anchor, positive, negatives


# ----------------------------------------------------------------------------
# Main
# ----------------------------------------------------------------------------
if __name__ == "__main__":
    cfg = dict(frame_embed_size=48, audio_embed_size=40, text_embed_size=24,
               common_embed_size=32, hidden_size=64, latent_size=16,
               nhead=4, nlayers=2, dropout=0.0)
    B, T, K, IMG = 2, 5, 3, 16

    key = jax.random.PRNGKey(0)
    kp, kf, kt, kd, ka, kth = jax.random.split(key, 6)
    params = init_params(kp, cfg)

    frames = jax.random.normal(kf, (B, T, cfg['frame_embed_size']), jnp.float32)
    title = jax.random.normal(kt, (B, cfg['text_embed_size']), jnp.float32)
    description = jax.random.normal(kd, (B, cfg['text_embed_size']), jnp.float32)
    audio = jax.random.normal(ka, (B, cfg['audio_embed_size']), jnp.float32)
    thumbnails = jax.random.normal(kth, (B, K, 3, IMG, IMG), jnp.float32)

    fwd = jax.jit(functools.partial(
        thumbnail_selector_forward,
        nhead=cfg['nhead'], common_embed_size=cfg['common_embed_size']))

    anchor, positive, negatives = fwd(params, frames, title, description, audio, thumbnails)
    jax.block_until_ready((anchor, positive, negatives))

    assert anchor.shape == (B, cfg['latent_size'])
    assert positive.shape == (B, cfg['latent_size'])
    assert negatives.shape == (B, K - 1, cfg['latent_size'])
    assert bool(jnp.all(jnp.isfinite(anchor)))
    assert bool(jnp.all(jnp.isfinite(positive)))
    assert bool(jnp.all(jnp.isfinite(negatives)))
    print("KERNEL_OK")
</pallas_src>

<mosaic_0001>
module attributes {stable_mosaic.version = 11 : i64} {
  func.func @thumb_tower_kernel(%arg0: i32, %arg1: memref<3x64x147xbf16, #tpu.memory_space<vmem>>, %arg2: memref<147x64xbf16, #tpu.memory_space<vmem>>, %arg3: memref<1x64xf32, #tpu.memory_space<vmem>>, %arg4: memref<64x2048xbf16, #tpu.memory_space<vmem>>, %arg5: memref<1x2048xf32, #tpu.memory_space<vmem>>, %arg6: memref<2048x32xbf16, #tpu.memory_space<vmem>>, %arg7: memref<1x32xf32, #tpu.memory_space<vmem>>, %arg8: memref<32x16xbf16, #tpu.memory_space<vmem>>, %arg9: memref<1x16xf32, #tpu.memory_space<vmem>>, %arg10: memref<1x3x16xf32, #tpu.memory_space<vmem>>) attributes {dimension_semantics = [#tpu.dimension_semantics<parallel>], iteration_bounds = array<i64: 2>, scalar_prefetch = 0 : i64, scratch_operands = 0 : i64, tpu.core_type = #tpu.core_type<tc>, window_params = [{transform_indices = @transform_0, window_bounds = array<i64: 3, 64, 147>}, {pipeline_mode = #tpu.pipeline_mode<synchronous>, transform_indices = @transform_1, window_bounds = array<i64: 147, 64>}, {pipeline_mode = #tpu.pipeline_mode<synchronous>, transform_indices = @transform_2, window_bounds = array<i64: 1, 64>}, {pipeline_mode = #tpu.pipeline_mode<synchronous>, transform_indices = @transform_3, window_bounds = array<i64: 64, 2048>}, {pipeline_mode = #tpu.pipeline_mode<synchronous>, transform_indices = @transform_4, window_bounds = array<i64: 1, 2048>}, {pipeline_mode = #tpu.pipeline_mode<synchronous>, transform_indices = @transform_5, window_bounds = array<i64: 2048, 32>}, {pipeline_mode = #tpu.pipeline_mode<synchronous>, transform_indices = @transform_6, window_bounds = array<i64: 1, 32>}, {pipeline_mode = #tpu.pipeline_mode<synchronous>, transform_indices = @transform_7, window_bounds = array<i64: 32, 16>}, {pipeline_mode = #tpu.pipeline_mode<synchronous>, transform_indices = @transform_8, window_bounds = array<i64: 1, 16>}, {transform_indices = @transform_9, window_bounds = array<i64: 1, 3, 16>}]} {
    %c0 = arith.constant 0 : index
    %c0_0 = arith.constant 0 : index
    %c0_1 = arith.constant 0 : index
    %0 = vector.load %arg1[%c0, %c0_0, %c0_1] : memref<3x64x147xbf16, #tpu.memory_space<vmem>>, vector<3x64x147xbf16>
    %1 = vector.shape_cast %0 : vector<3x64x147xbf16> to vector<192x147xbf16>
    %c0_2 = arith.constant 0 : index
    %c0_3 = arith.constant 0 : index
    %2 = vector.load %arg2[%c0_2, %c0_3] : memref<147x64xbf16, #tpu.memory_space<vmem>>, vector<147x64xbf16>
    %cst = arith.constant dense<0.000000e+00> : vector<192x64xf32>
    %3 = tpu.matmul %1, %2, %cst {dimension_numbers = #tpu.dot_dimension_numbers<[1], [0], [0], [1], [0, 0, 1, 1], [], []>} : vector<192x147xbf16>, vector<147x64xbf16>, vector<192x64xf32> -> vector<192x64xf32>
    %c0_4 = arith.constant 0 : index
    %c0_5 = arith.constant 0 : index
    %4 = vector.load %arg3[%c0_4, %c0_5] : memref<1x64xf32, #tpu.memory_space<vmem>>, vector<1x64xf32>
    %5 = vector.broadcast %4 : vector<1x64xf32> to vector<192x64xf32>
    %6 = arith.addf %3, %5 : vector<192x64xf32>
    %cst_6 = arith.constant 0.000000e+00 : f32
    %7 = vector.broadcast %cst_6 : f32 to vector<192x64xf32>
    %8 = arith.maximumf %6, %7 : vector<192x64xf32>
    %9 = vector.shape_cast %8 : vector<192x64xf32> to vector<3x64x64xf32>
    %cst_7 = arith.constant dense<0.000000e+00> : vector<3x64xf32>
    %10 = vector.multi_reduction <add>, %9, %cst_7 [1] : vector<3x64x64xf32> to vector<3x64xf32>
    %cst_8 = arith.constant 6.400000e+01 : f32
    %11 = vector.broadcast %cst_8 : f32 to vector<3x64xf32>
    %12 = arith.divf %10, %11 : vector<3x64xf32>
    %13 = arith.truncf %12 : vector<3x64xf32> to vector<3x64xbf16>
    %c0_9 = arith.constant 0 : index
    %c0_10 = arith.constant 0 : index
    %14 = vector.load %arg4[%c0_9, %c0_10] : memref<64x2048xbf16, #tpu.memory_space<vmem>>, vector<64x2048xbf16>
    %cst_11 = arith.constant dense<0.000000e+00> : vector<3x2048xf32>
    %15 = tpu.matmul %13, %14, %cst_11 {dimension_numbers = #tpu.dot_dimension_numbers<[1], [0], [0], [1], [0, 0, 1, 1], [], []>} : vector<3x64xbf16>, vector<64x2048xbf16>, vector<3x2048xf32> -> vector<3x2048xf32>
    %c0_12 = arith.constant 0 : index
    %c0_13 = arith.constant 0 : index
    %16 = vector.load %arg5[%c0_12, %c0_13] : memref<1x2048xf32, #tpu.memory_space<vmem>>, vector<1x2048xf32>
    %17 = vector.broadcast %16 : vector<1x2048xf32> to vector<3x2048xf32>
    %18 = arith.addf %15, %17 : vector<3x2048xf32>
    %19 = arith.truncf %18 : vector<3x2048xf32> to vector<3x2048xbf16>
    %c0_14 = arith.constant 0 : index
    %c0_15 = arith.constant 0 : index
    %20 = vector.load %arg6[%c0_14, %c0_15] : memref<2048x32xbf16, #tpu.memory_space<vmem>>, vector<2048x32xbf16>
    %cst_16 = arith.constant dense<0.000000e+00> : vector<3x32xf32>
    %21 = tpu.matmul %19, %20, %cst_16 {dimension_numbers = #tpu.dot_dimension_numbers<[1], [0], [0], [1], [0, 0, 1, 1], [], []>} : vector<3x2048xbf16>, vector<2048x32xbf16>, vector<3x32xf32> -> vector<3x32xf32>
    %c0_17 = arith.constant 0 : index
    %c0_18 = arith.constant 0 : index
    %22 = vector.load %arg7[%c0_17, %c0_18] : memref<1x32xf32, #tpu.memory_space<vmem>>, vector<1x32xf32>
    %23 = vector.broadcast %22 : vector<1x32xf32> to vector<3x32xf32>
    %24 = arith.addf %21, %23 : vector<3x32xf32>
    %cst_19 = arith.constant 0.000000e+00 : f32
    %25 = vector.broadcast %cst_19 : f32 to vector<3x32xf32>
    %26 = arith.maximumf %24, %25 : vector<3x32xf32>
    %27 = arith.truncf %26 : vector<3x32xf32> to vector<3x32xbf16>
    %c0_20 = arith.constant 0 : index
    %c0_21 = arith.constant 0 : index
    %28 = vector.load %arg8[%c0_20, %c0_21] : memref<32x16xbf16, #tpu.memory_space<vmem>>, vector<32x16xbf16>
    %cst_22 = arith.constant dense<0.000000e+00> : vector<3x16xf32>
    %29 = tpu.matmul %27, %28, %cst_22 {dimension_numbers = #tpu.dot_dimension_numbers<[1], [0], [0], [1], [0, 0, 1, 1], [], []>} : vector<3x32xbf16>, vector<32x16xbf16>, vector<3x16xf32> -> vector<3x16xf32>
    %c0_23 = arith.constant 0 : index
    %c0_24 = arith.constant 0 : index
    %30 = vector.load %arg9[%c0_23, %c0_24] : memref<1x16xf32, #tpu.memory_space<vmem>>, vector<1x16xf32>
    %31 = vector.broadcast %30 : vector<1x16xf32> to vector<3x16xf32>
    %32 = arith.addf %29, %31 : vector<3x16xf32>
    %33 = vector.shape_cast %32 : vector<3x16xf32> to vector<1x3x16xf32>
    %c0_25 = arith.constant 0 : index
    %c0_26 = arith.constant 0 : index
    %c0_27 = arith.constant 0 : index
    %34 = vector.load %arg10[%c0_25, %c0_26, %c0_27] : memref<1x3x16xf32, #tpu.memory_space<vmem>>, vector<1x3x16xf32>
    tpu.vector_store %arg10[%c0_25, %c0_26, %c0_27], %33 {strides = array<i32>} : memref<1x3x16xf32, #tpu.memory_space<vmem>>, vector<1x3x16xf32>,
    return
  }
  func.func @transform_0(%arg0: i32) -> (i32, i32, i32) {
    %c0_i32 = arith.constant 0 : i32
    %c0_i32_0 = arith.constant 0 : i32
    %c0_i32_1 = arith.constant 0 : i32
    return %arg0, %c0_i32, %c0_i32_0 : i32, i32, i32
  }
  func.func @transform_1(%arg0: i32) -> (i32, i32) {
    %c0_i32 = arith.constant 0 : i32
    %c0_i32_0 = arith.constant 0 : i32
    %c0_i32_1 = arith.constant 0 : i32
    return %c0_i32, %c0_i32_0 : i32, i32
  }
  func.func @transform_2(%arg0: i32) -> (i32, i32) {
    %c0_i32 = arith.constant 0 : i32
    %c0_i32_0 = arith.constant 0 : i32
    %c0_i32_1 = arith.constant 0 : i32
    return %c0_i32, %c0_i32_0 : i32, i32
  }
  func.func @transform_3(%arg0: i32) -> (i32, i32) {
    %c0_i32 = arith.constant 0 : i32
    %c0_i32_0 = arith.constant 0 : i32
    %c0_i32_1 = arith.constant 0 : i32
    return %c0_i32, %c0_i32_0 : i32, i32
  }
  func.func @transform_4(%arg0: i32) -> (i32, i32) {
    %c0_i32 = arith.constant 0 : i32
    %c0_i32_0 = arith.constant 0 : i32
    %c0_i32_1 = arith.constant 0 : i32
    return %c0_i32, %c0_i32_0 : i32, i32
  }
  func.func @transform_5(%arg0: i32) -> (i32, i32) {
    %c0_i32 = arith.constant 0 : i32
    %c0_i32_0 = arith.constant 0 : i32
    %c0_i32_1 = arith.constant 0 : i32
    return %c0_i32, %c0_i32_0 : i32, i32
  }
  func.func @transform_6(%arg0: i32) -> (i32, i32) {
    %c0_i32 = arith.constant 0 : i32
    %c0_i32_0 = arith.constant 0 : i32
    %c0_i32_1 = arith.constant 0 : i32
    return %c0_i32, %c0_i32_0 : i32, i32
  }
  func.func @transform_7(%arg0: i32) -> (i32, i32) {
    %c0_i32 = arith.constant 0 : i32
    %c0_i32_0 = arith.constant 0 : i32
    %c0_i32_1 = arith.constant 0 : i32
    return %c0_i32, %c0_i32_0 : i32, i32
  }
  func.func @transform_8(%arg0: i32) -> (i32, i32) {
    %c0_i32 = arith.constant 0 : i32
    %c0_i32_0 = arith.constant 0 : i32
    %c0_i32_1 = arith.constant 0 : i32
    return %c0_i32, %c0_i32_0 : i32, i32
  }
  func.func @transform_9(%arg0: i32) -> (i32, i32, i32) {
    %c0_i32 = arith.constant 0 : i32
    %c0_i32_0 = arith.constant 0 : i32
    %c0_i32_1 = arith.constant 0 : i32
    return %arg0, %c0_i32, %c0_i32_0 : i32, i32, i32
  }
}

module attributes {stable_mosaic.version = 11 : i64} {
  func.func @context_kernel(%arg0: memref<10x48xf32, #tpu.memory_space<vmem>>, %arg1: memref<2x24xf32, #tpu.memory_space<vmem>>, %arg2: memref<2x24xf32, #tpu.memory_space<vmem>>, %arg3: memref<2x40xf32, #tpu.memory_space<vmem>>, %arg4: memref<48x64xbf16, #tpu.memory_space<vmem>>, %arg5: memref<1x64xf32, #tpu.memory_space<vmem>>, %arg6: memref<64x32xbf16, #tpu.memory_space<vmem>>, %arg7: memref<1x32xf32, #tpu.memory_space<vmem>>, %arg8: memref<24x32xbf16, #tpu.memory_space<vmem>>, %arg9: memref<1x32xf32, #tpu.memory_space<vmem>>, %arg10: memref<32x32xbf16, #tpu.memory_space<vmem>>, %arg11: memref<1x32xf32, #tpu.memory_space<vmem>>, %arg12: memref<24x32xbf16, #tpu.memory_space<vmem>>, %arg13: memref<1x32xf32, #tpu.memory_space<vmem>>, %arg14: memref<32x32xbf16, #tpu.memory_space<vmem>>, %arg15: memref<1x32xf32, #tpu.memory_space<vmem>>, %arg16: memref<40x64xbf16, #tpu.memory_space<vmem>>, %arg17: memref<1x64xf32, #tpu.memory_space<vmem>>, %arg18: memref<64x32xbf16, #tpu.memory_space<vmem>>, %arg19: memref<1x32xf32, #tpu.memory_space<vmem>>, %arg20: memref<2x32x96xbf16, #tpu.memory_space<vmem>>, %arg21: memref<2x1x96xf32, #tpu.memory_space<vmem>>, %arg22: memref<2x32x32xbf16, #tpu.memory_space<vmem>>, %arg23: memref<2x1x32xf32, #tpu.memory_space<vmem>>, %arg24: memref<2x1x32xf32, #tpu.memory_space<vmem>>, %arg25: memref<2x1x32xf32, #tpu.memory_space<vmem>>, %arg26: memref<2x32x64xbf16, #tpu.memory_space<vmem>>, %arg27: memref<2x1x64xf32, #tpu.memory_space<vmem>>, %arg28: memref<2x64x32xbf16, #tpu.memory_space<vmem>>, %arg29: memref<2x1x32xf32, #tpu.memory_space<vmem>>, %arg30: memref<2x1x32xf32, #tpu.memory_space<vmem>>, %arg31: memref<2x1x32xf32, #tpu.memory_space<vmem>>, %arg32: memref<32x16xbf16, #tpu.memory_space<vmem>>, %arg33: memref<1x16xf32, #tpu.memory_space<vmem>>, %arg34: memref<2x16xf32, #tpu.memory_space<vmem>>) attributes {dimension_semantics = [], scalar_prefetch = 0 : i64, scratch_operands = 0 : i64, tpu.core_type = #tpu.core_type<tc>} {
    %c0 = arith.constant 0 : index
    %c0_0 = arith.constant 0 : index
    %0 = vector.load %arg0[%c0, %c0_0] : memref<10x48xf32, #tpu.memory_space<vmem>>, vector<10x48xf32>
    %1 = arith.truncf %0 : vector<10x48xf32> to vector<10x48xbf16>
    %c0_1 = arith.constant 0 : index
    %c0_2 = arith.constant 0 : index
    %2 = vector.load %arg4[%c0_1, %c0_2] : memref<48x64xbf16, #tpu.memory_space<vmem>>, vector<48x64xbf16>
    %cst = arith.constant dense<0.000000e+00> : vector<10x64xf32>
    %3 = tpu.matmul %1, %2, %cst {dimension_numbers = #tpu.dot_dimension_numbers<[1], [0], [0], [1], [0, 0, 1, 1], [], []>} : vector<10x48xbf16>, vector<48x64xbf16>, vector<10x64xf32> -> vector<10x64xf32>
    %c0_3 = arith.constant 0 : index
    %c0_4 = arith.constant 0 : index
    %4 = vector.load %arg5[%c0_3, %c0_4] : memref<1x64xf32, #tpu.memory_space<vmem>>, vector<1x64xf32>
    %5 = vector.broadcast %4 : vector<1x64xf32> to vector<10x64xf32>
    %6 = arith.addf %3, %5 : vector<10x64xf32>
    %cst_5 = arith.constant 0.000000e+00 : f32
    %7 = vector.broadcast %cst_5 : f32 to vector<10x64xf32>
    %8 = arith.maximumf %6, %7 : vector<10x64xf32>
    %9 = arith.truncf %8 : vector<10x64xf32> to vector<10x64xbf16>
    %c0_6 = arith.constant 0 : index
    %c0_7 = arith.constant 0 : index
    %10 = vector.load %arg6[%c0_6, %c0_7] : memref<64x32xbf16, #tpu.memory_space<vmem>>, vector<64x32xbf16>
    %cst_8 = arith.constant dense<0.000000e+00> : vector<10x32xf32>
    %11 = tpu.matmul %9, %10, %cst_8 {dimension_numbers = #tpu.dot_dimension_numbers<[1], [0], [0], [1], [0, 0, 1, 1], [], []>} : vector<10x64xbf16>, vector<64x32xbf16>, vector<10x32xf32> -> vector<10x32xf32>
    %c0_9 = arith.constant 0 : index
    %c0_10 = arith.constant 0 : index
    %12 = vector.load %arg7[%c0_9, %c0_10] : memref<1x32xf32, #tpu.memory_space<vmem>>, vector<1x32xf32>
    %13 = vector.broadcast %12 : vector<1x32xf32> to vector<10x32xf32>
    %14 = arith.addf %11, %13 : vector<10x32xf32>
    %c0_11 = arith.constant 0 : index
    %c0_12 = arith.constant 0 : index
    %15 = vector.load %arg1[%c0_11, %c0_12] : memref<2x24xf32, #tpu.memory_space<vmem>>, vector<2x24xf32>
    %16 = arith.truncf %15 : vector<2x24xf32> to vector<2x24xbf16>
    %c0_13 = arith.constant 0 : index
    %c0_14 = arith.constant 0 : index
    %17 = vector.load %arg8[%c0_13, %c0_14] : memref<24x32xbf16, #tpu.memory_space<vmem>>, vector<24x32xbf16>
    %cst_15 = arith.constant dense<0.000000e+00> : vector<2x32xf32>
    %18 = tpu.matmul %16, %17, %cst_15 {dimension_numbers = #tpu.dot_dimension_numbers<[1], [0], [0], [1], [0, 0, 1, 1], [], []>} : vector<2x24xbf16>, vector<24x32xbf16>, vector<2x32xf32> -> vector<2x32xf32>
    %c0_16 = arith.constant 0 : index
    %c0_17 = arith.constant 0 : index
    %19 = vector.load %arg9[%c0_16, %c0_17] : memref<1x32xf32, #tpu.memory_space<vmem>>, vector<1x32xf32>
    %20 = vector.broadcast %19 : vector<1x32xf32> to vector<2x32xf32>
    %21 = arith.addf %18, %20 : vector<2x32xf32>
    %cst_18 = arith.constant 0.000000e+00 : f32
    %22 = vector.broadcast %cst_18 : f32 to vector<2x32xf32>
    %23 = arith.maximumf %21, %22 : vector<2x32xf32>
    %24 = arith.truncf %23 : vector<2x32xf32> to vector<2x32xbf16>
    %c0_19 = arith.constant 0 : index
    %c0_20 = arith.constant 0 : index
    %25 = vector.load %arg10[%c0_19, %c0_20] : memref<32x32xbf16, #tpu.memory_space<vmem>>, vector<32x32xbf16>
    %cst_21 = arith.constant dense<0.000000e+00> : vector<2x32xf32>
    %26 = tpu.matmul %24, %25, %cst_21 {dimension_numbers = #tpu.dot_dimension_numbers<[1], [0], [0], [1], [0, 0, 1, 1], [], []>} : vector<2x32xbf16>, vector<32x32xbf16>, vector<2x32xf32> -> vector<2x32xf32>
    %c0_22 = arith.constant 0 : index
    %c0_23 = arith.constant 0 : index
    %27 = vector.load %arg11[%c0_22, %c0_23] : memref<1x32xf32, #tpu.memory_space<vmem>>, vector<1x32xf32>
    %28 = vector.broadcast %27 : vector<1x32xf32> to vector<2x32xf32>
    %29 = arith.addf %26, %28 : vector<2x32xf32>
    %c0_24 = arith.constant 0 : index
    %c0_25 = arith.constant 0 : index
    %30 = vector.load %arg2[%c0_24, %c0_25] : memref<2x24xf32, #tpu.memory_space<vmem>>, vector<2x24xf32>
    %31 = arith.truncf %30 : vector<2x24xf32> to vector<2x24xbf16>
    %c0_26 = arith.constant 0 : index
    %c0_27 = arith.constant 0 : index
    %32 = vector.load %arg12[%c0_26, %c0_27] : memref<24x32xbf16, #tpu.memory_space<vmem>>, vector<24x32xbf16>
    %cst_28 = arith.constant dense<0.000000e+00> : vector<2x32xf32>
    %33 = tpu.matmul %31, %32, %cst_28 {dimension_numbers = #tpu.dot_dimension_numbers<[1], [0], [0], [1], [0, 0, 1, 1], [], []>} : vector<2x24xbf16>, vector<24x32xbf16>, vector<2x32xf32> -> vector<2x32xf32>
    %c0_29 = arith.constant 0 : index
    %c0_30 = arith.constant 0 : index
    %34 = vector.load %arg13[%c0_29, %c0_30] : memref<1x32xf32, #tpu.memory_space<vmem>>, vector<1x32xf32>
    %35 = vector.broadcast %34 : vector<1x32xf32> to vector<2x32xf32>
    %36 = arith.addf %33, %35 : vector<2x32xf32>
    %cst_31 = arith.constant 0.000000e+00 : f32
    %37 = vector.broadcast %cst_31 : f32 to vector<2x32xf32>
    %38 = arith.maximumf %36, %37 : vector<2x32xf32>
    %39 = arith.truncf %38 : vector<2x32xf32> to vector<2x32xbf16>
    %c0_32 = arith.constant 0 : index
    %c0_33 = arith.constant 0 : index
    %40 = vector.load %arg14[%c0_32, %c0_33] : memref<32x32xbf16, #tpu.memory_space<vmem>>, vector<32x32xbf16>
    %cst_34 = arith.constant dense<0.000000e+00> : vector<2x32xf32>
    %41 = tpu.matmul %39, %40, %cst_34 {dimension_numbers = #tpu.dot_dimension_numbers<[1], [0], [0], [1], [0, 0, 1, 1], [], []>} : vector<2x32xbf16>, vector<32x32xbf16>, vector<2x32xf32> -> vector<2x32xf32>
    %c0_35 = arith.constant 0 : index
    %c0_36 = arith.constant 0 : index
    %42 = vector.load %arg15[%c0_35, %c0_36] : memref<1x32xf32, #tpu.memory_space<vmem>>, vector<1x32xf32>
    %43 = vector.broadcast %42 : vector<1x32xf32> to vector<2x32xf32>
    %44 = arith.addf %41, %43 : vector<2x32xf32>
    %c0_37 = arith.constant 0 : index
    %c0_38 = arith.constant 0 : index
    %45 = vector.load %arg3[%c0_37, %c0_38] : memref<2x40xf32, #tpu.memory_space<vmem>>, vector<2x40xf32>
    %46 = arith.truncf %45 : vector<2x40xf32> to vector<2x40xbf16>
    %c0_39 = arith.constant 0 : index
    %c0_40 = arith.constant 0 : index
    %47 = vector.load %arg16[%c0_39, %c0_40] : memref<40x64xbf16, #tpu.memory_space<vmem>>, vector<40x64xbf16>
    %cst_41 = arith.constant dense<0.000000e+00> : vector<2x64xf32>
    %48 = tpu.matmul %46, %47, %cst_41 {dimension_numbers = #tpu.dot_dimension_numbers<[1], [0], [0], [1], [0, 0, 1, 1], [], []>} : vector<2x40xbf16>, vector<40x64xbf16>, vector<2x64xf32> -> vector<2x64xf32>
    %c0_42 = arith.constant 0 : index
    %c0_43 = arith.constant 0 : index
    %49 = vector.load %arg17[%c0_42, %c0_43] : memref<1x64xf32, #tpu.memory_space<vmem>>, vector<1x64xf32>
    %50 = vector.broadcast %49 : vector<1x64xf32> to vector<2x64xf32>
    %51 = arith.addf %48, %50 : vector<2x64xf32>
    %cst_44 = arith.constant 0.000000e+00 : f32
    %52 = vector.broadcast %cst_44 : f32 to vector<2x64xf32>
    %53 = arith.maximumf %51, %52 : vector<2x64xf32>
    %54 = arith.truncf %53 : vector<2x64xf32> to vector<2x64xbf16>
    %c0_45 = arith.constant 0 : index
    %c0_46 = arith.constant 0 : index
    %55 = vector.load %arg18[%c0_45, %c0_46] : memref<64x32xbf16, #tpu.memory_space<vmem>>, vector<64x32xbf16>
    %cst_47 = arith.constant dense<0.000000e+00> : vector<2x32xf32>
    %56 = tpu.matmul %54, %55, %cst_47 {dimension_numbers = #tpu.dot_dimension_numbers<[1], [0], [0], [1], [0, 0, 1, 1], [], []>} : vector<2x64xbf16>, vector<64x32xbf16>, vector<2x32xf32> -> vector<2x32xf32>
    %c0_48 = arith.constant 0 : index
    %c0_49 = arith.constant 0 : index
    %57 = vector.load %arg19[%c0_48, %c0_49] : memref<1x32xf32, #tpu.memory_space<vmem>>, vector<1x32xf32>
    %58 = vector.broadcast %57 : vector<1x32xf32> to vector<2x32xf32>
    %59 = arith.addf %56, %58 : vector<2x32xf32>
    %60 = tpu.concatenate %14, %29, %44, %59 in 0 : vector<10x32xf32>, vector<2x32xf32>, vector<2x32xf32>, vector<2x32xf32> -> vector<16x32xf32>
    %cst_50 = arith.constant 5.65685415 : f32
    %61 = vector.broadcast %cst_50 : f32 to vector<16x32xf32>
    %62 = arith.mulf %60, %61 : vector<16x32xf32>
    %c0_51 = arith.constant 0 : index
    %c0_52 = arith.constant 0 : index
    %c0_53 = arith.constant 0 : index
    %63 = vector.load %arg20[%c0_51, %c0_52, %c0_53] : memref<2x32x96xbf16, #tpu.memory_space<vmem>>, vector<1x32x96xbf16>
    %64 = vector.shape_cast %63 : vector<1x32x96xbf16> to vector<32x96xbf16>
    %c0_54 = arith.constant 0 : index
    %c0_55 = arith.constant 0 : index
    %c0_56 = arith.constant 0 : index
    %65 = vector.load %arg21[%c0_54, %c0_55, %c0_56] : memref<2x1x96xf32, #tpu.memory_space<vmem>>, vector<1x1x96xf32>
    %66 = vector.shape_cast %65 : vector<1x1x96xf32> to vector<1x96xf32>
    %c0_57 = arith.constant 0 : index
    %c0_58 = arith.constant 0 : index
    %c0_59 = arith.constant 0 : index
    %67 = vector.load %arg22[%c0_57, %c0_58, %c0_59] : memref<2x32x32xbf16, #tpu.memory_space<vmem>>, vector<1x32x32xbf16>
    %68 = vector.shape_cast %67 : vector<1x32x32xbf16> to vector<32x32xbf16>
    %c0_60 = arith.constant 0 : index
    %c0_61 = arith.constant 0 : index
    %c0_62 = arith.constant 0 : index
    %69 = vector.load %arg23[%c0_60, %c0_61, %c0_62] : memref<2x1x32xf32, #tpu.memory_space<vmem>>, vector<1x1x32xf32>
    %70 = vector.shape_cast %69 : vector<1x1x32xf32> to vector<1x32xf32>
    %c0_63 = arith.constant 0 : index
    %c0_64 = arith.constant 0 : index
    %c0_65 = arith.constant 0 : index
    %71 = vector.load %arg24[%c0_63, %c0_64, %c0_65] : memref<2x1x32xf32, #tpu.memory_space<vmem>>, vector<1x1x32xf32>
    %72 = vector.shape_cast %71 : vector<1x1x32xf32> to vector<1x32xf32>
    %c0_66 = arith.constant 0 : index
    %c0_67 = arith.constant 0 : index
    %c0_68 = arith.constant 0 : index
    %73 = vector.load %arg25[%c0_66, %c0_67, %c0_68] : memref<2x1x32xf32, #tpu.memory_space<vmem>>, vector<1x1x32xf32>
    %74 = vector.shape_cast %73 : vector<1x1x32xf32> to vector<1x32xf32>
    %c0_69 = arith.constant 0 : index
    %c0_70 = arith.constant 0 : index
    %c0_71 = arith.constant 0 : index
    %75 = vector.load %arg26[%c0_69, %c0_70, %c0_71] : memref<2x32x64xbf16, #tpu.memory_space<vmem>>, vector<1x32x64xbf16>
    %76 = vector.shape_cast %75 : vector<1x32x64xbf16> to vector<32x64xbf16>
    %c0_72 = arith.constant 0 : index
    %c0_73 = arith.constant 0 : index
    %c0_74 = arith.constant 0 : index
    %77 = vector.load %arg27[%c0_72, %c0_73, %c0_74] : memref<2x1x64xf32, #tpu.memory_space<vmem>>, vector<1x1x64xf32>
    %78 = vector.shape_cast %77 : vector<1x1x64xf32> to vector<1x64xf32>
    %c0_75 = arith.constant 0 : index
    %c0_76 = arith.constant 0 : index
    %c0_77 = arith.constant 0 : index
    %79 = vector.load %arg28[%c0_75, %c0_76, %c0_77] : memref<2x64x32xbf16, #tpu.memory_space<vmem>>, vector<1x64x32xbf16>
    %80 = vector.shape_cast %79 : vector<1x64x32xbf16> to vector<64x32xbf16>
    %c0_78 = arith.constant 0 : index
    %c0_79 = arith.constant 0 : index
    %c0_80 = arith.constant 0 : index
    %81 = vector.load %arg29[%c0_78, %c0_79, %c0_80] : memref<2x1x32xf32, #tpu.memory_space<vmem>>, vector<1x1x32xf32>
    %82 = vector.shape_cast %81 : vector<1x1x32xf32> to vector<1x32xf32>
    %c0_81 = arith.constant 0 : index
    %c0_82 = arith.constant 0 : index
    %c0_83 = arith.constant 0 : index
    %83 = vector.load %arg30[%c0_81, %c0_82, %c0_83] : memref<2x1x32xf32, #tpu.memory_space<vmem>>, vector<1x1x32xf32>
    %84 = vector.shape_cast %83 : vector<1x1x32xf32> to vector<1x32xf32>
    %c0_84 = arith.constant 0 : index
    %c0_85 = arith.constant 0 : index
    %c0_86 = arith.constant 0 : index
    %85 = vector.load %arg31[%c0_84, %c0_85, %c0_86] : memref<2x1x32xf32, #tpu.memory_space<vmem>>, vector<1x1x32xf32>
    %86 = vector.shape_cast %85 : vector<1x1x32xf32> to vector<1x32xf32>
    %87 = arith.truncf %62 : vector<16x32xf32> to vector<16x32xbf16>
    %cst_87 = arith.constant dense<0.000000e+00> : vector<16x96xf32>
    %88 = tpu.matmul %87, %64, %cst_87 {dimension_numbers = #tpu.dot_dimension_numbers<[1], [0], [0], [1], [0, 0, 1, 1], [], []>} : vector<16x32xbf16>, vector<32x96xbf16>, vector<16x96xf32> -> vector<16x96xf32>
    %89 = vector.broadcast %66 : vector<1x96xf32> to vector<16x96xf32>
    %90 = arith.addf %88, %89 : vector<16x96xf32>
    %91 = vector.shape_cast %90 : vector<16x96xf32> to vector<8x2x96xf32>
    %cst_88 = arith.constant 0.000000e+00 : f32
    %92 = vector.broadcast %cst_88 : f32 to vector<16x32xf32>
    %93 = vector.extract_strided_slice %91 {offsets = [0, 0, 0], sizes = [8, 2, 8], strides = [1, 1, 1]} : vector<8x2x96xf32> to vector<8x2x8xf32>
    %cst_89 = arith.constant 0.353553385 : f32
    %94 = vector.broadcast %cst_89 : f32 to vector<8x2x8xf32>
    %95 = arith.mulf %93, %94 : vector<8x2x8xf32>
    %96 = vector.extract_strided_slice %91 {offsets = [0, 0, 32], sizes = [8, 2, 8], strides = [1, 1, 1]} : vector<8x2x96xf32> to vector<8x2x8xf32>
    %97 = vector.extract_strided_slice %91 {offsets = [0, 0, 64], sizes = [8, 2, 8], strides = [1, 1, 1]} : vector<8x2x96xf32> to vector<8x2x8xf32>
    %98 = arith.truncf %95 : vector<8x2x8xf32> to vector<8x2x8xbf16>
    %99 = arith.truncf %96 : vector<8x2x8xf32> to vector<8x2x8xbf16>
    "tpu.trace_start"() <{level = 10 : i32, message = "nld,nmd->nlm"}> : () -> ()
    %cst_90 = arith.constant dense<0.000000e+00> : vector<8x2x2xf32>
    %100 = tpu.matmul %98, %99, %cst_90 {dimension_numbers = #tpu.dot_dimension_numbers<[2], [2], [1], [1], [0, 0, 0, 1, 1, 1], [0], [0]>} : vector<8x2x8xbf16>, vector<8x2x8xbf16>, vector<8x2x2xf32> -> vector<8x2x2xf32>
    "tpu.trace_stop"() : () -> ()
    %cst_91 = arith.constant dense<0xFF800000> : vector<8x2xf32>
    %101 = vector.multi_reduction <maximumf>, %100, %cst_91 [2] : vector<8x2x2xf32> to vector<8x2xf32>
    %102 = vector.shape_cast %101 : vector<8x2xf32> to vector<8x2x1xf32>
    %103 = vector.broadcast %102 : vector<8x2x1xf32> to vector<8x2x2xf32>
    %104 = arith.subf %100, %103 : vector<8x2x2xf32>
    %105 = math.exp %104 : vector<8x2x2xf32>
    %cst_92 = arith.constant dense<0.000000e+00> : vector<8x2xf32>
    %106 = vector.multi_reduction <add>, %105, %cst_92 [2] : vector<8x2x2xf32> to vector<8x2xf32>
    %107 = vector.shape_cast %106 : vector<8x2xf32> to vector<8x2x1xf32>
    %108 = tpu.reciprocal %107 {approx = true} : vector<8x2x1xf32> -> vector<8x2x1xf32>
    %109 = vector.broadcast %108 : vector<8x2x1xf32> to vector<8x2x2xf32>
    %110 = arith.mulf %105, %109 : vector<8x2x2xf32>
    %111 = arith.truncf %110 : vector<8x2x2xf32> to vector<8x2x2xbf16>
    %112 = arith.truncf %97 : vector<8x2x8xf32> to vector<8x2x8xbf16>
    "tpu.trace_start"() <{level = 10 : i32, message = "nlm,nmd->nld"}> : () -> ()
    %cst_93 = arith.constant dense<0.000000e+00> : vector<8x2x8xf32>
    %113 = tpu.matmul %111, %112, %cst_93 {dimension_numbers = #tpu.dot_dimension_numbers<[2], [1], [1], [2], [0, 0, 0, 1, 1, 2], [0], [0]>} : vector<8x2x2xbf16>, vector<8x2x8xbf16>, vector<8x2x8xf32> -> vector<8x2x8xf32>
    "tpu.trace_stop"() : () -> ()
    %114 = vector.shape_cast %113 : vector<8x2x8xf32> to vector<16x8xf32>
    %115 = arith.truncf %114 : vector<16x8xf32> to vector<16x8xbf16>
    %116 = vector.extract_strided_slice %68 {offsets = [0, 0], sizes = [8, 32], strides = [1, 1]} : vector<32x32xbf16> to vector<8x32xbf16>
    %cst_94 = arith.constant dense<0.000000e+00> : vector<16x32xf32>
    %117 = tpu.matmul %115, %116, %cst_94 {dimension_numbers = #tpu.dot_dimension_numbers<[1], [0], [0], [1], [0, 0, 1, 1], [], []>} : vector<16x8xbf16>, vector<8x32xbf16>, vector<16x32xf32> -> vector<16x32xf32>
    %118 = arith.addf %92, %117 : vector<16x32xf32>
    %119 = vector.extract_strided_slice %91 {offsets = [0, 0, 8], sizes = [8, 2, 8], strides = [1, 1, 1]} : vector<8x2x96xf32> to vector<8x2x8xf32>
    %cst_95 = arith.constant 0.353553385 : f32
    %120 = vector.broadcast %cst_95 : f32 to vector<8x2x8xf32>
    %121 = arith.mulf %119, %120 : vector<8x2x8xf32>
    %122 = vector.extract_strided_slice %91 {offsets = [0, 0, 40], sizes = [8, 2, 8], strides = [1, 1, 1]} : vector<8x2x96xf32> to vector<8x2x8xf32>
    %123 = vector.extract_strided_slice %91 {offsets = [0, 0, 72], sizes = [8, 2, 8], strides = [1, 1, 1]} : vector<8x2x96xf32> to vector<8x2x8xf32>
    %124 = arith.truncf %121 : vector<8x2x8xf32> to vector<8x2x8xbf16>
    %125 = arith.truncf %122 : vector<8x2x8xf32> to vector<8x2x8xbf16>
    "tpu.trace_start"() <{level = 10 : i32, message = "nld,nmd->nlm"}> : () -> ()
    %cst_96 = arith.constant dense<0.000000e+00> : vector<8x2x2xf32>
    %126 = tpu.matmul %124, %125, %cst_96 {dimension_numbers = #tpu.dot_dimension_numbers<[2], [2], [1], [1], [0, 0, 0, 1, 1, 1], [0], [0]>} : vector<8x2x8xbf16>, vector<8x2x8xbf16>, vector<8x2x2xf32> -> vector<8x2x2xf32>
    "tpu.trace_stop"() : () -> ()
    %cst_97 = arith.constant dense<0xFF800000> : vector<8x2xf32>
    %127 = vector.multi_reduction <maximumf>, %126, %cst_97 [2] : vector<8x2x2xf32> to vector<8x2xf32>
    %128 = vector.shape_cast %127 : vector<8x2xf32> to vector<8x2x1xf32>
    %129 = vector.broadcast %128 : vector<8x2x1xf32> to vector<8x2x2xf32>
    %130 = arith.subf %126, %129 : vector<8x2x2xf32>
    %131 = math.exp %130 : vector<8x2x2xf32>
    %cst_98 = arith.constant dense<0.000000e+00> : vector<8x2xf32>
    %132 = vector.multi_reduction <add>, %131, %cst_98 [2] : vector<8x2x2xf32> to vector<8x2xf32>
    %133 = vector.shape_cast %132 : vector<8x2xf32> to vector<8x2x1xf32>
    %134 = tpu.reciprocal %133 {approx = true} : vector<8x2x1xf32> -> vector<8x2x1xf32>
    %135 = vector.broadcast %134 : vector<8x2x1xf32> to vector<8x2x2xf32>
    %136 = arith.mulf %131, %135 : vector<8x2x2xf32>
    %137 = arith.truncf %136 : vector<8x2x2xf32> to vector<8x2x2xbf16>
    %138 = arith.truncf %123 : vector<8x2x8xf32> to vector<8x2x8xbf16>
    "tpu.trace_start"() <{level = 10 : i32, message = "nlm,nmd->nld"}> : () -> ()
    %cst_99 = arith.constant dense<0.000000e+00> : vector<8x2x8xf32>
    %139 = tpu.matmul %137, %138, %cst_99 {dimension_numbers = #tpu.dot_dimension_numbers<[2], [1], [1], [2], [0, 0, 0, 1, 1, 2], [0], [0]>} : vector<8x2x2xbf16>, vector<8x2x8xbf16>, vector<8x2x8xf32> -> vector<8x2x8xf32>
    "tpu.trace_stop"() : () -> ()
    %140 = vector.shape_cast %139 : vector<8x2x8xf32> to vector<16x8xf32>
    %141 = arith.truncf %140 : vector<16x8xf32> to vector<16x8xbf16>
    %142 = vector.extract_strided_slice %68 {offsets = [8, 0], sizes = [8, 32], strides = [1, 1]} : vector<32x32xbf16> to vector<8x32xbf16>
    %cst_100 = arith.constant dense<0.000000e+00> : vector<16x32xf32>
    %143 = tpu.matmul %141, %142, %cst_100 {dimension_numbers = #tpu.dot_dimension_numbers<[1], [0], [0], [1], [0, 0, 1, 1], [], []>} : vector<16x8xbf16>, vector<8x32xbf16>, vector<16x32xf32> -> vector<16x32xf32>
    %144 = arith.addf %118, %143 : vector<16x32xf32>
    %145 = vector.extract_strided_slice %91 {offsets = [0, 0, 16], sizes = [8, 2, 8], strides = [1, 1, 1]} : vector<8x2x96xf32> to vector<8x2x8xf32>
    %cst_101 = arith.constant 0.353553385 : f32
    %146 = vector.broadcast %cst_101 : f32 to vector<8x2x8xf32>
    %147 = arith.mulf %145, %146 : vector<8x2x8xf32>
    %148 = vector.extract_strided_slice %91 {offsets = [0, 0, 48], sizes = [8, 2, 8], strides = [1, 1, 1]} : vector<8x2x96xf32> to vector<8x2x8xf32>
    %149 = vector.extract_strided_slice %91 {offsets = [0, 0, 80], sizes = [8, 2, 8], strides = [1, 1, 1]} : vector<8x2x96xf32> to vector<8x2x8xf32>
    %150 = arith.truncf %147 : vector<8x2x8xf32> to vector<8x2x8xbf16>
    %151 = arith.truncf %148 : vector<8x2x8xf32> to vector<8x2x8xbf16>
    "tpu.trace_start"() <{level = 10 : i32, message = "nld,nmd->nlm"}> : () -> ()
    %cst_102 = arith.constant dense<0.000000e+00> : vector<8x2x2xf32>
    %152 = tpu.matmul %150, %151, %cst_102 {dimension_numbers = #tpu.dot_dimension_numbers<[2], [2], [1], [1], [0, 0, 0, 1, 1, 1], [0], [0]>} : vector<8x2x8xbf16>, vector<8x2x8xbf16>, vector<8x2x2xf32> -> vector<8x2x2xf32>
    "tpu.trace_stop"() : () -> ()
    %cst_103 = arith.constant dense<0xFF800000> : vector<8x2xf32>
    %153 = vector.multi_reduction <maximumf>, %152, %cst_103 [2] : vector<8x2x2xf32> to vector<8x2xf32>
    %154 = vector.shape_cast %153 : vector<8x2xf32> to vector<8x2x1xf32>
    %155 = vector.broadcast %154 : vector<8x2x1xf32> to vector<8x2x2xf32>
    %156 = arith.subf %152, %155 : vector<8x2x2xf32>
    %157 = math.exp %156 : vector<8x2x2xf32>
    %cst_104 = arith.constant dense<0.000000e+00> : vector<8x2xf32>
    %158 = vector.multi_reduction <add>, %157, %cst_104 [2] : vector<8x2x2xf32> to vector<8x2xf32>
    %159 = vector.shape_cast %158 : vector<8x2xf32> to vector<8x2x1xf32>
    %160 = tpu.reciprocal %159 {approx = true} : vector<8x2x1xf32> -> vector<8x2x1xf32>
    %161 = vector.broadcast %160 : vector<8x2x1xf32> to vector<8x2x2xf32>
    %162 = arith.mulf %157, %161 : vector<8x2x2xf32>
    %163 = arith.truncf %162 : vector<8x2x2xf32> to vector<8x2x2xbf16>
    %164 = arith.truncf %149 : vector<8x2x8xf32> to vector<8x2x8xbf16>
    "tpu.trace_start"() <{level = 10 : i32, message = "nlm,nmd->nld"}> : () -> ()
    %cst_105 = arith.constant dense<0.000000e+00> : vector<8x2x8xf32>
    %165 = tpu.matmul %163, %164, %cst_105 {dimension_numbers = #tpu.dot_dimension_numbers<[2], [1], [1], [2], [0, 0, 0, 1, 1, 2], [0], [0]>} : vector<8x2x2xbf16>, vector<8x2x8xbf16>, vector<8x2x8xf32> -> vector<8x2x8xf32>
    "tpu.trace_stop"() : () -> ()
    %166 = vector.shape_cast %165 : vector<8x2x8xf32> to vector<16x8xf32>
    %167 = arith.truncf %166 : vector<16x8xf32> to vector<16x8xbf16>
    %168 = vector.extract_strided_slice %68 {offsets = [16, 0], sizes = [8, 32], strides = [1, 1]} : vector<32x32xbf16> to vector<8x32xbf16>
    %cst_106 = arith.constant dense<0.000000e+00> : vector<16x32xf32>
    %169 = tpu.matmul %167, %168, %cst_106 {dimension_numbers = #tpu.dot_dimension_numbers<[1], [0], [0], [1], [0, 0, 1, 1], [], []>} : vector<16x8xbf16>, vector<8x32xbf16>, vector<16x32xf32> -> vector<16x32xf32>
    %170 = arith.addf %144, %169 : vector<16x32xf32>
    %171 = vector.extract_strided_slice %91 {offsets = [0, 0, 24], sizes = [8, 2, 8], strides = [1, 1, 1]} : vector<8x2x96xf32> to vector<8x2x8xf32>
    %cst_107 = arith.constant 0.353553385 : f32
    %172 = vector.broadcast %cst_107 : f32 to vector<8x2x8xf32>
    %173 = arith.mulf %171, %172 : vector<8x2x8xf32>
    %174 = vector.extract_strided_slice %91 {offsets = [0, 0, 56], sizes = [8, 2, 8], strides = [1, 1, 1]} : vector<8x2x96xf32> to vector<8x2x8xf32>
    %175 = vector.extract_strided_slice %91 {offsets = [0, 0, 88], sizes = [8, 2, 8], strides = [1, 1, 1]} : vector<8x2x96xf32> to vector<8x2x8xf32>
    %176 = arith.truncf %173 : vector<8x2x8xf32> to vector<8x2x8xbf16>
    %177 = arith.truncf %174 : vector<8x2x8xf32> to vector<8x2x8xbf16>
    "tpu.trace_start"() <{level = 10 : i32, message = "nld,nmd->nlm"}> : () -> ()
    %cst_108 = arith.constant dense<0.000000e+00> : vector<8x2x2xf32>
    %178 = tpu.matmul %176, %177, %cst_108 {dimension_numbers = #tpu.dot_dimension_numbers<[2], [2], [1], [1], [0, 0, 0, 1, 1, 1], [0], [0]>} : vector<8x2x8xbf16>, vector<8x2x8xbf16>, vector<8x2x2xf32> -> vector<8x2x2xf32>
    "tpu.trace_stop"() : () -> ()
    %cst_109 = arith.constant dense<0xFF800000> : vector<8x2xf32>
    %179 = vector.multi_reduction <maximumf>, %178, %cst_109 [2] : vector<8x2x2xf32> to vector<8x2xf32>
    %180 = vector.shape_cast %179 : vector<8x2xf32> to vector<8x2x1xf32>
    %181 = vector.broadcast %180 : vector<8x2x1xf32> to vector<8x2x2xf32>
    %182 = arith.subf %178, %181 : vector<8x2x2xf32>
    %183 = math.exp %182 : vector<8x2x2xf32>
    %cst_110 = arith.constant dense<0.000000e+00> : vector<8x2xf32>
    %184 = vector.multi_reduction <add>, %183, %cst_110 [2] : vector<8x2x2xf32> to vector<8x2xf32>
    %185 = vector.shape_cast %184 : vector<8x2xf32> to vector<8x2x1xf32>
    %186 = tpu.reciprocal %185 {approx = true} : vector<8x2x1xf32> -> vector<8x2x1xf32>
    %187 = vector.broadcast %186 : vector<8x2x1xf32> to vector<8x2x2xf32>
    %188 = arith.mulf %183, %187 : vector<8x2x2xf32>
    %189 = arith.truncf %188 : vector<8x2x2xf32> to vector<8x2x2xbf16>
    %190 = arith.truncf %175 : vector<8x2x8xf32> to vector<8x2x8xbf16>
    "tpu.trace_start"() <{level = 10 : i32, message = "nlm,nmd->nld"}> : () -> ()
    %cst_111 = arith.constant dense<0.000000e+00> : vector<8x2x8xf32>
    %191 = tpu.matmul %189, %190, %cst_111 {dimension_numbers = #tpu.dot_dimension_numbers<[2], [1], [1], [2], [0, 0, 0, 1, 1, 2], [0], [0]>} : vector<8x2x2xbf16>, vector<8x2x8xbf16>, vector<8x2x8xf32> -> vector<8x2x8xf32>
    "tpu.trace_stop"() : () -> ()
    %192 = vector.shape_cast %191 : vector<8x2x8xf32> to vector<16x8xf32>
    %193 = arith.truncf %192 : vector<16x8xf32> to vector<16x8xbf16>
    %194 = vector.extract_strided_slice %68 {offsets = [24, 0], sizes = [8, 32], strides = [1, 1]} : vector<32x32xbf16> to vector<8x32xbf16>
    %cst_112 = arith.constant dense<0.000000e+00> : vector<16x32xf32>
    %195 = tpu.matmul %193, %194, %cst_112 {dimension_numbers = #tpu.dot_dimension_numbers<[1], [0], [0], [1], [0, 0, 1, 1], [], []>} : vector<16x8xbf16>, vector<8x32xbf16>, vector<16x32xf32> -> vector<16x32xf32>
    %196 = arith.addf %170, %195 : vector<16x32xf32>
    %197 = vector.broadcast %70 : vector<1x32xf32> to vector<16x32xf32>
    %198 = arith.addf %196, %197 : vector<16x32xf32>
    %199 = arith.addf %62, %198 : vector<16x32xf32>
    %cst_113 = arith.constant dense<0.000000e+00> : vector<16xf32>
    %200 = vector.multi_reduction <add>, %199, %cst_113 [1] : vector<16x32xf32> to vector<16xf32>
    %201 = vector.shape_cast %200 : vector<16xf32> to vector<16x1xf32>
    %cst_114 = arith.constant 3.200000e+01 : f32
    %202 = vector.broadcast %cst_114 : f32 to vector<16x1xf32>
    %203 = arith.divf %201, %202 : vector<16x1xf32>
    %204 = vector.broadcast %203 : vector<16x1xf32> to vector<16x32xf32>
    %205 = arith.subf %199, %204 : vector<16x32xf32>
    %206 = arith.mulf %205, %205 : vector<16x32xf32>
    %cst_115 = arith.constant dense<0.000000e+00> : vector<16xf32>
    %207 = vector.multi_reduction <add>, %206, %cst_115 [1] : vector<16x32xf32> to vector<16xf32>
    %208 = vector.shape_cast %207 : vector<16xf32> to vector<16x1xf32>
    %cst_116 = arith.constant 3.200000e+01 : f32
    %209 = vector.broadcast %cst_116 : f32 to vector<16x1xf32>
    %210 = arith.divf %208, %209 : vector<16x1xf32>
    %211 = vector.broadcast %203 : vector<16x1xf32> to vector<16x32xf32>
    %212 = arith.subf %199, %211 : vector<16x32xf32>
    %cst_117 = arith.constant 9.99999974E-6 : f32
    %213 = vector.broadcast %cst_117 : f32 to vector<16x1xf32>
    %214 = arith.addf %210, %213 : vector<16x1xf32>
    %215 = math.rsqrt %214 : vector<16x1xf32>
    %216 = vector.broadcast %215 : vector<16x1xf32> to vector<16x32xf32>
    %217 = arith.mulf %212, %216 : vector<16x32xf32>
    %218 = vector.broadcast %72 : vector<1x32xf32> to vector<16x32xf32>
    %219 = arith.mulf %217, %218 : vector<16x32xf32>
    %220 = vector.broadcast %74 : vector<1x32xf32> to vector<16x32xf32>
    %221 = arith.addf %219, %220 : vector<16x32xf32>
    %222 = arith.truncf %221 : vector<16x32xf32> to vector<16x32xbf16>
    %cst_118 = arith.constant dense<0.000000e+00> : vector<16x64xf32>
    %223 = tpu.matmul %222, %76, %cst_118 {dimension_numbers = #tpu.dot_dimension_numbers<[1], [0], [0], [1], [0, 0, 1, 1], [], []>} : vector<16x32xbf16>, vector<32x64xbf16>, vector<16x64xf32> -> vector<16x64xf32>
    %224 = vector.broadcast %78 : vector<1x64xf32> to vector<16x64xf32>
    %225 = arith.addf %223, %224 : vector<16x64xf32>
    %cst_119 = arith.constant 0.000000e+00 : f32
    %226 = vector.broadcast %cst_119 : f32 to vector<16x64xf32>
    %227 = arith.maximumf %225, %226 : vector<16x64xf32>
    %228 = arith.truncf %227 : vector<16x64xf32> to vector<16x64xbf16>
    %cst_120 = arith.constant dense<0.000000e+00> : vector<16x32xf32>
    %229 = tpu.matmul %228, %80, %cst_120 {dimension_numbers = #tpu.dot_dimension_numbers<[1], [0], [0], [1], [0, 0, 1, 1], [], []>} : vector<16x64xbf16>, vector<64x32xbf16>, vector<16x32xf32> -> vector<16x32xf32>
    %230 = vector.broadcast %82 : vector<1x32xf32> to vector<16x32xf32>
    %231 = arith.addf %229, %230 : vector<16x32xf32>
    %232 = arith.addf %221, %231 : vector<16x32xf32>
    %cst_121 = arith.constant dense<0.000000e+00> : vector<16xf32>
    %233 = vector.multi_reduction <add>, %232, %cst_121 [1] : vector<16x32xf32> to vector<16xf32>
    %234 = vector.shape_cast %233 : vector<16xf32> to vector<16x1xf32>
    %cst_122 = arith.constant 3.200000e+01 : f32
    %235 = vector.broadcast %cst_122 : f32 to vector<16x1xf32>
    %236 = arith.divf %234, %235 : vector<16x1xf32>
    %237 = vector.broadcast %236 : vector<16x1xf32> to vector<16x32xf32>
    %238 = arith.subf %232, %237 : vector<16x32xf32>
    %239 = arith.mulf %238, %238 : vector<16x32xf32>
    %cst_123 = arith.constant dense<0.000000e+00> : vector<16xf32>
    %240 = vector.multi_reduction <add>, %239, %cst_123 [1] : vector<16x32xf32> to vector<16xf32>
    %241 = vector.shape_cast %240 : vector<16xf32> to vector<16x1xf32>
    %cst_124 = arith.constant 3.200000e+01 : f32
    %242 = vector.broadcast %cst_124 : f32 to vector<16x1xf32>
    %243 = arith.divf %241, %242 : vector<16x1xf32>
    %244 = vector.broadcast %236 : vector<16x1xf32> to vector<16x32xf32>
    %245 = arith.subf %232, %244 : vector<16x32xf32>
    %cst_125 = arith.constant 9.99999974E-6 : f32
    %246 = vector.broadcast %cst_125 : f32 to vector<16x1xf32>
    %247 = arith.addf %243, %246 : vector<16x1xf32>
    %248 = math.rsqrt %247 : vector<16x1xf32>
    %249 = vector.broadcast %248 : vector<16x1xf32> to vector<16x32xf32>
    %250 = arith.mulf %245, %249 : vector<16x32xf32>
    %251 = vector.broadcast %84 : vector<1x32xf32> to vector<16x32xf32>
    %252 = arith.mulf %250, %251 : vector<16x32xf32>
    %253 = vector.broadcast %86 : vector<1x32xf32> to vector<16x32xf32>
    %254 = arith.addf %252, %253 : vector<16x32xf32>
    %c1 = arith.constant 1 : index
    %c0_126 = arith.constant 0 : index
    %c0_127 = arith.constant 0 : index
    %255 = vector.load %arg20[%c1, %c0_126, %c0_127] : memref<2x32x96xbf16, #tpu.memory_space<vmem>>, vector<1x32x96xbf16>
    %256 = vector.shape_cast %255 : vector<1x32x96xbf16> to vector<32x96xbf16>
    %c1_128 = arith.constant 1 : index
    %c0_129 = arith.constant 0 : index
    %c0_130 = arith.constant 0 : index
    %257 = vector.load %arg21[%c1_128, %c0_129, %c0_130] : memref<2x1x96xf32, #tpu.memory_space<vmem>>, vector<1x1x96xf32>
    %258 = vector.shape_cast %257 : vector<1x1x96xf32> to vector<1x96xf32>
    %c1_131 = arith.constant 1 : index
    %c0_132 = arith.constant 0 : index
    %c0_133 = arith.constant 0 : index
    %259 = vector.load %arg22[%c1_131, %c0_132, %c0_133] : memref<2x32x32xbf16, #tpu.memory_space<vmem>>, vector<1x32x32xbf16>
    %260 = vector.shape_cast %259 : vector<1x32x32xbf16> to vector<32x32xbf16>
    %c1_134 = arith.constant 1 : index
    %c0_135 = arith.constant 0 : index
    %c0_136 = arith.constant 0 : index
    %261 = vector.load %arg23[%c1_134, %c0_135, %c0_136] : memref<2x1x32xf32, #tpu.memory_space<vmem>>, vector<1x1x32xf32>
    %262 = vector.shape_cast %261 : vector<1x1x32xf32> to vector<1x32xf32>
    %c1_137 = arith.constant 1 : index
    %c0_138 = arith.constant 0 : index
    %c0_139 = arith.constant 0 : index
    %263 = vector.load %arg24[%c1_137, %c0_138, %c0_139] : memref<2x1x32xf32, #tpu.memory_space<vmem>>, vector<1x1x32xf32>
    %264 = vector.shape_cast %263 : vector<1x1x32xf32> to vector<1x32xf32>
    %c1_140 = arith.constant 1 : index
    %c0_141 = arith.constant 0 : index
    %c0_142 = arith.constant 0 : index
    %265 = vector.load %arg25[%c1_140, %c0_141, %c0_142] : memref<2x1x32xf32, #tpu.memory_space<vmem>>, vector<1x1x32xf32>
    %266 = vector.shape_cast %265 : vector<1x1x32xf32> to vector<1x32xf32>
    %c1_143 = arith.constant 1 : index
    %c0_144 = arith.constant 0 : index
    %c0_145 = arith.constant 0 : index
    %267 = vector.load %arg26[%c1_143, %c0_144, %c0_145] : memref<2x32x64xbf16, #tpu.memory_space<vmem>>, vector<1x32x64xbf16>
    %268 = vector.shape_cast %267 : vector<1x32x64xbf16> to vector<32x64xbf16>
    %c1_146 = arith.constant 1 : index
    %c0_147 = arith.constant 0 : index
    %c0_148 = arith.constant 0 : index
    %269 = vector.load %arg27[%c1_146, %c0_147, %c0_148] : memref<2x1x64xf32, #tpu.memory_space<vmem>>, vector<1x1x64xf32>
    %270 = vector.shape_cast %269 : vector<1x1x64xf32> to vector<1x64xf32>
    %c1_149 = arith.constant 1 : index
    %c0_150 = arith.constant 0 : index
    %c0_151 = arith.constant 0 : index
    %271 = vector.load %arg28[%c1_149, %c0_150, %c0_151] : memref<2x64x32xbf16, #tpu.memory_space<vmem>>, vector<1x64x32xbf16>
    %272 = vector.shape_cast %271 : vector<1x64x32xbf16> to vector<64x32xbf16>
    %c1_152 = arith.constant 1 : index
    %c0_153 = arith.constant 0 : index
    %c0_154 = arith.constant 0 : index
    %273 = vector.load %arg29[%c1_152, %c0_153, %c0_154] : memref<2x1x32xf32, #tpu.memory_space<vmem>>, vector<1x1x32xf32>
    %274 = vector.shape_cast %273 : vector<1x1x32xf32> to vector<1x32xf32>
    %c1_155 = arith.constant 1 : index
    %c0_156 = arith.constant 0 : index
    %c0_157 = arith.constant 0 : index
    %275 = vector.load %arg30[%c1_155, %c0_156, %c0_157] : memref<2x1x32xf32, #tpu.memory_space<vmem>>, vector<1x1x32xf32>
    %276 = vector.shape_cast %275 : vector<1x1x32xf32> to vector<1x32xf32>
    %c1_158 = arith.constant 1 : index
    %c0_159 = arith.constant 0 : index
    %c0_160 = arith.constant 0 : index
    %277 = vector.load %arg31[%c1_158, %c0_159, %c0_160] : memref<2x1x32xf32, #tpu.memory_space<vmem>>, vector<1x1x32xf32>
    %278 = vector.shape_cast %277 : vector<1x1x32xf32> to vector<1x32xf32>
    %279 = arith.truncf %254 : vector<16x32xf32> to vector<16x32xbf16>
    %cst_161 = arith.constant dense<0.000000e+00> : vector<16x96xf32>
    %280 = tpu.matmul %279, %256, %cst_161 {dimension_numbers = #tpu.dot_dimension_numbers<[1], [0], [0], [1], [0, 0, 1, 1], [], []>} : vector<16x32xbf16>, vector<32x96xbf16>, vector<16x96xf32> -> vector<16x96xf32>
    %281 = vector.broadcast %258 : vector<1x96xf32> to vector<16x96xf32>
    %282 = arith.addf %280, %281 : vector<16x96xf32>
    %283 = vector.shape_cast %282 : vector<16x96xf32> to vector<8x2x96xf32>
    %cst_162 = arith.constant 0.000000e+00 : f32
    %284 = vector.broadcast %cst_162 : f32 to vector<16x32xf32>
    %285 = vector.extract_strided_slice %283 {offsets = [0, 0, 0], sizes = [8, 2, 8], strides = [1, 1, 1]} : vector<8x2x96xf32> to vector<8x2x8xf32>
    %cst_163 = arith.constant 0.353553385 : f32
    %286 = vector.broadcast %cst_163 : f32 to vector<8x2x8xf32>
    %287 = arith.mulf %285, %286 : vector<8x2x8xf32>
    %288 = vector.extract_strided_slice %283 {offsets = [0, 0, 32], sizes = [8, 2, 8], strides = [1, 1, 1]} : vector<8x2x96xf32> to vector<8x2x8xf32>
    %289 = vector.extract_strided_slice %283 {offsets = [0, 0, 64], sizes = [8, 2, 8], strides = [1, 1, 1]} : vector<8x2x96xf32> to vector<8x2x8xf32>
    %290 = arith.truncf %287 : vector<8x2x8xf32> to vector<8x2x8xbf16>
    %291 = arith.truncf %288 : vector<8x2x8xf32> to vector<8x2x8xbf16>
    "tpu.trace_start"() <{level = 10 : i32, message = "nld,nmd->nlm"}> : () -> ()
    %cst_164 = arith.constant dense<0.000000e+00> : vector<8x2x2xf32>
    %292 = tpu.matmul %290, %291, %cst_164 {dimension_numbers = #tpu.dot_dimension_numbers<[2], [2], [1], [1], [0, 0, 0, 1, 1, 1], [0], [0]>} : vector<8x2x8xbf16>, vector<8x2x8xbf16>, vector<8x2x2xf32> -> vector<8x2x2xf32>
    "tpu.trace_stop"() : () -> ()
    %cst_165 = arith.constant dense<0xFF800000> : vector<8x2xf32>
    %293 = vector.multi_reduction <maximumf>, %292, %cst_165 [2] : vector<8x2x2xf32> to vector<8x2xf32>
    %294 = vector.shape_cast %293 : vector<8x2xf32> to vector<8x2x1xf32>
    %295 = vector.broadcast %294 : vector<8x2x1xf32> to vector<8x2x2xf32>
    %296 = arith.subf %292, %295 : vector<8x2x2xf32>
    %297 = math.exp %296 : vector<8x2x2xf32>
    %cst_166 = arith.constant dense<0.000000e+00> : vector<8x2xf32>
    %298 = vector.multi_reduction <add>, %297, %cst_166 [2] : vector<8x2x2xf32> to vector<8x2xf32>
    %299 = vector.shape_cast %298 : vector<8x2xf32> to vector<8x2x1xf32>
    %300 = tpu.reciprocal %299 {approx = true} : vector<8x2x1xf32> -> vector<8x2x1xf32>
    %301 = vector.broadcast %300 : vector<8x2x1xf32> to vector<8x2x2xf32>
    %302 = arith.mulf %297, %301 : vector<8x2x2xf32>
    %303 = arith.truncf %302 : vector<8x2x2xf32> to vector<8x2x2xbf16>
    %304 = arith.truncf %289 : vector<8x2x8xf32> to vector<8x2x8xbf16>
    "tpu.trace_start"() <{level = 10 : i32, message = "nlm,nmd->nld"}> : () -> ()
    %cst_167 = arith.constant dense<0.000000e+00> : vector<8x2x8xf32>
    %305 = tpu.matmul %303, %304, %cst_167 {dimension_numbers = #tpu.dot_dimension_numbers<[2], [1], [1], [2], [0, 0, 0, 1, 1, 2], [0], [0]>} : vector<8x2x2xbf16>, vector<8x2x8xbf16>, vector<8x2x8xf32> -> vector<8x2x8xf32>
    "tpu.trace_stop"() : () -> ()
    %306 = vector.shape_cast %305 : vector<8x2x8xf32> to vector<16x8xf32>
    %307 = arith.truncf %306 : vector<16x8xf32> to vector<16x8xbf16>
    %308 = vector.extract_strided_slice %260 {offsets = [0, 0], sizes = [8, 32], strides = [1, 1]} : vector<32x32xbf16> to vector<8x32xbf16>
    %cst_168 = arith.constant dense<0.000000e+00> : vector<16x32xf32>
    %309 = tpu.matmul %307, %308, %cst_168 {dimension_numbers = #tpu.dot_dimension_numbers<[1], [0], [0], [1], [0, 0, 1, 1], [], []>} : vector<16x8xbf16>, vector<8x32xbf16>, vector<16x32xf32> -> vector<16x32xf32>
    %310 = arith.addf %284, %309 : vector<16x32xf32>
    %311 = vector.extract_strided_slice %283 {offsets = [0, 0, 8], sizes = [8, 2, 8], strides = [1, 1, 1]} : vector<8x2x96xf32> to vector<8x2x8xf32>
    %cst_169 = arith.constant 0.353553385 : f32
    %312 = vector.broadcast %cst_169 : f32 to vector<8x2x8xf32>
    %313 = arith.mulf %311, %312 : vector<8x2x8xf32>
    %314 = vector.extract_strided_slice %283 {offsets = [0, 0, 40], sizes = [8, 2, 8], strides = [1, 1, 1]} : vector<8x2x96xf32> to vector<8x2x8xf32>
    %315 = vector.extract_strided_slice %283 {offsets = [0, 0, 72], sizes = [8, 2, 8], strides = [1, 1, 1]} : vector<8x2x96xf32> to vector<8x2x8xf32>
    %316 = arith.truncf %313 : vector<8x2x8xf32> to vector<8x2x8xbf16>
    %317 = arith.truncf %314 : vector<8x2x8xf32> to vector<8x2x8xbf16>
    "tpu.trace_start"() <{level = 10 : i32, message = "nld,nmd->nlm"}> : () -> ()
    %cst_170 = arith.constant dense<0.000000e+00> : vector<8x2x2xf32>
    %318 = tpu.matmul %316, %317, %cst_170 {dimension_numbers = #tpu.dot_dimension_numbers<[2], [2], [1], [1], [0, 0, 0, 1, 1, 1], [0], [0]>} : vector<8x2x8xbf16>, vector<8x2x8xbf16>, vector<8x2x2xf32> -> vector<8x2x2xf32>
    "tpu.trace_stop"() : () -> ()
    %cst_171 = arith.constant dense<0xFF800000> : vector<8x2xf32>
    %319 = vector.multi_reduction <maximumf>, %318, %cst_171 [2] : vector<8x2x2xf32> to vector<8x2xf32>
    %320 = vector.shape_cast %319 : vector<8x2xf32> to vector<8x2x1xf32>
    %321 = vector.broadcast %320 : vector<8x2x1xf32> to vector<8x2x2xf32>
    %322 = arith.subf %318, %321 : vector<8x2x2xf32>
    %323 = math.exp %322 : vector<8x2x2xf32>
    %cst_172 = arith.constant dense<0.000000e+00> : vector<8x2xf32>
    %324 = vector.multi_reduction <add>, %323, %cst_172 [2] : vector<8x2x2xf32> to vector<8x2xf32>
    %325 = vector.shape_cast %324 : vector<8x2xf32> to vector<8x2x1xf32>
    %326 = tpu.reciprocal %325 {approx = true} : vector<8x2x1xf32> -> vector<8x2x1xf32>
    %327 = vector.broadcast %326 : vector<8x2x1xf32> to vector<8x2x2xf32>
    %328 = arith.mulf %323, %327 : vector<8x2x2xf32>
    %329 = arith.truncf %328 : vector<8x2x2xf32> to vector<8x2x2xbf16>
    %330 = arith.truncf %315 : vector<8x2x8xf32> to vector<8x2x8xbf16>
    "tpu.trace_start"() <{level = 10 : i32, message = "nlm,nmd->nld"}> : () -> ()
    %cst_173 = arith.constant dense<0.000000e+00> : vector<8x2x8xf32>
    %331 = tpu.matmul %329, %330, %cst_173 {dimension_numbers = #tpu.dot_dimension_numbers<[2], [1], [1], [2], [0, 0, 0, 1, 1, 2], [0], [0]>} : vector<8x2x2xbf16>, vector<8x2x8xbf16>, vector<8x2x8xf32> -> vector<8x2x8xf32>
    "tpu.trace_stop"() : () -> ()
    %332 = vector.shape_cast %331 : vector<8x2x8xf32> to vector<16x8xf32>
    %333 = arith.truncf %332 : vector<16x8xf32> to vector<16x8xbf16>
    %334 = vector.extract_strided_slice %260 {offsets = [8, 0], sizes = [8, 32], strides = [1, 1]} : vector<32x32xbf16> to vector<8x32xbf16>
    %cst_174 = arith.constant dense<0.000000e+00> : vector<16x32xf32>
    %335 = tpu.matmul %333, %334, %cst_174 {dimension_numbers = #tpu.dot_dimension_numbers<[1], [0], [0], [1], [0, 0, 1, 1], [], []>} : vector<16x8xbf16>, vector<8x32xbf16>, vector<16x32xf32> -> vector<16x32xf32>
    %336 = arith.addf %310, %335 : vector<16x32xf32>
    %337 = vector.extract_strided_slice %283 {offsets = [0, 0, 16], sizes = [8, 2, 8], strides = [1, 1, 1]} : vector<8x2x96xf32> to vector<8x2x8xf32>
    %cst_175 = arith.constant 0.353553385 : f32
    %338 = vector.broadcast %cst_175 : f32 to vector<8x2x8xf32>
    %339 = arith.mulf %337, %338 : vector<8x2x8xf32>
    %340 = vector.extract_strided_slice %283 {offsets = [0, 0, 48], sizes = [8, 2, 8], strides = [1, 1, 1]} : vector<8x2x96xf32> to vector<8x2x8xf32>
    %341 = vector.extract_strided_slice %283 {offsets = [0, 0, 80], sizes = [8, 2, 8], strides = [1, 1, 1]} : vector<8x2x96xf32> to vector<8x2x8xf32>
    %342 = arith.truncf %339 : vector<8x2x8xf32> to vector<8x2x8xbf16>
    %343 = arith.truncf %340 : vector<8x2x8xf32> to vector<8x2x8xbf16>
    "tpu.trace_start"() <{level = 10 : i32, message = "nld,nmd->nlm"}> : () -> ()
    %cst_176 = arith.constant dense<0.000000e+00> : vector<8x2x2xf32>
    %344 = tpu.matmul %342, %343, %cst_176 {dimension_numbers = #tpu.dot_dimension_numbers<[2], [2], [1], [1], [0, 0, 0, 1, 1, 1], [0], [0]>} : vector<8x2x8xbf16>, vector<8x2x8xbf16>, vector<8x2x2xf32> -> vector<8x2x2xf32>
    "tpu.trace_stop"() : () -> ()
    %cst_177 = arith.constant dense<0xFF800000> : vector<8x2xf32>
    %345 = vector.multi_reduction <maximumf>, %344, %cst_177 [2] : vector<8x2x2xf32> to vector<8x2xf32>
    %346 = vector.shape_cast %345 : vector<8x2xf32> to vector<8x2x1xf32>
    %347 = vector.broadcast %346 : vector<8x2x1xf32> to vector<8x2x2xf32>
    %348 = arith.subf %344, %347 : vector<8x2x2xf32>
    %349 = math.exp %348 : vector<8x2x2xf32>
    %cst_178 = arith.constant dense<0.000000e+00> : vector<8x2xf32>
    %350 = vector.multi_reduction <add>, %349, %cst_178 [2] : vector<8x2x2xf32> to vector<8x2xf32>
    %351 = vector.shape_cast %350 : vector<8x2xf32> to vector<8x2x1xf32>
    %352 = tpu.reciprocal %351 {approx = true} : vector<8x2x1xf32> -> vector<8x2x1xf32>
    %353 = vector.broadcast %352 : vector<8x2x1xf32> to vector<8x2x2xf32>
    %354 = arith.mulf %349, %353 : vector<8x2x2xf32>
    %355 = arith.truncf %354 : vector<8x2x2xf32> to vector<8x2x2xbf16>
    %356 = arith.truncf %341 : vector<8x2x8xf32> to vector<8x2x8xbf16>
    "tpu.trace_start"() <{level = 10 : i32, message = "nlm,nmd->nld"}> : () -> ()
    %cst_179 = arith.constant dense<0.000000e+00> : vector<8x2x8xf32>
    %357 = tpu.matmul %355, %356, %cst_179 {dimension_numbers = #tpu.dot_dimension_numbers<[2], [1], [1], [2], [0, 0, 0, 1, 1, 2], [0], [0]>} : vector<8x2x2xbf16>, vector<8x2x8xbf16>, vector<8x2x8xf32> -> vector<8x2x8xf32>
    "tpu.trace_stop"() : () -> ()
    %358 = vector.shape_cast %357 : vector<8x2x8xf32> to vector<16x8xf32>
    %359 = arith.truncf %358 : vector<16x8xf32> to vector<16x8xbf16>
    %360 = vector.extract_strided_slice %260 {offsets = [16, 0], sizes = [8, 32], strides = [1, 1]} : vector<32x32xbf16> to vector<8x32xbf16>
    %cst_180 = arith.constant dense<0.000000e+00> : vector<16x32xf32>
    %361 = tpu.matmul %359, %360, %cst_180 {dimension_numbers = #tpu.dot_dimension_numbers<[1], [0], [0], [1], [0, 0, 1, 1], [], []>} : vector<16x8xbf16>, vector<8x32xbf16>, vector<16x32xf32> -> vector<16x32xf32>
    %362 = arith.addf %336, %361 : vector<16x32xf32>
    %363 = vector.extract_strided_slice %283 {offsets = [0, 0, 24], sizes = [8, 2, 8], strides = [1, 1, 1]} : vector<8x2x96xf32> to vector<8x2x8xf32>
    %cst_181 = arith.constant 0.353553385 : f32
    %364 = vector.broadcast %cst_181 : f32 to vector<8x2x8xf32>
    %365 = arith.mulf %363, %364 : vector<8x2x8xf32>
    %366 = vector.extract_strided_slice %283 {offsets = [0, 0, 56], sizes = [8, 2, 8], strides = [1, 1, 1]} : vector<8x2x96xf32> to vector<8x2x8xf32>
    %367 = vector.extract_strided_slice %283 {offsets = [0, 0, 88], sizes = [8, 2, 8], strides = [1, 1, 1]} : vector<8x2x96xf32> to vector<8x2x8xf32>
    %368 = arith.truncf %365 : vector<8x2x8xf32> to vector<8x2x8xbf16>
    %369 = arith.truncf %366 : vector<8x2x8xf32> to vector<8x2x8xbf16>
    "tpu.trace_start"() <{level = 10 : i32, message = "nld,nmd->nlm"}> : () -> ()
    %cst_182 = arith.constant dense<0.000000e+00> : vector<8x2x2xf32>
    %370 = tpu.matmul %368, %369, %cst_182 {dimension_numbers = #tpu.dot_dimension_numbers<[2], [2], [1], [1], [0, 0, 0, 1, 1, 1], [0], [0]>} : vector<8x2x8xbf16>, vector<8x2x8xbf16>, vector<8x2x2xf32> -> vector<8x2x2xf32>
    "tpu.trace_stop"() : () -> ()
    %cst_183 = arith.constant dense<0xFF800000> : vector<8x2xf32>
    %371 = vector.multi_reduction <maximumf>, %370, %cst_183 [2] : vector<8x2x2xf32> to vector<8x2xf32>
    %372 = vector.shape_cast %371 : vector<8x2xf32> to vector<8x2x1xf32>
    %373 = vector.broadcast %372 : vector<8x2x1xf32> to vector<8x2x2xf32>
    %374 = arith.subf %370, %373 : vector<8x2x2xf32>
    %375 = math.exp %374 : vector<8x2x2xf32>
    %cst_184 = arith.constant dense<0.000000e+00> : vector<8x2xf32>
    %376 = vector.multi_reduction <add>, %375, %cst_184 [2] : vector<8x2x2xf32> to vector<8x2xf32>
    %377 = vector.shape_cast %376 : vector<8x2xf32> to vector<8x2x1xf32>
    %378 = tpu.reciprocal %377 {approx = true} : vector<8x2x1xf32> -> vector<8x2x1xf32>
    %379 = vector.broadcast %378 : vector<8x2x1xf32> to vector<8x2x2xf32>
    %380 = arith.mulf %375, %379 : vector<8x2x2xf32>
    %381 = arith.truncf %380 : vector<8x2x2xf32> to vector<8x2x2xbf16>
    %382 = arith.truncf %367 : vector<8x2x8xf32> to vector<8x2x8xbf16>
    "tpu.trace_start"() <{level = 10 : i32, message = "nlm,nmd->nld"}> : () -> ()
    %cst_185 = arith.constant dense<0.000000e+00> : vector<8x2x8xf32>
    %383 = tpu.matmul %381, %382, %cst_185 {dimension_numbers = #tpu.dot_dimension_numbers<[2], [1], [1], [2], [0, 0, 0, 1, 1, 2], [0], [0]>} : vector<8x2x2xbf16>, vector<8x2x8xbf16>, vector<8x2x8xf32> -> vector<8x2x8xf32>
    "tpu.trace_stop"() : () -> ()
    %384 = vector.shape_cast %383 : vector<8x2x8xf32> to vector<16x8xf32>
    %385 = arith.truncf %384 : vector<16x8xf32> to vector<16x8xbf16>
    %386 = vector.extract_strided_slice %260 {offsets = [24, 0], sizes = [8, 32], strides = [1, 1]} : vector<32x32xbf16> to vector<8x32xbf16>
    %cst_186 = arith.constant dense<0.000000e+00> : vector<16x32xf32>
    %387 = tpu.matmul %385, %386, %cst_186 {dimension_numbers = #tpu.dot_dimension_numbers<[1], [0], [0], [1], [0, 0, 1, 1], [], []>} : vector<16x8xbf16>, vector<8x32xbf16>, vector<16x32xf32> -> vector<16x32xf32>
    %388 = arith.addf %362, %387 : vector<16x32xf32>
    %389 = vector.broadcast %262 : vector<1x32xf32> to vector<16x32xf32>
    %390 = arith.addf %388, %389 : vector<16x32xf32>
    %391 = arith.addf %254, %390 : vector<16x32xf32>
    %cst_187 = arith.constant dense<0.000000e+00> : vector<16xf32>
    %392 = vector.multi_reduction <add>, %391, %cst_187 [1] : vector<16x32xf32> to vector<16xf32>
    %393 = vector.shape_cast %392 : vector<16xf32> to vector<16x1xf32>
    %cst_188 = arith.constant 3.200000e+01 : f32
    %394 = vector.broadcast %cst_188 : f32 to vector<16x1xf32>
    %395 = arith.divf %393, %394 : vector<16x1xf32>
    %396 = vector.broadcast %395 : vector<16x1xf32> to vector<16x32xf32>
    %397 = arith.subf %391, %396 : vector<16x32xf32>
    %398 = arith.mulf %397, %397 : vector<16x32xf32>
    %cst_189 = arith.constant dense<0.000000e+00> : vector<16xf32>
    %399 = vector.multi_reduction <add>, %398, %cst_189 [1] : vector<16x32xf32> to vector<16xf32>
    %400 = vector.shape_cast %399 : vector<16xf32> to vector<16x1xf32>
    %cst_190 = arith.constant 3.200000e+01 : f32
    %401 = vector.broadcast %cst_190 : f32 to vector<16x1xf32>
    %402 = arith.divf %400, %401 : vector<16x1xf32>
    %403 = vector.broadcast %395 : vector<16x1xf32> to vector<16x32xf32>
    %404 = arith.subf %391, %403 : vector<16x32xf32>
    %cst_191 = arith.constant 9.99999974E-6 : f32
    %405 = vector.broadcast %cst_191 : f32 to vector<16x1xf32>
    %406 = arith.addf %402, %405 : vector<16x1xf32>
    %407 = math.rsqrt %406 : vector<16x1xf32>
    %408 = vector.broadcast %407 : vector<16x1xf32> to vector<16x32xf32>
    %409 = arith.mulf %404, %408 : vector<16x32xf32>
    %410 = vector.broadcast %264 : vector<1x32xf32> to vector<16x32xf32>
    %411 = arith.mulf %409, %410 : vector<16x32xf32>
    %412 = vector.broadcast %266 : vector<1x32xf32> to vector<16x32xf32>
    %413 = arith.addf %411, %412 : vector<16x32xf32>
    %414 = arith.truncf %413 : vector<16x32xf32> to vector<16x32xbf16>
    %cst_192 = arith.constant dense<0.000000e+00> : vector<16x64xf32>
    %415 = tpu.matmul %414, %268, %cst_192 {dimension_numbers = #tpu.dot_dimension_numbers<[1], [0], [0], [1], [0, 0, 1, 1], [], []>} : vector<16x32xbf16>, vector<32x64xbf16>, vector<16x64xf32> -> vector<16x64xf32>
    %416 = vector.broadcast %270 : vector<1x64xf32> to vector<16x64xf32>
    %417 = arith.addf %415, %416 : vector<16x64xf32>
    %cst_193 = arith.constant 0.000000e+00 : f32
    %418 = vector.broadcast %cst_193 : f32 to vector<16x64xf32>
    %419 = arith.maximumf %417, %418 : vector<16x64xf32>
    %420 = arith.truncf %419 : vector<16x64xf32> to vector<16x64xbf16>
    %cst_194 = arith.constant dense<0.000000e+00> : vector<16x32xf32>
    %421 = tpu.matmul %420, %272, %cst_194 {dimension_numbers = #tpu.dot_dimension_numbers<[1], [0], [0], [1], [0, 0, 1, 1], [], []>} : vector<16x64xbf16>, vector<64x32xbf16>, vector<16x32xf32> -> vector<16x32xf32>
    %422 = vector.broadcast %274 : vector<1x32xf32> to vector<16x32xf32>
    %423 = arith.addf %421, %422 : vector<16x32xf32>
    %424 = arith.addf %413, %423 : vector<16x32xf32>
    %cst_195 = arith.constant dense<0.000000e+00> : vector<16xf32>
    %425 = vector.multi_reduction <add>, %424, %cst_195 [1] : vector<16x32xf32> to vector<16xf32>
    %426 = vector.shape_cast %425 : vector<16xf32> to vector<16x1xf32>
    %cst_196 = arith.constant 3.200000e+01 : f32
    %427 = vector.broadcast %cst_196 : f32 to vector<16x1xf32>
    %428 = arith.divf %426, %427 : vector<16x1xf32>
    %429 = vector.broadcast %428 : vector<16x1xf32> to vector<16x32xf32>
    %430 = arith.subf %424, %429 : vector<16x32xf32>
    %431 = arith.mulf %430, %430 : vector<16x32xf32>
    %cst_197 = arith.constant dense<0.000000e+00> : vector<16xf32>
    %432 = vector.multi_reduction <add>, %431, %cst_197 [1] : vector<16x32xf32> to vector<16xf32>
    %433 = vector.shape_cast %432 : vector<16xf32> to vector<16x1xf32>
    %cst_198 = arith.constant 3.200000e+01 : f32
    %434 = vector.broadcast %cst_198 : f32 to vector<16x1xf32>
    %435 = arith.divf %433, %434 : vector<16x1xf32>
    %436 = vector.broadcast %428 : vector<16x1xf32> to vector<16x32xf32>
    %437 = arith.subf %424, %436 : vector<16x32xf32>
    %cst_199 = arith.constant 9.99999974E-6 : f32
    %438 = vector.broadcast %cst_199 : f32 to vector<16x1xf32>
    %439 = arith.addf %435, %438 : vector<16x1xf32>
    %440 = math.rsqrt %439 : vector<16x1xf32>
    %441 = vector.broadcast %440 : vector<16x1xf32> to vector<16x32xf32>
    %442 = arith.mulf %437, %441 : vector<16x32xf32>
    %443 = vector.broadcast %276 : vector<1x32xf32> to vector<16x32xf32>
    %444 = arith.mulf %442, %443 : vector<16x32xf32>
    %445 = vector.broadcast %278 : vector<1x32xf32> to vector<16x32xf32>
    %446 = arith.addf %444, %445 : vector<16x32xf32>
    %447 = vector.shape_cast %446 : vector<16x32xf32> to vector<8x2x32xf32>
    %cst_200 = arith.constant dense<0.000000e+00> : vector<2x32xf32>
    %448 = vector.multi_reduction <add>, %447, %cst_200 [0] : vector<8x2x32xf32> to vector<2x32xf32>
    %cst_201 = arith.constant 8.000000e+00 : f32
    %449 = vector.broadcast %cst_201 : f32 to vector<2x32xf32>
    %450 = arith.divf %448, %449 : vector<2x32xf32>
    %451 = arith.truncf %450 : vector<2x32xf32> to vector<2x32xbf16>
    %c0_202 = arith.constant 0 : index
    %c0_203 = arith.constant 0 : index
    %452 = vector.load %arg32[%c0_202, %c0_203] : memref<32x16xbf16, #tpu.memory_space<vmem>>, vector<32x16xbf16>
    %cst_204 = arith.constant dense<0.000000e+00> : vector<2x16xf32>
    %453 = tpu.matmul %451, %452, %cst_204 {dimension_numbers = #tpu.dot_dimension_numbers<[1], [0], [0], [1], [0, 0, 1, 1], [], []>} : vector<2x32xbf16>, vector<32x16xbf16>, vector<2x16xf32> -> vector<2x16xf32>
    %c0_205 = arith.constant 0 : index
    %c0_206 = arith.constant 0 : index
    %454 = vector.load %arg33[%c0_205, %c0_206] : memref<1x16xf32, #tpu.memory_space<vmem>>, vector<1x16xf32>
    %455 = vector.broadcast %454 : vector<1x16xf32> to vector<2x16xf32>
    %456 = arith.addf %453, %455 : vector<2x16xf32>
    %c0_207 = arith.constant 0 : index
    %c0_208 = arith.constant 0 : index
    %457 = vector.load %arg34[%c0_207, %c0_208] : memref<2x16xf32, #tpu.memory_space<vmem>>, vector<2x16xf32>
    tpu.vector_store %arg34[%c0_207, %c0_208], %456 {strides = array<i32>} : memref<2x16xf32, #tpu.memory_space<vmem>>, vector<2x16xf32>,
    return
  }
}

</mosaic_0001>

<bundles_post_ra>
// kernel: thumbnail_selector_forward.3
= control target key start
LH: loop header
LB: loop body
LE: loop exit
PB: predicated region body
PF: predicated region fallthrough
CT: control target
= control target key end

     0   :  { %s4070_s30 = smov 0   ;;  %s5085_s0 = inlined_call_operand.vmem [shape: bf16[6,64,147], index: 0, kind: input, shape index: {}]   ;;  %s5086_s1 = inlined_call_operand.vmem [shape: bf16[147,64], index: 1, kind: input, shape index: {}]   ;;  %s5087_s2 = inlined_call_operand.vmem [shape: f32[1,64], index: 2, kind: input, shape index: {}]   ;;  %s5088_s3 = inlined_call_operand.vmem [shape: bf16[64,2048], index: 3, kind: input, shape index: {}]   ;;  %s5089_s4 = inlined_call_operand.vmem [shape: f32[1,2048], index: 4, kind: input, shape index: {}]   ;;  %s5090_s5 = inlined_call_operand.vmem [shape: bf16[2048,32], index: 5, kind: input, shape index: {}]   ;;  %s5091_s6 = inlined_call_operand.vmem [shape: f32[1,32], index: 6, kind: input, shape index: {}]   ;;  %s5092_s7 = inlined_call_operand.vmem [shape: bf16[32,16], index: 7, kind: input, shape index: {}]   ;;  %s5093_s8 = inlined_call_operand.vmem [shape: f32[1,16], index: 8, kind: input, shape index: {}]   ;;  %s5094_s9 = inlined_call_operand.vmem [shape: f32[2,3,16], index: 9, kind: output, shape index: {}]  }
   0x1 LB: > { %s4076_s10 = sadd.s32 4294967295, %s4016_s30   ;;  %p2824_p0 = scmp.ge.s32.totalorder %s4016_s30, 1  ;;  %s4016_s30 = sphi %s4070_s30, %s19_s30  }
   0x2   : > { %p289_p1 = scmp.lt.s32.totalorder %s4016_s30, 3 }
   0x4   : > { %p290_p2 = pnand %p2824_p0, %p289_p1 }
   0x5   : > { %s325_s15 = smul.u32 (!%p290_p2), 3, %s4076_s10  ;;  %p332_p4 = scmp.lt.s32.totalorder (!%p290_p2), %s4076_s10, 1 }
   0x6   : > { %293 = sbr.rel (%p290_p2) target bundleno = 913 (0x391), region = 56 }
   0x7   : > { %p326_p3 = scmp.lt.s32.totalorder (!%p290_p2), %s325_s15, 5 }
   0xb   : > { %v3799_v0 = vld [vmem:[%s5086_s1 + $0x38] sm:$0xff]  ;;  %vm586_vm0 = vcmask 1040384   ;;  %vm587_vm1 = vcmask 1041408   ;;  %v379_v1 = vld [vmem:[%s5086_s1 + $0x48] sm:$0x3]  ;;  %v4018_v2 = vmov 65535  }
   0xc   : > { %v588_v3 = vsel %vm586_vm0, 4294967295, %v4018_v2  ;;  %593 = vmatpush.bf16.msra.mxu0 %v3799_v0  ;;  %v3798_v4 = vld [vmem:[%s5086_s1 + $0x30] sm:$0xff]  ;;  %v529_v5 = vunpack.c.l.b16 %v379_v1  ;;  %s5096_s15 = smov (!%p326_p3, %s325_s15), 5  ;;  %v3797_v8 = vld [vmem:[%s5086_s1 + $0x28] sm:$0xff]  ;;  %v3800_v10 = vld [vmem:[%s5086_s1 + $0x40] sm:$0xff]  ;;  %vm549_vm2 = vcmask 154624  }
   0xd   : > { %v589_v6 = vsel %vm587_vm1, %v588_v3, 0  ;;  %s3767_s20 = sshll.u32 %s5096_s15, 6  ;;  %v3796_v13 = vld [vmem:[%s5086_s1 + $0x20] sm:$0xff]  ;;  %v3795_v15 = vld [vmem:[%s5086_s1 + $0x18] sm:$0xff]  ;;  %v3794_v16 = vld [vmem:[%s5086_s1 + $0x10] sm:$0xff]  ;;  %vm755_vm3 = vcmask 523264  }
   0xe   : > { %v539_v7 = vpack.c.b16 %v529_v5, %v529_v5  ;;  %s4099_s25 = scalar_lea.vmem %s5085_s0, %s3767_s20  ;;  %v3793_v17 = vld [vmem:[%s5086_s1 + $0x8] sm:$0xff]  ;;  %v3792_v20 = vld [vmem:[%s5086_s1] sm:$0xff]  ;;  %vm938_vm5 = vcmask 1041409   ;;  %vm940_vm6 = vcmask 1042434   ;;  %vm2748_vm7 = vcmask 261120   ;;  %s5098_s10 = smov (!%p332_p4, %s4076_s10), 1 }
   0xf   : > { %v3768_v11 = vld [vmem:[%s4099_s25 + $0x4] sm:$0xf]  ;;  %v2832_v12 = vld [vmem:[%s4099_s25 + $0x8] sm:$0xf0]  ;;  %v3770_v18 = vld [vmem:[%s4099_s25 + $0x14] sm:$0xf] }
  0x10   : > { %594 = vmatpush.bf16.msra.mxu0 %v3798_v4  ;;  %v591_v9 = vand.u32 %v589_v6, %v539_v7  ;;  %v2835_v14 = vor.u32 %v3768_v11, %v2832_v12  ;;  %v2840_v19 = vld [vmem:[%s4099_s25 + $0x18] sm:$0xf0]  ;;  %v2830_v21 = vld [vmem:[%s4099_s25] sm:$0xf]  ;;  %v3769_v22 = vld [vmem:[%s4099_s25 + $0x4] sm:$0xf0] }
  0x11   : > { %v2843_v23 = vor.u32 %v3770_v18, %v2840_v19  ;;  %v2831_v24 = vor.u32 %v3769_v22, %v2830_v21  ;;  %v3772_v25 = vld [vmem:[%s4099_s25 + $0x24] sm:$0xf]  ;;  %v2848_v26 = vld [vmem:[%s4099_s25 + $0x28] sm:$0xf0]  ;;  %v2838_v27 = vld [vmem:[%s4099_s25 + $0x10] sm:$0xf] }
  0x12   : > { %668 = vmatpush.bf16.msra.mxu1 %v591_v9  ;;  %v3771_v28 = vld [vmem:[%s4099_s25 + $0x14] sm:$0xf0]  ;;  %v2851_v29 = vor.u32 %v3772_v25, %v2848_v26  ;;  %v3774_v31 = vld [vmem:[%s4099_s25 + $0x34] sm:$0xf]  ;;  %v2856_v32 = vld [vmem:[%s4099_s25 + $0x38] sm:$0xf0] }
  0x13   : > { %v2839_v30 = vor.u32 %v3771_v28, %v2838_v27  ;;  %v2846_v33 = vld [vmem:[%s4099_s25 + $0x20] sm:$0xf]  ;;  %v3773_v34 = vld [vmem:[%s4099_s25 + $0x24] sm:$0xf0]  ;;  %v2859_v35 = vor.u32 %v3774_v31, %v2856_v32  ;;  %v3776_v37 = vld [vmem:[%s4099_s25 + $0x44] sm:$0xf] }
  0x14   : > { %595 = vmatpush.bf16.msra.mxu0 %v3797_v8  ;;  %v2847_v36 = vor.u32 %v3773_v34, %v2846_v33  ;;  %v2864_v38 = vld [vmem:[%s4099_s25 + $0x48] sm:$0xf0]  ;;  %v2854_v39 = vld [vmem:[%s4099_s25 + $0x30] sm:$0xf]  ;;  %v3775_v40 = vld [vmem:[%s4099_s25 + $0x34] sm:$0xf0] }
  0x15   : > { %v2867_v41 = vor.u32 %v3776_v37, %v2864_v38  ;;  %v2855_v42 = vor.u32 %v3775_v40, %v2854_v39  ;;  %v3778_v43 = vld [vmem:[%s4099_s25 + $0x54] sm:$0xf]  ;;  %v2872_v44 = vld [vmem:[%s4099_s25 + $0x58] sm:$0xf0]  ;;  %v2862_v45 = vld [vmem:[%s4099_s25 + $0x40] sm:$0xf] }
  0x16   : > { %669 = vmatpush.bf16.msra.mxu1 %v3800_v10  ;;  %v3777_v46 = vld [vmem:[%s4099_s25 + $0x44] sm:$0xf0]  ;;  %v2875_v47 = vor.u32 %v3778_v43, %v2872_v44  ;;  %v3780_v49 = vld [vmem:[%s4099_s25 + $0x64] sm:$0xf]  ;;  %v2880_v50 = vld [vmem:[%s4099_s25 + $0x68] sm:$0xf0] }
  0x17   : > { %v2863_v48 = vor.u32 %v3777_v46, %v2862_v45  ;;  %v2870_v51 = vld [vmem:[%s4099_s25 + $0x50] sm:$0xf]  ;;  %v3779_v52 = vld [vmem:[%s4099_s25 + $0x54] sm:$0xf0]  ;;  %v2883_v53 = vor.u32 %v3780_v49, %v2880_v50  ;;  %v3782_v55 = vld [vmem:[%s4099_s25 + $0x74] sm:$0xf] }
  0x18   : > { %596 = vmatpush.bf16.msra.mxu0 %v3796_v13  ;;  %v2871_v54 = vor.u32 %v3779_v52, %v2870_v51  ;;  %v2888_v56 = vld [vmem:[%s4099_s25 + $0x78] sm:$0xf0]  ;;  %v2878_v57 = vld [vmem:[%s4099_s25 + $0x60] sm:$0xf]  ;;  %v3781_v58 = vld [vmem:[%s4099_s25 + $0x64] sm:$0xf0] }
  0x19   : > { %2960 = vmatmul.msk.bf16.vlgmr.msra.gmra.mxu1 %vm549_vm2, %v2835_v14  ;;  %v2891_v59 = vor.u32 %v3782_v55, %v2888_v56  ;;  %v2879_v60 = vor.u32 %v3781_v58, %v2878_v57  ;;  %v3784_v61 = vld [vmem:[%s4099_s25 + $0x84] sm:$0xf]  ;;  %v2896_v62 = vld [vmem:[%s4099_s25 + $0x88] sm:$0xf0]  ;;  %v2886_v63 = vld [vmem:[%s4099_s25 + $0x70] sm:$0xf] }
  0x1a   : > { %v3783_v0 = vld [vmem:[%s4099_s25 + $0x74] sm:$0xf0]  ;;  %v2899_v1 = vor.u32 %v3784_v61, %v2896_v62  ;;  %v3786_v5 = vld [vmem:[%s4099_s25 + $0x94] sm:$0xf]  ;;  %v2904_v6 = vld [vmem:[%s4099_s25 + $0x98] sm:$0xf0] }
  0x1b   : > { %v2887_v3 = vor.u32 %v3783_v0, %v2886_v63  ;;  %v2894_v7 = vld [vmem:[%s4099_s25 + $0x80] sm:$0xf]  ;;  %v3785_v8 = vld [vmem:[%s4099_s25 + $0x84] sm:$0xf0]  ;;  %v2907_v10 = vor.u32 %v3786_v5, %v2904_v6  ;;  %v3788_v19 = vld [vmem:[%s4099_s25 + $0xa4] sm:$0xf] }
  0x1c   : > { %597 = vmatpush.bf16.msra.mxu0 %v3795_v15  ;;  %v4166_v9 = vld [vmem:[%s5087_s2] ss:$0 sm:$0xff]  ;;  %v2895_v12 = vor.u32 %v3785_v8, %v2894_v7  ;;  %v2902_v22 = vld [vmem:[%s4099_s25 + $0x90] sm:$0xf]  ;;  %v3789_v45 = vld [vmem:[%s4099_s25 + $0xa4] sm:$0xf0] }
  0x1d   : > { %v2910_v44 = vld [vmem:[%s4099_s25 + $0xa0] sm:$0xf]  ;;  %v2918_v62 = vld [vmem:[%s4099_s25 + $0xb0] sm:$0xf]  ;;  %v3791_v63 = vld [vmem:[%s4099_s25 + $0xb4] sm:$0xf0] }
  0x1e   : > { %v2911_v49 = vor.u32 %v3789_v45, %v2910_v44  ;;  %s2827_s28 = sshll.u32 %s5098_s10, 2  ;;  %vm2765_vm8 = vcmask 124928  }
  0x1f   : > { %s335_s14 = scalar_lea.vmem %s5094_s9, %s2827_s28 }
  0x20   : > { %598 = vmatpush.bf16.msra.mxu0 %v3794_v16 }
  0x24   : > { %599 = vmatpush.bf16.msra.mxu0 %v3793_v17 }
  0x28   : > { %600 = vmatpush.bf16.msra.mxu0 %v3792_v20  ;;  %v2912_v20 = vld [vmem:[%s4099_s25 + $0xa8] sm:$0xf0] }
  0x29   : > { %2961 = vmatmul.msk.bf16.gmra.mxu1 %vm549_vm2, %v2843_v23  ;;  %v3787_v23 = vld [vmem:[%s4099_s25 + $0x94] sm:$0xf0] }
  0x2a   : > { %v2903_v27 = vor.u32 %v3787_v23, %v2902_v22 }
  0x2b   : > { %601 = vmatmul.bf16.vlgmr.msra.gmra.mxu0 %v2831_v24  ;;  %v2915_v24 = vor.u32 %v3788_v19, %v2912_v20 }
  0x39   : > { %2962 = vmatmul.msk.bf16.gmra.mxu1 %vm549_vm2, %v2851_v29 }
  0x3b   : > { %606 = vmatmul.bf16.gmra.mxu0 %v2839_v30 }
  0x49   : > { %2963 = vmatmul.msk.bf16.gmra.mxu1 %vm549_vm2, %v2859_v35 }
  0x4b   : > { %611 = vmatmul.bf16.gmra.mxu0 %v2847_v36 }
  0x59   : > { %2964 = vmatmul.msk.bf16.gmra.mxu1 %vm549_vm2, %v2867_v41  ;;  %v3790_v41 = vld [vmem:[%s4099_s25 + $0xb4] sm:$0xf] }
  0x5b   : > { %616 = vmatmul.bf16.gmra.mxu0 %v2855_v42  ;;  %v2920_v42 = vld [vmem:[%s4099_s25 + $0xb8] sm:$0xf0] }
  0x5c   : > { %v2923_v46 = vor.u32 %v3790_v41, %v2920_v42 }
  0x69   : > { %2965 = vmatmul.msk.bf16.gmra.mxu1 %vm549_vm2, %v2875_v47 }
  0x6b   : > { %621 = vmatmul.bf16.gmra.mxu0 %v2863_v48 }
  0x79   : > { %2966 = vmatmul.msk.bf16.gmra.mxu1 %vm549_vm2, %v2883_v53 }
  0x7b   : > { %626 = vmatmul.bf16.gmra.mxu0 %v2871_v54 }
  0x89   : > { %2967 = vmatmul.msk.bf16.gmra.mxu1 %vm549_vm2, %v2891_v59 }
  0x8b   : > { %631 = vmatmul.bf16.gmra.mxu0 %v2879_v60 }
  0x96   : > { %v671_v2 = vpop.f32.mrf.mxu1 }
  0x99   : > { %2968 = vmatmul.msk.bf16.gmra.mxu1 %vm549_vm2, %v2899_v1 }
  0x9b   : > { %636 = vmatmul.bf16.gmra.mxu0 %v2887_v3 }
  0x9e   : > { %v673_v4 = vpop.f32.mrf.mxu1 }
  0xa6   : > { %v676_v11 = vpop.f32.mrf.mxu1 }
  0xa8   : > { %v602_v13 = vpop.f32.mrf.mxu0 }
  0xa9   : > { %v603_v14 = vadd.f32 %v4166_v9, %v602_v13  ;;  %2969 = vmatmul.msk.bf16.gmra.mxu1 %vm549_vm2, %v2907_v10 }
  0xab   : > { %v672_v15 = vadd.f32 %v671_v2, %v603_v14  ;;  %641 = vmatmul.bf16.gmra.mxu0 %v2895_v12  ;;  %v2919_v2 = vor.u32 %v3791_v63, %v2918_v62 }
  0xad   : > { %v731_v29 = vmax.f32 %v672_v15, 0.0 }
  0xae   : > { %v678_v16 = vpop.f32.mrf.mxu1 }
  0xaf   : > { %v756_v33 = vsel %vm755_vm3, %v731_v29, 0.0 }
  0xb0   : > { %v604_v17 = vpop.f32.mrf.mxu0 }
  0xb1   : > { %v605_v18 = vadd.f32 %v4166_v9, %v604_v17 }
  0xb3   : > { %v674_v21 = vadd.f32 %v673_v4, %v605_v18 }
  0xb5   : > { %v732_v26 = vmax.f32 %v674_v21, 0.0 }
  0xb6   : > { %v681_v25 = vpop.f32.mrf.mxu1 }
  0xb7   : > { %v757_v31 = vsel %vm755_vm3, %v732_v26, 0.0 }
  0xb8   : > { %v607_v28 = vpop.f32.mrf.mxu0  ;;  %v758_v35 = vadd.f32 %v757_v31, %v756_v33 }
  0xb9   : > { %v608_v30 = vadd.f32 %v4166_v9, %v607_v28  ;;  %2970 = vmatmul.msk.bf16.gmra.mxu1 %vm549_vm2, %v2915_v24 }
  0xbb   : > { %v677_v32 = vadd.f32 %v676_v11, %v608_v30  ;;  %646 = vmatmul.bf16.gmra.mxu0 %v2903_v27 }
  0xbd   : > { %v733_v34 = vmax.f32 %v677_v32, 0.0 }
  0xbe   : > { %v683_v36 = vpop.f32.mrf.mxu1 }
  0xbf   : > { %v759_v37 = vsel %vm755_vm3, %v733_v34, 0.0 }
  0xc0   : > { %v760_v38 = vadd.f32 %v759_v37, %v758_v35  ;;  %v609_v39 = vpop.f32.mrf.mxu0 }
  0xc1   : > { %v610_v40 = vadd.f32 %v4166_v9, %v609_v39 }
  0xc3   : > { %v679_v43 = vadd.f32 %v678_v16, %v610_v40 }
  0xc5   : > { %v734_v48 = vmax.f32 %v679_v43, 0.0 }
  0xc6   : > { %v686_v47 = vpop.f32.mrf.mxu1 }
  0xc7   : > { %v761_v52 = vsel %vm755_vm3, %v734_v48, 0.0 }
  0xc8   : > { %v612_v50 = vpop.f32.mrf.mxu0  ;;  %v762_v55 = vadd.f32 %v761_v52, %v760_v38 }
  0xc9   : > { %v613_v51 = vadd.f32 %v4166_v9, %v612_v50  ;;  %2971 = vmatmul.msk.bf16.gmra.mxu1 %vm549_vm2, %v2923_v46 }
  0xcb   : > { %v682_v53 = vadd.f32 %v681_v25, %v613_v51  ;;  %651 = vmatmul.bf16.gmra.mxu0 %v2911_v49 }
  0xcd   : > { %v735_v54 = vmax.f32 %v682_v53, 0.0 }
  0xce   : > { %v688_v56 = vpop.f32.mrf.mxu1 }
  0xcf   : > { %v763_v57 = vsel %vm755_vm3, %v735_v54, 0.0 }
  0xd0   : > { %v764_v58 = vadd.f32 %v763_v57, %v762_v55  ;;  %v614_v59 = vpop.f32.mrf.mxu0 }
  0xd1   : > { %v615_v60 = vadd.f32 %v4166_v9, %v614_v59 }
  0xd3   : > { %v684_v61 = vadd.f32 %v683_v36, %v615_v60 }
  0xd5   : > { %v736_v1 = vmax.f32 %v684_v61, 0.0 }
  0xd6   : > { %v691_v0 = vpop.f32.mrf.mxu1 }
  0xd7   : > { %v765_v5 = vsel %vm755_vm3, %v736_v1, 0.0 }
  0xd8   : > { %v617_v3 = vpop.f32.mrf.mxu0  ;;  %v766_v8 = vadd.f32 %v765_v5, %v764_v58  ;;  %v4019_v58 = vmov 64.0  }
  0xd9   : > { %v618_v4 = vadd.f32 %v4166_v9, %v617_v3  ;;  %4008 = vrcp.f32 %v4019_v58  ;;  %v3102_v58 = vld [vmem:[%s5088_s3 + $0x100] sm:$0xf] }
  0xdb   : > { %v687_v6 = vadd.f32 %v686_v47, %v618_v4  ;;  %656 = vmatmul.bf16.gmra.mxu0 %v2919_v2 }
  0xdd   : > { %v737_v7 = vmax.f32 %v687_v6, 0.0 }
  0xde   : > { %v693_v10 = vpop.f32.mrf.mxu1 }
  0xdf   : > { %v767_v11 = vsel %vm755_vm3, %v737_v7, 0.0  ;;  %v4009_v1 = vpop.eup %4008 }
  0xe0   : > { %v768_v12 = vadd.f32 %v767_v11, %v766_v8  ;;  %v619_v13 = vpop.f32.mrf.mxu0  ;;  %v820_v5 = vmul.f32 64.0, %v4009_v1  ;;  %vm824_vm4 = vweird.f32 %v4009_v1 }
  0xe1   : > { %v620_v14 = vadd.f32 %v4166_v9, %v619_v13 }
  0xe3   : > { %v689_v15 = vadd.f32 %v688_v56, %v620_v14 }
  0xe5   : > { %v738_v16 = vmax.f32 %v689_v15, 0.0 }
  0xe6   : > { %v696_v17 = vpop.f32.mrf.mxu1 }
  0xe7   : > { %v769_v18 = vsel %vm755_vm3, %v738_v16, 0.0 }
  0xe8   : > { %v770_v19 = vadd.f32 %v769_v18, %v768_v12  ;;  %v622_v20 = vpop.f32.mrf.mxu0  ;;  %v821_v12 = vsub.f32 1.0, %v820_v5 }
  0xe9   : > { %v623_v21 = vadd.f32 %v4166_v9, %v622_v20 }
  0xea   : > { %v771_v63 = vrot.slane %v770_v19, 4 }
  0xeb   : > { %v692_v22 = vadd.f32 %v691_v0, %v623_v21 }
  0xec   : > { %v772_v4 = vadd.f32 %v771_v63, %v770_v19  ;;  %v3104_v63 = vld [vmem:[%s5088_s3 + $0x140] sm:$0xf0] }
  0xed   : > { %v739_v26 = vmax.f32 %v692_v22, 0.0 }
  0xee   : > { %v698_v23 = vpop.f32.mrf.mxu1  ;;  %v773_v11 = vrot.slane %v772_v4, 2 }
  0xef   : > { %v777_v30 = vsel %vm755_vm3, %v739_v26, 0.0 }
  0xf0   : > { %v624_v24 = vpop.f32.mrf.mxu0  ;;  %v774_v15 = vadd.f32 %v773_v11, %v772_v4  ;;  %v3817_v11 = vld [vmem:[%s5088_s3 + $0x84] sm:$0xf] }
  0xf1   : > { %v625_v25 = vadd.f32 %v4166_v9, %v624_v24 }
  0xf2   : > { %v775_v22 = vrot.slane %v774_v15, 1 }
  0xf3   : > { %v694_v27 = vadd.f32 %v693_v10, %v625_v25 }
  0xf4   : > { %v776_v25 = vadd.f32 %v775_v22, %v774_v15 }
  0xf5   : > { %v740_v28 = vmax.f32 %v694_v27, 0.0 }
  0xf6   : > { %v701_v29 = vpop.f32.mrf.mxu1 }
  0xf7   : > { %v778_v31 = vsel %vm755_vm3, %v740_v28, 0.0 }
  0xf8   : > { %v779_v32 = vadd.f32 %v778_v31, %v777_v30  ;;  %v627_v33 = vpop.f32.mrf.mxu0 }
  0xf9   : > { %v628_v34 = vadd.f32 %v4166_v9, %v627_v33 }
  0xfb   : > { %v697_v35 = vadd.f32 %v696_v17, %v628_v34  ;;  %v822_v17 = vmul.f32 %v4009_v1, %v821_v12  ;;  %v3040_v12 = vld [vmem:[%s5088_s3 + $0xc0] sm:$0xf0] }
  0xfc   : > { %v3043_v15 = vor.u32 %v3817_v11, %v3040_v12 }
  0xfd   : > { %v741_v36 = vmax.f32 %v697_v35, 0.0 }
  0xfe   : > { %v703_v37 = vpop.f32.mrf.mxu1 }
  0xff   : > { %v780_v38 = vsel %vm755_vm3, %v741_v36, 0.0 }
 0x100   : > { %v781_v39 = vadd.f32 %v780_v38, %v779_v32  ;;  %v629_v40 = vpop.f32.mrf.mxu0 }
 0x101   : > { %v630_v41 = vadd.f32 %v4166_v9, %v629_v40 }
 0x103   : > { %v699_v42 = vadd.f32 %v698_v23, %v630_v41  ;;  %v823_v23 = vadd.f32 %v4009_v1, %v822_v17 }
 0x105   : > { %v742_v43 = vmax.f32 %v699_v42, 0.0  ;;  %v4213_v27 = vsel %vm824_vm4, %v4009_v1, %v823_v23  ;;  %v3809_v23 = vld [vmem:[%s5088_s3 + $0x3c] sm:$0xf0] }
 0x106   : > { %v706_v47 = vpop.f32.mrf.mxu1  ;;  %v826_v31 = vmul.f32 %v4213_v27, %v776_v25 }
 0x107   : > { %v782_v44 = vsel %vm755_vm3, %v742_v43, 0.0 }
 0x108   : > { %v783_v45 = vadd.f32 %v782_v44, %v781_v39  ;;  %v632_v46 = vpop.f32.mrf.mxu0  ;;  %v829_v34 = vpack.c.bf16 %v826_v31, %v826_v31 }
 0x109   : > { %v633_v48 = vadd.f32 %v4166_v9, %v632_v46  ;;  %v3166_v46 = vld [vmem:[%s5088_s3 + $0x180] sm:$0xf] }
 0x10a   : > { %v935_v38 = vunpack.c.l.b16 %v829_v34 }
 0x10b   : > { %v702_v49 = vadd.f32 %v701_v29, %v633_v48 }
 0x10d   : > { %v743_v50 = vmax.f32 %v702_v49, 0.0 }
 0x10e   : > { %v708_v55 = vpop.f32.mrf.mxu1 }
 0x10f   : > { %v784_v51 = vsel %vm755_vm3, %v743_v50, 0.0 }
 0x110   : > { %v785_v52 = vadd.f32 %v784_v51, %v783_v45  ;;  %v634_v53 = vpop.f32.mrf.mxu0  ;;  %v3849_v51 = vld [vmem:[%s5088_s3 + $0x184] sm:$0xf] }
 0x111   : > { %v635_v54 = vadd.f32 %v4166_v9, %v634_v53 }
 0x113   : > { %v704_v56 = vadd.f32 %v703_v37, %v635_v54 }
 0x115   : > { %v744_v57 = vmax.f32 %v704_v56, 0.0 }
 0x116   : > { %v711_v2 = vpop.f32.mrf.mxu1 }
 0x117   : > { %v786_v59 = vsel %vm755_vm3, %v744_v57, 0.0 }
 0x118   : > { %v787_v60 = vadd.f32 %v786_v59, %v785_v52  ;;  %v637_v61 = vpop.f32.mrf.mxu0  ;;  %v3168_v52 = vld [vmem:[%s5088_s3 + $0x1c0] sm:$0xf0]  ;;  %v3841_v59 = vld [vmem:[%s5088_s3 + $0x13c] sm:$0xf0] }
 0x119   : > { %v638_v62 = vadd.f32 %v4166_v9, %v637_v61  ;;  %v3171_v54 = vor.u32 %v3849_v51, %v3168_v52  ;;  %v3834_v51 = vld [vmem:[%s5088_s3 + $0x10c] sm:$0xf] }
 0x11a   : > { %v3112_v52 = vld [vmem:[%s5088_s3 + $0x148] sm:$0xf0] }
 0x11b   : > { %v707_v0 = vadd.f32 %v706_v47, %v638_v62  ;;  %v3857_v47 = vld [vmem:[%s5088_s3 + $0x1bc] sm:$0xf0]  ;;  %1283 = vmatpush.bf16.msra.mxu3 %v3171_v54  ;;  %v3103_v62 = vor.u32 %v3841_v59, %v3102_v58 }
 0x11c   : > { %v3167_v50 = vor.u32 %v3857_v47, %v3166_v46  ;;  %v3110_v46 = vld [vmem:[%s5088_s3 + $0x108] sm:$0xf] }
 0x11d   : > { %v745_v3 = vmax.f32 %v707_v0, 0.0  ;;  %v3842_v47 = vld [vmem:[%s5088_s3 + $0x144] sm:$0xf0] }
 0x11e   : > { %v713_v16 = vpop.f32.mrf.mxu1  ;;  %1270 = vmatpush.bf16.msra.mxu2 %v3167_v50  ;;  %v3111_v50 = vor.u32 %v3842_v47, %v3110_v46  ;;  %v3803_v46 = vld [vmem:[%s5088_s3 + $0x14] sm:$0xf] }
 0x11f   : > { %v788_v6 = vsel %vm755_vm3, %v745_v3, 0.0  ;;  %v2992_v47 = vld [vmem:[%s5088_s3 + $0x50] sm:$0xf0] }
 0x120   : > { %v789_v7 = vadd.f32 %v788_v6, %v787_v60  ;;  %v639_v8 = vpop.f32.mrf.mxu0  ;;  %v3833_v60 = vld [vmem:[%s5088_s3 + $0x104] sm:$0xf] }
 0x121   : > { %v640_v10 = vadd.f32 %v4166_v9, %v639_v8  ;;  %v3107_v3 = vor.u32 %v3833_v60, %v3104_v63  ;;  %v3818_v60 = vld [vmem:[%s5088_s3 + $0x8c] sm:$0xf] }
 0x122   : > { %1271 = vmatpush.bf16.msra.mxu2 %v3103_v62 }
 0x123   : > { %v709_v13 = vadd.f32 %v708_v55, %v640_v10  ;;  %1284 = vmatpush.bf16.msra.mxu3 %v3107_v3 }
 0x125   : > { %v746_v14 = vmax.f32 %v709_v13, 0.0 }
 0x126   : > { %v716_v30 = vpop.f32.mrf.mxu1 }
 0x127   : > { %v790_v18 = vsel %vm755_vm3, %v746_v14, 0.0  ;;  %1285 = vmatpush.bf16.msra.mxu3 %v3043_v15 }
 0x128   : > { %v791_v20 = vadd.f32 %v790_v18, %v789_v7  ;;  %v642_v21 = vpop.f32.mrf.mxu0  ;;  %v3038_v7 = vld [vmem:[%s5088_s3 + $0x80] sm:$0xf] }
 0x129   : > { %v643_v48 = vadd.f32 %v4166_v9, %v642_v21 }
 0x12a   : > { %v792_v19 = vrot.slane %v791_v20, 4 }
 0x12b   : > { %v712_v61 = vadd.f32 %v711_v2, %v643_v48  ;;  %v3825_v2 = vld [vmem:[%s5088_s3 + $0xbc] sm:$0xf0] }
 0x12c   : > { %v793_v24 = vadd.f32 %v792_v19, %v791_v20  ;;  %v3039_v10 = vor.u32 %v3825_v2, %v3038_v7  ;;  %v2974_v19 = vld [vmem:[%s5088_s3] sm:$0xf]  ;;  %v3802_v7 = vld [vmem:[%s5088_s3 + $0xc] sm:$0xf] }
 0x12d   : > { %v747_v8 = vmax.f32 %v712_v61, 0.0  ;;  %v2984_v2 = vld [vmem:[%s5088_s3 + $0x48] sm:$0xf0] }
 0x12e   : > { %v794_v26 = vrot.slane %v793_v24, 2  ;;  %v718_v40 = vpop.f32.mrf.mxu1  ;;  %1272 = vmatpush.bf16.msra.mxu2 %v3039_v10  ;;  %v2987_v12 = vor.u32 %v3802_v7, %v2984_v2  ;;  %v3812_v7 = vld [vmem:[%s5088_s3 + $0x54] sm:$0xf0]  ;;  %v3804_v2 = vld [vmem:[%s5088_s3 + $0x1c] sm:$0xf] }
 0x12f   : > { %v798_v25 = vsel %vm755_vm3, %v747_v8, 0.0 }
 0x130   : > { %v795_v28 = vadd.f32 %v794_v26, %v793_v24  ;;  %v644_v29 = vpop.f32.mrf.mxu0  ;;  %v3801_v24 = vld [vmem:[%s5088_s3 + $0x4] sm:$0xf]  ;;  %v2975_v26 = vor.u32 %v3809_v23, %v2974_v19  ;;  %v3182_v23 = vld [vmem:[%s5088_s3 + $0x190] sm:$0xf] }
 0x131   : > { %v645_v45 = vadd.f32 %v4166_v9, %v644_v29 }
 0x132   : > { %v796_v32 = vrot.slane %v795_v28, 1  ;;  %1273 = vmatpush.bf16.msra.mxu2 %v2975_v26  ;;  %v3184_v26 = vld [vmem:[%s5088_s3 + $0x1d0] sm:$0xf0] }
 0x133   : > { %v714_v55 = vadd.f32 %v713_v16, %v645_v45 }
 0x134   : > { %v797_v33 = vadd.f32 %v796_v32, %v795_v28  ;;  %v2976_v28 = vld [vmem:[%s5088_s3 + $0x40] sm:$0xf0] }
 0x135   : > { %v748_v4 = vmax.f32 %v714_v55, 0.0  ;;  %v2979_v32 = vor.u32 %v3801_v24, %v2976_v28  ;;  %v3115_v55 = vor.u32 %v3834_v51, %v3112_v52  ;;  %v3859_v24 = vld [vmem:[%s5088_s3 + $0x1cc] sm:$0xf0]  ;;  %v3860_v51 = vld [vmem:[%s5088_s3 + $0x1d4] sm:$0xf0] }
 0x136   : > { %v827_v35 = vmul.f32 %v4213_v27, %v797_v33  ;;  %v721_v43 = vpop.f32.mrf.mxu1  ;;  %v3852_v52 = vld [vmem:[%s5088_s3 + $0x19c] sm:$0xf] }
 0x137   : > { %v799_v16 = vsel %vm755_vm3, %v748_v4, 0.0  ;;  %1286 = vmatpush.bf16.msra.mxu3 %v2979_v32  ;;  %v2982_v4 = vld [vmem:[%s5088_s3 + $0x8] sm:$0xf] }
 0x138   : > { %v830_v36 = vpack.c.bf16 %v827_v35, %v827_v35  ;;  %v647_v37 = vpop.f32.mrf.mxu0  ;;  %v800_v33 = vadd.f32 %v799_v16, %v798_v25  ;;  %v3851_v25 = vld [vmem:[%s5088_s3 + $0x194] sm:$0xf] }
 0x139   : > { %v648_v53 = vadd.f32 %v4166_v9, %v647_v37  ;;  %v3858_v37 = vld [vmem:[%s5088_s3 + $0x1c4] sm:$0xf0] }
 0x13a   : > { %v936_v39 = vunpack.c.l.b16 %v830_v36  ;;  %v3174_v36 = vld [vmem:[%s5088_s3 + $0x188] sm:$0xf] }
 0x13b   : > { %v717_v0 = vadd.f32 %v716_v30, %v648_v53 }
 0x13c   : > { %v4217_v41 = vsel %vm938_vm5, %v936_v39, %v935_v38  ;;  %v3175_v39 = vor.u32 %v3858_v37, %v3174_v36  ;;  %v3054_v37 = vld [vmem:[%s5088_s3 + $0x90] sm:$0xf] }
 0x13d   : > { %v749_v13 = vmax.f32 %v717_v0, 0.0 }
 0x13e   : > { %v723_v49 = vpop.f32.mrf.mxu1  ;;  %1296 = vmatpush.bf16.msrb.mxu2 %v3175_v39  ;;  %v3819_v39 = vld [vmem:[%s5088_s3 + $0x94] sm:$0xf] }
 0x13f   : > { %v801_v29 = vsel %vm755_vm3, %v749_v13, 0.0 }
 0x140   : > { %v649_v42 = vpop.f32.mrf.mxu0  ;;  %v802_v38 = vadd.f32 %v801_v29, %v800_v33  ;;  %v3183_v29 = vor.u32 %v3859_v24, %v3182_v23  ;;  %v3843_v33 = vld [vmem:[%s5088_s3 + $0x14c] sm:$0xf0]  ;;  %v3070_v24 = vld [vmem:[%s5088_s3 + $0xa0] sm:$0xf] }
 0x141   : > { %v650_v56 = vadd.f32 %v4166_v9, %v649_v42  ;;  %v3176_v42 = vld [vmem:[%s5088_s3 + $0x1c8] sm:$0xf0] }
 0x142   : > { %1297 = vmatpush.bf16.msrb.mxu2 %v3111_v50  ;;  %v3190_v50 = vld [vmem:[%s5088_s3 + $0x198] sm:$0xf] }
 0x143   : > { %v719_v5 = vadd.f32 %v718_v40, %v650_v56  ;;  %v3850_v40 = vld [vmem:[%s5088_s3 + $0x18c] sm:$0xf]  ;;  %v3046_v56 = vld [vmem:[%s5088_s3 + $0x88] sm:$0xf] }
 0x144   : > { %v3179_v45 = vor.u32 %v3850_v40, %v3176_v42  ;;  %v3056_v40 = vld [vmem:[%s5088_s3 + $0xd0] sm:$0xf0] }
 0x145   : > { %v750_v17 = vmax.f32 %v719_v5, 0.0  ;;  %v3810_v5 = vld [vmem:[%s5088_s3 + $0x44] sm:$0xf0] }
 0x146   : > { %v726_v18 = vpop.f32.mrf.mxu1  ;;  %1309 = vmatpush.bf16.msrb.mxu3 %v3179_v45  ;;  %v2983_v11 = vor.u32 %v3810_v5, %v2982_v4  ;;  %v3811_v45 = vld [vmem:[%s5088_s3 + $0x4c] sm:$0xf0] }
 0x147   : > { %v803_v34 = vsel %vm755_vm3, %v750_v17, 0.0  ;;  %v3904_v17 = vld [vmem:[%s5090_s5 + $0x138] sm:$0xff] }
 0x148   : > { %v652_v44 = vpop.f32.mrf.mxu0  ;;  %v804_v48 = vadd.f32 %v803_v34, %v802_v38  ;;  %2570 = vmatpush.bf16.msrb.mxu1 %v3904_v17  ;;  %v3835_v34 = vld [vmem:[%s5088_s3 + $0x114] sm:$0xf]  ;;  %v3827_v38 = vld [vmem:[%s5088_s3 + $0xcc] sm:$0xf0] }
 0x149   : > { %v653_v1 = vadd.f32 %v4166_v9, %v652_v44  ;;  %v3055_v42 = vor.u32 %v3827_v38, %v3054_v37  ;;  %v3206_v38 = vld [vmem:[%s5088_s3 + $0x1a8] sm:$0xf] }
 0x14a   : > { %1310 = vmatpush.bf16.msrb.mxu3 %v3115_v55 }
 0x14b   : > { %v722_v14 = vadd.f32 %v721_v43, %v653_v1 }
 0x14d   : > { %v751_v30 = vmax.f32 %v722_v14, 0.0 }
 0x14e   : > { %v728_v59 = vpop.f32.mrf.mxu1 }
 0x14f   : > { %v805_v43 = vsel %vm755_vm3, %v751_v30, 0.0  ;;  %v3187_v30 = vor.u32 %v3851_v25, %v3184_v26  ;;  %v3829_v25 = vld [vmem:[%s5088_s3 + $0xdc] sm:$0xf0]  ;;  %v3821_v26 = vld [vmem:[%s5088_s3 + $0xa4] sm:$0xf] }
 0x150   : > { %v654_v57 = vpop.f32.mrf.mxu0  ;;  %v806_v58 = vadd.f32 %v805_v43, %v804_v48  ;;  %v3059_v43 = vor.u32 %v3819_v39, %v3056_v40  ;;  %v3862_v39 = vld [vmem:[%s5088_s3 + $0x1e4] sm:$0xf0]  ;;  %v3854_v40 = vld [vmem:[%s5088_s3 + $0x1ac] sm:$0xf] }
 0x151   : > { %v655_v6 = vadd.f32 %v4166_v9, %v654_v57  ;;  %v3826_v57 = vld [vmem:[%s5088_s3 + $0xc4] sm:$0xf0] }
 0x152   : > { %v3047_v0 = vor.u32 %v3826_v57, %v3046_v56  ;;  %v3126_v56 = vld [vmem:[%s5088_s3 + $0x118] sm:$0xf] }
 0x153   : > { %v724_v21 = vadd.f32 %v723_v49, %v655_v6  ;;  %v3844_v57 = vld [vmem:[%s5088_s3 + $0x154] sm:$0xf0] }
 0x154   : > { %1298 = vmatpush.bf16.msrb.mxu2 %v3047_v0  ;;  %v3828_v0 = vld [vmem:[%s5088_s3 + $0xd4] sm:$0xf0] }
 0x155   : > { %v752_v35 = vmax.f32 %v724_v21, 0.0 }
 0x157   : > { %v807_v53 = vsel %vm755_vm3, %v752_v35, 0.0 }
 0x158   : > { %v657_v20 = vpop.f32.mrf.mxu0  ;;  %v808_v63 = vadd.f32 %v807_v53, %v806_v58  ;;  %1299 = vmatpush.bf16.msrb.mxu2 %v2983_v11  ;;  %v3192_v53 = vld [vmem:[%s5088_s3 + $0x1d8] sm:$0xf0] }
 0x159   : > { %v658_v22 = vadd.f32 %v4166_v9, %v657_v20  ;;  %v3912_v20 = vld [vmem:[%s5090_s5 + $0x178] sm:$0xff]  ;;  %v3195_v55 = vor.u32 %v3852_v52, %v3192_v53  ;;  %v3830_v52 = vld [vmem:[%s5088_s3 + $0xe4] sm:$0xf0]  ;;  %v3822_v53 = vld [vmem:[%s5088_s3 + $0xac] sm:$0xf] }
 0x15a   : > { %2583 = vmatpush.bf16.msrb.mxu0 %v3912_v20  ;;  %v3836_v58 = vld [vmem:[%s5088_s3 + $0x11c] sm:$0xf]  ;;  %v3845_v20 = vld [vmem:[%s5088_s3 + $0x15c] sm:$0xf0] }
 0x15b   : > { %v727_v31 = vadd.f32 %v726_v18, %v658_v22 }
 0x15d   : > { %v753_v44 = vmax.f32 %v727_v31, 0.0  ;;  %v3118_v31 = vld [vmem:[%s5088_s3 + $0x110] sm:$0xf] }
 0x15e   : > { %v3119_v35 = vor.u32 %v3843_v33, %v3118_v31  ;;  %v3813_v31 = vld [vmem:[%s5088_s3 + $0x5c] sm:$0xf0]  ;;  %v3902_v33 = vld [vmem:[%s5090_s5 + $0x128] sm:$0xff] }
 0x15f   : > { %v809_v61 = vsel %vm755_vm3, %v753_v44, 0.0  ;;  %v2990_v44 = vld [vmem:[%s5088_s3 + $0x10] sm:$0xf] }
 0x160   : > { %v659_v49 = vpop.f32.mrf.mxu0  ;;  %v810_v6 = vadd.f32 %v809_v61, %v808_v63  ;;  %v2991_v48 = vor.u32 %v3811_v45, %v2990_v44  ;;  %v3911_v63 = vld [vmem:[%s5090_s5 + $0x170] sm:$0xff]  ;;  %v3142_v45 = vld [vmem:[%s5088_s3 + $0x128] sm:$0xf] }
 0x161   : > { %v660_v54 = vadd.f32 %v4166_v9, %v659_v49  ;;  %v3048_v9 = vld [vmem:[%s5088_s3 + $0xc8] sm:$0xf0]  ;;  %v2995_v49 = vor.u32 %v3803_v46, %v2992_v47  ;;  %2584 = vmatpush.bf16.msrb.mxu0 %v3911_v63  ;;  %v3846_v46 = vld [vmem:[%s5088_s3 + $0x164] sm:$0xf0]  ;;  %v3863_v63 = vld [vmem:[%s5088_s3 + $0x1ec] sm:$0xf0] }
 0x162   : > { %v3051_v3 = vor.u32 %v3818_v60, %v3048_v9  ;;  %v3903_v60 = vld [vmem:[%s5090_s5 + $0x130] sm:$0xff]  ;;  %v3127_v9 = vor.u32 %v3844_v57, %v3126_v56  ;;  %v3838_v47 = vld [vmem:[%s5088_s3 + $0x12c] sm:$0xf]  ;;  %v3014_v57 = vld [vmem:[%s5088_s3 + $0x28] sm:$0xf] }
 0x163   : > { %v729_v62 = vadd.f32 %v728_v59, %v660_v54  ;;  %v3191_v54 = vor.u32 %v3860_v51, %v3190_v50  ;;  %v3128_v59 = vld [vmem:[%s5088_s3 + $0x158] sm:$0xf0]  ;;  %2571 = vmatpush.bf16.msrb.mxu1 %v3903_v60  ;;  %v3078_v51 = vld [vmem:[%s5088_s3 + $0xa8] sm:$0xf]  ;;  %v3016_v60 = vld [vmem:[%s5088_s3 + $0x68] sm:$0xf0] }
 0x164   : > { %1311 = vmatpush.bf16.msrb.mxu3 %v3051_v3  ;;  %v3131_v61 = vor.u32 %v3836_v58, %v3128_v59  ;;  %v3064_v3 = vld [vmem:[%s5088_s3 + $0xd8] sm:$0xf0]  ;;  %v3814_v58 = vld [vmem:[%s5088_s3 + $0x64] sm:$0xf0]  ;;  %v3806_v59 = vld [vmem:[%s5088_s3 + $0x2c] sm:$0xf] }
 0x165   : > { %v754_v1 = vmax.f32 %v729_v62, 0.0  ;;  %v3062_v62 = vld [vmem:[%s5088_s3 + $0x98] sm:$0xf] }
 0x166   : > { %v3063_v4 = vor.u32 %v3828_v0, %v3062_v62  ;;  %v3214_v62 = vld [vmem:[%s5088_s3 + $0x1b0] sm:$0xf]  ;;  %v3855_v0 = vld [vmem:[%s5088_s3 + $0x1b4] sm:$0xf] }
 0x167   : > { %v811_v8 = vsel %vm755_vm3, %v754_v1, 0.0  ;;  %v3820_v1 = vld [vmem:[%s5088_s3 + $0x9c] sm:$0xf]  ;;  %2572 = vmatpush.bf16.msrb.mxu1 %v3902_v33  ;;  %v3848_v33 = vld [vmem:[%s5088_s3 + $0x174] sm:$0xf0] }
 0x168   : > { %v812_v10 = vadd.f32 %v811_v8, %v810_v6  ;;  %1312 = vmatpush.bf16.msrb.mxu3 %v2987_v12  ;;  %v3067_v5 = vor.u32 %v3820_v1, %v3064_v3  ;;  %v2998_v6 = vld [vmem:[%s5088_s3 + $0x18] sm:$0xf]  ;;  %v3000_v8 = vld [vmem:[%s5088_s3 + $0x58] sm:$0xf0]  ;;  %v3198_v12 = vld [vmem:[%s5088_s3 + $0x1a0] sm:$0xf]  ;;  %v3215_v3 = vor.u32 %v3863_v63, %v3214_v62 }
 0x169   : > { %v3003_v11 = vor.u32 %v3804_v2, %v3000_v8  ;;  %v3216_v1 = vld [vmem:[%s5088_s3 + $0x1f0] sm:$0xf0] }
 0x16a   : > { %v813_v13 = vrot.slane %v812_v10, 4  ;;  %v3152_v2 = vld [vmem:[%s5088_s3 + $0x170] sm:$0xf0] }
 0x16b   : > { %v3875_v62 = vld [vmem:[%s5090_s5 + $0x50] sm:$0xff] }
 0x16c   : > { %v814_v14 = vadd.f32 %v813_v13, %v812_v10  ;;  %v2999_v10 = vor.u32 %v3812_v7, %v2998_v6  ;;  %v3861_v13 = vld [vmem:[%s5088_s3 + $0x1dc] sm:$0xf0]  ;;  %v3847_v6 = vld [vmem:[%s5088_s3 + $0x16c] sm:$0xf0]  ;;  %v3839_v7 = vld [vmem:[%s5088_s3 + $0x134] sm:$0xf] }
 0x16d   : > { %v3899_v63 = vld [vmem:[%s5090_s5 + $0x110] sm:$0xff] }
 0x16e   : > { %v815_v15 = vrot.slane %v814_v14, 2 }
 0x170   : > { %v816_v16 = vadd.f32 %v815_v15, %v814_v14  ;;  %v3853_v14 = vld [vmem:[%s5088_s3 + $0x1a4] sm:$0xf] }
 0x171   : > { %v3200_v15 = vld [vmem:[%s5088_s3 + $0x1e0] sm:$0xf0] }
 0x172   : > { %v817_v18 = vrot.slane %v816_v16, 1  ;;  %v3203_v17 = vor.u32 %v3853_v14, %v3200_v15  ;;  %v3823_v14 = vld [vmem:[%s5088_s3 + $0xb4] sm:$0xf] }
 0x173   : > { %v3088_v15 = vld [vmem:[%s5088_s3 + $0xf0] sm:$0xf0] }
 0x174   : > { %v818_v21 = vadd.f32 %v817_v18, %v816_v16  ;;  %v3199_v16 = vor.u32 %v3861_v13, %v3198_v12  ;;  %v3134_v18 = vld [vmem:[%s5088_s3 + $0x120] sm:$0xf]  ;;  %v3831_v13 = vld [vmem:[%s5088_s3 + $0xec] sm:$0xf0] }
 0x175   : > { %v3901_v12 = vld [vmem:[%s5090_s5 + $0x120] sm:$0xff] }
 0x176   : > { %v828_v22 = vmul.f32 %v4213_v27, %v818_v21  ;;  %v3837_v21 = vld [vmem:[%s5088_s3 + $0x124] sm:$0xf]  ;;  %2573 = vmatpush.bf16.msrb.mxu1 %v3901_v12 }
 0x178   : > { %v831_v19 = vpack.c.bf16 %v828_v22, %v828_v22  ;;  %v3136_v22 = vld [vmem:[%s5088_s3 + $0x160] sm:$0xf0] }
 0x179   : > { %v3139_v23 = vor.u32 %v3837_v21, %v3136_v22  ;;  %v3815_v21 = vld [vmem:[%s5088_s3 + $0x6c] sm:$0xf0]  ;;  %v3807_v22 = vld [vmem:[%s5088_s3 + $0x34] sm:$0xf] }
 0x17a   : > { %v937_v28 = vunpack.c.l.b16 %v831_v19  ;;  %v3135_v19 = vor.u32 %v3845_v20, %v3134_v18  ;;  %v3022_v18 = vld [vmem:[%s5088_s3 + $0x30] sm:$0xf]  ;;  %v3909_v20 = vld [vmem:[%s5090_s5 + $0x160] sm:$0xff] }
 0x17c   : > { %v941_v27 = vsel %vm940_vm6, %v937_v28, %v4217_v41  ;;  %v3120_v41 = vld [vmem:[%s5088_s3 + $0x150] sm:$0xf0]  ;;  %v3072_v28 = vld [vmem:[%s5088_s3 + $0xe0] sm:$0xf0] }
 0x17d   : > { %v4354_v32 = vpack.c.b16 %v941_v27, %v941_v27  ;;  %v3123_v36 = vor.u32 %v3835_v34, %v3120_v41  ;;  %v3071_v27 = vor.u32 %v3829_v25, %v3070_v24  ;;  %v3805_v34 = vld [vmem:[%s5088_s3 + $0x24] sm:$0xf]  ;;  %v3222_v25 = vld [vmem:[%s5088_s3 + $0x1b8] sm:$0xf] }
 0x17e   : > { %v3008_v41 = vld [vmem:[%s5088_s3 + $0x60] sm:$0xf0] }
 0x17f   : > { %3228 = vmatmul.msk.bf16.vlgmr.msra.gmra.mxu2 %vm755_vm3, %v4354_v32  ;;  %3229 = vmatmul.msk.bf16.vlgmr.msra.gmra.mxu3 %vm755_vm3, %v4354_v32  ;;  %v3011_v37 = vor.u32 %v3805_v34, %v3008_v41  ;;  %v3840_v34 = vld [vmem:[%s5088_s3 + $0x13c] sm:$0xf] }
 0x180   : > { %1322 = vmatpush.bf16.msra.mxu2 %v3183_v29  ;;  %1335 = vmatpush.bf16.msra.mxu3 %v3187_v30  ;;  %v3075_v29 = vor.u32 %v3821_v26, %v3072_v28  ;;  %v3006_v30 = vld [vmem:[%s5088_s3 + $0x20] sm:$0xf]  ;;  %v3864_v26 = vld [vmem:[%s5088_s3 + $0x1f4] sm:$0xf0]  ;;  %v3856_v28 = vld [vmem:[%s5088_s3 + $0x1bc] sm:$0xf] }
 0x181   : > { %v3160_v41 = vld [vmem:[%s5088_s3 + $0x178] sm:$0xf0] }
 0x184   : > { %1323 = vmatpush.bf16.msra.mxu2 %v3119_v35  ;;  %1336 = vmatpush.bf16.msra.mxu3 %v3123_v36  ;;  %v3910_v35 = vld [vmem:[%s5090_s5 + $0x168] sm:$0xff]  ;;  %v3007_v36 = vor.u32 %v3813_v31, %v3006_v30  ;;  %v3158_v31 = vld [vmem:[%s5088_s3 + $0x138] sm:$0xf] }
 0x185   : > { %2585 = vmatpush.bf16.msrb.mxu0 %v3910_v35  ;;  %v3159_v35 = vor.u32 %v3848_v33, %v3158_v31  ;;  %v3935_v33 = vld [vmem:[%s5090_s5 + $0x230] sm:$0xff] }
 0x188   : > { %1324 = vmatpush.bf16.msra.mxu2 %v3055_v42  ;;  %1337 = vmatpush.bf16.msra.mxu3 %v3059_v43  ;;  %v3208_v42 = vld [vmem:[%s5088_s3 + $0x1e8] sm:$0xf0]  ;;  %v3207_v43 = vor.u32 %v3862_v39, %v3206_v38  ;;  %v3832_v38 = vld [vmem:[%s5088_s3 + $0xf4] sm:$0xf0]  ;;  %v3824_v39 = vld [vmem:[%s5088_s3 + $0xbc] sm:$0xf] }
 0x189   : > { %v3211_v44 = vor.u32 %v3854_v40, %v3208_v42  ;;  %2586 = vmatpush.bf16.msrb.mxu0 %v3909_v20  ;;  %v3096_v40 = vld [vmem:[%s5088_s3 + $0xf8] sm:$0xf0] }
 0x18c   : > { %1325 = vmatpush.bf16.msra.mxu2 %v2991_v48  ;;  %1338 = vmatpush.bf16.msra.mxu3 %v2995_v49  ;;  %v3144_v48 = vld [vmem:[%s5088_s3 + $0x168] sm:$0xf0]  ;;  %v3143_v49 = vor.u32 %v3846_v46, %v3142_v45  ;;  %v3816_v45 = vld [vmem:[%s5088_s3 + $0x74] sm:$0xf0]  ;;  %v3808_v46 = vld [vmem:[%s5088_s3 + $0x3c] sm:$0xf] }
 0x18d   : > { %v3147_v50 = vor.u32 %v3838_v47, %v3144_v48  ;;  %v3032_v47 = vld [vmem:[%s5088_s3 + $0x78] sm:$0xf0] }
 0x18f   : > { %3230 = vmatmul.msk.bf16.vlgmr.msrb.gmra.mxu2 %vm755_vm3, %v4354_v32  ;;  %3231 = vmatmul.msk.bf16.vlgmr.msrb.gmra.mxu3 %vm755_vm3, %v4354_v32 }
 0x190   : > { %1348 = vmatpush.bf16.msrb.mxu2 %v3191_v54  ;;  %1361 = vmatpush.bf16.msrb.mxu3 %v3195_v55  ;;  %v3080_v54 = vld [vmem:[%s5088_s3 + $0xe8] sm:$0xf0]  ;;  %v3079_v55 = vor.u32 %v3830_v52, %v3078_v51  ;;  %v3872_v51 = vld [vmem:[%s5090_s5 + $0x38] sm:$0xff] }
 0x191   : > { %v3083_v56 = vor.u32 %v3822_v53, %v3080_v54  ;;  %v3880_v52 = vld [vmem:[%s5090_s5 + $0x78] sm:$0xff]  ;;  %v3871_v54 = vld [vmem:[%s5090_s5 + $0x30] sm:$0xff] }
 0x192   : > { %v3908_v53 = vld [vmem:[%s5090_s5 + $0x158] sm:$0xff] }
 0x193   : > { %2587 = vmatpush.bf16.msrb.mxu0 %v3908_v53  ;;  %v3932_v53 = vld [vmem:[%s5090_s5 + $0x218] sm:$0xff] }
 0x194   : > { %1349 = vmatpush.bf16.msrb.mxu2 %v3127_v9  ;;  %1362 = vmatpush.bf16.msrb.mxu3 %v3131_v61  ;;  %v3015_v9 = vor.u32 %v3814_v58, %v3014_v57  ;;  %v3019_v61 = vor.u32 %v3806_v59, %v3016_v60  ;;  %v3878_v57 = vld [vmem:[%s5090_s5 + $0x68] sm:$0xff]  ;;  %v3869_v58 = vld [vmem:[%s5090_s5 + $0x20] sm:$0xff]  ;;  %v3868_v60 = vld [vmem:[%s5090_s5 + $0x18] sm:$0xff] }
 0x195   : > { %v3877_v59 = vld [vmem:[%s5090_s5 + $0x60] sm:$0xff] }
 0x198   : > { %1350 = vmatpush.bf16.msrb.mxu2 %v3063_v4  ;;  %1363 = vmatpush.bf16.msrb.mxu3 %v3067_v5  ;;  %v3219_v4 = vor.u32 %v3855_v0, %v3216_v1  ;;  %v3150_v5 = vld [vmem:[%s5088_s3 + $0x130] sm:$0xf]  ;;  %v3874_v0 = vld [vmem:[%s5090_s5 + $0x48] sm:$0xff] }
 0x199   : > { %v3151_v8 = vor.u32 %v3847_v6, %v3150_v5  ;;  %v3907_v1 = vld [vmem:[%s5090_s5 + $0x150] sm:$0xff]  ;;  %v3888_v5 = vld [vmem:[%s5090_s5 + $0xb8] sm:$0xff] }
 0x19a   : > { %2588 = vmatpush.bf16.msrb.mxu0 %v3907_v1  ;;  %v3896_v6 = vld [vmem:[%s5090_s5 + $0xf8] sm:$0xff]  ;;  %v3930_v1 = vld [vmem:[%s5090_s5 + $0x208] sm:$0xff] }
 0x19c   : > { %1351 = vmatpush.bf16.msrb.mxu2 %v2999_v10  ;;  %1364 = vmatpush.bf16.msrb.mxu3 %v3003_v11  ;;  %v3155_v10 = vor.u32 %v3839_v7, %v3152_v2  ;;  %v3086_v11 = vld [vmem:[%s5088_s3 + $0xb0] sm:$0xf]  ;;  %v4748_v7 = vld [vmem:[%s5089_s4] sm:$0xff] }
 0x19d   : > { %v3887_v2 = vld [vmem:[%s5090_s5 + $0xb0] sm:$0xff]  ;;  %v900_v12 = vperm.slane %v4748_v7, 0 }
 0x19f   : > { %3232 = vmatmul.msk.bf16.vlgmr.msra.gmra.mxu2 %vm755_vm3, %v4354_v32  ;;  %3233 = vmatmul.msk.bf16.vlgmr.msra.gmra.mxu3 %vm755_vm3, %v4354_v32 }
 0x1a0   : > { %1374 = vmatpush.bf16.msra.mxu2 %v3199_v16  ;;  %1387 = vmatpush.bf16.msra.mxu3 %v3203_v17  ;;  %v3087_v16 = vor.u32 %v3831_v13, %v3086_v11  ;;  %v3091_v17 = vor.u32 %v3823_v14, %v3088_v15  ;;  %v3906_v11 = vld [vmem:[%s5090_s5 + $0x148] sm:$0xff]  ;;  %v901_v13 = vperm.slane %v4748_v7, 1 }
 0x1a1   : > { %2589 = vmatpush.bf16.msrb.mxu0 %v3906_v11  ;;  %v3886_v14 = vld [vmem:[%s5090_s5 + $0xa8] sm:$0xff]  ;;  %v3929_v11 = vld [vmem:[%s5090_s5 + $0x200] sm:$0xff] }
 0x1a2   : > { %v3894_v15 = vld [vmem:[%s5090_s5 + $0xe8] sm:$0xff] }
 0x1a4   : > { %1375 = vmatpush.bf16.msra.mxu2 %v3135_v19  ;;  %1388 = vmatpush.bf16.msra.mxu3 %v3139_v23  ;;  %v3024_v19 = vld [vmem:[%s5088_s3 + $0x70] sm:$0xf0]  ;;  %v3023_v23 = vor.u32 %v3815_v21, %v3022_v18  ;;  %v3897_v21 = vld [vmem:[%s5090_s5 + $0x100] sm:$0xff] }
 0x1a5   : > { %v3027_v24 = vor.u32 %v3807_v22, %v3024_v19  ;;  %v3905_v22 = vld [vmem:[%s5090_s5 + $0x140] sm:$0xff] }
 0x1a6   : > { %2590 = vmatpush.bf16.msrb.mxu0 %v3905_v22  ;;  %v3915_v22 = vld [vmem:[%s5090_s5 + $0x190] sm:$0xff] }
 0x1a8   : > { %1376 = vmatpush.bf16.msra.mxu2 %v3071_v27  ;;  %1389 = vmatpush.bf16.msra.mxu3 %v3075_v29  ;;  %v3224_v27 = vld [vmem:[%s5088_s3 + $0x1f8] sm:$0xf0]  ;;  %v3223_v29 = vor.u32 %v3864_v26, %v3222_v25  ;;  %v3893_v25 = vld [vmem:[%s5090_s5 + $0xe0] sm:$0xff] }
 0x1a9   : > { %v3227_v30 = vor.u32 %v3856_v28, %v3224_v27  ;;  %v3936_v26 = vld [vmem:[%s5090_s5 + $0x238] sm:$0xff] }
 0x1aa   : > { %v3944_v28 = vld [vmem:[%s5090_s5 + $0x278] sm:$0xff] }
 0x1ab   : > { %v3884_v27 = vld [vmem:[%s5090_s5 + $0x98] sm:$0xff]  ;;  %2635 = vmatpush.bf16.msra.mxu0 %v3944_v28  ;;  %v906_v28 = vperm.slane %v4748_v7, 6 }
 0x1ac   : > { %1377 = vmatpush.bf16.msra.mxu2 %v3007_v36  ;;  %1390 = vmatpush.bf16.msra.mxu3 %v3011_v37  ;;  %v3163_v36 = vor.u32 %v3840_v34, %v3160_v41  ;;  %v3094_v37 = vld [vmem:[%s5088_s3 + $0xb8] sm:$0xf]  ;;  %v3943_v34 = vld [vmem:[%s5090_s5 + $0x270] sm:$0xff] }
 0x1ad   : > { %v3095_v42 = vor.u32 %v3832_v38, %v3094_v37  ;;  %v3883_v41 = vld [vmem:[%s5090_s5 + $0x90] sm:$0xff]  ;;  %v3942_v37 = vld [vmem:[%s5090_s5 + $0x268] sm:$0xff] }
 0x1ae   : > { %v3882_v38 = vld [vmem:[%s5090_s5 + $0x88] sm:$0xff] }
 0x1af   : > { %3234 = vmatmul.msk.bf16.vlgmr.msrb.gmra.mxu2 %vm755_vm3, %v4354_v32  ;;  %3235 = vmatmul.msk.bf16.vlgmr.msrb.gmra.mxu3 %vm755_vm3, %v4354_v32 }
 0x1b0   : > { %1400 = vmatpush.bf16.msrb.mxu2 %v3207_v43  ;;  %1413 = vmatpush.bf16.msrb.mxu3 %v3211_v44  ;;  %v3099_v43 = vor.u32 %v3824_v39, %v3096_v40  ;;  %v3030_v44 = vld [vmem:[%s5088_s3 + $0x38] sm:$0xf]  ;;  %v3890_v39 = vld [vmem:[%s5090_s5 + $0xc8] sm:$0xff]  ;;  %v902_v40 = vperm.slane %v4748_v7, 2 }
 0x1b1   : > { %v3031_v48 = vor.u32 %v3816_v45, %v3030_v44  ;;  %2636 = vmatpush.bf16.msra.mxu0 %v3943_v34  ;;  %v3933_v45 = vld [vmem:[%s5090_s5 + $0x220] sm:$0xff] }
 0x1b2   : > { %v3913_v34 = vld [vmem:[%s5090_s5 + $0x180] sm:$0xff] }
 0x1b4   : > { %1401 = vmatpush.bf16.msrb.mxu2 %v3143_v49  ;;  %1414 = vmatpush.bf16.msrb.mxu3 %v3147_v50  ;;  %v3035_v49 = vor.u32 %v3808_v46, %v3032_v47  ;;  %v3900_v50 = vld [vmem:[%s5090_s5 + $0x118] sm:$0xff]  ;;  %v3941_v46 = vld [vmem:[%s5090_s5 + $0x260] sm:$0xff] }
 0x1b5   : > { %2574 = vmatpush.bf16.msrb.mxu1 %v3900_v50  ;;  %2637 = vmatpush.bf16.msra.mxu0 %v3942_v37  ;;  %v3881_v47 = vld [vmem:[%s5090_s5 + $0x80] sm:$0xff]  ;;  %v3960_v37 = vld [vmem:[%s5090_s5 + $0x2f8] sm:$0xff] }
 0x1b8   : > { %1402 = vmatpush.bf16.msrb.mxu2 %v3079_v55  ;;  %1415 = vmatpush.bf16.msrb.mxu3 %v3083_v56  ;;  %v3879_v55 = vld [vmem:[%s5090_s5 + $0x70] sm:$0xff]  ;;  %v3870_v56 = vld [vmem:[%s5090_s5 + $0x28] sm:$0xff] }
 0x1b9   : > { %2575 = vmatpush.bf16.msrb.mxu1 %v3899_v63  ;;  %2638 = vmatpush.bf16.msra.mxu0 %v3941_v46  ;;  %v3926_v63 = vld [vmem:[%s5090_s5 + $0x1e8] sm:$0xff]  ;;  %v3972_v46 = vld [vmem:[%s5090_s5 + $0x358] sm:$0xff] }
 0x1bc   : > { %1403 = vmatpush.bf16.msrb.mxu2 %v3015_v9  ;;  %1416 = vmatpush.bf16.msrb.mxu3 %v3019_v61  ;;  %v3876_v9 = vld [vmem:[%s5090_s5 + $0x58] sm:$0xff]  ;;  %v3867_v61 = vld [vmem:[%s5090_s5 + $0x10] sm:$0xff] }
 0x1bf   : > { %3236 = vmatmul.msk.bf16.vlgmr.msra.gmra.mxu2 %vm755_vm3, %v4354_v32  ;;  %3237 = vmatmul.msk.bf16.vlgmr.msra.gmra.mxu3 %vm755_vm3, %v4354_v32 }
 0x1c0   : > { %1426 = vmatpush.bf16.msra.mxu2 %v3215_v3  ;;  %1439 = vmatpush.bf16.msra.mxu3 %v3219_v4  ;;  %v3865_v3 = vld [vmem:[%s5090_s5] sm:$0xff] }
 0x1c1   : > { %v3873_v4 = vld [vmem:[%s5090_s5 + $0x40] sm:$0xff] }
 0x1c4   : > { %1427 = vmatpush.bf16.msra.mxu2 %v3151_v8  ;;  %1440 = vmatpush.bf16.msra.mxu3 %v3155_v10  ;;  %v3895_v8 = vld [vmem:[%s5090_s5 + $0xf0] sm:$0xff]  ;;  %v3898_v10 = vld [vmem:[%s5090_s5 + $0x108] sm:$0xff] }
 0x1c5   : > { %2576 = vmatpush.bf16.msrb.mxu1 %v3898_v10 }
 0x1c8   : > { %1428 = vmatpush.bf16.msra.mxu2 %v3087_v16  ;;  %1441 = vmatpush.bf16.msra.mxu3 %v3091_v17 }
 0x1c9   : > { %2577 = vmatpush.bf16.msrb.mxu1 %v3897_v21 }
 0x1cc   : > { %1429 = vmatpush.bf16.msra.mxu2 %v3023_v23  ;;  %1442 = vmatpush.bf16.msra.mxu3 %v3027_v24  ;;  %v3885_v24 = vld [vmem:[%s5090_s5 + $0xa0] sm:$0xff] }
 0x1cd   : > { %2622 = vmatpush.bf16.msra.mxu1 %v3936_v26  ;;  %v3922_v26 = vld [vmem:[%s5090_s5 + $0x1c8] sm:$0xff] }
 0x1cf   : > { %3238 = vmatmul.msk.bf16.vlgmr.msrb.gmra.mxu2 %vm755_vm3, %v4354_v32  ;;  %3239 = vmatmul.msk.bf16.vlgmr.msrb.gmra.mxu3 %vm755_vm3, %v4354_v32 }
 0x1d0   : > { %1452 = vmatpush.bf16.msrb.mxu2 %v3223_v29  ;;  %1465 = vmatpush.bf16.msrb.mxu3 %v3227_v30  ;;  %v3892_v29 = vld [vmem:[%s5090_s5 + $0xd8] sm:$0xff] }
 0x1d1   : > { %2623 = vmatpush.bf16.msra.mxu1 %v3935_v33 }
 0x1d4   : > { %1453 = vmatpush.bf16.msrb.mxu2 %v3159_v35  ;;  %1466 = vmatpush.bf16.msrb.mxu3 %v3163_v36  ;;  %v3891_v35 = vld [vmem:[%s5090_s5 + $0xd0] sm:$0xff]  ;;  %v3934_v36 = vld [vmem:[%s5090_s5 + $0x228] sm:$0xff] }
 0x1d5   : > { %2624 = vmatpush.bf16.msra.mxu1 %v3934_v36  ;;  %v3952_v36 = vld [vmem:[%s5090_s5 + $0x2b8] sm:$0xff] }
 0x1d8   : > { %1454 = vmatpush.bf16.msrb.mxu2 %v3095_v42  ;;  %1467 = vmatpush.bf16.msrb.mxu3 %v3099_v43  ;;  %v903_v43 = vperm.slane %v4748_v7, 3 }
 0x1d9   : > { %2625 = vmatpush.bf16.msra.mxu1 %v3933_v45  ;;  %v3964_v45 = vld [vmem:[%s5090_s5 + $0x318] sm:$0xff] }
 0x1dc   : > { %1455 = vmatpush.bf16.msrb.mxu2 %v3031_v48  ;;  %1468 = vmatpush.bf16.msrb.mxu3 %v3035_v49  ;;  %v3889_v48 = vld [vmem:[%s5090_s5 + $0xc0] sm:$0xff] }
 0x1dd   : > { %2626 = vmatpush.bf16.msra.mxu1 %v3932_v53  ;;  %v3971_v53 = vld [vmem:[%s5090_s5 + $0x350] sm:$0xff] }
 0x1df   : > { %3240 = vmatmul.msk.bf16.vlgmr.msra.gmra.mxu2 %vm755_vm3, %v4354_v32  ;;  %3241 = vmatmul.msk.bf16.vlgmr.msra.gmra.mxu3 %vm755_vm3, %v4354_v32 }
 0x1e0   : > { %2518 = vmatpush.bf16.msra.mxu2 %v3872_v51  ;;  %2531 = vmatpush.bf16.msra.mxu3 %v3880_v52  ;;  %v3920_v51 = vld [vmem:[%s5090_s5 + $0x1b8] sm:$0xff] }
 0x1e1   : > { %v3928_v52 = vld [vmem:[%s5090_s5 + $0x1f8] sm:$0xff] }
 0x1e4   : > { %2519 = vmatpush.bf16.msra.mxu2 %v3871_v54  ;;  %2532 = vmatpush.bf16.msra.mxu3 %v3879_v55  ;;  %v3940_v54 = vld [vmem:[%s5090_s5 + $0x258] sm:$0xff] }
 0x1e5   : > { %2639 = vmatpush.bf16.msra.mxu0 %v3940_v54  ;;  %v3962_v54 = vld [vmem:[%s5090_s5 + $0x308] sm:$0xff] }
 0x1e8   : > { %2520 = vmatpush.bf16.msra.mxu2 %v3870_v56  ;;  %2533 = vmatpush.bf16.msra.mxu3 %v3878_v57 }
 0x1ec   : > { %2521 = vmatpush.bf16.msra.mxu2 %v3869_v58  ;;  %2534 = vmatpush.bf16.msra.mxu3 %v3877_v59  ;;  %v3919_v59 = vld [vmem:[%s5090_s5 + $0x1b0] sm:$0xff] }
 0x1ef   : > { %3242 = vmatmul.msk.bf16.vlgmr.msrb.gmra.mxu2 %vm755_vm3, %v4354_v32  ;;  %3243 = vmatmul.msk.bf16.vlgmr.msrb.gmra.mxu3 %vm755_vm3, %v4354_v32  ;;  %v3866_v32 = vld [vmem:[%s5090_s5 + $0x8] sm:$0xff] }
 0x1f0   : > { %2522 = vmatpush.bf16.msra.mxu2 %v3868_v60  ;;  %2535 = vmatpush.bf16.msra.mxu3 %v3876_v9  ;;  %v3927_v60 = vld [vmem:[%s5090_s5 + $0x1f0] sm:$0xff] }
 0x1f1   : > { %v3931_v9 = vld [vmem:[%s5090_s5 + $0x210] sm:$0xff] }
 0x1f2   : > { %2627 = vmatpush.bf16.msra.mxu1 %v3931_v9 }
 0x1f4   : > { %2523 = vmatpush.bf16.msra.mxu2 %v3867_v61  ;;  %2536 = vmatpush.bf16.msra.mxu3 %v3875_v62  ;;  %v3939_v61 = vld [vmem:[%s5090_s5 + $0x250] sm:$0xff]  ;;  %v3918_v62 = vld [vmem:[%s5090_s5 + $0x1a8] sm:$0xff] }
 0x1f5   : > { %2640 = vmatpush.bf16.msra.mxu0 %v3939_v61 }
 0x1f6   : > { %2628 = vmatpush.bf16.msra.mxu1 %v3930_v1 }
 0x1f8   : > { %2524 = vmatpush.bf16.msra.mxu2 %v3866_v32  ;;  %2537 = vmatpush.bf16.msra.mxu3 %v3874_v0  ;;  %v904_v32 = vperm.slane %v4748_v7, 4  ;;  %v905_v0 = vperm.slane %v4748_v7, 5 }
 0x1fa   : > { %2629 = vmatpush.bf16.msra.mxu1 %v3929_v11  ;;  %v3954_v11 = vld [vmem:[%s5090_s5 + $0x2c8] sm:$0xff] }
 0x1fc   : > { %2525 = vmatpush.bf16.msra.mxu2 %v3865_v3  ;;  %2538 = vmatpush.bf16.msra.mxu3 %v3873_v4  ;;  %v3938_v3 = vld [vmem:[%s5090_s5 + $0x248] sm:$0xff] }
 0x1fd   : > { %2641 = vmatpush.bf16.msra.mxu0 %v3938_v3 }
 0x200   : > { %2544 = vmatpush.bf16.msrb.mxu2 %v3888_v5  ;;  %2557 = vmatpush.bf16.msrb.mxu3 %v3896_v6  ;;  %v3917_v6 = vld [vmem:[%s5090_s5 + $0x1a0] sm:$0xff] }
 0x202   : > { %v1275_v16 = vpop.f32.mrf.mxu2  ;;  %v1288_v17 = vpop.f32.mrf.mxu3 }
 0x203   : > { %v1276_v18 = vadd.f32 %v1275_v16, %v900_v12  ;;  %v1289_v20 = vadd.f32 %v1288_v17, %v901_v13  ;;  %v3937_v12 = vld [vmem:[%s5090_s5 + $0x240] sm:$0xff]  ;;  %v3924_v16 = vld [vmem:[%s5090_s5 + $0x1d8] sm:$0xff] }
 0x204   : > { %2545 = vmatpush.bf16.msrb.mxu2 %v3887_v2  ;;  %2558 = vmatpush.bf16.msrb.mxu3 %v3895_v8  ;;  %v3925_v2 = vld [vmem:[%s5090_s5 + $0x1e0] sm:$0xff]  ;;  %v3968_v17 = vld [vmem:[%s5090_s5 + $0x338] sm:$0xff] }
 0x205   : > { %v1474_v19 = vpack.c.bf16 %v1276_v18, %v1276_v18  ;;  %v1475_v23 = vpack.c.bf16 %v1289_v20, %v1289_v20  ;;  %2642 = vmatpush.bf16.msra.mxu0 %v3937_v12  ;;  %v3976_v18 = vld [vmem:[%s5090_s5 + $0x378] sm:$0xff] }
 0x207   : > { %2526 = vmatmul.bf16.vlgmr.msra.gmra.mxu2 %v1474_v19  ;;  %2539 = vmatmul.bf16.vlgmr.msra.gmra.mxu3 %v1475_v23  ;;  %v3923_v19 = vld [vmem:[%s5090_s5 + $0x1d0] sm:$0xff] }
 0x208   : > { %2546 = vmatpush.bf16.msrb.mxu2 %v3886_v14  ;;  %2559 = vmatpush.bf16.msrb.mxu3 %v3894_v15  ;;  %v3916_v15 = vld [vmem:[%s5090_s5 + $0x198] sm:$0xff]  ;;  %v3967_v23 = vld [vmem:[%s5090_s5 + $0x330] sm:$0xff] }
 0x20a   : > { %v1277_v30 = vpop.f32.mrf.mxu2  ;;  %v1290_v31 = vpop.f32.mrf.mxu3 }
 0x20b   : > { %v3974_v30 = vld [vmem:[%s5090_s5 + $0x368] sm:$0xff] }
 0x20c   : > { %2547 = vmatpush.bf16.msrb.mxu2 %v3885_v24  ;;  %2560 = vmatpush.bf16.msrb.mxu3 %v3893_v25  ;;  %v3975_v24 = vld [vmem:[%s5090_s5 + $0x370] sm:$0xff]  ;;  %v3914_v25 = vld [vmem:[%s5090_s5 + $0x188] sm:$0xff] }
 0x210   : > { %2548 = vmatpush.bf16.msrb.mxu2 %v3884_v27  ;;  %2561 = vmatpush.bf16.msrb.mxu3 %v3892_v29  ;;  %v907_v27 = vperm.slane %v4748_v7, 7  ;;  %v3966_v29 = vld [vmem:[%s5090_s5 + $0x328] sm:$0xff]  ;;  %v3921_v7 = vld [vmem:[%s5090_s5 + $0x1c0] sm:$0xff] }
 0x212   : > { %v1301_v42 = vpop.f32.mrf.mxu2  ;;  %v1314_v44 = vpop.f32.mrf.mxu3 }
 0x213   : > { %v1302_v49 = vadd.f32 %v1301_v42, %v902_v40  ;;  %v1315_v50 = vadd.f32 %v1314_v44, %v903_v43  ;;  %v3951_v43 = vld [vmem:[%s5090_s5 + $0x2b0] sm:$0xff] }
 0x214   : > { %2549 = vmatpush.bf16.msrb.mxu2 %v3883_v41  ;;  %2562 = vmatpush.bf16.msrb.mxu3 %v3891_v35  ;;  %v3959_v44 = vld [vmem:[%s5090_s5 + $0x2f0] sm:$0xff] }
 0x215   : > { %v1476_v55 = vpack.c.bf16 %v1302_v49, %v1302_v49  ;;  %v1477_v56 = vpack.c.bf16 %v1315_v50, %v1315_v50  ;;  %v3963_v49 = vld [vmem:[%s5090_s5 + $0x310] sm:$0xff]  ;;  %v3950_v50 = vld [vmem:[%s5090_s5 + $0x2a8] sm:$0xff] }
 0x218   : > { %2550 = vmatpush.bf16.msrb.mxu2 %v3882_v38  ;;  %2563 = vmatpush.bf16.msrb.mxu3 %v3890_v39  ;;  %v3965_v38 = vld [vmem:[%s5090_s5 + $0x320] sm:$0xff] }
 0x219   : > { %v3973_v39 = vld [vmem:[%s5090_s5 + $0x360] sm:$0xff] }
 0x21a   : > { %v1303_v57 = vpop.f32.mrf.mxu2  ;;  %v1316_v58 = vpop.f32.mrf.mxu3 }
 0x21b   : > { %v3949_v57 = vld [vmem:[%s5090_s5 + $0x2a0] sm:$0xff] }
 0x21c   : > { %2551 = vmatpush.bf16.msrb.mxu2 %v3881_v47  ;;  %2564 = vmatpush.bf16.msrb.mxu3 %v3889_v48  ;;  %v3957_v58 = vld [vmem:[%s5090_s5 + $0x2e0] sm:$0xff] }
 0x21f   : > { %2552 = vmatmul.bf16.vlgmr.msrb.gmra.mxu2 %v1476_v55  ;;  %2565 = vmatmul.bf16.vlgmr.msrb.gmra.mxu3 %v1477_v56 }
 0x220   : > { %2596 = vmatpush.bf16.msra.mxu2 %v3920_v51  ;;  %2609 = vmatpush.bf16.msra.mxu3 %v3928_v52  ;;  %v3958_v51 = vld [vmem:[%s5090_s5 + $0x2e8] sm:$0xff] }
 0x221   : > { %v4962_v52 = vld [vmem:[%s5089_s4 + $0x8] sm:$0xff] }
 0x222   : > { %v1327_v4 = vpop.f32.mrf.mxu2  ;;  %v1340_v5 = vpop.f32.mrf.mxu3  ;;  %v908_v55 = vperm.slane %v4962_v52, 0  ;;  %v909_v56 = vperm.slane %v4962_v52, 1  ;;  %v910_v12 = vperm.slane %v4962_v52, 2 }
 0x223   : > { %v1328_v8 = vadd.f32 %v1327_v4, %v904_v32  ;;  %v1341_v10 = vadd.f32 %v1340_v5, %v905_v0  ;;  %v3948_v32 = vld [vmem:[%s5090_s5 + $0x298] sm:$0xff]  ;;  %v3969_v4 = vld [vmem:[%s5090_s5 + $0x340] sm:$0xff]  ;;  %v3947_v5 = vld [vmem:[%s5090_s5 + $0x290] sm:$0xff] }
 0x224   : > { %2597 = vmatpush.bf16.msra.mxu2 %v3919_v59  ;;  %2610 = vmatpush.bf16.msra.mxu3 %v3927_v60  ;;  %v3970_v59 = vld [vmem:[%s5090_s5 + $0x348] sm:$0xff]  ;;  %v3956_v0 = vld [vmem:[%s5090_s5 + $0x2d8] sm:$0xff] }
 0x225   : > { %v1478_v13 = vpack.c.bf16 %v1328_v8, %v1328_v8  ;;  %v1479_v14 = vpack.c.bf16 %v1341_v10, %v1341_v10  ;;  %v3946_v10 = vld [vmem:[%s5090_s5 + $0x288] sm:$0xff] }
 0x227   : > { %2578 = vmatmul.bf16.vlgmr.msrb.gmra.mxu1 %v1478_v13  ;;  %2591 = vmatmul.bf16.vlgmr.msrb.gmra.mxu0 %v1479_v14  ;;  %v911_v13 = vperm.slane %v4962_v52, 3  ;;  %v3945_v14 = vld [vmem:[%s5090_s5 + $0x280] sm:$0xff] }
 0x228   : > { %2598 = vmatpush.bf16.msra.mxu2 %v3918_v62  ;;  %2611 = vmatpush.bf16.msra.mxu3 %v3926_v63  ;;  %v3961_v63 = vld [vmem:[%s5090_s5 + $0x300] sm:$0xff] }
 0x229   : > { %2674 = vmatpush.bf16.msrb.mxu1 %v3968_v17  ;;  %2687 = vmatpush.bf16.msrb.mxu0 %v3976_v18  ;;  %v3992_v17 = vld [vmem:[%s5090_s5 + $0x3f8] sm:$0xff] }
 0x22a   : > { %v1329_v20 = vpop.f32.mrf.mxu2  ;;  %v1342_v21 = vpop.f32.mrf.mxu3 }
 0x22c   : > { %2599 = vmatpush.bf16.msra.mxu2 %v3917_v6  ;;  %2612 = vmatpush.bf16.msra.mxu3 %v3925_v2  ;;  %v3955_v6 = vld [vmem:[%s5090_s5 + $0x2d0] sm:$0xff] }
 0x22d   : > { %2675 = vmatpush.bf16.msrb.mxu1 %v3967_v23  ;;  %2688 = vmatpush.bf16.msrb.mxu0 %v3975_v24  ;;  %v3983_v24 = vld [vmem:[%s5090_s5 + $0x3b0] sm:$0xff] }
 0x230   : > { %2600 = vmatpush.bf16.msra.mxu2 %v3916_v15  ;;  %2613 = vmatpush.bf16.msra.mxu3 %v3924_v16  ;;  %v3953_v15 = vld [vmem:[%s5090_s5 + $0x2c0] sm:$0xff]  ;;  %v3984_v16 = vld [vmem:[%s5090_s5 + $0x3b8] sm:$0xff] }
 0x231   : > { %2676 = vmatpush.bf16.msrb.mxu1 %v3966_v29  ;;  %2689 = vmatpush.bf16.msrb.mxu0 %v3974_v30  ;;  %v3981_v30 = vld [vmem:[%s5090_s5 + $0x3a0] sm:$0xff] }
 0x232   : > { %v1353_v31 = vpop.f32.mrf.mxu2  ;;  %v1366_v33 = vpop.f32.mrf.mxu3 }
 0x233   : > { %v1354_v41 = vadd.f32 %v1353_v31, %v906_v28  ;;  %v1367_v35 = vadd.f32 %v1366_v33, %v907_v27  ;;  %v3990_v28 = vld [vmem:[%s5090_s5 + $0x3e8] sm:$0xff]  ;;  %v3989_v31 = vld [vmem:[%s5090_s5 + $0x3e0] sm:$0xff]  ;;  %v912_v33 = vperm.slane %v4962_v52, 4 }
 0x234   : > { %2601 = vmatpush.bf16.msra.mxu2 %v3915_v22  ;;  %2614 = vmatpush.bf16.msra.mxu3 %v3923_v19 }
 0x235   : > { %v1480_v40 = vpack.c.bf16 %v1354_v41, %v1354_v41  ;;  %v1481_v42 = vpack.c.bf16 %v1367_v35, %v1367_v35  ;;  %2677 = vmatpush.bf16.msrb.mxu1 %v3965_v38  ;;  %2690 = vmatpush.bf16.msrb.mxu0 %v3973_v39  ;;  %v3988_v41 = vld [vmem:[%s5090_s5 + $0x3d8] sm:$0xff] }
 0x238   : > { %2602 = vmatpush.bf16.msra.mxu2 %v3914_v25  ;;  %2615 = vmatpush.bf16.msra.mxu3 %v3922_v26  ;;  %v3991_v25 = vld [vmem:[%s5090_s5 + $0x3f0] sm:$0xff]  ;;  %v3982_v26 = vld [vmem:[%s5090_s5 + $0x3a8] sm:$0xff] }
 0x239   : > { %2678 = vmatpush.bf16.msrb.mxu1 %v3964_v45  ;;  %2691 = vmatpush.bf16.msrb.mxu0 %v3972_v46  ;;  %v3986_v45 = vld [vmem:[%s5090_s5 + $0x3c8] sm:$0xff] }
 0x23a   : > { %v1355_v47 = vpop.f32.mrf.mxu2  ;;  %v1368_v48 = vpop.f32.mrf.mxu3 }
 0x23b   : > { %v3977_v48 = vld [vmem:[%s5090_s5 + $0x380] sm:$0xff] }
 0x23c   : > { %2603 = vmatpush.bf16.msra.mxu2 %v3913_v34  ;;  %2616 = vmatpush.bf16.msra.mxu3 %v3921_v7  ;;  %v913_v34 = vperm.slane %v4962_v52, 5  ;;  %v3980_v7 = vld [vmem:[%s5090_s5 + $0x398] sm:$0xff] }
 0x23d   : > { %2679 = vmatpush.bf16.msrb.mxu1 %v3963_v49  ;;  %2692 = vmatpush.bf16.msrb.mxu0 %v3971_v53  ;;  %v3985_v49 = vld [vmem:[%s5090_s5 + $0x3c0] sm:$0xff] }
 0x23f   : > { %2604 = vmatmul.bf16.vlgmr.msra.gmra.mxu2 %v1480_v40  ;;  %2617 = vmatmul.bf16.vlgmr.msra.gmra.mxu3 %v1481_v42  ;;  %v3979_v42 = vld [vmem:[%s5090_s5 + $0x390] sm:$0xff] }
 0x240   : > { %2648 = vmatpush.bf16.msrb.mxu2 %v3952_v36  ;;  %2661 = vmatpush.bf16.msrb.mxu3 %v3960_v37 }
 0x241   : > { %2680 = vmatpush.bf16.msrb.mxu1 %v3962_v54  ;;  %2693 = vmatpush.bf16.msrb.mxu0 %v3970_v59 }
 0x242   : > { %v1379_v60 = vpop.f32.mrf.mxu2  ;;  %v1392_v9 = vpop.f32.mrf.mxu3 }
 0x243   : > { %v1380_v61 = vadd.f32 %v1379_v60, %v908_v55  ;;  %v1393_v62 = vadd.f32 %v1392_v9, %v909_v56  ;;  %v4006_v9 = vld [vmem:[%s5091_s6] ss:$0 sm:$0xff] }
 0x244   : > { %2649 = vmatpush.bf16.msrb.mxu2 %v3951_v43  ;;  %2662 = vmatpush.bf16.msrb.mxu3 %v3959_v44  ;;  %v3987_v43 = vld [vmem:[%s5090_s5 + $0x3d0] sm:$0xff]  ;;  %v3978_v44 = vld [vmem:[%s5090_s5 + $0x388] sm:$0xff] }
 0x245   : > { %v1482_v1 = vpack.c.bf16 %v1380_v61, %v1380_v61  ;;  %v1483_v3 = vpack.c.bf16 %v1393_v62, %v1393_v62  ;;  %2681 = vmatpush.bf16.msrb.mxu1 %v3961_v63  ;;  %2694 = vmatpush.bf16.msrb.mxu0 %v3969_v4 }
 0x247   : > { %2630 = vmatmul.bf16.vlgmr.msra.gmra.mxu1 %v1482_v1  ;;  %2643 = vmatmul.bf16.vlgmr.msra.gmra.mxu0 %v1483_v3 }
 0x248   : > { %2650 = vmatpush.bf16.msrb.mxu2 %v3950_v50  ;;  %2663 = vmatpush.bf16.msrb.mxu3 %v3958_v51  ;;  %v914_v50 = vperm.slane %v4962_v52, 6  ;;  %v915_v51 = vperm.slane %v4962_v52, 7 }
 0x24a   : > { %v1381_v2 = vpop.f32.mrf.mxu2  ;;  %v1394_v8 = vpop.f32.mrf.mxu3 }
 0x24c   : > { %2651 = vmatpush.bf16.msrb.mxu2 %v3949_v57  ;;  %2664 = vmatpush.bf16.msrb.mxu3 %v3957_v58 }
 0x250   : > { %2652 = vmatpush.bf16.msrb.mxu2 %v3948_v32  ;;  %2665 = vmatpush.bf16.msrb.mxu3 %v3956_v0 }
 0x252   : > { %v1405_v18 = vpop.f32.mrf.mxu2  ;;  %v1418_v20 = vpop.f32.mrf.mxu3 }
 0x253   : > { %v1406_v21 = vadd.f32 %v1405_v18, %v910_v12  ;;  %v1419_v22 = vadd.f32 %v1418_v20, %v911_v13 }
 0x254   : > { %2653 = vmatpush.bf16.msrb.mxu2 %v3947_v5  ;;  %2666 = vmatpush.bf16.msrb.mxu3 %v3955_v6 }
 0x255   : > { %v1484_v19 = vpack.c.bf16 %v1406_v21, %v1406_v21  ;;  %v1485_v23 = vpack.c.bf16 %v1419_v22, %v1419_v22  ;;  %v3994_v22 = vld [vmem:[%s5092_s7 + $0x8] sm:$0xff] }
 0x256   : > { %2758 = vmatpush.bf16.msra.mxu1 %v3994_v22 }
 0x258   : > { %2654 = vmatpush.bf16.msrb.mxu2 %v3946_v10  ;;  %2667 = vmatpush.bf16.msrb.mxu3 %v3954_v11 }
 0x25a   : > { %v1407_v27 = vpop.f32.mrf.mxu2  ;;  %v1420_v29 = vpop.f32.mrf.mxu3 }
 0x25c   : > { %2655 = vmatpush.bf16.msrb.mxu2 %v3945_v14  ;;  %2668 = vmatpush.bf16.msrb.mxu3 %v3953_v15 }
 0x25f   : > { %2656 = vmatmul.bf16.vlgmr.msrb.gmra.mxu2 %v1484_v19  ;;  %2669 = vmatmul.bf16.vlgmr.msrb.gmra.mxu3 %v1485_v23 }
 0x260   : > { %2700 = vmatpush.bf16.msra.mxu2 %v3984_v16  ;;  %2713 = vmatpush.bf16.msra.mxu3 %v3992_v17 }
 0x262   : > { %v1431_v35 = vpop.f32.mrf.mxu2  ;;  %v1444_v36 = vpop.f32.mrf.mxu3 }
 0x263   : > { %v1432_v37 = vadd.f32 %v1431_v35, %v912_v33  ;;  %v1445_v38 = vadd.f32 %v1444_v36, %v913_v34 }
 0x264   : > { %2701 = vmatpush.bf16.msra.mxu2 %v3983_v24  ;;  %2714 = vmatpush.bf16.msra.mxu3 %v3991_v25 }
 0x265   : > { %v1486_v39 = vpack.c.bf16 %v1432_v37, %v1432_v37  ;;  %v1487_v40 = vpack.c.bf16 %v1445_v38, %v1445_v38 }
 0x267   : > { %2682 = vmatmul.bf16.vlgmr.msrb.gmra.mxu1 %v1486_v39  ;;  %2695 = vmatmul.bf16.vlgmr.msrb.gmra.mxu0 %v1487_v40 }
 0x268   : > { %2702 = vmatpush.bf16.msra.mxu2 %v3982_v26  ;;  %2715 = vmatpush.bf16.msra.mxu3 %v3990_v28  ;;  %v3993_v26 = vld [vmem:[%s5092_s7] sm:$0xff] }
 0x269   : > { %2759 = vmatpush.bf16.msra.mxu1 %v3993_v26 }
 0x26a   : > { %v1433_v46 = vpop.f32.mrf.mxu2  ;;  %v1446_v47 = vpop.f32.mrf.mxu3 }
 0x26c   : > { %2703 = vmatpush.bf16.msra.mxu2 %v3981_v30  ;;  %2716 = vmatpush.bf16.msra.mxu3 %v3989_v31 }
 0x270   : > { %2704 = vmatpush.bf16.msra.mxu2 %v3980_v7  ;;  %2717 = vmatpush.bf16.msra.mxu3 %v3988_v41 }
 0x272   : > { %v1457_v53 = vpop.f32.mrf.mxu2  ;;  %v1470_v54 = vpop.f32.mrf.mxu3 }
 0x273   : > { %v1458_v55 = vadd.f32 %v1457_v53, %v914_v50  ;;  %v1471_v56 = vadd.f32 %v1470_v54, %v915_v51 }
 0x274   : > { %2705 = vmatpush.bf16.msra.mxu2 %v3979_v42  ;;  %2718 = vmatpush.bf16.msra.mxu3 %v3987_v43 }
 0x275   : > { %v1488_v57 = vpack.c.bf16 %v1458_v55, %v1458_v55  ;;  %v1489_v58 = vpack.c.bf16 %v1471_v56, %v1471_v56 }
 0x278   : > { %2706 = vmatpush.bf16.msra.mxu2 %v3978_v44  ;;  %2719 = vmatpush.bf16.msra.mxu3 %v3986_v45 }
 0x27a   : > { %v1459_v59 = vpop.f32.mrf.mxu2  ;;  %v1472_v60 = vpop.f32.mrf.mxu3 }
 0x27c   : > { %2707 = vmatpush.bf16.msra.mxu2 %v3977_v48  ;;  %2720 = vmatpush.bf16.msra.mxu3 %v3985_v49  ;;  %v4007_v49 = vld [vmem:[%s5093_s8] ss:$0 sm:$0xff] }
 0x27f   : > { %2708 = vmatmul.bf16.vlgmr.msra.gmra.mxu2 %v1488_v57  ;;  %2721 = vmatmul.bf16.vlgmr.msra.gmra.mxu3 %v1489_v58 }
 0x28a   : > { %v2527_v61 = vpop.f32.mrf.mxu2  ;;  %v2540_v62 = vpop.f32.mrf.mxu3 }
 0x28b   : > { %v2528_v63 = vadd.f32 %v4006_v9, %v2527_v61 }
 0x28d   : > { %v2541_v52 = vadd.f32 %v2540_v62, %v2528_v63 }
 0x292   : > { %v2529_v32 = vpop.f32.mrf.mxu2  ;;  %v2542_v0 = vpop.f32.mrf.mxu3 }
 0x2a2   : > { %v2553_v1 = vpop.f32.mrf.mxu2  ;;  %v2566_v3 = vpop.f32.mrf.mxu3 }
 0x2a3   : > { %v2554_v4 = vadd.f32 %v2553_v1, %v2541_v52 }
 0x2a4   : > { %v2579_v6 = vpop.f32.mrf.mxu1  ;;  %v2592_v2 = vpop.f32.mrf.mxu0 }
 0x2a5   : > { %v2567_v5 = vadd.f32 %v2566_v3, %v2554_v4 }
 0x2a7   : > { %v2580_v8 = vadd.f32 %v2579_v6, %v2567_v5 }
 0x2a9   : > { %v2593_v10 = vadd.f32 %v2592_v2, %v2580_v8 }
 0x2aa   : > { %v2555_v11 = vpop.f32.mrf.mxu2  ;;  %v2568_v12 = vpop.f32.mrf.mxu3 }
 0x2ac   : > { %v2581_v13 = vpop.f32.mrf.mxu1  ;;  %v2594_v14 = vpop.f32.mrf.mxu0 }
 0x2c2   : > { %v2605_v15 = vpop.f32.mrf.mxu2  ;;  %v2618_v16 = vpop.f32.mrf.mxu3 }
 0x2c3   : > { %v2606_v29 = vadd.f32 %v2605_v15, %v2593_v10 }
 0x2c4   : > { %v2631_v20 = vpop.f32.mrf.mxu1  ;;  %v2644_v21 = vpop.f32.mrf.mxu0 }
 0x2c5   : > { %v2619_v33 = vadd.f32 %v2618_v16, %v2606_v29 }
 0x2c7   : > { %v2632_v34 = vadd.f32 %v2631_v20, %v2619_v33 }
 0x2c9   : > { %v2645_v35 = vadd.f32 %v2644_v21, %v2632_v34 }
 0x2ca   : > { %v2607_v17 = vpop.f32.mrf.mxu2  ;;  %v2620_v18 = vpop.f32.mrf.mxu3 }
 0x2cc   : > { %v2633_v19 = vpop.f32.mrf.mxu1  ;;  %v2646_v23 = vpop.f32.mrf.mxu0 }
 0x2e2   : > { %v2657_v24 = vpop.f32.mrf.mxu2  ;;  %v2670_v25 = vpop.f32.mrf.mxu3 }
 0x2e3   : > { %v2658_v36 = vadd.f32 %v2657_v24, %v2645_v35 }
 0x2e4   : > { %v2683_v30 = vpop.f32.mrf.mxu1  ;;  %v2696_v31 = vpop.f32.mrf.mxu0 }
 0x2e5   : > { %v2671_v37 = vadd.f32 %v2670_v25, %v2658_v36 }
 0x2e7   : > { %v2684_v38 = vadd.f32 %v2683_v30, %v2671_v37 }
 0x2e9   : > { %v2697_v39 = vadd.f32 %v2696_v31, %v2684_v38 }
 0x2ea   : > { %v2659_v28 = vpop.f32.mrf.mxu2  ;;  %v2672_v27 = vpop.f32.mrf.mxu3 }
 0x2ec   : > { %v2685_v7 = vpop.f32.mrf.mxu1  ;;  %v2698_v41 = vpop.f32.mrf.mxu0 }
 0x302   : > { %v2709_v40 = vpop.f32.mrf.mxu2  ;;  %v2722_v42 = vpop.f32.mrf.mxu3 }
 0x303   : > { %v2710_v43 = vadd.f32 %v2709_v40, %v2697_v39 }
 0x305   : > { %v2723_v44 = vadd.f32 %v2722_v42, %v2710_v43 }
 0x307   : > { %v2726_v45 = vmax.f32 %v2723_v44, 0.0 }
 0x309   : > { %v2727_v46 = vpack.c.bf16 %v2726_v45, %v2726_v45 }
 0x30a   : > { %v2711_v47 = vpop.f32.mrf.mxu2  ;;  %v2724_v48 = vpop.f32.mrf.mxu3 }
 0x30b   : > { %3764 = vmatmul.msk.bf16.vlgmr.msra.gmra.mxu1 %vm2748_vm7, %v2727_v46 }
 0x388   : > { %v2761_v50 = vpop.f32.mrf.mxu1 }
 0x389   : > { %v2762_v51 = vadd.f32 %v4007_v49, %v2761_v50 }
 0x38b   : > { %2766 = vst.msk [vmem:[%s335_s14] sm:$0x7] %vm2765_vm8, %v2762_v51 }
 0x390   : > { %v2763_v53 = vpop.f32.mrf.mxu1 }
 0x391 PF: > { %s19_s30 = sadd.s32 1, %s4016_s30  }
 0x392   : > { %p16_p5 = scmp.ge.s32.totalorder %s19_s30, 4  }
 0x394   :  { %18 = sbr.rel (!%p16_p5) target bundleno = 1 (0x1), region = 86 }

// kernel: thumbnail_selector_forward.2
= control target key start
LH: loop header
LB: loop body
LE: loop exit
PB: predicated region body
PF: predicated region fallthrough
CT: control target
= control target key end

     0   :  { %s6124_s6 = smov 1   ;;  %s6125_s10 = smov 2   ;;  %s7799_s0 = inlined_call_operand.smem [shape: u32[35], index: -1, kind: input, shape index: {}] }
   0x1   :  { %s6182_s5 = sld [smem:[%s7799_s0]]   ;;  %s6126_s14 = smov 3  }
   0x2   :  { %s6187_s9 = sld [smem:[%s7799_s0 + %s6124_s6]]   ;;  %s6127_s18 = smov 4  }
   0x3   :  { %s6192_s13 = sld [smem:[%s7799_s0 + %s6125_s10]]   ;;  %s6128_s22 = smov 5  }
   0x4   :  { %s6197_s17 = sld [smem:[%s7799_s0 + %s6126_s14]]   ;;  %s6129_s26 = smov 6  }
   0x5   :  { %s6202_s21 = sld [smem:[%s7799_s0 + %s6127_s18]]   ;;  %s6130_s30 = smov 7  }
   0x6   :  { %s6207_s25 = sld [smem:[%s7799_s0 + %s6128_s22]]   ;;  %s6131_s4 = smov 8  }
   0x7   :  { %s6212_s29 = sld [smem:[%s7799_s0 + %s6129_s26]]   ;;  %s6132_s10 = smov 9  }
   0x8   :  { %s6217_s3 = sld [smem:[%s7799_s0 + %s6130_s30]]   ;;  %s6133_s15 = smov 10  }
   0x9   :  { %s6222_s8 = sld [smem:[%s7799_s0 + %s6131_s4]]   ;;  %s6134_s20 = smov 11  }
   0xa   :  { %s6227_s14 = sld [smem:[%s7799_s0 + %s6132_s10]]   ;;  %s6135_s26 = smov 12  }
   0xb   :  { %s6232_s19 = sld [smem:[%s7799_s0 + %s6133_s15]]   ;;  %s6136_s1 = smov 13  }
   0xc   :  { %s6237_s24 = sld [smem:[%s7799_s0 + %s6134_s20]]   ;;  %s6137_s7 = smov 14  }
   0xd   :  { %s6242_s30 = sld [smem:[%s7799_s0 + %s6135_s26]]   ;;  %s6138_s15 = smov 15  }
   0xe   :  { %7811 = sst [smem:[#allocation11_spill]] %s6217_s3  ;;  %s6139_s22 = smov 16  }
   0xf   :  { %s6247_s6 = sld [smem:[%s7799_s0 + %s6136_s1]]   ;;  %s6140_s28 = smov 17  }
  0x10   :  { %7812 = sst [smem:[#allocation12_spill]] %s6227_s14 }
  0x11   :  { %s6252_s12 = sld [smem:[%s7799_s0 + %s6137_s7]]   ;;  %s6141_s7 = smov 18  }
  0x12   :  { %7813 = sst [smem:[#allocation13_spill]] %s6237_s24 }
  0x13   :  { %s6257_s20 = sld [smem:[%s7799_s0 + %s6138_s15]]   ;;  %s6142_s15 = smov 19  }
  0x14   :  { %s6262_s27 = sld [smem:[%s7799_s0 + %s6139_s22]]   ;;  %s6143_s22 = smov 20  }
  0x15   :  { %7814 = sst [smem:[#allocation14_spill]] %s6247_s6 }
  0x16   :  { %s6267_s4 = sld [smem:[%s7799_s0 + %s6140_s28]]   ;;  %s6144_s28 = smov 21  }
  0x17   :  { %s6272_s3 = sld [smem:[%s7799_s0 + %s6141_s7]]   ;;  %s6145_s7 = smov 22  }
  0x18   :  { %s6282_s24 = sld [smem:[%s7799_s0 + %s6143_s22]]   ;;  %s6147_s22 = smov 24  }
  0x19   :  { %7815 = sst [smem:[#allocation15_spill]] %s6257_s20 }
  0x1a   :  { %s6277_s20 = sld [smem:[%s7799_s0 + %s6142_s15]]   ;;  %s6146_s15 = smov 23  }
  0x1b   :  { %s6287_s6 = sld [smem:[%s7799_s0 + %s6144_s28]]   ;;  %s6148_s28 = smov 25  }
  0x1c   :  { %7816 = sst [smem:[#allocation16_spill]] %s6267_s4 }
  0x1d   :  { %s6292_s4 = sld [smem:[%s7799_s0 + %s6145_s7]]   ;;  %s6149_s7 = smov 26  }
  0x1e   :  { %7817 = sst [smem:[#allocation17_spill]] %s6282_s24 }
  0x1f   :  { %s6297_s14 = sld [smem:[%s7799_s0 + %s6146_s15]]   ;;  %s6150_s15 = smov 27  }
  0x20   :  { %s6302_s24 = sld [smem:[%s7799_s0 + %s6147_s22]]   ;;  %s6151_s22 = smov 28  }
  0x21   :  { %7818 = sst [smem:[#allocation18_spill]] %s6287_s6 }
  0x22   :  { %s6307_s6 = sld [smem:[%s7799_s0 + %s6148_s28]]   ;;  %s6152_s28 = smov 29  }
  0x23   :  { %7819 = sst [smem:[#allocation19_spill]] %s6292_s4 }
  0x24   :  { %s6312_s4 = sld [smem:[%s7799_s0 + %s6149_s7]]   ;;  %s6153_s7 = smov 30  }
  0x25   :  { %7820 = sst [smem:[#allocation20_spill]] %s6297_s14 }
  0x26   :  { %7821 = sst [smem:[#allocation21_spill]] %s6302_s24 }
  0x27   :  { %s6317_s14 = sld [smem:[%s7799_s0 + %s6150_s15]]   ;;  %s6154_s15 = smov 31  }
  0x28   :  { %7822 = sst [smem:[#allocation22_spill]] %s6307_s6 }
  0x29   :  { %s6322_s24 = sld [smem:[%s7799_s0 + %s6151_s22]]   ;;  %s6155_s22 = smov 32  }
  0x2a   :  { %7823 = sst [smem:[#allocation23_spill]] %s6312_s4 }
  0x2b   :  { %s6327_s6 = sld [smem:[%s7799_s0 + %s6152_s28]]   ;;  %s6156_s28 = smov 33  }
  0x2c   :  { %s6332_s4 = sld [smem:[%s7799_s0 + %s6153_s7]]   ;;  %s6157_s7 = smov 34  }
  0x2d   :  { %7824 = sst [smem:[#allocation24_spill]] %s6317_s14 }
  0x2e   :  { %s6337_s14 = sld [smem:[%s7799_s0 + %s6154_s15]]  }
  0x2f   :  { %7825 = sst [smem:[#allocation25_spill]] %s6322_s24 }
  0x30   :  { %s6342_s24 = sld [smem:[%s7799_s0 + %s6155_s22]]  }
  0x31   :  { %7826 = sst [smem:[#allocation26_spill]] %s6327_s6 }
  0x32   :  { %7827 = sst [smem:[#allocation27_spill]] %s6332_s4 }
  0x33   :  { %s6347_s6 = sld [smem:[%s7799_s0 + %s6156_s28]]  }
  0x34   :  { %s6352_s4 = sld [smem:[%s7799_s0 + %s6157_s7]]  }
  0x35   :  { %74 = vsyncpa [#allocation3], 0 }
  0x36   :  { %75 = vsyncpa [#allocation6], 0 }
  0x37   :  { %76 = vsyncpa [#allocation4], 0  ;;  %s120_s15 = sshll.u32 %s6277_s20, 4  ;;  %s6158_s16 = smov [#allocation2]   ;;  %s121_s15 = int_to_ptr.hbm [resolvable:$true] %s120_s15 }
  0x38   :  { %s122_s18 = sshll.u32 %s6158_s16, 4  ;;  %s6046_s23 = sshra.s32 %s121_s15, 4  ;;  %s123_s18 = int_to_ptr.vmem [resolvable:$true] %s122_s18  ;;  %s6047_s23 = int_to_ptr.hbm [resolvable:$true] %s6046_s23 }
  0x39   :  { %s157_s22 = sshll.u32 %s6347_s6, 4  ;;  %s6048_s26 = scalar_lea.hbm %s6047_s23, 1  ;;  %s158_s22 = int_to_ptr.hbm [resolvable:$true] %s157_s22 }
  0x3a   :  { %p6049_p0 = scmp.ne.s32.totalorder %s6047_s23, %s6048_s26  ;;  %s6050_s28 = scalar_lea.hbm %s6277_s20, 1 }
  0x3b   :  { %p6051_p1 = scmp.lt.s32.totalorder %s6047_s23, %s6277_s20  ;;  %p6052_p2 = scmp.lt.s32.totalorder %s6050_s28, %s6048_s26 }
  0x3d   :  { %p6053_p3 = por %p6052_p2, %p6051_p1 }
  0x3f   :  { %p6054_p4 = pnand %p6053_p3, %p6049_p0 }
  0x41   :  { %6057 = shalt.err (!%p6054_p4)
}
  0x42   :  { %125 = dma.hbm_to_vmem [thread:$0]  %s121_s15, 16, %s123_s18, [#allocation3]  }
  0x43   :  { %s6159_s0 = smov [#allocation5]   ;;  %s6070_s2 = sshra.s32 %s158_s22, 4  ;;  %s6071_s2 = int_to_ptr.hbm [resolvable:$true] %s6070_s2 }
  0x44   :  { %s159_s1 = sshll.u32 %s6159_s0, 4  ;;  %s6072_s7 = scalar_lea.hbm %s6071_s2, 1  ;;  %s160_s1 = int_to_ptr.vmem [resolvable:$true] %s159_s1 }
  0x45   :  { %p6073_p5 = scmp.ne.s32.totalorder %s6071_s2, %s6072_s7  ;;  %s6074_s10 = scalar_lea.hbm %s6347_s6, 1 }
  0x46   :  { %p6075_p6 = scmp.lt.s32.totalorder %s6071_s2, %s6347_s6  ;;  %p6076_p7 = scmp.lt.s32.totalorder %s6074_s10, %s6072_s7 }
  0x48   :  { %p6077_p8 = por %p6076_p7, %p6075_p6 }
  0x4a   :  { %p6078_p9 = pnand %p6077_p8, %p6073_p5 }
  0x4c   :  { %6081 = shalt.err (!%p6078_p9)
}
  0x4d   :  { %162 = dma.hbm_to_vmem [thread:$0]  %s158_s22, 16, %s160_s1, [#allocation6]  }
  0x4e   :  { %6118 = dma.done.wait [#allocation3], 16  }
  0x4f   :  { %6119 = vsyncadd [#allocation3], 4294967280 }
  0x50   :  { %6120 = dma.done.wait [#allocation6], 16  }
  0x51   :  { %6121 = vsyncadd [#allocation6], 4294967280  ;;  %v5660_v0 = vld [vmem:[%s6202_s21 + $0x10] sm:$0xff]  ;;  %v282_v1 = vld [vmem:[%s6222_s8 + $0x8] sm:$0xf]  ;;  %vm300_vm0 = vcmask 1043456  }
  0x52   :  { %v292_v2 = vunpack.c.l.b16 %v282_v1  ;;  %212 = vmatpush.bf16.msra.mxu0 %v5660_v0  ;;  %v5659_v3 = vld [vmem:[%s6202_s21 + $0x8] sm:$0xff]  ;;  %v437_v7 = vld [vmem:[%s6262_s27 + $0x10] sm:$0xf]  ;;  %v5665_v8 = vld [vmem:[%s6222_s8] sm:$0xff]  ;;  %vm296_vm1 = vcmask 195584   ;;  %vm203_vm2 = vcmask 392192  }
  0x53   :  { %v360_v4 = vld [vmem:[%s6242_s30 + $0x8] sm:$0xf]  ;;  %v5658_v9 = vld [vmem:[%s6202_s21] sm:$0xff]  ;;  %v451_v11 = vunpack.c.l.b16 %v437_v7  ;;  %vm457_vm3 = vcmask 326656   ;;  %v5664_v28 = vld [vmem:[%s6212_s29 + $0x18] sm:$0xff]  ;;  %vm339_vm4 = vcmask 261120  }
  0x54   :  { %v294_v5 = vpack.c.b16 %v292_v2, %v292_v2  ;;  %v370_v6 = vunpack.c.l.b16 %v360_v4  ;;  %v278_v10 = vld [vmem:[%s6187_s9] sm:$0x3]  ;;  %v173_v14 = vld [vmem:[%s6182_s5 + $0x8] sm:$0x3]  ;;  %268 = vmatpush.bf16.msra.mxu1 %v5664_v28  ;;  %v5663_v29 = vld [vmem:[%s6212_s29 + $0x10] sm:$0xff]  ;;  %s7829_s9 = sld [smem:[#allocation16_spill]] }
  0x55   :  { %v172_v13 = vld [vmem:[%s6182_s5] sm:$0xff]  ;;  %v454_v16 = vpack.c.b16 %v451_v11, %v451_v11  ;;  %v279_v19 = vpack.c.bf16 %v278_v10, %v278_v10  ;;  %v5672_v22 = vld [vmem:[%s6262_s27 + $0x8] sm:$0xff]  ;;  %s7828_s5 = sld [smem:[#allocation12_spill]]  ;;  %v5676_v34 = vld [vmem:[%s6272_s3 + $0x18] sm:$0xff]  ;;  %vm260_vm5 = vcmask 523264   ;;  %vm540_vm6 = vcmask 1041408  }
  0x56   :  { %v302_v12 = vsel %vm300_vm0, %v294_v5, 0  ;;  %v372_v15 = vpack.c.b16 %v370_v6, %v370_v6  ;;  %213 = vmatpush.bf16.msra.mxu0 %v5659_v3  ;;  %v174_v20 = vpack.c.bf16 %v173_v14, %v172_v13  ;;  %v5668_v21 = vld [vmem:[%s6242_s30] sm:$0xff]  ;;  %v5667_v30 = vld [vmem:[%s6232_s19 + $0x8] sm:$0xff]  ;;  %v5675_v35 = vld [vmem:[%s6272_s3 + $0x10] sm:$0xff]  ;;  %s7832_s21 = sld [smem:[#allocation13_spill]]  ;;  %vm543_vm7 = vcmask 1045504  }
  0x57   :  { %310 = vmatpush.bf16.msra.mxu2 %v302_v12  ;;  %v462_v18 = vsel %vm300_vm0, %v454_v16, 0  ;;  %v5671_v23 = vld [vmem:[%s6262_s27] sm:$0xff]  ;;  %349 = vmatpush.bf16.msra.mxu3 %v5667_v30  ;;  %v5662_v31 = vld [vmem:[%s6212_s29 + $0x8] sm:$0xff]  ;;  %s6160_s8 = smov 96   ;;  %s6162_s30 = smov 88   ;;  %vm651_vm8 = vcmask 64512  }
  0x58   :  { %v378_v17 = vsel %vm300_vm0, %v372_v15, 0  ;;  %v356_v24 = vld [vmem:[%s6192_s13] sm:$0x3]  ;;  %269 = vmatpush.bf16.msra.mxu1 %v5663_v29  ;;  %v5670_v36 = vld [vmem:[%s6252_s12 + $0x8] sm:$0xff]  ;;  %s7830_s13 = sld [smem:[#allocation14_spill]]  ;;  %s6163_s6 = smov 120  }
  0x59   :  { %v431_v25 = vld [vmem:[%s6197_s17] sm:$0x3]  ;;  %v357_v26 = vpack.c.bf16 %v356_v24, %v356_v24  ;;  %v5674_v37 = vld [vmem:[%s6272_s3 + $0x8] sm:$0xff]  ;;  %s7831_s17 = sld [smem:[#allocation17_spill]]  ;;  %vm942_vm9 = vcmask 1040384   ;;  %vm839_vm10 = vcmask 9216  }
  0x5a   :  { %214 = vmatpush.bf16.msra.mxu0 %v5658_v9  ;;  %v432_v27 = vpack.c.bf16 %v431_v25, %v431_v25  ;;  %v5666_v32 = vld [vmem:[%s6232_s19] sm:$0xff]  ;;  %v5751_v9 = vld [vmem:[#allocation2] ss:$0 sm:$0xff]  ;;  %s6161_s19 = smov 64   ;;  %vm938_vm11 = vcmask 15360   ;;  %s6165_s20 = smov 80  }
  0x5b   :  { %311 = vmatpush.bf16.msra.mxu2 %v5665_v8  ;;  %350 = vmatpush.bf16.msra.mxu3 %v5666_v32  ;;  %v5661_v33 = vld [vmem:[%s6212_s29] sm:$0xff]  ;;  %s7834_s29 = sld [smem:[#allocation11_spill]]  ;;  %s6166_s27 = smov 112  }
  0x5c   :  { %270 = vmatpush.bf16.msra.mxu1 %v5662_v31  ;;  %v5669_v38 = vld [vmem:[%s6252_s12] sm:$0xff]  ;;  %s6164_s12 = smov 56   ;;  %s6167_s11 = smov 48  }
  0x5d   :  { %5343 = vmatmul.msk.bf16.vlgmr.msra.gmra.mxu0 %vm203_vm2, %v174_v20  ;;  %v5673_v39 = vld [vmem:[%s6272_s3] sm:$0xff]  ;;  %s7835_s3 = sld [smem:[#allocation18_spill]]  ;;  %s6168_s16 = smov 72  }
  0x5e   :  { %469 = vmatpush.bf16.msrb.mxu0 %v462_v18  ;;  %5365 = vmatmul.msk.bf16.vlgmr.msra.gmra.mxu2 %vm296_vm1, %v279_v19  ;;  %v5745_v41 = vld [vmem:[%s6207_s25] ss:$0 sm:$0xff]  ;;  %s7833_s25 = sld [smem:[#allocation15_spill]]  ;;  %s6169_s18 = smov 104  }
  0x5f   :  { %386 = vmatpush.bf16.msrb.mxu2 %v378_v17  ;;  %424 = vmatpush.bf16.msrb.mxu3 %v5670_v36  ;;  %v5746_v42 = vld [vmem:[%s7828_s5] ss:$0 sm:$0xff]  ;;  %v5678_v2 = vld [vmem:[%s7831_s17 + $0x8] sm:$0xff]  ;;  %s7836_s15 = sld [smem:[#allocation19_spill]]  ;;  %s6170_s22 = smov 40  }
  0x60   :  { %271 = vmatpush.bf16.msra.mxu1 %v5661_v33  ;;  %v5747_v54 = vld [vmem:[%s7829_s9] ss:$0 sm:$0xff]  ;;  %s7837_s23 = sld [smem:[#allocation20_spill]]  ;;  %s5286_s5 = sshll.u32 %s6352_s4, 4  ;;  %s5287_s5 = int_to_ptr.hbm [resolvable:$true] %s5286_s5 }
  0x61   :  { %v5748_v57 = vld [vmem:[%s7830_s13] ss:$0 sm:$0xff]  ;;  %s7838_s26 = sld [smem:[#allocation23_spill]]  ;;  %s6106_s9 = sshra.s32 %s5287_s5, 4  ;;  %s6107_s9 = int_to_ptr.hbm [resolvable:$true] %s6106_s9 }
  0x62   :  { %470 = vmatpush.bf16.msrb.mxu0 %v5672_v22  ;;  %v5677_v3 = vld [vmem:[%s7831_s17] sm:$0xff]  ;;  %s7839_s28 = sld [smem:[#allocation21_spill]]  ;;  %s6108_s13 = scalar_lea.hbm %s6107_s9, 2 }
  0x63   :  { %387 = vmatpush.bf16.msrb.mxu2 %v5668_v21  ;;  %425 = vmatpush.bf16.msrb.mxu3 %v5669_v38  ;;  %v5750_v8 = vld [vmem:[%s7832_s21] ss:$0 sm:$0xff]  ;;  %s7840_s0 = sld [smem:[#allocation22_spill]]  ;;  %p6109_p10 = scmp.ne.s32.totalorder %s6107_s9, %s6108_s13 }
  0x64   :  { %522 = vmatpush.bf16.msrb.mxu1 %v5676_v34  ;;  %v5752_v11 = vld [vmem:[%s7833_s25] ss:$0 sm:$0xff]  ;;  %s7841_s1 = sld [smem:[#allocation25_spill]]  ;;  %p6111_p11 = scmp.lt.s32.totalorder %s6107_s9, %s6352_s4 }
  0x65   :  { %v5749_v12 = vld [vmem:[%s7834_s29] ss:$0 sm:$0xff]  ;;  %s7842_s2 = sld [smem:[#allocation24_spill]] }
  0x66   :  { %471 = vmatpush.bf16.msrb.mxu0 %v5671_v23  ;;  %v5753_v30 = vld [vmem:[%s7835_s3] ss:$0 sm:$0xff]  ;;  %s7843_s7 = sld [smem:[#allocation26_spill]] }
  0x67   :  { %600 = vmatpush.bf16.msra.mxu2 %v5678_v2  ;;  %s7844_s10 = sld [smem:[#allocation27_spill]] }
  0x68   :  { %523 = vmatpush.bf16.msrb.mxu1 %v5675_v35 }
  0x6b   :  { %601 = vmatpush.bf16.msra.mxu2 %v5677_v3 }
  0x6c   :  { %524 = vmatpush.bf16.msrb.mxu1 %v5674_v37 }
  0x6d   :  { %5397 = vmatmul.msk.bf16.vlgmr.msrb.gmra.mxu0 %vm457_vm3, %v432_v27 }
  0x6e   :  { %5379 = vmatmul.msk.bf16.vlgmr.msrb.gmra.mxu2 %vm296_vm1, %v357_v26 }
  0x70   :  { %525 = vmatpush.bf16.msrb.mxu1 %v5673_v39 }
  0xda   :  { %v216_v40 = vpop.f32.mrf.mxu0 }
  0xdb   :  { %v217_v44 = vadd.f32 %v5745_v41, %v216_v40 }
  0xdd   :  { %v221_v49 = vmax.f32 %v217_v44, 0.0 }
  0xe1   :  { %v313_v43 = vpop.f32.mrf.mxu2 }
  0xe2   :  { %v314_v45 = vadd.f32 %v5746_v42, %v313_v43  ;;  %v218_v46 = vpop.f32.mrf.mxu0 }
  0xe3   :  { %v219_v48 = vadd.f32 %v5745_v41, %v218_v46 }
  0xe4   :  { %v317_v47 = vmax.f32 %v314_v45, 0.0 }
  0xe5   :  { %v222_v51 = vmax.f32 %v219_v48, 0.0 }
  0xe6   :  { %v318_v50 = vpack.c.bf16 %v317_v47, %v317_v47 }
  0xe7   :  { %v223_v52 = vpack.c.bf16 %v222_v51, %v221_v49 }
  0xe8   :  { %5374 = vmatmul.msk.bf16.vlgmr.msra.gmra.mxu3 %vm339_vm4, %v318_v50 }
  0xe9   :  { %v315_v53 = vpop.f32.mrf.mxu2  ;;  %5360 = vmatmul.msk.bf16.vlgmr.msra.gmra.mxu1 %vm260_vm5, %v223_v52 }
  0xea   :  { %v473_v55 = vpop.f32.mrf.mxu0 }
  0xeb   :  { %v474_v56 = vadd.f32 %v5747_v54, %v473_v55 }
  0xed   :  { %v477_v59 = vmax.f32 %v474_v56, 0.0 }
  0xef   :  { %v478_v63 = vpack.c.bf16 %v477_v59, %v477_v59 }
  0xf1   :  { %v389_v58 = vpop.f32.mrf.mxu2 }
  0xf2   :  { %v390_v60 = vadd.f32 %v5748_v57, %v389_v58  ;;  %v475_v61 = vpop.f32.mrf.mxu0 }
  0xf4   :  { %v393_v62 = vmax.f32 %v390_v60, 0.0 }
  0xf6   :  { %v394_v0 = vpack.c.bf16 %v393_v62, %v393_v62 }
  0xf8   :  { %5388 = vmatmul.msk.bf16.vlgmr.msrb.gmra.mxu3 %vm339_vm4, %v394_v0 }
  0xf9   :  { %v391_v1 = vpop.f32.mrf.mxu2  ;;  %5414 = vmatmul.msk.bf16.vlgmr.msrb.gmra.mxu1 %vm260_vm5, %v478_v63 }
 0x166   :  { %v273_v4 = vpop.f32.mrf.mxu1 }
 0x167   :  { %v274_v20 = vadd.f32 %v5749_v12, %v273_v4 }
 0x169   :  { %v6406_v26 = vmul.f32 5.656854, %v274_v20 }
 0x16b   :  { %v352_v5 = vpop.f32.mrf.mxu3 }
 0x16c   :  { %v353_v13 = vadd.f32 %v5750_v8, %v352_v5 }
 0x16e   :  { %v275_v6 = vpop.f32.mrf.mxu1  ;;  %v532_v18 = vrot.slane %v353_v13, 6 }
 0x16f   :  { %v276_v15 = vadd.f32 %v5749_v12, %v275_v6 }
 0x171   :  { %v541_v22 = vsel %vm540_vm6, %v276_v15, %v532_v18 }
 0x173   :  { %v354_v7 = vpop.f32.mrf.mxu3 }
 0x176   :  { %v527_v10 = vpop.f32.mrf.mxu1 }
 0x177   :  { %v528_v14 = vadd.f32 %v5751_v9, %v527_v10 }
 0x179   :  { %v538_v19 = vrot.slane %v528_v14, 2 }
 0x17b   :  { %v427_v16 = vpop.f32.mrf.mxu3 }
 0x17c   :  { %v428_v17 = vadd.f32 %v5752_v11, %v427_v16 }
 0x17e   :  { %v535_v21 = vrot.slane %v428_v17, 4  ;;  %v529_v23 = vpop.f32.mrf.mxu1 }
 0x180   :  { %v542_v24 = vsel %vm300_vm0, %v541_v22, %v535_v21 }
 0x181   :  { %v544_v25 = vsel %vm543_vm7, %v542_v24, %v538_v19 }
 0x182   :  { %v6408_v27 = vmul.f32 5.656854, %v544_v25 }
 0x183   :  { %v429_v28 = vpop.f32.mrf.mxu3 }
 0x184   :  { %v575_v29 = vpack.c.bf16 %v6408_v27, %v6406_v26 }
 0x186   :  { %5423 = vmatmul.msk.bf16.vlgmr.msra.gmra.mxu2 %vm339_vm4, %v575_v29 }
 0x209   :  { %v603_v31 = vpop.f32.mrf.mxu2 }
 0x20a   :  { %v604_v32 = vadd.f32 %v5753_v30, %v603_v31 }
 0x20c   :  { %v6414_v33 = vrot.slane %v604_v32, 2  ;;  %v612_v34 = vrot.slane %v604_v32, 6  ;;  %v638_v35 = vpack.c.bf16 %v604_v32, %v604_v32  ;;  %v6416_v36 = vrot.slane %v604_v32, 4 }
 0x20d   :  { %v622_v2 = vmul.f32 0.35355338, %v604_v32 }
 0x20e   :  { %v639_v37 = vpack.c.bf16 %v6414_v33, %v6414_v33  ;;  %v647_v38 = vunpack.c.l.b16 %v638_v35  ;;  %v641_v39 = vpack.c.bf16 %v612_v34, %v612_v34  ;;  %v640_v43 = vpack.c.bf16 %v6416_v36, %v6416_v36 }
 0x20f   :  { %v625_v1 = vmul.f32 0.35355338, %v612_v34  ;;  %v630_v4 = vpack.c.bf16 %v622_v2, %v622_v2  ;;  %v623_v11 = vmul.f32 0.35355338, %v6414_v33  ;;  %v624_v15 = vmul.f32 0.35355338, %v6416_v36 }
 0x210   :  { %v6420_v40 = vpack.c.b16 %v647_v38, %v647_v38  ;;  %v672_v41 = vunpack.c.l.b16 %v639_v37  ;;  %v720_v46 = vunpack.c.l.b16 %v641_v39  ;;  %v696_v50 = vunpack.c.l.b16 %v640_v43 }
 0x211   :  { %v605_v42 = vpop.f32.mrf.mxu2  ;;  %v633_v3 = vpack.c.bf16 %v625_v1, %v625_v1  ;;  %v1135_v6 = vunpack.c.l.b16 %v630_v4  ;;  %v6507_v12 = vpack.c.bf16 %v623_v11, %v623_v11  ;;  %v6513_v16 = vpack.c.bf16 %v624_v15, %v624_v15 }
 0x212   :  { %v6424_v44 = vpack.c.b16 %v672_v41, %v672_v41  ;;  %v6426_v45 = vadd.f32 %v5753_v30, %v605_v42  ;;  %649 = vrot.lane.b32.xlu0 %v6420_v40, %s6160_s8  ;;  %v6440_v52 = vpack.c.b16 %v720_v46, %v720_v46  ;;  %v6448_v56 = vpack.c.b16 %v696_v50, %v696_v50 }
 0x213   :  { %v1213_v5 = vunpack.c.l.b16 %v633_v3  ;;  %v6487_v8 = vpack.c.b16 %v1135_v6, %v1135_v6 }
 0x214   :  { %v6431_v47 = vrot.slane %v6426_v45, 2  ;;  %v6434_v48 = vrot.slane %v6426_v45, 6  ;;  %v642_v49 = vpack.c.bf16 %v6426_v45, %v6426_v45  ;;  %674 = vrot.lane.b32.xlu2 %v6424_v44, %s6160_s8  ;;  %v6455_v57 = vrot.slane %v6426_v45, 4 }
 0x215   :  { %v6485_v7 = vpack.c.b16 %v1213_v5, %v1213_v5  ;;  %v626_v35 = vmul.f32 0.35355338, %v6426_v45 }
 0x216   :  { %v744_v51 = vunpack.c.l.b16 %v642_v49  ;;  %v643_v53 = vpack.c.bf16 %v6431_v47, %v6431_v47  ;;  %v645_v54 = vpack.c.bf16 %v6434_v48, %v6434_v48  ;;  %v644_v60 = vpack.c.bf16 %v6455_v57, %v6455_v57 }
 0x217   :  { %v627_v36 = vmul.f32 0.35355338, %v6431_v47  ;;  %v6530_v37 = vpack.c.bf16 %v626_v35, %v626_v35  ;;  %v628_v47 = vmul.f32 0.35355338, %v6455_v57  ;;  %v629_v49 = vmul.f32 0.35355338, %v6434_v48 }
 0x218   :  { %v6446_v55 = vpack.c.b16 %v744_v51, %v744_v51  ;;  %v768_v58 = vunpack.c.l.b16 %v643_v53  ;;  %v816_v59 = vunpack.c.l.b16 %v645_v54  ;;  %v792_v63 = vunpack.c.l.b16 %v644_v60 }
 0x219   :  { %v6532_v38 = vpack.c.bf16 %v627_v36, %v627_v36  ;;  %v6545_v50 = vpack.c.bf16 %v628_v47, %v628_v47  ;;  %v6547_v51 = vpack.c.bf16 %v629_v49, %v629_v49  ;;  %v1161_v35 = vunpack.c.l.b16 %v6507_v12 }
 0x21a   :  { %746 = vrot.lane.b32.xlu1 %v6446_v55, %s6160_s8  ;;  %722 = vrot.lane.b32.xlu0 %v6440_v52, %s6160_s8  ;;  %v6461_v61 = vpack.c.b16 %v768_v58, %v768_v58  ;;  %v6463_v62 = vpack.c.b16 %v816_v59, %v816_v59  ;;  %v6471_v0 = vpack.c.b16 %v792_v63, %v792_v63 }
 0x21b   :  { %v6575_v36 = vpack.c.b16 %v1161_v35, %v1161_v35 }
 0x21c   :  { %698 = vrot.lane.b32.xlu2 %v6448_v56, %s6160_s8 }
 0x222   :  { %818 = vrot.lane.b32.xlu1 %v6463_v62, %s6160_s8  ;;  %770 = vrot.lane.b32.xlu0 %v6461_v61, %s6160_s8 }
 0x224   :  { %936 = vrot.lane.b32.xlu2 %v6420_v40, %s6161_s19 }
 0x22a   :  { %794 = vrot.lane.b32.xlu1 %v6471_v0, %s6160_s8  ;;  %1001 = vrot.lane.b32.xlu0 %v6440_v52, %s6161_s19 }
 0x22c   :  { %959 = vrot.lane.b32.xlu2 %v6424_v44, %s6161_s19 }
 0x232   :  { %1217 = vrot.lane.b32.xlu0 %v6440_v52, %s6162_s30  ;;  %980 = vrot.lane.b32.xlu1 %v6448_v56, %s6161_s19 }
 0x234   :  { %1022 = vrot.lane.b32.xlu2 %v6446_v55, %s6161_s19 }
 0x23a   :  { %1215 = vrot.lane.b32.xlu0 %v6485_v7, %s6163_s6  ;;  %1137 = vrot.lane.b32.xlu1 %v6487_v8, %s6163_s6 }
 0x23c   :  { %1139 = vrot.lane.b32.xlu2 %v6420_v40, %s6162_s30 }
 0x242   :  { %1165 = vrot.lane.b32.xlu0 %v6424_v44, %s6162_s30 }
 0x244   :  { %1191 = vrot.lane.b32.xlu2 %v6448_v56, %s6162_s30 }
 0x24a   :  { %1043 = vrot.lane.b32.xlu0 %v6461_v61, %s6161_s19 }
 0x24c   :  { %1085 = vrot.lane.b32.xlu2 %v6463_v62, %s6161_s19 }
 0x252   :  { %1064 = vrot.lane.b32.xlu0 %v6471_v0, %s6161_s19 }
 0x26e   :  { %v675_v9 = vpop.permute.xlu2 %674 }
 0x26f   :  { %v680_v10 = vsel %vm651_vm8, %v675_v9, 0 }
 0x270   :  { %689 = vmatpush.bf16.xpose.msra.mxu0 %v680_v10 }
 0x276   :  { %v699_v13 = vpop.permute.xlu2 %698 }
 0x277   :  { %v704_v14 = vsel %vm651_vm8, %v699_v13, 0  ;;  %5425 = vmatmul.msk.bf16.vlgmr.msra.gmra.mxu0 %vm651_vm8, %v6507_v12 }
 0x278   :  { %713 = vmatpush.bf16.xpose.msra.mxu1 %v704_v14 }
 0x27e   :  { %v937_v17 = vpop.permute.xlu2 %936 }
 0x27f   :  { %5426 = vmatmul.msk.bf16.vlgmr.msra.gmra.mxu1 %vm651_vm8, %v6513_v16  ;;  %v944_v25 = vsel %vm942_vm9, %v937_v17, 0 }
 0x284   :  { %v650_v18 = vpop.permute.xlu0 %649 }
 0x285   :  { %v656_v19 = vsel %vm651_vm8, %v650_v18, 0 }
 0x286   :  { %665 = vmatpush.bf16.xpose.msra.mxu3 %v656_v19  ;;  %v960_v20 = vpop.permute.xlu2 %959 }
 0x287   :  { %v965_v33 = vsel %vm942_vm9, %v960_v20, 0 }
 0x28c   :  { %v747_v21 = vpop.permute.xlu1 %746  ;;  %v723_v22 = vpop.permute.xlu0 %722 }
 0x28d   :  { %v752_v23 = vsel %vm651_vm8, %v747_v21, 0  ;;  %v728_v24 = vsel %vm651_vm8, %v723_v22, 0  ;;  %5424 = vmatmul.msk.bf16.vlgmr.msra.gmra.mxu3 %vm651_vm8, %v630_v4 }
 0x28e   :  { %737 = vmatpush.bf16.xpose.msrb.mxu2 %v728_v24  ;;  %761 = vmatpush.bf16.xpose.msrb.mxu3 %v752_v23  ;;  %v1023_v28 = vpop.permute.xlu2 %1022 }
 0x28f   :  { %v1028_v42 = vsel %vm942_vm9, %v1023_v28, 0 }
 0x294   :  { %v819_v29 = vpop.permute.xlu1 %818  ;;  %v771_v30 = vpop.permute.xlu0 %770 }
 0x295   :  { %v824_v31 = vsel %vm651_vm8, %v819_v29, 0  ;;  %v776_v32 = vsel %vm651_vm8, %v771_v30, 0  ;;  %5427 = vmatmul.msk.bf16.vlgmr.msrb.gmra.mxu2 %vm651_vm8, %v633_v3 }
 0x296   :  { %953 = vmatpush.bf16.msra.mxu3 %v944_v25  ;;  %785 = vmatpush.bf16.xpose.msrb.mxu0 %v776_v32  ;;  %v6526_v34 = vpop.permute.xlu2 %1139 }
 0x297   :  { %833 = vmatpush.bf16.xpose.msra.mxu2 %v824_v31 }
 0x29c   :  { %v795_v39 = vpop.permute.xlu1 %794  ;;  %v1002_v41 = vpop.permute.xlu0 %1001 }
 0x29d   :  { %v800_v43 = vsel %vm651_vm8, %v795_v39, 0  ;;  %v1007_v46 = vsel %vm942_vm9, %v1002_v41, 0  ;;  %5428 = vmatmul.msk.bf16.vlgmr.msrb.gmra.mxu3 %vm651_vm8, %v6530_v37  ;;  %5429 = vmatmul.msk.bf16.vlgmr.msrb.gmra.mxu0 %vm651_vm8, %v6532_v38 }
 0x29e   :  { %974 = vmatpush.bf16.msra.mxu0 %v965_v33  ;;  %1037 = vmatpush.bf16.msrb.mxu3 %v1028_v42  ;;  %v6541_v45 = vpop.permute.xlu2 %1191 }
 0x29f   :  { %809 = vmatpush.bf16.xpose.msrb.mxu1 %v800_v43  ;;  %1016 = vmatpush.bf16.msrb.mxu2 %v1007_v46 }
 0x2a4   :  { %v6549_v53 = vpop.permute.xlu0 %1217  ;;  %v981_v54 = vpop.permute.xlu1 %980 }
 0x2a5   :  { %v986_v58 = vsel %vm942_vm9, %v981_v54, 0  ;;  %5431 = vmatmul.msk.bf16.vlgmr.msra.gmra.mxu2 %vm651_vm8, %v6547_v51 }
 0x2a6   :  { %5430 = vmatmul.msk.bf16.vlgmr.msrb.gmra.mxu1 %vm651_vm8, %v6545_v50  ;;  %v1086_v59 = vpop.permute.xlu2 %1085 }
 0x2a7   :  { %995 = vmatpush.bf16.msra.mxu1 %v986_v58  ;;  %v1091_v57 = vsel %vm942_vm9, %v1086_v59, 0 }
 0x2a8   :  { %1100 = vmatpush.bf16.msra.mxu2 %v1091_v57 }
 0x2ac   :  { %v6557_v48 = vpop.permute.xlu0 %1215  ;;  %v6579_v39 = vpop.permute.xlu1 %1137 }
 0x2b4   :  { %v6559_v60 = vpop.permute.xlu0 %1165 }
 0x2bc   :  { %v1044_v63 = vpop.permute.xlu0 %1043 }
 0x2bd   :  { %v1049_v1 = vsel %vm942_vm9, %v1044_v63, 0 }
 0x2be   :  { %1058 = vmatpush.bf16.msrb.mxu0 %v1049_v1 }
 0x2c4   :  { %v1065_v2 = vpop.permute.xlu0 %1064 }
 0x2c5   :  { %v1070_v3 = vsel %vm942_vm9, %v1065_v2, 0 }
 0x2c6   :  { %1079 = vmatpush.bf16.msrb.mxu1 %v1070_v3 }
 0x2f4   :  { %v691_v4 = vpop.f32.mrf.mxu0 }
 0x2f5   :  { %v843_v5 = vsel %vm839_vm10, %v691_v4, -inf }
 0x2f6   :  { %844 = vmax.xlane.f32.xlu1 %v843_v5 }
 0x2fc   :  { %v693_v6 = vpop.f32.mrf.mxu0  ;;  %v715_v9 = vpop.f32.mrf.mxu1 }
 0x2fd   :  { %v846_v10 = vsel %vm839_vm10, %v715_v9, -inf }
 0x2fe   :  { %847 = vmax.xlane.f32.xlu2 %v846_v10 }
 0x304   :  { %v717_v11 = vpop.f32.mrf.mxu1 }
 0x310   :  { %v667_v13 = vpop.f32.mrf.mxu3 }
 0x311   :  { %v840_v14 = vsel %vm839_vm10, %v667_v13, -inf }
 0x312   :  { %841 = vmax.xlane.f32.xlu2 %v840_v14 }
 0x318   :  { %v669_v15 = vpop.f32.mrf.mxu3  ;;  %v739_v17 = vpop.f32.mrf.mxu2 }
 0x319   :  { %v849_v18 = vsel %vm839_vm10, %v739_v17, -inf }
 0x31a   :  { %850 = vmax.xlane.f32.xlu0 %v849_v18  ;;  %v787_v19 = vpop.f32.mrf.mxu0 }
 0x31b   :  { %v855_v20 = vsel %vm839_vm10, %v787_v19, -inf }
 0x31c   :  { %856 = vmax.xlane.f32.xlu1 %v855_v20  ;;  %v1265_v20 = vunpack.c.l.b16 %v6532_v38 }
 0x320   :  { %v741_v21 = vpop.f32.mrf.mxu2  ;;  %v6568_v22 = vpop.f32.mrf.mxu3 }
 0x321   :  { %v852_v32 = vsel %vm839_vm10, %v6568_v22, -inf }
 0x322   :  { %v789_v23 = vpop.f32.mrf.mxu0 }
 0x323   :  { %v811_v24 = vpop.f32.mrf.mxu1  ;;  %v6607_v23 = vpack.c.b16 %v1265_v20, %v1265_v20 }
 0x324   :  { %v858_v25 = vsel %vm839_vm10, %v811_v24, -inf }
 0x325   :  { %859 = vmax.xlane.f32.xlu2 %v858_v25 }
 0x328   :  { %v765_v28 = vpop.f32.mrf.mxu3  ;;  %v835_v29 = vpop.f32.mrf.mxu2 }
 0x329   :  { %v861_v30 = vsel %vm839_vm10, %v835_v29, -inf }
 0x32a   :  { %862 = vmax.xlane.f32.xlu0 %v861_v30 }
 0x32b   :  { %v813_v31 = vpop.f32.mrf.mxu1 }
 0x32d   :  { %853 = vmax.xlane.f32.xlu2 %v852_v32 }
 0x330   :  { %v837_v33 = vpop.f32.mrf.mxu2 }
 0x345   :  { %1163 = vrot.lane.b32.xlu2 %v6575_v36, %s6163_s6 }
 0x369   :  { %v845_v41 = vpop.xlane.xlu1 %844 }
 0x36a   :  { %v865_v42 = vsub.f32 %v691_v4, %v845_v41 }
 0x36c   :  { %v874_v43 = vmul.f32 1.442695, %v865_v42 }
 0x36e   :  { %5770 = vpow2.f32 %v874_v43  ;;  %v1187_v43 = vunpack.c.l.b16 %v6513_v16 }
 0x371   :  { %v848_v46 = vpop.xlane.xlu2 %847 }
 0x372   :  { %v866_v47 = vsub.f32 %v715_v9, %v848_v46  ;;  %v6631_v46 = vpack.c.b16 %v1187_v43, %v1187_v43 }
 0x374   :  { %v6581_v49 = vpop.eup %5770  ;;  %v876_v54 = vmul.f32 1.442695, %v866_v47  ;;  %v1239_v47 = vunpack.c.l.b16 %v6530_v37 }
 0x375   :  { %v891_v58 = vsel %vm839_vm10, %v6581_v49, 0.0 }
 0x376   :  { %5772 = vpow2.f32 %v876_v54  ;;  %892 = vadd.xlane.f32.xlu1 %v891_v58  ;;  %v6636_v54 = vpack.c.b16 %v1239_v47, %v1239_v47 }
 0x37c   :  { %v6585_v12 = vpop.eup %5772 }
 0x37d   :  { %v894_v59 = vsel %vm839_vm10, %v6585_v12, 0.0 }
 0x37e   :  { %895 = vadd.xlane.f32.xlu1 %v894_v59  ;;  %v1291_v59 = vunpack.c.l.b16 %v6545_v50 }
 0x380   :  { %v6646_v37 = vpack.c.b16 %v1291_v59, %v1291_v59 }
 0x385   :  { %v842_v57 = vpop.xlane.xlu2 %841 }
 0x386   :  { %v864_v63 = vsub.f32 %v667_v13, %v842_v57  ;;  %v1317_v13 = vunpack.c.l.b16 %v6547_v51 }
 0x388   :  { %v872_v1 = vmul.f32 1.442695, %v864_v63  ;;  %v6602_v18 = vpack.c.b16 %v1317_v13, %v1317_v13 }
 0x38a   :  { %5774 = vpow2.f32 %v872_v1 }
 0x38d   :  { %v851_v11 = vpop.xlane.xlu0 %850 }
 0x38e   :  { %v867_v14 = vsub.f32 %v739_v17, %v851_v11 }
 0x38f   :  { %v857_v2 = vpop.xlane.xlu1 %856 }
 0x390   :  { %v6589_v3 = vpop.eup %5774  ;;  %v869_v4 = vsub.f32 %v787_v19, %v857_v2  ;;  %v878_v19 = vmul.f32 1.442695, %v867_v14  ;;  %v1171_v2 = vsel %vm651_vm8, %v6559_v60, 0  ;;  %v1145_v14 = vsel %vm651_vm8, %v6526_v34, 0 }
 0x391   :  { %v888_v5 = vsel %vm839_vm10, %v6589_v3, 0.0 }
 0x392   :  { %v882_v6 = vmul.f32 1.442695, %v869_v4  ;;  %889 = vadd.xlane.f32.xlu0 %v888_v5  ;;  %v1197_v5 = vsel %vm651_vm8, %v6541_v45, 0 }
 0x394   :  { %5776 = vpow2.f32 %v882_v6 }
 0x395   :  { %5778 = vpow2.f32 %v878_v19 }
 0x397   :  { %1321 = vrot.lane.b32.xlu1 %v6463_v62, %s6162_s30 }
 0x398   :  { %v860_v15 = vpop.xlane.xlu2 %859 }
 0x399   :  { %v870_v21 = vsub.f32 %v811_v24, %v860_v15 }
 0x39a   :  { %v6595_v9 = vpop.eup %5776 }
 0x39b   :  { %v903_v10 = vsel %vm839_vm10, %v6595_v9, 0.0  ;;  %v884_v25 = vmul.f32 1.442695, %v870_v21  ;;  %v6611_v51 = vpop.eup %5778 }
 0x39c   :  { %904 = vadd.xlane.f32.xlu2 %v903_v10  ;;  %v897_v32 = vsel %vm839_vm10, %v6611_v51, 0.0 }
 0x39d   :  { %v863_v28 = vpop.xlane.xlu0 %862  ;;  %5780 = vpow2.f32 %v884_v25 }
 0x39e   :  { %v871_v17 = vsub.f32 %v835_v29, %v863_v28 }
 0x3a0   :  { %v854_v30 = vpop.xlane.xlu2 %853  ;;  %v886_v38 = vmul.f32 1.442695, %v871_v17  ;;  %v1223_v17 = vsel %vm651_vm8, %v6549_v53, 0 }
 0x3a1   :  { %v868_v31 = vsub.f32 %v6568_v22, %v854_v30 }
 0x3a2   :  { %5782 = vpow2.f32 %v886_v38 }
 0x3a3   :  { %v880_v24 = vmul.f32 1.442695, %v868_v31  ;;  %v6618_v33 = vpop.eup %5780 }
 0x3a4   :  { %v906_v29 = vsel %vm839_vm10, %v6618_v33, 0.0 }
 0x3a5   :  { %5784 = vpow2.f32 %v880_v24 }
 0x3a6   :  { %1243 = vrot.lane.b32.xlu0 %v6446_v55, %s6162_s30 }
 0x3a8   :  { %v6622_v35 = vpop.eup %5782  ;;  %v1164_v6 = vpop.permute.xlu2 %1163 }
 0x3a9   :  { %v909_v41 = vsel %vm839_vm10, %v6622_v35, 0.0 }
 0x3ab   :  { %v6624_v22 = vpop.eup %5784 }
 0x3ac   :  { %v900_v42 = vsel %vm839_vm10, %v6624_v22, 0.0 }
 0x3b4   :  { %1319 = vrot.lane.b32.xlu2 %v6602_v18, %s6163_s6 }
 0x3bc   :  { %1267 = vrot.lane.b32.xlu2 %v6607_v23, %s6163_s6 }
 0x3c1   :  { %898 = vadd.xlane.f32.xlu1 %v897_v32 }
 0x3c4   :  { %1501 = vrot.lane.b32.xlu2 %v6440_v52, %s6164_s12 }
 0x3c9   :  { %907 = vadd.xlane.f32.xlu1 %v906_v29 }
 0x3d0   :  { %910 = vadd.xlane.f32.xlu0 %v909_v41 }
 0x3d1   :  { %901 = vadd.xlane.f32.xlu1 %v900_v42 }
 0x3e4   :  { %1189 = vrot.lane.b32.xlu0 %v6631_v46, %s6163_s6 }
 0x3e9   :  { %v893_v58 = vpop.xlane.xlu1 %892 }
 0x3ea   :  { %5786 = vrcp.f32 %v893_v58  ;;  %1241 = vrot.lane.b32.xlu1 %v6636_v54, %s6163_s6 }
 0x3ec   :  { %1269 = vrot.lane.b32.xlu0 %v6461_v61, %s6162_s30 }
 0x3f0   :  { %v5787_v16 = vpop.eup %5786 }
 0x3f1   :  { %v921_v57 = vmul.f32 %v5787_v16, %v6581_v49  ;;  %v896_v63 = vpop.xlane.xlu1 %895 }
 0x3f2   :  { %5788 = vrcp.f32 %v896_v63  ;;  %1295 = vrot.lane.b32.xlu1 %v6471_v0, %s6162_s30 }
 0x3f3   :  { %v929_v1 = vpack.c.bf16 %v921_v57, %v921_v57 }
 0x3f4   :  { %1293 = vrot.lane.b32.xlu0 %v6646_v37, %s6163_s6 }
 0x3f5   :  { %5433 = vmatmul.msk.bf16.vlgmr.msra.gmra.mxu0 %vm938_vm11, %v929_v1 }
 0x3f6   :  { %1180 = vmatpush.bf16.xpose.msra.mxu0 %v1171_v2 }
 0x3f8   :  { %v5789_v50 = vpop.eup %5788 }
 0x3f9   :  { %v922_v49 = vmul.f32 %v5789_v50, %v6585_v12 }
 0x3fa   :  { %1438 = vrot.lane.b32.xlu1 %v6420_v40, %s6164_s12 }
 0x3fb   :  { %v930_v4 = vpack.c.bf16 %v922_v49, %v922_v49 }
 0x3fc   :  { %1459 = vrot.lane.b32.xlu0 %v6424_v44, %s6164_s12 }
 0x3fd   :  { %5434 = vmatmul.msk.bf16.vlgmr.msra.gmra.mxu1 %vm938_vm11, %v930_v4 }
 0x3fe   :  { %1206 = vmatpush.bf16.xpose.msra.mxu1 %v1197_v5 }
 0x405   :  { %v890_v60 = vpop.xlane.xlu0 %889 }
 0x406   :  { %5790 = vrcp.f32 %v890_v60 }
 0x409   :  { %v1322_v20 = vpop.permute.xlu1 %1321 }
 0x40a   :  { %v1327_v58 = vsel %vm651_vm8, %v1322_v20, 0 }
 0x40c   :  { %v5791_v10 = vpop.eup %5790 }
 0x40d   :  { %v920_v11 = vmul.f32 %v5791_v10, %v6589_v3 }
 0x40f   :  { %v928_v12 = vpack.c.bf16 %v920_v11, %v920_v11  ;;  %v905_v13 = vpop.xlane.xlu2 %904 }
 0x410   :  { %5792 = vrcp.f32 %v905_v13 }
 0x411   :  { %5432 = vmatmul.msk.bf16.vlgmr.msra.gmra.mxu3 %vm938_vm11, %v928_v12 }
 0x412   :  { %1154 = vmatpush.bf16.xpose.msra.mxu3 %v1145_v14 }
 0x416   :  { %v5793_v15 = vpop.eup %5792 }
 0x417   :  { %v925_v45 = vmul.f32 %v5793_v15, %v6595_v9 }
 0x418   :  { %v1244_v25 = vpop.permute.xlu0 %1243 }
 0x419   :  { %v933_v19 = vpack.c.bf16 %v925_v45, %v925_v45  ;;  %v1249_v59 = vsel %vm651_vm8, %v1244_v25, 0 }
 0x41b   :  { %5437 = vmatmul.msk.bf16.vlgmr.msrb.gmra.mxu0 %vm938_vm11, %v933_v19 }
 0x42b   :  { %5441 = vmatmul.msk.bf16.vlgmr.msra.gmra.mxu0 %vm651_vm8, %v1164_v6 }
 0x434   :  { %v899_v21 = vpop.xlane.xlu1 %898 }
 0x435   :  { %5794 = vrcp.f32 %v899_v21 }
 0x43b   :  { %v5795_v3 = vpop.eup %5794 }
 0x43c   :  { %v923_v28 = vmul.f32 %v5795_v3, %v6611_v51  ;;  %v908_v30 = vpop.xlane.xlu1 %907  ;;  %v1320_v51 = vpop.permute.xlu2 %1319 }
 0x43d   :  { %5796 = vrcp.f32 %v908_v30 }
 0x43e   :  { %v931_v34 = vpack.c.bf16 %v923_v28, %v923_v28 }
 0x440   :  { %5435 = vmatmul.msk.bf16.vlgmr.msrb.gmra.mxu2 %vm938_vm11, %v931_v34 }
 0x441   :  { %1232 = vmatpush.bf16.xpose.msrb.mxu2 %v1223_v17 }
 0x443   :  { %v5797_v9 = vpop.eup %5796  ;;  %v911_v31 = vpop.xlane.xlu0 %910 }
 0x444   :  { %v926_v32 = vmul.f32 %v5797_v9, %v6618_v33  ;;  %5798 = vrcp.f32 %v911_v31  ;;  %v902_v38 = vpop.xlane.xlu1 %901  ;;  %v1268_v33 = vpop.permute.xlu2 %1267 }
 0x445   :  { %5800 = vrcp.f32 %v902_v38 }
 0x446   :  { %v934_v24 = vpack.c.bf16 %v926_v32, %v926_v32 }
 0x448   :  { %5438 = vmatmul.msk.bf16.vlgmr.msrb.gmra.mxu1 %vm938_vm11, %v934_v24 }
 0x44a   :  { %v5799_v29 = vpop.eup %5798 }
 0x44b   :  { %v5801_v41 = vpop.eup %5800  ;;  %v927_v42 = vmul.f32 %v5799_v29, %v6622_v35 }
 0x44c   :  { %v924_v53 = vmul.f32 %v5801_v41, %v6624_v22  ;;  %v1502_v35 = vpop.permute.xlu2 %1501 }
 0x44d   :  { %v935_v43 = vpack.c.bf16 %v927_v42, %v927_v42  ;;  %v1507_v1 = vsel %vm942_vm9, %v1502_v35, 0 }
 0x44e   :  { %v932_v47 = vpack.c.bf16 %v924_v53, %v924_v53 }
 0x450   :  { %5436 = vmatmul.msk.bf16.vlgmr.msrb.gmra.mxu3 %vm938_vm11, %v932_v47  ;;  %5439 = vmatmul.msk.bf16.vlgmr.msra.gmra.mxu2 %vm938_vm11, %v935_v43 }
 0x451   :  { %1258 = vmatpush.bf16.xpose.msrb.mxu3 %v1249_v59  ;;  %1336 = vmatpush.bf16.xpose.msra.mxu2 %v1327_v58 }
 0x456   :  { %v1190_v16 = vpop.permute.xlu0 %1189 }
 0x458   :  { %5442 = vmatmul.msk.bf16.vlgmr.msra.gmra.mxu1 %vm651_vm8, %v1190_v16 }
 0x45c   :  { %v1242_v57 = vpop.permute.xlu1 %1241 }
 0x45e   :  { %v1270_v63 = vpop.permute.xlu0 %1269 }
 0x45f   :  { %v1275_v22 = vsel %vm651_vm8, %v1270_v63, 0 }
 0x460   :  { %5440 = vmatmul.msk.bf16.vlgmr.msra.gmra.mxu3 %vm651_vm8, %v6579_v39  ;;  %5443 = vmatmul.msk.bf16.vlgmr.msrb.gmra.mxu2 %vm651_vm8, %v6557_v48 }
 0x461   :  { %1284 = vmatpush.bf16.xpose.msrb.mxu0 %v1275_v22  ;;  %1516 = vmatpush.bf16.msrb.mxu2 %v1507_v1 }
 0x464   :  { %v1296_v2 = vpop.permute.xlu1 %1295 }
 0x465   :  { %v1301_v50 = vsel %vm651_vm8, %v1296_v2, 0 }
 0x466   :  { %v1294_v49 = vpop.permute.xlu0 %1293  ;;  %1310 = vmatpush.bf16.xpose.msrb.mxu1 %v1301_v50 }
 0x468   :  { %5445 = vmatmul.msk.bf16.vlgmr.msrb.gmra.mxu0 %vm651_vm8, %v1268_v33 }
 0x46c   :  { %v1439_v4 = vpop.permute.xlu1 %1438 }
 0x46d   :  { %v1444_v5 = vsel %vm942_vm9, %v1439_v4, 0  ;;  %5446 = vmatmul.msk.bf16.vlgmr.msrb.gmra.mxu1 %vm651_vm8, %v1294_v49 }
 0x46e   :  { %v1460_v60 = vpop.permute.xlu0 %1459  ;;  %1453 = vmatpush.bf16.msra.mxu3 %v1444_v5 }
 0x46f   :  { %v1465_v39 = vsel %vm942_vm9, %v1460_v60, 0 }
 0x470   :  { %5444 = vmatmul.msk.bf16.vlgmr.msrb.gmra.mxu3 %vm651_vm8, %v1242_v57  ;;  %5447 = vmatmul.msk.bf16.vlgmr.msra.gmra.mxu2 %vm651_vm8, %v1320_v51 }
 0x471   :  { %1474 = vmatpush.bf16.msra.mxu0 %v1465_v39 }
 0x472   :  { %v976_v48 = vpop.f32.mrf.mxu0 }
 0x473   :  { %1116 = vst [vmem:[#allocation1 + $0x1] ss:$4 sm:$0xff] %v976_v48 }
 0x47a   :  { %v978_v6 = vpop.f32.mrf.mxu0  ;;  %v997_v10 = vpop.f32.mrf.mxu1 }
 0x47b   :  { %1118 = vst [vmem:[#allocation1 + $0x2] ss:$4 sm:$0xff] %v997_v10 }
 0x482   :  { %v999_v11 = vpop.f32.mrf.mxu1 }
 0x494   :  { %v955_v12 = vpop.f32.mrf.mxu3 }
 0x495   :  { %1114 = vst [vmem:[#allocation1] ss:$4 sm:$0xff] %v955_v12 }
 0x498   :  { %v1060_v13 = vpop.f32.mrf.mxu0 }
 0x499   :  { %1124 = vst [vmem:[#allocation1 + $0x21] ss:$4 sm:$0xff] %v1060_v13 }
 0x49c   :  { %v957_v14 = vpop.f32.mrf.mxu3 }
 0x4a0   :  { %v1062_v15 = vpop.f32.mrf.mxu0 }
 0x4a8   :  { %v1182_v45 = vpop.f32.mrf.mxu0 }
 0x4a9   :  { %v1345_v19 = vsel %vm839_vm10, %v1182_v45, -inf }
 0x4aa   :  { %1346 = vmax.xlane.f32.xlu0 %v1345_v19 }
 0x4b0   :  { %v1184_v20 = vpop.f32.mrf.mxu0 }
 0x4c3   :  { %v1018_v21 = vpop.f32.mrf.mxu2 }
 0x4c4   :  { %1120 = vst [vmem:[#allocation1 + $0x3] ss:$4 sm:$0xff] %v1018_v21 }
 0x4c5   :  { %v1081_v3 = vpop.f32.mrf.mxu1 }
 0x4c6   :  { %1126 = vst [vmem:[#allocation1 + $0x22] ss:$4 sm:$0xff] %v1081_v3 }
 0x4cb   :  { %v1020_v25 = vpop.f32.mrf.mxu2 }
 0x4cd   :  { %v1083_v28 = vpop.f32.mrf.mxu1 }
 0x4d3   :  { %v1039_v30 = vpop.f32.mrf.mxu3  ;;  %v1102_v34 = vpop.f32.mrf.mxu2 }
 0x4d4   :  { %1122 = vst [vmem:[#allocation1 + $0x20] ss:$4 sm:$0xff] %v1039_v30 }
 0x4d5   :  { %1128 = vst [vmem:[#allocation1 + $0x23] ss:$4 sm:$0xff] %v1102_v34  ;;  %v1208_v17 = vpop.f32.mrf.mxu1 }
 0x4d6   :  { %v1348_v9 = vsel %vm839_vm10, %v1208_v17, -inf }
 0x4d7   :  { %1349 = vmax.xlane.f32.xlu1 %v1348_v9 }
 0x4db   :  { %v1041_v31 = vpop.f32.mrf.mxu3  ;;  %v1104_v32 = vpop.f32.mrf.mxu2 }
 0x4dd   :  { %v1210_v38 = vpop.f32.mrf.mxu1 }
 0x4e3   :  { %v1156_v24 = vpop.f32.mrf.mxu3  ;;  %v1234_v51 = vpop.f32.mrf.mxu2 }
 0x4e4   :  { %v1351_v29 = vsel %vm839_vm10, %v1234_v51, -inf  ;;  %v1342_v41 = vsel %vm839_vm10, %v1156_v24, -inf }
 0x4e5   :  { %v6698_v42 = vpop.f32.mrf.mxu0  ;;  %1352 = vmax.xlane.f32.xlu2 %v1351_v29  ;;  %1343 = vmax.xlane.f32.xlu1 %v1342_v41 }
 0x4e6   :  { %v1357_v49 = vsel %vm839_vm10, %v6698_v42, -inf }
 0x4ea   :  { %v1312_v53 = vpop.f32.mrf.mxu1 }
 0x4eb   :  { %v1158_v43 = vpop.f32.mrf.mxu3  ;;  %v1236_v47 = vpop.f32.mrf.mxu2  ;;  %v1360_v58 = vsel %vm839_vm10, %v1312_v53, -inf }
 0x4ed   :  { %v1288_v59 = vpop.f32.mrf.mxu0  ;;  %1361 = vmax.xlane.f32.xlu2 %v1360_v58 }
 0x4f2   :  { %v1314_v33 = vpop.f32.mrf.mxu1 }
 0x4f3   :  { %v1260_v16 = vpop.f32.mrf.mxu3  ;;  %v1338_v57 = vpop.f32.mrf.mxu2 }
 0x4f4   :  { %v1354_v35 = vsel %vm839_vm10, %v1260_v16, -inf  ;;  %v1363_v63 = vsel %vm839_vm10, %v1338_v57, -inf }
 0x4f5   :  { %1355 = vmax.xlane.f32.xlu2 %v1354_v35  ;;  %1364 = vmax.xlane.f32.xlu0 %v1363_v63 }
 0x4fb   :  { %v1262_v22 = vpop.f32.mrf.mxu3  ;;  %v1340_v1 = vpop.f32.mrf.mxu2 }
 0x4fe   :  { %1480 = vrot.lane.b32.xlu1 %v6448_v56, %s6164_s12 }
 0x50d   :  { %1522 = vrot.lane.b32.xlu2 %v6446_v55, %s6164_s12 }
 0x51d   :  { %v1347_v2 = vpop.xlane.xlu0 %1346 }
 0x51e   :  { %v1367_v50 = vsub.f32 %v1182_v45, %v1347_v2 }
 0x520   :  { %v1376_v4 = vmul.f32 1.442695, %v1367_v50 }
 0x522   :  { %5802 = vpow2.f32 %v1376_v4 }
 0x528   :  { %1358 = vmax.xlane.f32.xlu1 %v1357_v49  ;;  %v6709_v5 = vpop.eup %5802 }
 0x529   :  { %v1393_v60 = vsel %vm839_vm10, %v6709_v5, 0.0 }
 0x536   :  { %1394 = vadd.xlane.f32.xlu2 %v1393_v60 }
 0x54a   :  { %v1350_v39 = vpop.xlane.xlu1 %1349 }
 0x54b   :  { %v1368_v48 = vsub.f32 %v1208_v17, %v1350_v39 }
 0x54d   :  { %v1378_v6 = vmul.f32 1.442695, %v1368_v48 }
 0x54f   :  { %5804 = vpow2.f32 %v1378_v6 }
 0x555   :  { %v6713_v10 = vpop.eup %5804 }
 0x556   :  { %v1396_v11 = vsel %vm839_vm10, %v6713_v10, 0.0 }
 0x557   :  { %1397 = vadd.xlane.f32.xlu0 %v1396_v11 }
 0x558   :  { %v1353_v12 = vpop.xlane.xlu2 %1352  ;;  %v1344_v13 = vpop.xlane.xlu1 %1343 }
 0x559   :  { %v1369_v14 = vsub.f32 %v1234_v51, %v1353_v12  ;;  %v1366_v15 = vsub.f32 %v1156_v24, %v1344_v13 }
 0x55b   :  { %v1380_v45 = vmul.f32 1.442695, %v1369_v14  ;;  %v1374_v19 = vmul.f32 1.442695, %v1366_v15 }
 0x55d   :  { %5806 = vpow2.f32 %v1380_v45 }
 0x55e   :  { %5808 = vpow2.f32 %v1374_v19 }
 0x560   :  { %v1362_v20 = vpop.xlane.xlu2 %1361 }
 0x561   :  { %v1372_v21 = vsub.f32 %v1312_v53, %v1362_v20 }
 0x563   :  { %v6717_v3 = vpop.eup %5806  ;;  %v1386_v25 = vmul.f32 1.442695, %v1372_v21 }
 0x564   :  { %v6719_v28 = vpop.eup %5808  ;;  %v1399_v30 = vsel %vm839_vm10, %v6717_v3, 0.0 }
 0x565   :  { %5810 = vpow2.f32 %v1386_v25  ;;  %v1390_v34 = vsel %vm839_vm10, %v6719_v28, 0.0  ;;  %1400 = vadd.xlane.f32.xlu1 %v1399_v30 }
 0x566   :  { %1391 = vadd.xlane.f32.xlu0 %v1390_v34 }
 0x568   :  { %v1356_v17 = vpop.xlane.xlu2 %1355  ;;  %v1365_v9 = vpop.xlane.xlu0 %1364 }
 0x569   :  { %v1370_v31 = vsub.f32 %v1260_v16, %v1356_v17  ;;  %v1373_v32 = vsub.f32 %v1338_v57, %v1365_v9 }
 0x56b   :  { %v6725_v38 = vpop.eup %5810  ;;  %v1382_v24 = vmul.f32 1.442695, %v1370_v31  ;;  %v1388_v51 = vmul.f32 1.442695, %v1373_v32 }
 0x56c   :  { %v1408_v29 = vsel %vm839_vm10, %v6725_v38, 0.0 }
 0x56d   :  { %5812 = vpow2.f32 %v1382_v24 }
 0x56e   :  { %5814 = vpow2.f32 %v1388_v51  ;;  %1409 = vadd.xlane.f32.xlu0 %v1408_v29 }
 0x570   :  { %v1523_v41 = vpop.permute.xlu2 %1522  ;;  %v1481_v53 = vpop.permute.xlu1 %1480 }
 0x571   :  { %v1528_v43 = vsel %vm942_vm9, %v1523_v41, 0  ;;  %v1486_v47 = vsel %vm942_vm9, %v1481_v53, 0  ;;  %v553_v53 = vld [vmem:[%s7836_s15 + $0x4] sm:$0xf] }
 0x572   :  { %1495 = vmatpush.bf16.msra.mxu1 %v1486_v47  ;;  %1537 = vmatpush.bf16.msrb.mxu3 %v1528_v43  ;;  %v1638_v47 = vsel %vm300_vm0, %v553_v53, 0 }
 0x573   :  { %v6731_v58 = vpop.eup %5812 }
 0x574   :  { %v6733_v59 = vpop.eup %5814  ;;  %v1402_v33 = vsel %vm839_vm10, %v6731_v58, 0.0 }
 0x575   :  { %v1411_v16 = vsel %vm839_vm10, %v6733_v59, 0.0 }
 0x576   :  { %1403 = vadd.xlane.f32.xlu0 %v1402_v33  ;;  %1412 = vadd.xlane.f32.xlu2 %v1411_v16 }
 0x58a   :  { %1543 = vrot.lane.b32.xlu0 %v6461_v61, %s6164_s12 }
 0x58e   :  { %1564 = vrot.lane.b32.xlu2 %v6471_v0, %s6164_s12 }
 0x592   :  { %1699 = vrot.lane.b32.xlu0 %v6424_v44, %s6165_s20 }
 0x596   :  { %1697 = vrot.lane.b32.xlu2 %v6575_v36, %s6166_s27 }
 0x59a   :  { %1720 = vrot.lane.b32.xlu0 %v6631_v46, %s6166_s27 }
 0x59b   :  { %v1359_v57 = vpop.xlane.xlu1 %1358 }
 0x59c   :  { %v1371_v35 = vsub.f32 %v6698_v42, %v1359_v57 }
 0x59e   :  { %v1384_v63 = vmul.f32 1.442695, %v1371_v35  ;;  %1745 = vrot.lane.b32.xlu2 %v6440_v52, %s6165_s20 }
 0x5a0   :  { %5816 = vpow2.f32 %v1384_v63 }
 0x5a2   :  { %1791 = vrot.lane.b32.xlu0 %v6461_v61, %s6165_s20 }
 0x5a6   :  { %v6754_v22 = vpop.eup %5816  ;;  %1674 = vrot.lane.b32.xlu2 %v6487_v8, %s6166_s27 }
 0x5a7   :  { %v1405_v1 = vsel %vm839_vm10, %v6754_v22, 0.0 }
 0x5a8   :  { %1406 = vadd.xlane.f32.xlu1 %v1405_v1 }
 0x5a9   :  { %v1395_v2 = vpop.xlane.xlu2 %1394 }
 0x5aa   :  { %1743 = vrot.lane.b32.xlu0 %v6485_v7, %s6166_s27  ;;  %5818 = vrcp.f32 %v1395_v2 }
 0x5ae   :  { %1812 = vrot.lane.b32.xlu2 %v6646_v37, %s6166_s27 }
 0x5b0   :  { %v5819_v42 = vpop.eup %5818 }
 0x5b1   :  { %v1423_v50 = vmul.f32 %v5819_v42, %v6709_v5 }
 0x5b2   :  { %1768 = vrot.lane.b32.xlu0 %v6446_v55, %s6165_s20 }
 0x5b3   :  { %v1431_v49 = vpack.c.bf16 %v1423_v50, %v1423_v50  ;;  %v1129_v50 = vld.sshfl [vmem:[#allocation1] sm:$0xff pattern:$0x73625140] }
 0x5b5   :  { %5449 = vmatmul.msk.bf16.vlgmr.msra.gmra.mxu0 %vm938_vm11, %v1431_v49  ;;  %v1130_v49 = vld.sshfl [vmem:[#allocation1 + $0x20] sm:$0xff pattern:$0x73625140] }
 0x5b6   :  { %1766 = vrot.lane.b32.xlu2 %v6636_v54, %s6166_s27 }
 0x5ba   :  { %1835 = vrot.lane.b32.xlu0 %v6602_v18, %s6166_s27 }
 0x5be   :  { %1975 = vrot.lane.b32.xlu2 %v6424_v44, %s6167_s11 }
 0x5c1   :  { %1585 = vrot.lane.b32.xlu1 %v6463_v62, %s6164_s12 }
 0x5c9   :  { %1722 = vrot.lane.b32.xlu1 %v6448_v56, %s6165_s20 }
 0x5ca   :  { %v1398_v4 = vpop.xlane.xlu0 %1397 }
 0x5cb   :  { %5820 = vrcp.f32 %v1398_v4 }
 0x5d1   :  { %v5821_v5 = vpop.eup %5820  ;;  %1676 = vrot.lane.b32.xlu1 %v6420_v40, %s6165_s20 }
 0x5d2   :  { %v1424_v60 = vmul.f32 %v5821_v5, %v6713_v10 }
 0x5d4   :  { %v1432_v39 = vpack.c.bf16 %v1424_v60, %v1424_v60 }
 0x5d6   :  { %5450 = vmatmul.msk.bf16.vlgmr.msra.gmra.mxu1 %vm938_vm11, %v1432_v39 }
 0x5d8   :  { %v1401_v48 = vpop.xlane.xlu1 %1400 }
 0x5d9   :  { %v1392_v6 = vpop.xlane.xlu0 %1391  ;;  %5822 = vrcp.f32 %v1401_v48  ;;  %1814 = vrot.lane.b32.xlu1 %v6471_v0, %s6165_s20  ;;  %v1133_v48 = vpack.c.bf16 %v1130_v49, %v1129_v50 }
 0x5da   :  { %5824 = vrcp.f32 %v1392_v6 }
 0x5df   :  { %v5823_v11 = vpop.eup %5822 }
 0x5e0   :  { %v5825_v12 = vpop.eup %5824  ;;  %v1425_v13 = vmul.f32 %v5823_v11, %v6717_v3 }
 0x5e1   :  { %v1422_v14 = vmul.f32 %v5825_v12, %v6719_v28  ;;  %v1410_v15 = vpop.xlane.xlu0 %1409  ;;  %1789 = vrot.lane.b32.xlu1 %v6607_v23, %s6166_s27 }
 0x5e2   :  { %v1433_v10 = vpack.c.bf16 %v1425_v13, %v1425_v13  ;;  %5826 = vrcp.f32 %v1410_v15 }
 0x5e3   :  { %v1430_v45 = vpack.c.bf16 %v1422_v14, %v1422_v14 }
 0x5e4   :  { %5451 = vmatmul.msk.bf16.vlgmr.msrb.gmra.mxu2 %vm938_vm11, %v1433_v10 }
 0x5e5   :  { %5448 = vmatmul.msk.bf16.vlgmr.msra.gmra.mxu3 %vm938_vm11, %v1430_v45 }
 0x5e6   :  { %1647 = vmatpush.bf16.msra.mxu3 %v1638_v47 }
 0x5e8   :  { %v5827_v21 = vpop.eup %5826 }
 0x5e9   :  { %v1413_v19 = vpop.xlane.xlu2 %1412  ;;  %v1404_v20 = vpop.xlane.xlu0 %1403  ;;  %1837 = vrot.lane.b32.xlu1 %v6463_v62, %s6165_s20  ;;  %v1428_v3 = vmul.f32 %v5827_v21, %v6725_v38  ;;  %v552_v38 = vld [vmem:[%s7836_s15] sm:$0xf] }
 0x5ea   :  { %5828 = vrcp.f32 %v1404_v20  ;;  %v1658_v24 = vsel %vm300_vm0, %v552_v38, 0 }
 0x5eb   :  { %v1436_v17 = vpack.c.bf16 %v1428_v3, %v1428_v3 }
 0x5f0   :  { %v5829_v25 = vpop.eup %5828 }
 0x5f1   :  { %v1565_v28 = vpop.permute.xlu2 %1564  ;;  %1996 = vrot.lane.b32.xlu1 %v6448_v56, %s6167_s11  ;;  %v1426_v30 = vmul.f32 %v5829_v25, %v6731_v58 }
 0x5f2   :  { %v1570_v34 = vsel %vm942_vm9, %v1565_v28, 0 }
 0x5f3   :  { %1579 = vmatpush.bf16.msrb.mxu1 %v1570_v34  ;;  %v1434_v9 = vpack.c.bf16 %v1426_v30, %v1426_v30 }
 0x5f5   :  { %5452 = vmatmul.msk.bf16.vlgmr.msrb.gmra.mxu3 %vm938_vm11, %v1434_v9 }
 0x5f6   :  { %5454 = vmatmul.msk.bf16.vlgmr.msrb.gmra.mxu1 %vm938_vm11, %v1436_v17 }
 0x5f9   :  { %v1698_v51 = vpop.permute.xlu2 %1697 }
 0x5fc   :  { %v1544_v31 = vpop.permute.xlu0 %1543 }
 0x5fd   :  { %v1549_v32 = vsel %vm942_vm9, %v1544_v31, 0 }
 0x5fe   :  { %1558 = vmatpush.bf16.msrb.mxu0 %v1549_v32 }
 0x601   :  { %v1746_v43 = vpop.permute.xlu2 %1745 }
 0x602   :  { %1667 = vmatpush.bf16.msra.mxu0 %v1658_v24  ;;  %v1751_v35 = vsel %vm651_vm8, %v1746_v43, 0 }
 0x604   :  { %v1700_v29 = vpop.permute.xlu0 %1699 }
 0x605   :  { %v1705_v39 = vsel %vm651_vm8, %v1700_v29, 0 }
 0x609   :  { %v1675_v63 = vpop.permute.xlu2 %1674 }
 0x60c   :  { %v6805_v16 = vpop.permute.xlu0 %1720 }
 0x611   :  { %v6809_v42 = vpop.permute.xlu2 %1812 }
 0x614   :  { %v1792_v1 = vpop.permute.xlu0 %1791 }
 0x615   :  { %v1797_v11 = vsel %vm651_vm8, %v1792_v1, 0 }
 0x619   :  { %v1767_v13 = vpop.permute.xlu2 %1766 }
 0x61b   :  { %v1407_v41 = vpop.xlane.xlu1 %1406 }
 0x61c   :  { %5830 = vrcp.f32 %v1407_v41  ;;  %v1744_v12 = vpop.permute.xlu0 %1743 }
 0x61d   :  { %5832 = vrcp.f32 %v1413_v19 }
 0x621   :  { %v1976_v20 = vpop.permute.xlu2 %1975 }
 0x622   :  { %v5831_v58 = vpop.eup %5830  ;;  %v1981_v3 = vsel %vm942_vm9, %v1976_v20, 0 }
 0x623   :  { %v1427_v33 = vmul.f32 %v5831_v58, %v6754_v22  ;;  %v5833_v2 = vpop.eup %5832 }
 0x624   :  { %v1429_v4 = vmul.f32 %v5833_v2, %v6733_v59  ;;  %v1769_v10 = vpop.permute.xlu0 %1768 }
 0x625   :  { %v1435_v57 = vpack.c.bf16 %v1427_v33, %v1427_v33  ;;  %v1774_v21 = vsel %vm651_vm8, %v1769_v10, 0 }
 0x626   :  { %v1437_v6 = vpack.c.bf16 %v1429_v4, %v1429_v4 }
 0x627   :  { %5453 = vmatmul.msk.bf16.vlgmr.msrb.gmra.mxu0 %vm938_vm11, %v1435_v57 }
 0x628   :  { %1760 = vmatpush.bf16.xpose.msrb.mxu0 %v1751_v35 }
 0x62c   :  { %v1836_v31 = vpop.permute.xlu0 %1835 }
 0x632   :  { %v1476_v5 = vpop.f32.mrf.mxu0 }
 0x633   :  { %1616 = vst [vmem:[#allocation1 + $0x1] ss:$4 sm:$0xff] %v1476_v5  ;;  %v1586_v22 = vpop.permute.xlu1 %1585 }
 0x634   :  { %v1591_v60 = vsel %vm942_vm9, %v1586_v22, 0 }
 0x635   :  { %1600 = vmatpush.bf16.msra.mxu2 %v1591_v60 }
 0x637   :  { %5457 = vmatmul.msk.bf16.vlgmr.msra.gmra.mxu0 %vm651_vm8, %v1133_v48 }
 0x638   :  { %5455 = vmatmul.msk.bf16.vlgmr.msra.gmra.mxu2 %vm938_vm11, %v1437_v6 }
 0x639   :  { %1714 = vmatpush.bf16.xpose.msrb.mxu2 %v1705_v39 }
 0x63a   :  { %v1478_v59 = vpop.f32.mrf.mxu0 }
 0x63b   :  { %v1723_v14 = vpop.permute.xlu1 %1722 }
 0x63c   :  { %v1728_v15 = vsel %vm651_vm8, %v1723_v14, 0 }
 0x63d   :  { %1737 = vmatpush.bf16.xpose.msrb.mxu3 %v1728_v15 }
 0x641   :  { %1806 = vmatpush.bf16.xpose.msra.mxu2 %v1797_v11 }
 0x643   :  { %v1677_v45 = vpop.permute.xlu1 %1676 }
 0x644   :  { %v1682_v19 = vsel %vm651_vm8, %v1677_v45, 0 }
 0x645   :  { %1691 = vmatpush.bf16.xpose.msra.mxu1 %v1682_v19 }
 0x647   :  { %5461 = vmatmul.msk.bf16.vlgmr.msrb.gmra.mxu0 %vm651_vm8, %v1744_v12 }
 0x648   :  { %5459 = vmatmul.msk.bf16.vlgmr.msrb.gmra.mxu2 %vm651_vm8, %v1698_v51 }
 0x649   :  { %1990 = vmatpush.bf16.msrb.mxu2 %v1981_v3 }
 0x64b   :  { %v1815_v25 = vpop.permute.xlu1 %1814 }
 0x64c   :  { %5458 = vmatmul.msk.bf16.vlgmr.msra.gmra.mxu1 %vm651_vm8, %v1675_v63  ;;  %v1820_v5 = vsel %vm651_vm8, %v1815_v25, 0 }
 0x64d   :  { %1783 = vmatpush.bf16.xpose.msrb.mxu1 %v1774_v21 }
 0x653   :  { %v1497_v28 = vpop.f32.mrf.mxu1  ;;  %v1790_v30 = vpop.permute.xlu1 %1789 }
 0x654   :  { %1618 = vst [vmem:[#allocation1 + $0x2] ss:$4 sm:$0xff] %v1497_v28 }
 0x658   :  { %5463 = vmatmul.msk.bf16.vlgmr.msra.gmra.mxu2 %vm651_vm8, %v1790_v30 }
 0x65b   :  { %v1499_v34 = vpop.f32.mrf.mxu1  ;;  %v1838_v17 = vpop.permute.xlu1 %1837 }
 0x65c   :  { %v1843_v9 = vsel %vm651_vm8, %v1838_v17, 0  ;;  %5462 = vmatmul.msk.bf16.vlgmr.msrb.gmra.mxu1 %vm651_vm8, %v1767_v13 }
 0x65d   :  { %1852 = vmatpush.bf16.xpose.msra.mxu0 %v1843_v9 }
 0x663   :  { %v1997_v12 = vpop.permute.xlu1 %1996 }
 0x664   :  { %5465 = vmatmul.msk.bf16.vlgmr.msra.gmra.mxu0 %vm651_vm8, %v1836_v31  ;;  %v2002_v13 = vsel %vm942_vm9, %v1997_v12, 0 }
 0x667   :  { %v1518_v32 = vpop.f32.mrf.mxu2 }
 0x668   :  { %v1455_v38 = vpop.f32.mrf.mxu3  ;;  %1620 = vst [vmem:[#allocation1 + $0x3] ss:$4 sm:$0xff] %v1518_v32 }
 0x669   :  { %1614 = vst [vmem:[#allocation1] ss:$4 sm:$0xff] %v1455_v38 }
 0x66f   :  { %v1520_v24 = vpop.f32.mrf.mxu2 }
 0x670   :  { %v1457_v51 = vpop.f32.mrf.mxu3  ;;  %v1629_v63 = vld.sshfl [vmem:[#allocation1] sm:$0xff pattern:$0x73625140] }
 0x673   :  { %v1581_v29 = vpop.f32.mrf.mxu1 }
 0x674   :  { %1626 = vst [vmem:[#allocation1 + $0x22] ss:$4 sm:$0xff] %v1581_v29 }
 0x678   :  { %v1539_v41 = vpop.f32.mrf.mxu3 }
 0x679   :  { %1622 = vst [vmem:[#allocation1 + $0x20] ss:$4 sm:$0xff] %v1539_v41 }
 0x67b   :  { %v1583_v53 = vpop.f32.mrf.mxu1 }
 0x680   :  { %v1541_v43 = vpop.f32.mrf.mxu3 }
 0x6a4   :  { %v1560_v47 = vpop.f32.mrf.mxu0 }
 0x6a5   :  { %1624 = vst [vmem:[#allocation1 + $0x21] ss:$4 sm:$0xff] %v1560_v47 }
 0x6ac   :  { %v1562_v58 = vpop.f32.mrf.mxu0 }
 0x6b4   :  { %v6828_v33 = vpop.f32.mrf.mxu0 }
 0x6bb   :  { %v1602_v57 = vpop.f32.mrf.mxu2 }
 0x6bc   :  { %1628 = vst [vmem:[#allocation1 + $0x23] ss:$4 sm:$0xff] %v1602_v57  ;;  %v6830_v35 = vpop.f32.mrf.mxu0 }
 0x6c3   :  { %v1630_v1 = vld.sshfl [vmem:[#allocation1 + $0x20] sm:$0xff pattern:$0x73625140]  ;;  %v1604_v2 = vpop.f32.mrf.mxu2 }
 0x6c4   :  { %v1762_v50 = vpop.f32.mrf.mxu0  ;;  %v1633_v49 = vpack.c.bf16 %v1630_v1, %v1629_v63 }
 0x6c5   :  { %v1867_v4 = vsel %vm839_vm10, %v1762_v50, -inf }
 0x6c6   :  { %5456 = vmatmul.msk.bf16.vlgmr.msra.gmra.mxu3 %vm651_vm8, %v1633_v49  ;;  %1868 = vmax.xlane.f32.xlu2 %v1867_v4 }
 0x6c7   :  { %1829 = vmatpush.bf16.xpose.msra.mxu3 %v1820_v5 }
 0x6c9   :  { %v1693_v22 = vpop.f32.mrf.mxu1 }
 0x6ca   :  { %v1858_v60 = vsel %vm839_vm10, %v1693_v22, -inf }
 0x6cb   :  { %v1716_v39 = vpop.f32.mrf.mxu2  ;;  %1859 = vmax.xlane.f32.xlu0 %v1858_v60 }
 0x6cc   :  { %v1764_v48 = vpop.f32.mrf.mxu0  ;;  %v1861_v6 = vsel %vm839_vm10, %v1716_v39, -inf }
 0x6cd   :  { %1862 = vmax.xlane.f32.xlu1 %v1861_v6 }
 0x6d1   :  { %v1695_v11 = vpop.f32.mrf.mxu1 }
 0x6d3   :  { %v1718_v59 = vpop.f32.mrf.mxu2 }
 0x6d6   :  { %5460 = vmatmul.msk.bf16.vlgmr.msrb.gmra.mxu3 %vm651_vm8, %v6805_v16 }
 0x6d7   :  { %2011 = vmatpush.bf16.msrb.mxu3 %v2002_v13 }
 0x6d9   :  { %v1785_v14 = vpop.f32.mrf.mxu1 }
 0x6da   :  { %v1870_v15 = vsel %vm839_vm10, %v1785_v14, -inf }
 0x6db   :  { %v1808_v10 = vpop.f32.mrf.mxu2  ;;  %1871 = vmax.xlane.f32.xlu2 %v1870_v15 }
 0x6dc   :  { %v1873_v25 = vsel %vm839_vm10, %v1808_v10, -inf }
 0x6e1   :  { %v1787_v45 = vpop.f32.mrf.mxu1  ;;  %v1854_v19 = vpop.f32.mrf.mxu0 }
 0x6e2   :  { %v1879_v20 = vsel %vm839_vm10, %v1854_v19, -inf }
 0x6e3   :  { %v1810_v21 = vpop.f32.mrf.mxu2  ;;  %1880 = vmax.xlane.f32.xlu1 %v1879_v20 }
 0x6e6   :  { %5464 = vmatmul.msk.bf16.vlgmr.msra.gmra.mxu3 %vm651_vm8, %v6809_v42 }
 0x6e9   :  { %v1856_v3 = vpop.f32.mrf.mxu0 }
 0x6eb   :  { %1874 = vmax.xlane.f32.xlu1 %v1873_v25 }
 0x739   :  { %v1869_v16 = vpop.xlane.xlu2 %1868 }
 0x73a   :  { %v1885_v28 = vsub.f32 %v1762_v50, %v1869_v16 }
 0x73c   :  { %v1896_v30 = vmul.f32 1.442695, %v1885_v28 }
 0x73e   :  { %5834 = vpow2.f32 %v1896_v30  ;;  %v1860_v34 = vpop.xlane.xlu0 %1859 }
 0x73f   :  { %v1882_v17 = vsub.f32 %v1693_v22, %v1860_v34 }
 0x740   :  { %v1863_v9 = vpop.xlane.xlu1 %1862 }
 0x741   :  { %v1890_v31 = vmul.f32 1.442695, %v1882_v17  ;;  %v1883_v32 = vsub.f32 %v1716_v39, %v1863_v9 }
 0x743   :  { %5836 = vpow2.f32 %v1890_v31  ;;  %v1892_v38 = vmul.f32 1.442695, %v1883_v32 }
 0x744   :  { %v5835_v24 = vpop.eup %5834 }
 0x745   :  { %5838 = vpow2.f32 %v1892_v38  ;;  %v1915_v51 = vsel %vm839_vm10, %v5835_v24, 0.0 }
 0x746   :  { %1916 = vadd.xlane.f32.xlu0 %v1915_v51 }
 0x749   :  { %v6846_v42 = vpop.eup %5836  ;;  %v6848_v29 = vpop.f32.mrf.mxu3 }
 0x74a   :  { %v1906_v41 = vsel %vm839_vm10, %v6846_v42, 0.0 }
 0x74b   :  { %v5839_v53 = vpop.eup %5838  ;;  %1907 = vadd.xlane.f32.xlu1 %v1906_v41 }
 0x74c   :  { %v1909_v43 = vsel %vm839_vm10, %v5839_v53, 0.0 }
 0x74e   :  { %1910 = vadd.xlane.f32.xlu0 %v1909_v43  ;;  %v1872_v49 = vpop.xlane.xlu2 %1871 }
 0x74f   :  { %v1886_v4 = vsub.f32 %v1785_v14, %v1872_v49 }
 0x751   :  { %v6853_v47 = vpop.f32.mrf.mxu3  ;;  %v1898_v22 = vmul.f32 1.442695, %v1886_v4 }
 0x753   :  { %5840 = vpow2.f32 %v1898_v22 }
 0x756   :  { %v1881_v5 = vpop.xlane.xlu1 %1880 }
 0x757   :  { %v1889_v12 = vsub.f32 %v1854_v19, %v1881_v5 }
 0x759   :  { %v1739_v58 = vpop.f32.mrf.mxu3  ;;  %v6863_v48 = vpop.eup %5840  ;;  %v1904_v59 = vmul.f32 1.442695, %v1889_v12 }
 0x75a   :  { %v1864_v57 = vsel %vm839_vm10, %v1739_v58, -inf  ;;  %v1918_v11 = vsel %vm839_vm10, %v6863_v48, 0.0 }
 0x75b   :  { %1865 = vmax.xlane.f32.xlu2 %v1864_v57 }
 0x75e   :  { %v1875_v60 = vpop.xlane.xlu1 %1874 }
 0x75f   :  { %v1887_v39 = vsub.f32 %v1808_v10, %v1875_v60 }
 0x761   :  { %v1741_v63 = vpop.f32.mrf.mxu3  ;;  %v1900_v6 = vmul.f32 1.442695, %v1887_v39 }
 0x763   :  { %5842 = vpow2.f32 %v1900_v6 }
 0x764   :  { %2059 = vrot.lane.b32.xlu1 %v6461_v61, %s6167_s11  ;;  %5844 = vpow2.f32 %v1904_v59 }
 0x769   :  { %v1831_v1 = vpop.f32.mrf.mxu3  ;;  %v6867_v13 = vpop.eup %5842 }
 0x76a   :  { %v1876_v2 = vsel %vm839_vm10, %v1831_v1, -inf  ;;  %v1921_v14 = vsel %vm839_vm10, %v6867_v13, 0.0  ;;  %v6871_v15 = vpop.eup %5844 }
 0x76b   :  { %1877 = vmax.xlane.f32.xlu0 %v1876_v2  ;;  %v1927_v10 = vsel %vm839_vm10, %v6871_v15, 0.0 }
 0x771   :  { %v1833_v50 = vpop.f32.mrf.mxu3 }
 0x773   :  { %2017 = vrot.lane.b32.xlu2 %v6440_v52, %s6167_s11 }
 0x77f   :  { %1954 = vrot.lane.b32.xlu0 %v6420_v40, %s6167_s11 }
 0x79c   :  { %1919 = vadd.xlane.f32.xlu2 %v1918_v11 }
 0x7a9   :  { %1922 = vadd.xlane.f32.xlu0 %v1921_v14 }
 0x7b1   :  { %1928 = vadd.xlane.f32.xlu0 %v1927_v10 }
 0x7b9   :  { %v1917_v45 = vpop.xlane.xlu0 %1916 }
 0x7be   :  { %v1908_v25 = vpop.xlane.xlu1 %1907 }
 0x7c1   :  { %v1911_v20 = vpop.xlane.xlu0 %1910 }
 0x7c2   :  { %5846 = vrcp.f32 %v1911_v20 }
 0x7c3   :  { %5848 = vrcp.f32 %v1917_v45 }
 0x7c5   :  { %2038 = vrot.lane.b32.xlu0 %v6446_v55, %s6167_s11 }
 0x7c8   :  { %v5847_v19 = vpop.eup %5846 }
 0x7c9   :  { %v1939_v21 = vmul.f32 %v5847_v19, %v5839_v53  ;;  %v5849_v34 = vpop.eup %5848 }
 0x7ca   :  { %v1941_v17 = vmul.f32 %v5849_v34, %v5835_v24 }
 0x7cb   :  { %v1947_v3 = vpack.c.bf16 %v1939_v21, %v1939_v21 }
 0x7cc   :  { %v1949_v41 = vpack.c.bf16 %v1941_v17, %v1941_v17  ;;  %v554_v17 = vld [vmem:[%s7836_s15 + $0x8] sm:$0xf] }
 0x7cd   :  { %5467 = vmatmul.msk.bf16.vlgmr.msrb.gmra.mxu2 %vm938_vm11, %v1947_v3  ;;  %2174 = vrot.lane.b32.xlu0 %v6420_v40, %s6168_s16 }
 0x7ce   :  { %v1866_v16 = vpop.xlane.xlu2 %1865 }
 0x7cf   :  { %v1884_v28 = vsub.f32 %v1739_v58, %v1866_v16 }
 0x7d1   :  { %v1894_v30 = vmul.f32 1.442695, %v1884_v28 }
 0x7d3   :  { %5850 = vpow2.f32 %v1894_v30 }
 0x7d5   :  { %2195 = vrot.lane.b32.xlu0 %v6575_v36, %s6169_s18 }
 0x7d6   :  { %v2018_v9 = vpop.permute.xlu2 %2017  ;;  %v2060_v31 = vpop.permute.xlu1 %2059 }
 0x7d7   :  { %v2023_v32 = vsel %vm942_vm9, %v2018_v9, 0  ;;  %v2065_v38 = vsel %vm942_vm9, %v2060_v31, 0  ;;  %v2154_v31 = vsel %vm300_vm0, %v554_v17, 0 }
 0x7d8   :  { %2032 = vmatpush.bf16.msrb.mxu0 %v2023_v32  ;;  %2074 = vmatpush.bf16.msra.mxu2 %v2065_v38 }
 0x7d9   :  { %v6884_v51 = vpop.eup %5850 }
 0x7da   :  { %v1912_v53 = vsel %vm839_vm10, %v6884_v51, 0.0 }
 0x7db   :  { %1913 = vadd.xlane.f32.xlu2 %v1912_v53  ;;  %5469 = vmatmul.msk.bf16.vlgmr.msrb.gmra.mxu0 %vm938_vm11, %v1949_v41 }
 0x7dd   :  { %2266 = vrot.lane.b32.xlu0 %v6446_v55, %s6168_s16 }
 0x7de   :  { %v1878_v36 = vpop.xlane.xlu0 %1877 }
 0x7df   :  { %v1888_v24 = vsub.f32 %v1831_v1, %v1878_v36 }
 0x7e1   :  { %v1902_v43 = vmul.f32 1.442695, %v1888_v24 }
 0x7e3   :  { %5852 = vpow2.f32 %v1902_v43 }
 0x7e4   :  { %5854 = vrcp.f32 %v1908_v25 }
 0x7e5   :  { %2241 = vrot.lane.b32.xlu0 %v6485_v7, %s6169_s18 }
 0x7e9   :  { %v6893_v58 = vpop.eup %5852 }
 0x7ea   :  { %v1924_v57 = vsel %vm839_vm10, %v6893_v58, 0.0  ;;  %v5855_v63 = vpop.eup %5854 }
 0x7eb   :  { %1925 = vadd.xlane.f32.xlu1 %v1924_v57  ;;  %v1938_v2 = vmul.f32 %v5855_v63, %v6846_v42 }
 0x7ed   :  { %2312 = vrot.lane.b32.xlu0 %v6471_v0, %s6168_s16  ;;  %v1946_v7 = vpack.c.bf16 %v1938_v2, %v1938_v2 }
 0x7f1   :  { %v1955_v50 = vpop.permute.xlu0 %1954 }
 0x7f2   :  { %v1960_v1 = vsel %vm942_vm9, %v1955_v50, 0 }
 0x7f3   :  { %1969 = vmatpush.bf16.msra.mxu1 %v1960_v1  ;;  %2080 = vrot.lane.b32.xlu2 %v6471_v0, %s6167_s11 }
 0x7f5   :  { %2333 = vrot.lane.b32.xlu0 %v6602_v18, %s6169_s18 }
 0x7f6   :  { %5466 = vmatmul.msk.bf16.vlgmr.msra.gmra.mxu1 %vm938_vm11, %v1946_v7 }
 0x7fb   :  { %2197 = vrot.lane.b32.xlu2 %v6424_v44, %s6168_s16 }
 0x803   :  { %2220 = vrot.lane.b32.xlu2 %v6448_v56, %s6168_s16 }
 0x804   :  { %2101 = vrot.lane.b32.xlu1 %v6463_v62, %s6167_s11 }
 0x80b   :  { %2289 = vrot.lane.b32.xlu2 %v6461_v61, %s6168_s16 }
 0x80c   :  { %2172 = vrot.lane.b32.xlu1 %v6487_v8, %s6169_s18 }
 0x80f   :  { %v1920_v49 = vpop.xlane.xlu2 %1919 }
 0x813   :  { %2264 = vrot.lane.b32.xlu2 %v6636_v54, %s6169_s18 }
 0x814   :  { %2243 = vrot.lane.b32.xlu1 %v6440_v52, %s6168_s16 }
 0x81b   :  { %2335 = vrot.lane.b32.xlu2 %v6463_v62, %s6168_s16 }
 0x81c   :  { %2218 = vrot.lane.b32.xlu1 %v6631_v46, %s6169_s18  ;;  %v1923_v18 = vpop.xlane.xlu0 %1922 }
 0x81d   :  { %5856 = vrcp.f32 %v1923_v18 }
 0x81e   :  { %5858 = vrcp.f32 %v1920_v49 }
 0x823   :  { %v5857_v42 = vpop.eup %5856  ;;  %2452 = vrot.lane.b32.xlu2 %v6420_v40, %s6170_s22 }
 0x824   :  { %v1943_v8 = vmul.f32 %v5857_v42, %v6867_v13  ;;  %2287 = vrot.lane.b32.xlu1 %v6607_v23, %s6169_s18  ;;  %v1929_v46 = vpop.xlane.xlu0 %1928  ;;  %v5859_v4 = vpop.eup %5858 }
 0x825   :  { %v1942_v5 = vmul.f32 %v5859_v4, %v6863_v48 }
 0x826   :  { %v1951_v54 = vpack.c.bf16 %v1943_v8, %v1943_v8 }
 0x827   :  { %v1950_v60 = vpack.c.bf16 %v1942_v5, %v1942_v5 }
 0x828   :  { %5471 = vmatmul.msk.bf16.vlgmr.msra.gmra.mxu2 %vm938_vm11, %v1951_v54 }
 0x82c   :  { %2310 = vrot.lane.b32.xlu1 %v6646_v37, %s6169_s18 }
 0x837   :  { %v2039_v22 = vpop.permute.xlu0 %2038 }
 0x838   :  { %v2044_v40 = vsel %vm942_vm9, %v2039_v22, 0 }
 0x839   :  { %2053 = vmatpush.bf16.msrb.mxu1 %v2044_v40 }
 0x83c   :  { %5470 = vmatmul.msk.bf16.vlgmr.msrb.gmra.mxu1 %vm938_vm11, %v1950_v60 }
 0x83d   :  { %2163 = vmatpush.bf16.msra.mxu1 %v2154_v31 }
 0x83f   :  { %v2175_v23 = vpop.permute.xlu0 %2174 }
 0x840   :  { %v2180_v39 = vsel %vm651_vm8, %v2175_v23, 0 }
 0x841   :  { %2189 = vmatpush.bf16.xpose.msrb.mxu2 %v2180_v39 }
 0x847   :  { %v2196_v6 = vpop.permute.xlu0 %2195 }
 0x84e   :  { %v1914_v11 = vpop.xlane.xlu2 %1913 }
 0x84f   :  { %5860 = vrcp.f32 %v1914_v11  ;;  %v2267_v37 = vpop.permute.xlu0 %2266 }
 0x850   :  { %v2272_v12 = vsel %vm651_vm8, %v2267_v37, 0  ;;  %v1992_v59 = vpop.f32.mrf.mxu2 }
 0x851   :  { %2132 = vst [vmem:[#allocation1 + $0x1] ss:$4 sm:$0xff] %v1992_v59  ;;  %2281 = vmatpush.bf16.xpose.msra.mxu2 %v2272_v12 }
 0x855   :  { %v5861_v48 = vpop.eup %5860 }
 0x856   :  { %v1940_v13 = vmul.f32 %v5861_v48, %v6884_v51  ;;  %v2081_v14 = vpop.permute.xlu2 %2080 }
 0x857   :  { %v2086_v10 = vsel %vm942_vm9, %v2081_v14, 0  ;;  %v6945_v32 = vpop.permute.xlu0 %2241 }
 0x858   :  { %v1948_v45 = vpack.c.bf16 %v1940_v13, %v1940_v13  ;;  %v1994_v20 = vpop.f32.mrf.mxu2  ;;  %v2034_v19 = vpop.f32.mrf.mxu0  ;;  %2095 = vmatpush.bf16.msra.mxu3 %v2086_v10 }
 0x859   :  { %2136 = vst [vmem:[#allocation1 + $0x3] ss:$4 sm:$0xff] %v2034_v19 }
 0x85a   :  { %5468 = vmatmul.msk.bf16.vlgmr.msrb.gmra.mxu3 %vm938_vm11, %v1948_v45 }
 0x85e   :  { %v2198_v21 = vpop.permute.xlu2 %2197  ;;  %v1926_v3 = vpop.xlane.xlu1 %1925 }
 0x85f   :  { %v2203_v25 = vsel %vm651_vm8, %v2198_v21, 0  ;;  %5862 = vrcp.f32 %v1926_v3  ;;  %v2313_v57 = vpop.permute.xlu0 %2312 }
 0x860   :  { %v2036_v16 = vpop.f32.mrf.mxu0  ;;  %2212 = vmatpush.bf16.xpose.msrb.mxu3 %v2203_v25  ;;  %5864 = vrcp.f32 %v1929_v46  ;;  %v2318_v50 = vsel %vm651_vm8, %v2313_v57, 0 }
 0x865   :  { %v5863_v28 = vpop.eup %5862 }
 0x866   :  { %v1944_v30 = vmul.f32 %v5863_v28, %v6893_v58  ;;  %v2221_v34 = vpop.permute.xlu2 %2220  ;;  %v5865_v41 = vpop.eup %5864 }
 0x867   :  { %v1945_v36 = vmul.f32 %v5865_v41, %v6871_v15  ;;  %v2226_v63 = vsel %vm651_vm8, %v2221_v34, 0 }
 0x868   :  { %v1952_v9 = vpack.c.bf16 %v1944_v30, %v1944_v30 }
 0x869   :  { %v1953_v2 = vpack.c.bf16 %v1945_v36, %v1945_v36 }
 0x86a   :  { %5472 = vmatmul.msk.bf16.vlgmr.msra.gmra.mxu3 %vm938_vm11, %v1952_v9 }
 0x86e   :  { %v2290_v38 = vpop.permute.xlu2 %2289 }
 0x86f   :  { %v2295_v51 = vsel %vm651_vm8, %v2290_v38, 0  ;;  %v2334_v38 = vpop.permute.xlu0 %2333 }
 0x870   :  { %2304 = vmatpush.bf16.xpose.msra.mxu3 %v2295_v51 }
 0x873   :  { %v1971_v53 = vpop.f32.mrf.mxu1 }
 0x874   :  { %2130 = vst [vmem:[#allocation1] ss:$4 sm:$0xff] %v1971_v53 }
 0x876   :  { %v2265_v24 = vpop.permute.xlu2 %2264  ;;  %v2102_v43 = vpop.permute.xlu1 %2101 }
 0x877   :  { %v2107_v58 = vsel %vm942_vm9, %v2102_v43, 0 }
 0x878   :  { %2116 = vmatpush.bf16.msra.mxu0 %v2107_v58 }
 0x87a   :  { %5476 = vmatmul.msk.bf16.vlgmr.msrb.gmra.mxu3 %vm651_vm8, %v2196_v6 }
 0x87b   :  { %v1973_v1 = vpop.f32.mrf.mxu1  ;;  %5473 = vmatmul.msk.bf16.vlgmr.msra.gmra.mxu0 %vm938_vm11, %v1953_v2 }
 0x87c   :  { %2235 = vmatpush.bf16.xpose.msrb.mxu0 %v2226_v63 }
 0x87e   :  { %v2336_v7 = vpop.permute.xlu2 %2335  ;;  %v2173_v15 = vpop.permute.xlu1 %2172 }
 0x87f   :  { %5475 = vmatmul.msk.bf16.vlgmr.msrb.gmra.mxu2 %vm651_vm8, %v2173_v15  ;;  %v2341_v45 = vsel %vm651_vm8, %v2336_v7, 0 }
 0x884   :  { %2327 = vmatpush.bf16.xpose.msra.mxu0 %v2318_v50 }
 0x886   :  { %v2453_v18 = vpop.permute.xlu2 %2452  ;;  %v2244_v42 = vpop.permute.xlu1 %2243 }
 0x887   :  { %v2458_v8 = vsel %vm942_vm9, %v2453_v18, 0  ;;  %v2249_v54 = vsel %vm651_vm8, %v2244_v42, 0 }
 0x888   :  { %2258 = vmatpush.bf16.xpose.msrb.mxu1 %v2249_v54  ;;  %2467 = vmatpush.bf16.msrb.mxu2 %v2458_v8 }
 0x88e   :  { %v2219_v49 = vpop.permute.xlu1 %2218 }
 0x88f   :  { %5477 = vmatmul.msk.bf16.vlgmr.msrb.gmra.mxu0 %vm651_vm8, %v2219_v49  ;;  %5479 = vmatmul.msk.bf16.vlgmr.msra.gmra.mxu2 %vm651_vm8, %v2265_v24  ;;  %v1670_v24 = vadd.f32 %v6828_v33, %v6848_v29 }
 0x896   :  { %v2288_v46 = vpop.permute.xlu1 %2287 }
 0x897   :  { %5480 = vmatmul.msk.bf16.vlgmr.msra.gmra.mxu3 %vm651_vm8, %v2288_v46 }
 0x89e   :  { %v2311_v4 = vpop.permute.xlu1 %2310 }
 0x89f   :  { %5481 = vmatmul.msk.bf16.vlgmr.msra.gmra.mxu0 %vm651_vm8, %v2311_v4 }
 0x8ab   :  { %v2076_v5 = vpop.f32.mrf.mxu2 }
 0x8ac   :  { %2140 = vst [vmem:[#allocation1 + $0x21] ss:$4 sm:$0xff] %v2076_v5 }
 0x8b3   :  { %v2078_v22 = vpop.f32.mrf.mxu2 }
 0x8b9   :  { %v2055_v40 = vpop.f32.mrf.mxu1 }
 0x8ba   :  { %2138 = vst [vmem:[#allocation1 + $0x20] ss:$4 sm:$0xff] %v2055_v40 }
 0x8c1   :  { %v2057_v60 = vpop.f32.mrf.mxu1 }
 0x8dd   :  { %v2013_v23 = vpop.f32.mrf.mxu3 }
 0x8de   :  { %2134 = vst [vmem:[#allocation1 + $0x2] ss:$4 sm:$0xff] %v2013_v23 }
 0x8e5   :  { %v2015_v39 = vpop.f32.mrf.mxu3  ;;  %v2145_v59 = vld.sshfl [vmem:[#allocation1] sm:$0xff pattern:$0x73625140] }
 0x8ed   :  { %v2097_v6 = vpop.f32.mrf.mxu3 }
 0x8ee   :  { %2142 = vst [vmem:[#allocation1 + $0x22] ss:$4 sm:$0xff] %v2097_v6 }
 0x8f5   :  { %v2099_v11 = vpop.f32.mrf.mxu3 }
 0x8f8   :  { %v2118_v37 = vpop.f32.mrf.mxu0 }
 0x8f9   :  { %2144 = vst [vmem:[#allocation1 + $0x23] ss:$4 sm:$0xff] %v2118_v37 }
 0x8fd   :  { %v6961_v12 = vpop.f32.mrf.mxu3 }
 0x8fe   :  { %v2359_v29 = vsel %vm839_vm10, %v6961_v12, -inf }
 0x900   :  { %v2146_v48 = vld.sshfl [vmem:[#allocation1 + $0x20] sm:$0xff pattern:$0x73625140]  ;;  %v2120_v13 = vpop.f32.mrf.mxu0 }
 0x901   :  { %v2149_v14 = vpack.c.bf16 %v2146_v48, %v2145_v59 }
 0x902   :  { %v2191_v10 = vpop.f32.mrf.mxu2 }
 0x903   :  { %5474 = vmatmul.msk.bf16.vlgmr.msra.gmra.mxu1 %vm651_vm8, %v2149_v14  ;;  %v2356_v20 = vsel %vm839_vm10, %v2191_v10, -inf }
 0x904   :  { %2350 = vmatpush.bf16.xpose.msra.mxu1 %v2341_v45  ;;  %2357 = vmax.xlane.f32.xlu2 %v2356_v20 }
 0x905   :  { %v2216_v19 = vpop.f32.mrf.mxu3 }
 0x90a   :  { %v2193_v21 = vpop.f32.mrf.mxu2 }
 0x90c   :  { %v2237_v3 = vpop.f32.mrf.mxu0 }
 0x90d   :  { %v2362_v25 = vsel %vm839_vm10, %v2237_v3, -inf }
 0x90e   :  { %2363 = vmax.xlane.f32.xlu0 %v2362_v25 }
 0x912   :  { %v2283_v16 = vpop.f32.mrf.mxu2 }
 0x913   :  { %5478 = vmatmul.msk.bf16.vlgmr.msrb.gmra.mxu1 %vm651_vm8, %v6945_v32  ;;  %v2368_v28 = vsel %vm839_vm10, %v2283_v16, -inf }
 0x914   :  { %2369 = vmax.xlane.f32.xlu1 %v2368_v28  ;;  %v2239_v30 = vpop.f32.mrf.mxu0 }
 0x91a   :  { %v2285_v34 = vpop.f32.mrf.mxu2  ;;  %v2306_v17 = vpop.f32.mrf.mxu3 }
 0x91b   :  { %v2371_v15 = vsel %vm839_vm10, %v2306_v17, -inf }
 0x91c   :  { %v6970_v9 = vpop.f32.mrf.mxu0 }
 0x91d   :  { %v2374_v31 = vsel %vm839_vm10, %v6970_v9, -inf }
 0x91e   :  { %2375 = vmax.xlane.f32.xlu2 %v2374_v31 }
 0x922   :  { %v2308_v51 = vpop.f32.mrf.mxu3 }
 0x923   :  { %5482 = vmatmul.msk.bf16.vlgmr.msra.gmra.mxu1 %vm651_vm8, %v2334_v38 }
 0x924   :  { %v2331_v41 = vpop.f32.mrf.mxu0 }
 0x977   :  { %v2358_v53 = vpop.xlane.xlu2 %2357 }
 0x978   :  { %v2380_v36 = vsub.f32 %v2191_v10, %v2358_v53 }
 0x97a   :  { %v2388_v32 = vmul.f32 1.442695, %v2380_v36 }
 0x97c   :  { %5866 = vpow2.f32 %v2388_v32 }
 0x980   :  { %v2165_v43 = vpop.f32.mrf.mxu1 }
 0x981   :  { %v6977_v58 = vadd.f32 %v2165_v43, %v1670_v24  ;;  %v2364_v57 = vpop.xlane.xlu0 %2363 }
 0x982   :  { %v5867_v63 = vpop.eup %5866  ;;  %v2382_v2 = vsub.f32 %v2237_v3, %v2364_v57 }
 0x983   :  { %v2404_v50 = vsel %vm839_vm10, %v5867_v63, 0.0 }
 0x984   :  { %v2392_v1 = vmul.f32 1.442695, %v2382_v2  ;;  %2405 = vadd.xlane.f32.xlu0 %v2404_v50 }
 0x986   :  { %5868 = vpow2.f32 %v2392_v1 }
 0x987   :  { %v2370_v4 = vpop.xlane.xlu1 %2369 }
 0x988   :  { %v6980_v7 = vpop.f32.mrf.mxu1  ;;  %v2384_v5 = vsub.f32 %v2283_v16, %v2370_v4 }
 0x98a   :  { %v2396_v22 = vmul.f32 1.442695, %v2384_v5 }
 0x98c   :  { %v5869_v18 = vpop.eup %5868  ;;  %2372 = vmax.xlane.f32.xlu0 %v2371_v15  ;;  %5870 = vpow2.f32 %v2396_v22 }
 0x98d   :  { %v2410_v42 = vsel %vm839_vm10, %v5869_v18, 0.0 }
 0x98e   :  { %2411 = vadd.xlane.f32.xlu1 %v2410_v42 }
 0x990   :  { %v6984_v33 = vpop.f32.mrf.mxu1 }
 0x991   :  { %v2376_v31 = vpop.xlane.xlu2 %2375 }
 0x992   :  { %v6996_v40 = vpop.eup %5870  ;;  %v2386_v38 = vsub.f32 %v6970_v9, %v2376_v31 }
 0x993   :  { %v2416_v60 = vsel %vm839_vm10, %v6996_v40, 0.0 }
 0x994   :  { %v2400_v41 = vmul.f32 1.442695, %v2386_v38  ;;  %v555_v38 = vld [vmem:[%s7836_s15 + $0xc] sm:$0xf] }
 0x996   :  { %2360 = vmax.xlane.f32.xlu1 %v2359_v29 }
 0x998   :  { %v2262_v8 = vpop.f32.mrf.mxu1 }
 0x9a0   :  { %v6988_v54 = vpop.f32.mrf.mxu1  ;;  %2494 = vrot.lane.b32.xlu0 %v6448_v56, %s6170_s22 }
 0x9a1   :  { %v2377_v49 = vsel %vm839_vm10, %v6988_v54, -inf }
 0x9a2   :  { %2378 = vmax.xlane.f32.xlu1 %v2377_v49 }
 0x9a8   :  { %v2354_v46 = vpop.f32.mrf.mxu1 }
 0x9bb   :  { %2473 = vrot.lane.b32.xlu1 %v6424_v44, %s6170_s22 }
 0x9ca   :  { %2417 = vadd.xlane.f32.xlu0 %v2416_v60 }
 0x9de   :  { %2578 = vrot.lane.b32.xlu0 %v6471_v0, %s6170_s22 }
 0x9f7   :  { %v2406_v56 = vpop.xlane.xlu0 %2405 }
 0x9f8   :  { %5872 = vrcp.f32 %v2406_v56 }
 0x9fe   :  { %v5873_v23 = vpop.eup %5872 }
 0x9ff   :  { %v2436_v39 = vmul.f32 %v5873_v23, %v5867_v63  ;;  %v2373_v6 = vpop.xlane.xlu0 %2372 }
 0xa00   :  { %v2385_v11 = vsub.f32 %v2306_v17, %v2373_v6 }
 0xa01   :  { %v2444_v37 = vpack.c.bf16 %v2436_v39, %v2436_v39  ;;  %v2412_v59 = vpop.xlane.xlu1 %2411 }
 0xa02   :  { %v2398_v44 = vmul.f32 1.442695, %v2385_v11 }
 0xa03   :  { %5483 = vmatmul.msk.bf16.vlgmr.msrb.gmra.mxu2 %vm938_vm11, %v2444_v37 }
 0xa04   :  { %5874 = vpow2.f32 %v2398_v44 }
 0xa05   :  { %5876 = vrcp.f32 %v2412_v59 }
 0xa09   :  { %v2361_v48 = vpop.xlane.xlu1 %2360 }
 0xa0a   :  { %v7003_v13 = vpop.eup %5874  ;;  %v2381_v14 = vsub.f32 %v6961_v12, %v2361_v48  ;;  %v2365_v12 = vsel %vm839_vm10, %v6984_v33, -inf }
 0xa0b   :  { %v2419_v0 = vsel %vm839_vm10, %v7003_v13, 0.0  ;;  %v5877_v45 = vpop.eup %5876 }
 0xa0c   :  { %v2390_v10 = vmul.f32 1.442695, %v2381_v14  ;;  %2420 = vadd.xlane.f32.xlu1 %v2419_v0  ;;  %v2438_v20 = vmul.f32 %v5877_v45, %v5869_v18 }
 0xa0e   :  { %5878 = vpow2.f32 %v2390_v10  ;;  %v2446_v25 = vpack.c.bf16 %v2438_v20, %v2438_v20 }
 0xa0f   :  { %5880 = vpow2.f32 %v2400_v41 }
 0xa12   :  { %v2495_v19 = vpop.permute.xlu0 %2494 }
 0xa13   :  { %v2500_v21 = vsel %vm942_vm9, %v2495_v19, 0 }
 0xa14   :  { %v5879_v3 = vpop.eup %5878  ;;  %2509 = vmatpush.bf16.msrb.mxu0 %v2500_v21 }
 0xa15   :  { %v2407_v16 = vsel %vm839_vm10, %v5879_v3, 0.0  ;;  %v2379_v28 = vpop.xlane.xlu1 %2378  ;;  %v5881_v36 = vpop.eup %5880 }
 0xa16   :  { %2408 = vadd.xlane.f32.xlu2 %v2407_v16  ;;  %v2387_v15 = vsub.f32 %v6988_v54, %v2379_v28 }
 0xa17   :  { %5485 = vmatmul.msk.bf16.vlgmr.msrb.gmra.mxu0 %vm938_vm11, %v2446_v25 }
 0xa18   :  { %v2402_v8 = vmul.f32 1.442695, %v2387_v15 }
 0xa1e   :  { %2366 = vmax.xlane.f32.xlu2 %v2365_v12 }
 0xa25   :  { %2536 = vrot.lane.b32.xlu1 %v6446_v55, %s6170_s22  ;;  %v2422_v55 = vsel %vm839_vm10, %v5881_v36, 0.0 }
 0xa2d   :  { %v2474_v30 = vpop.permute.xlu1 %2473 }
 0xa2e   :  { %v2479_v34 = vsel %vm942_vm9, %v2474_v30, 0 }
 0xa2f   :  { %2488 = vmatpush.bf16.msrb.mxu3 %v2479_v34 }
 0xa36   :  { %2515 = vrot.lane.b32.xlu2 %v6440_v52, %s6170_s22 }
 0xa3d   :  { %v2418_v17 = vpop.xlane.xlu0 %2417 }
 0xa50   :  { %v2579_v51 = vpop.permute.xlu0 %2578 }
 0xa51   :  { %v2584_v53 = vsel %vm942_vm9, %v2579_v51, 0  ;;  %v2652_v51 = vsel %vm300_vm0, %v555_v38, 0 }
 0xa52   :  { %2593 = vmatpush.bf16.msra.mxu0 %v2584_v53 }
 0xa5f   :  { %2423 = vadd.xlane.f32.xlu2 %v2422_v55 }
 0xa77   :  { %2557 = vrot.lane.b32.xlu2 %v6461_v61, %s6170_s22 }
 0xa7f   :  { %v2421_v9 = vpop.xlane.xlu1 %2420 }
 0xa86   :  { %v2469_v32 = vpop.f32.mrf.mxu2 }
 0xa87   :  { %2628 = vst [vmem:[#allocation1] ss:$4 sm:$0xff] %v2469_v32 }
 0xa89   :  { %v2409_v52 = vpop.xlane.xlu2 %2408 }
 0xa8a   :  { %5882 = vrcp.f32 %v2409_v52 }
 0xa8b   :  { %5884 = vrcp.f32 %v2418_v17 }
 0xa8e   :  { %v2471_v24 = vpop.f32.mrf.mxu2 }
 0xa90   :  { %v5883_v43 = vpop.eup %5882 }
 0xa91   :  { %v2437_v57 = vmul.f32 %v5883_v43, %v5879_v3  ;;  %v2367_v63 = vpop.xlane.xlu2 %2366  ;;  %v5885_v50 = vpop.eup %5884 }
 0xa92   :  { %v2383_v2 = vsub.f32 %v6984_v33, %v2367_v63  ;;  %v2440_v61 = vmul.f32 %v5885_v50, %v6996_v40 }
 0xa93   :  { %v2445_v1 = vpack.c.bf16 %v2437_v57, %v2437_v57 }
 0xa94   :  { %v2394_v18 = vmul.f32 1.442695, %v2383_v2  ;;  %v2511_v42 = vpop.f32.mrf.mxu0  ;;  %v2448_v4 = vpack.c.bf16 %v2440_v61, %v2440_v61  ;;  %v1672_v2 = vadd.f32 %v6830_v35, %v6853_v47 }
 0xa95   :  { %2632 = vst [vmem:[#allocation1 + $0x2] ss:$4 sm:$0xff] %v2511_v42  ;;  %5484 = vmatmul.msk.bf16.vlgmr.msrb.gmra.mxu3 %vm938_vm11, %v2445_v1 }
 0xa96   :  { %5886 = vpow2.f32 %v2394_v18  ;;  %v2171_v1 = vadd.f32 %v6980_v7, %v1672_v2 }
 0xa97   :  { %v2537_v29 = vpop.permute.xlu1 %2536  ;;  %5888 = vpow2.f32 %v2402_v8 }
 0xa98   :  { %v2542_v49 = vsel %vm942_vm9, %v2537_v29, 0  ;;  %5890 = vrcp.f32 %v2421_v9  ;;  %v5754_v9 = vld [vmem:[%s7837_s23] ss:$0 sm:$0xff] }
 0xa99   :  { %2551 = vmatpush.bf16.msra.mxu2 %v2542_v49  ;;  %v2516_v46 = vpop.permute.xlu2 %2515 }
 0xa9a   :  { %v2521_v33 = vsel %vm942_vm9, %v2516_v46, 0 }
 0xa9b   :  { %2530 = vmatpush.bf16.msrb.mxu1 %v2521_v33 }
 0xa9c   :  { %v5887_v5 = vpop.eup %5886  ;;  %v2513_v54 = vpop.f32.mrf.mxu0  ;;  %5487 = vmatmul.msk.bf16.vlgmr.msra.gmra.mxu2 %vm938_vm11, %v2448_v4 }
 0xa9d   :  { %v2413_v22 = vsel %vm839_vm10, %v5887_v5, 0.0  ;;  %v5889_v40 = vpop.eup %5888  ;;  %2661 = vmatpush.bf16.msrb.mxu2 %v2652_v51 }
 0xa9e   :  { %2414 = vadd.xlane.f32.xlu0 %v2413_v22  ;;  %v2425_v60 = vsel %vm839_vm10, %v5889_v40, 0.0  ;;  %v5891_v23 = vpop.eup %5890 }
 0xa9f   :  { %v2441_v6 = vmul.f32 %v5891_v23, %v7003_v13 }
 0xaa1   :  { %v2449_v48 = vpack.c.bf16 %v2441_v6, %v2441_v6  ;;  %v5680_v6 = vld [vmem:[%s7838_s26 + $0x8] sm:$0xff] }
 0xaa6   :  { %2426 = vadd.xlane.f32.xlu0 %v2425_v60 }
 0xaba   :  { %2599 = vrot.lane.b32.xlu0 %v6463_v62, %s6170_s22 }
 0xad2   :  { %v2424_v56 = vpop.xlane.xlu2 %2423 }
 0xad3   :  { %5892 = vrcp.f32 %v2424_v56 }
 0xad9   :  { %v5893_v39 = vpop.eup %5892 }
 0xada   :  { %v2442_v11 = vmul.f32 %v5893_v39, %v5881_v36  ;;  %v2558_v37 = vpop.permute.xlu2 %2557 }
 0xadb   :  { %v2563_v59 = vsel %vm942_vm9, %v2558_v37, 0 }
 0xadc   :  { %v2450_v44 = vpack.c.bf16 %v2442_v11, %v2442_v11  ;;  %2572 = vmatpush.bf16.msra.mxu3 %v2563_v59  ;;  %v5679_v59 = vld [vmem:[%s7838_s26] sm:$0xff] }
 0xade   :  { %5489 = vmatmul.msk.bf16.vlgmr.msra.gmra.mxu0 %vm938_vm11, %v2450_v44 }
 0xadf   :  { %5488 = vmatmul.msk.bf16.vlgmr.msra.gmra.mxu3 %vm938_vm11, %v2449_v48 }
 0xae0   :  { %2763 = vmatpush.bf16.msrb.mxu3 %v5680_v6 }
 0xae4   :  { %2764 = vmatpush.bf16.msrb.mxu3 %v5679_v59 }
 0xb11   :  { %v2415_v14 = vpop.xlane.xlu0 %2414 }
 0xb12   :  { %5894 = vrcp.f32 %v2415_v14 }
 0xb18   :  { %v5895_v62 = vpop.eup %5894  ;;  %v2490_v0 = vpop.f32.mrf.mxu3 }
 0xb19   :  { %v2439_v10 = vmul.f32 %v5895_v62, %v5887_v5  ;;  %2630 = vst [vmem:[#allocation1 + $0x1] ss:$4 sm:$0xff] %v2490_v0  ;;  %v2427_v13 = vpop.xlane.xlu0 %2426 }
 0xb1a   :  { %5896 = vrcp.f32 %v2427_v13 }
 0xb1b   :  { %v2447_v45 = vpack.c.bf16 %v2439_v10, %v2439_v10 }
 0xb1d   :  { %5486 = vmatmul.msk.bf16.vlgmr.msrb.gmra.mxu1 %vm938_vm11, %v2447_v45 }
 0xb1f   :  { %v2553_v20 = vpop.f32.mrf.mxu2 }
 0xb20   :  { %2636 = vst [vmem:[#allocation1 + $0x20] ss:$4 sm:$0xff] %v2553_v20  ;;  %v2492_v19 = vpop.f32.mrf.mxu3  ;;  %v5897_v3 = vpop.eup %5896 }
 0xb21   :  { %v2443_v25 = vmul.f32 %v5897_v3, %v5889_v40 }
 0xb23   :  { %v2451_v28 = vpack.c.bf16 %v2443_v25, %v2443_v25 }
 0xb27   :  { %v2555_v21 = vpop.f32.mrf.mxu2 }
 0xb2c   :  { %v2600_v16 = vpop.permute.xlu0 %2599 }
 0xb2d   :  { %v2605_v12 = vsel %vm942_vm9, %v2600_v16, 0 }
 0xb2e   :  { %2614 = vmatpush.bf16.msra.mxu1 %v2605_v12 }
 0xb31   :  { %5490 = vmatmul.msk.bf16.vlgmr.msra.gmra.mxu1 %vm938_vm11, %v2451_v28  ;;  %v5755_v28 = vld [vmem:[%s7839_s28] ss:$0 sm:$0xff] }
 0xb5b   :  { %v2595_v30 = vpop.f32.mrf.mxu0 }
 0xb5c   :  { %2640 = vst [vmem:[#allocation1 + $0x22] ss:$4 sm:$0xff] %v2595_v30 }
 0xb62   :  { %v2574_v34 = vpop.f32.mrf.mxu3 }
 0xb63   :  { %2638 = vst [vmem:[#allocation1 + $0x21] ss:$4 sm:$0xff] %v2574_v34  ;;  %v2597_v17 = vpop.f32.mrf.mxu0 }
 0xb6a   :  { %v2576_v31 = vpop.f32.mrf.mxu3 }
 0xb6b   :  { %v5756_v31 = vld [vmem:[%s7840_s0] ss:$0 sm:$0xff] }
 0xb9a   :  { %v2532_v41 = vpop.f32.mrf.mxu1 }
 0xb9b   :  { %2634 = vst [vmem:[#allocation1 + $0x3] ss:$4 sm:$0xff] %v2532_v41 }
 0xba2   :  { %v2534_v53 = vpop.f32.mrf.mxu1  ;;  %v2643_v55 = vld.sshfl [vmem:[#allocation1] sm:$0xff pattern:$0x73625140] }
 0xbae   :  { %v2616_v36 = vpop.f32.mrf.mxu1 }
 0xbaf   :  { %2642 = vst [vmem:[#allocation1 + $0x23] ss:$4 sm:$0xff] %v2616_v36 }
 0xbb6   :  { %v2644_v32 = vld.sshfl [vmem:[#allocation1 + $0x20] sm:$0xff pattern:$0x73625140]  ;;  %v2618_v52 = vpop.f32.mrf.mxu1 }
 0xbb7   :  { %v2647_v24 = vpack.c.bf16 %v2644_v32, %v2643_v55  ;;  %v5684_v32 = vld [vmem:[%s7841_s1 + $0x18] sm:$0xff]  ;;  %v5683_v52 = vld [vmem:[%s7841_s1 + $0x10] sm:$0xff] }
 0xbb8   :  { %2808 = vmatpush.bf16.msrb.mxu0 %v5684_v32 }
 0xbb9   :  { %5491 = vmatmul.msk.bf16.vlgmr.msrb.gmra.mxu2 %vm651_vm8, %v2647_v24  ;;  %v5682_v24 = vld [vmem:[%s7841_s1 + $0x8] sm:$0xff] }
 0xbbc   :  { %2809 = vmatpush.bf16.msrb.mxu0 %v5683_v52 }
 0xbc0   :  { %2810 = vmatpush.bf16.msrb.mxu0 %v5682_v24 }
 0xc3c   :  { %v2663_v43 = vpop.f32.mrf.mxu2 }
 0xc3d   :  { %v2668_v57 = vadd.f32 %v2663_v43, %v6977_v58  ;;  %v6171_v58 = vmov 32.0  }
 0xc3e   :  { %5898 = vrcp.f32 %v6171_v58 }
 0xc3f   :  { %v2673_v63 = vadd.f32 %v5754_v9, %v2668_v57  ;;  %v5757_v57 = vld [vmem:[%s7842_s2] ss:$0 sm:$0xff] }
 0xc41   :  { %v2675_v50 = vadd.f32 %v2673_v63, %v6406_v26 }
 0xc43   :  { %v2677_v15 = vsel %vm339_vm4, %v2675_v50, 0.0 }
 0xc44   :  { %v2665_v18 = vpop.f32.mrf.mxu2  ;;  %2678 = vadd.xlane.f32.xlu1 %v2677_v15  ;;  %v5899_v49 = vpop.eup %5898 }
 0xc45   :  { %v2669_v42 = vadd.f32 %v2665_v18, %v2171_v1  ;;  %v2684_v46 = vmul.f32 32.0, %v5899_v49  ;;  %vm2688_vm12 = vweird.f32 %v5899_v49 }
 0xc47   :  { %v2674_v61 = vadd.f32 %v5754_v9, %v2669_v42  ;;  %v2685_v35 = vsub.f32 1.0, %v2684_v46  ;;  %v5681_v9 = vld [vmem:[%s7841_s1] sm:$0xff] }
 0xc48   :  { %2811 = vmatpush.bf16.msrb.mxu0 %v5681_v9  ;;  %v5758_v42 = vld [vmem:[%s7843_s7] ss:$0 sm:$0xff] }
 0xc49   :  { %v2676_v29 = vadd.f32 %v2674_v61, %v6408_v27  ;;  %v2686_v47 = vmul.f32 %v5899_v49, %v2685_v35 }
 0xc4b   :  { %v2680_v8 = vsel %vm339_vm4, %v2676_v29, 0.0  ;;  %v2687_v26 = vadd.f32 %v5899_v49, %v2686_v47 }
 0xc4c   :  { %2681 = vadd.xlane.f32.xlu2 %v2680_v8 }
 0xc4d   :  { %v7053_v7 = vsel %vm2688_vm12, %v5899_v49, %v2687_v26 }
 0xcb7   :  { %v2679_v4 = vpop.xlane.xlu1 %2678 }
 0xcb8   :  { %v2690_v33 = vmul.f32 %v7053_v7, %v2679_v4 }
 0xcba   :  { %v2692_v5 = vsub.f32 %v2675_v50, %v2690_v33 }
 0xcbc   :  { %v2694_v27 = vmul.f32 %v2692_v5, %v2692_v5 }
 0xcbe   :  { %v2696_v54 = vsel %vm339_vm4, %v2694_v27, 0.0 }
 0xcbf   :  { %v2682_v22 = vpop.xlane.xlu2 %2681  ;;  %2697 = vadd.xlane.f32.xlu0 %v2696_v54 }
 0xcc0   :  { %v2691_v40 = vmul.f32 %v7053_v7, %v2682_v22 }
 0xcc2   :  { %v2693_v60 = vsub.f32 %v2676_v29, %v2691_v40 }
 0xcc4   :  { %v2695_v56 = vmul.f32 %v2693_v60, %v2693_v60 }
 0xcc6   :  { %v2699_v23 = vsel %vm339_vm4, %v2695_v56, 0.0 }
 0xcc7   :  { %2700 = vadd.xlane.f32.xlu2 %v2699_v23 }
 0xd32   :  { %v2698_v39 = vpop.xlane.xlu0 %2697 }
 0xd33   :  { %v2702_v11 = vmul.f32 %v2698_v39, %v7053_v7  ;;  %v5686_v39 = vld [vmem:[%s7831_s17 + $0x18] sm:$0xff] }
 0xd34   :  { %2939 = vmatpush.bf16.msrb.mxu1 %v5686_v39 }
 0xd35   :  { %v2704_v37 = vadd.f32 1e-05, %v2702_v11 }
 0xd37   :  { %5900 = vrsqrt.f32 %v2704_v37  ;;  %vm2712_vm14 = vweird.f32 %v2704_v37 }
 0xd3a   :  { %v2701_v44 = vpop.xlane.xlu2 %2700 }
 0xd3b   :  { %v2703_v48 = vmul.f32 %v2701_v44, %v7053_v7 }
 0xd3d   :  { %v5901_v14 = vpop.eup %5900  ;;  %v2705_v62 = vadd.f32 1e-05, %v2703_v48 }
 0xd3e   :  { %v2707_v0 = vmul.f32 %v5901_v14, %v2704_v37  ;;  %vm2713_vm13 = vweird.f32 %v5901_v14  ;;  %v5685_v37 = vld [vmem:[%s7831_s17 + $0x10] sm:$0xff]  ;;  %s6110_s17 = scalar_lea.hbm %s6352_s4, 2 }
 0xd3f   :  { %5902 = vrsqrt.f32 %v2705_v62  ;;  %vm2714_vm15 = vmor %vm2712_vm14, %vm2713_vm13  ;;  %vm2722_vm2 = vweird.f32 %v2705_v62  ;;  %2940 = vmatpush.bf16.msrb.mxu1 %v5685_v37  ;;  %p6112_p12 = scmp.lt.s32.totalorder %s6110_s17, %s6108_s13 }
 0xd40   :  { %v2708_v10 = vmul.f32 %v5901_v14, %v2707_v0 }
 0xd41   :  { %p6113_p13 = por %p6112_p12, %p6111_p11 }
 0xd42   :  { %v2709_v45 = vmul.f32 0.5, %v2708_v10 }
 0xd43   :  { %p6114_p0 = pnand %p6113_p13, %p6109_p10 }
 0xd44   :  { %v2710_v13 = vsub.f32 1.5, %v2709_v45 }
 0xd45   :  { %v5903_v20 = vpop.eup %5902 }
 0xd46   :  { %v2711_v19 = vmul.f32 %v5901_v14, %v2710_v13  ;;  %v2717_v21 = vmul.f32 %v5903_v20, %v2705_v62  ;;  %vm2723_vm1 = vweird.f32 %v5903_v20 }
 0xd47   :  { %vm2724_vm3 = vmor %vm2722_vm2, %vm2723_vm1 }
 0xd48   :  { %v2718_v3 = vmul.f32 %v5903_v20, %v2717_v21  ;;  %v2715_v25 = vsel %vm2714_vm15, %v5901_v14, %v2711_v19 }
 0xd49   :  { %v2726_v30 = vmul.f32 %v2715_v25, %v2692_v5 }
 0xd4a   :  { %v2719_v16 = vmul.f32 0.5, %v2718_v3 }
 0xd4b   :  { %v2731_v38 = vmul.f32 %v5755_v28, %v2726_v30 }
 0xd4c   :  { %v2720_v12 = vsub.f32 1.5, %v2719_v16 }
 0xd4d   :  { %v2736_v53 = vadd.f32 %v5756_v31, %v2731_v38 }
 0xd4e   :  { %v2721_v34 = vmul.f32 %v5903_v20, %v2720_v12  ;;  %v5759_v12 = vld [vmem:[%s7844_s10] ss:$0 sm:$0xff] }
 0xd50   :  { %v2725_v17 = vsel %vm2724_vm3, %v5903_v20, %v2721_v34 }
 0xd51   :  { %v2727_v51 = vmul.f32 %v2725_v17, %v2693_v60  ;;  %v5760_v17 = vld [vmem:[%s6337_s14] ss:$0 sm:$0xff] }
 0xd53   :  { %v2732_v41 = vmul.f32 %v5755_v28, %v2727_v51 }
 0xd55   :  { %v2737_v36 = vadd.f32 %v5756_v31, %v2732_v41 }
 0xd57   :  { %v2738_v55 = vpack.c.bf16 %v2737_v36, %v2736_v53 }
 0xd59   :  { %5500 = vmatmul.msk.bf16.vlgmr.msrb.gmra.mxu3 %vm339_vm4, %v2738_v55  ;;  %v5761_v55 = vld [vmem:[%s7835_s3 + $0x1] ss:$0 sm:$0xff] }
 0xddc   :  { %v2766_v43 = vpop.f32.mrf.mxu3 }
 0xddd   :  { %v2767_v63 = vadd.f32 %v5757_v57, %v2766_v43 }
 0xddf   :  { %v2771_v1 = vmax.f32 %v2767_v63, 0.0 }
 0xde4   :  { %v2768_v2 = vpop.f32.mrf.mxu3 }
 0xde5   :  { %v2769_v50 = vadd.f32 %v5757_v57, %v2768_v2 }
 0xde7   :  { %v2772_v15 = vmax.f32 %v2769_v50, 0.0 }
 0xde9   :  { %v2773_v18 = vpack.c.bf16 %v2772_v15, %v2771_v1 }
 0xdeb   :  { %5517 = vmatmul.msk.bf16.vlgmr.msrb.gmra.mxu0 %vm260_vm5, %v2773_v18 }
 0xe68   :  { %v2813_v61 = vpop.f32.mrf.mxu0 }
 0xe69   :  { %v2814_v29 = vadd.f32 %v5758_v42, %v2813_v61 }
 0xe6b   :  { %v2818_v8 = vadd.f32 %v2814_v29, %v2736_v53 }
 0xe6d   :  { %v2820_v58 = vsel %vm339_vm4, %v2818_v8, 0.0 }
 0xe6e   :  { %2821 = vadd.xlane.f32.xlu1 %v2820_v58 }
 0xe70   :  { %v2815_v49 = vpop.f32.mrf.mxu0 }
 0xe71   :  { %v2816_v46 = vadd.f32 %v5758_v42, %v2815_v49 }
 0xe73   :  { %v2819_v35 = vadd.f32 %v2816_v46, %v2737_v36 }
 0xe75   :  { %v2823_v47 = vsel %vm339_vm4, %v2819_v35, 0.0 }
 0xe76   :  { %2824 = vadd.xlane.f32.xlu2 %v2823_v47 }
 0xee1   :  { %v2822_v26 = vpop.xlane.xlu1 %2821 }
 0xee2   :  { %v2826_v4 = vmul.f32 %v2822_v26, %v7053_v7 }
 0xee4   :  { %v2828_v33 = vsub.f32 %v2818_v8, %v2826_v4 }
 0xee6   :  { %v2830_v5 = vmul.f32 %v2828_v33, %v2828_v33 }
 0xee8   :  { %v2832_v27 = vsel %vm339_vm4, %v2830_v5, 0.0 }
 0xee9   :  { %v2825_v54 = vpop.xlane.xlu2 %2824  ;;  %2833 = vadd.xlane.f32.xlu0 %v2832_v27 }
 0xeea   :  { %v2827_v22 = vmul.f32 %v2825_v54, %v7053_v7 }
 0xeec   :  { %v2829_v40 = vsub.f32 %v2819_v35, %v2827_v22 }
 0xeee   :  { %v2831_v60 = vmul.f32 %v2829_v40, %v2829_v40 }
 0xef0   :  { %v2835_v56 = vsel %vm339_vm4, %v2831_v60, 0.0 }
 0xef1   :  { %2836 = vadd.xlane.f32.xlu1 %v2835_v56 }
 0xf5c   :  { %v2834_v23 = vpop.xlane.xlu0 %2833 }
 0xf5d   :  { %v2838_v6 = vmul.f32 %v2834_v23, %v7053_v7 }
 0xf5f   :  { %v2840_v11 = vadd.f32 1e-05, %v2838_v6 }
 0xf61   :  { %5904 = vrsqrt.f32 %v2840_v11  ;;  %vm2848_vm7 = vweird.f32 %v2840_v11 }
 0xf64   :  { %v2837_v59 = vpop.xlane.xlu1 %2836 }
 0xf65   :  { %v2839_v44 = vmul.f32 %v2837_v59, %v7053_v7 }
 0xf67   :  { %v5905_v48 = vpop.eup %5904  ;;  %v2841_v14 = vadd.f32 1e-05, %v2839_v44 }
 0xf68   :  { %v2843_v62 = vmul.f32 %v5905_v48, %v2840_v11  ;;  %vm2849_vm6 = vweird.f32 %v5905_v48 }
 0xf69   :  { %5906 = vrsqrt.f32 %v2841_v14  ;;  %vm2850_vm12 = vmor %vm2848_vm7, %vm2849_vm6  ;;  %vm2858_vm14 = vweird.f32 %v2841_v14  ;;  %vm5216_vm7 = vcmask 254976  }
 0xf6a   :  { %v2844_v0 = vmul.f32 %v5905_v48, %v2843_v62 }
 0xf6c   :  { %v2845_v10 = vmul.f32 0.5, %v2844_v0 }
 0xf6e   :  { %v2846_v45 = vsub.f32 1.5, %v2845_v10 }
 0xf6f   :  { %v5907_v13 = vpop.eup %5906 }
 0xf70   :  { %v2847_v20 = vmul.f32 %v5905_v48, %v2846_v45  ;;  %v2853_v19 = vmul.f32 %v5907_v13, %v2841_v14  ;;  %vm2859_vm13 = vweird.f32 %v5907_v13 }
 0xf71   :  { %vm2860_vm15 = vmor %vm2858_vm14, %vm2859_vm13 }
 0xf72   :  { %v2854_v21 = vmul.f32 %v5907_v13, %v2853_v19  ;;  %v2851_v3 = vsel %vm2850_vm12, %v5905_v48, %v2847_v20 }
 0xf73   :  { %v2862_v28 = vmul.f32 %v2851_v3, %v2828_v33 }
 0xf74   :  { %v2855_v25 = vmul.f32 0.5, %v2854_v21 }
 0xf75   :  { %v2867_v31 = vmul.f32 %v5759_v12, %v2862_v28 }
 0xf76   :  { %v2856_v16 = vsub.f32 1.5, %v2855_v25 }
 0xf77   :  { %v7085_v41 = vadd.f32 %v5760_v17, %v2867_v31 }
 0xf78   :  { %v2857_v30 = vmul.f32 %v5907_v13, %v2856_v16 }
 0xf7a   :  { %v2861_v34 = vsel %vm2860_vm15, %v5907_v13, %v2857_v30  ;;  %vm5277_vm15 = vcmask 123904  }
 0xf7b   :  { %v2863_v38 = vmul.f32 %v2861_v34, %v2829_v40 }
 0xf7d   :  { %v2868_v51 = vmul.f32 %v5759_v12, %v2863_v38 }
 0xf7f   :  { %v7087_v53 = vadd.f32 %v5760_v17, %v2868_v51 }
 0xf81   :  { %v2914_v36 = vpack.c.bf16 %v7087_v53, %v7085_v41 }
 0xf83   :  { %5554 = vmatmul.msk.bf16.vlgmr.msrb.gmra.mxu1 %vm339_vm4, %v2914_v36 }
0x1000   :  { %v2942_v32 = vpop.f32.mrf.mxu1 }
0x1001   :  { %v2943_v52 = vadd.f32 %v5761_v55, %v2942_v32 }
0x1003   :  { %v2949_v24 = vrot.slane %v2943_v52, 2  ;;  %v2977_v9 = vpack.c.bf16 %v2943_v52, %v2943_v52  ;;  %v7093_v43 = vrot.slane %v2943_v52, 4  ;;  %v7105_v61 = vrot.slane %v2943_v52, 6 }
0x1004   :  { %v2961_v11 = vmul.f32 0.35355338, %v2943_v52 }
0x1005   :  { %v2978_v57 = vpack.c.bf16 %v2949_v24, %v2949_v24  ;;  %v2986_v63 = vunpack.c.l.b16 %v2977_v9  ;;  %v2979_v50 = vpack.c.bf16 %v7093_v43, %v7093_v43  ;;  %v2980_v26 = vpack.c.bf16 %v7105_v61, %v7105_v61 }
0x1006   :  { %v2969_v37 = vpack.c.bf16 %v2961_v11, %v2961_v11  ;;  %v2962_v44 = vmul.f32 0.35355338, %v2949_v24  ;;  %v2963_v19 = vmul.f32 0.35355338, %v7093_v43  ;;  %v2964_v43 = vmul.f32 0.35355338, %v7105_v61 }
0x1007   :  { %v3010_v2 = vunpack.c.l.b16 %v2978_v57  ;;  %v7097_v1 = vpack.c.b16 %v2986_v63, %v2986_v63  ;;  %v3034_v8 = vunpack.c.l.b16 %v2979_v50  ;;  %v3058_v40 = vunpack.c.l.b16 %v2980_v26 }
0x1008   :  { %v2944_v15 = vpop.f32.mrf.mxu1  ;;  %v3470_v59 = vunpack.c.l.b16 %v2969_v37  ;;  %v2970_v14 = vpack.c.bf16 %v2962_v44, %v2962_v44  ;;  %v7186_v21 = vpack.c.bf16 %v2963_v19, %v2963_v19 }
0x1009   :  { %v7099_v18 = vpack.c.b16 %v3010_v2, %v3010_v2  ;;  %v7101_v42 = vadd.f32 %v5761_v55, %v2944_v15  ;;  %2988 = vrot.lane.b32.xlu2 %v7097_v1, %s6160_s8  ;;  %v7124_v4 = vpack.c.b16 %v3034_v8, %v3034_v8  ;;  %v7140_v23 = vpack.c.b16 %v3058_v40, %v3058_v40 }
0x100a   :  { %v7158_v48 = vpack.c.b16 %v3470_v59, %v3470_v59  ;;  %v3496_v62 = vunpack.c.l.b16 %v2970_v14  ;;  %v7207_v15 = vpack.c.bf16 %v2964_v43, %v2964_v43 }
0x100b   :  { %v7108_v29 = vrot.slane %v7101_v42, 2  ;;  %3012 = vrot.lane.b32.xlu0 %v7099_v18, %s6160_s8  ;;  %v7113_v58 = vrot.slane %v7101_v42, 6  ;;  %v2981_v49 = vpack.c.bf16 %v7101_v42, %v7101_v42  ;;  %v7118_v46 = vrot.slane %v7101_v42, 4 }
0x100c   :  { %v7168_v0 = vpack.c.b16 %v3496_v62, %v3496_v62  ;;  %v2965_v31 = vmul.f32 0.35355338, %v7101_v42 }
0x100d   :  { %v2982_v35 = vpack.c.bf16 %v7108_v29, %v7108_v29  ;;  %v3082_v47 = vunpack.c.l.b16 %v2981_v49  ;;  %v2984_v33 = vpack.c.bf16 %v7113_v58, %v7113_v58  ;;  %v2983_v54 = vpack.c.bf16 %v7118_v46, %v7118_v46 }
0x100e   :  { %v7196_v36 = vpack.c.bf16 %v2965_v31, %v2965_v31  ;;  %v2966_v63 = vmul.f32 0.35355338, %v7108_v29  ;;  %v2967_v50 = vmul.f32 0.35355338, %v7118_v46 }
0x100f   :  { %v7128_v5 = vpack.c.b16 %v3082_v47, %v3082_v47  ;;  %v3106_v27 = vunpack.c.l.b16 %v2982_v35  ;;  %v3154_v60 = vunpack.c.l.b16 %v2984_v33  ;;  %v3130_v56 = vunpack.c.l.b16 %v2983_v54 }
0x1010   :  { %v7209_v42 = vpack.c.bf16 %v2966_v63, %v2966_v63  ;;  %v7213_v35 = vpack.c.bf16 %v2967_v50, %v2967_v50  ;;  %v2968_v54 = vmul.f32 0.35355338, %v7113_v58 }
0x1011   :  { %v7132_v22 = vpack.c.b16 %v3106_v27, %v3106_v27  ;;  %3084 = vrot.lane.b32.xlu1 %v7128_v5, %s6160_s8  ;;  %3036 = vrot.lane.b32.xlu2 %v7124_v4, %s6160_s8  ;;  %v7142_v39 = vpack.c.b16 %v3154_v60, %v3154_v60  ;;  %v7144_v6 = vpack.c.b16 %v3130_v56, %v3130_v56 }
0x1012   :  { %v7228_v40 = vpack.c.bf16 %v2968_v54, %v2968_v54 }
0x1013   :  { %3108 = vrot.lane.b32.xlu0 %v7132_v22, %s6160_s8 }
0x1019   :  { %3060 = vrot.lane.b32.xlu1 %v7140_v23, %s6160_s8  ;;  %3156 = vrot.lane.b32.xlu2 %v7142_v39, %s6160_s8 }
0x101b   :  { %3132 = vrot.lane.b32.xlu0 %v7144_v6, %s6160_s8 }
0x1021   :  { %3336 = vrot.lane.b32.xlu1 %v7140_v23, %s6161_s19  ;;  %3294 = vrot.lane.b32.xlu2 %v7099_v18, %s6161_s19 }
0x1023   :  { %3273 = vrot.lane.b32.xlu0 %v7097_v1, %s6161_s19 }
0x1029   :  { %3472 = vrot.lane.b32.xlu1 %v7158_v48, %s6163_s6  ;;  %3315 = vrot.lane.b32.xlu2 %v7124_v4, %s6161_s19 }
0x102b   :  { %3474 = vrot.lane.b32.xlu0 %v7097_v1, %s6162_s30 }
0x1031   :  { %3357 = vrot.lane.b32.xlu2 %v7128_v5, %s6161_s19 }
0x1033   :  { %3498 = vrot.lane.b32.xlu0 %v7168_v0, %s6163_s6 }
0x1039   :  { %3500 = vrot.lane.b32.xlu2 %v7099_v18, %s6162_s30 }
0x103b   :  { %3526 = vrot.lane.b32.xlu0 %v7124_v4, %s6162_s30 }
0x1041   :  { %3378 = vrot.lane.b32.xlu2 %v7132_v22, %s6161_s19 }
0x1043   :  { %3399 = vrot.lane.b32.xlu0 %v7144_v6, %s6161_s19 }
0x104b   :  { %3420 = vrot.lane.b32.xlu0 %v7142_v39, %s6161_s19 }
0x1063   :  { %v2989_v10 = vpop.permute.xlu2 %2988 }
0x1064   :  { %v2994_v45 = vsel %vm651_vm8, %v2989_v10, 0 }
0x1065   :  { %3003 = vmatpush.bf16.xpose.msra.mxu2 %v2994_v45 }
0x106b   :  { %v3037_v13 = vpop.permute.xlu2 %3036 }
0x106c   :  { %v3042_v20 = vsel %vm651_vm8, %v3037_v13, 0  ;;  %5555 = vmatmul.msk.bf16.vlgmr.msra.gmra.mxu2 %vm651_vm8, %v2969_v37 }
0x106d   :  { %3051 = vmatpush.bf16.xpose.msra.mxu0 %v3042_v20 }
0x1073   :  { %v3157_v3 = vpop.permute.xlu2 %3156 }
0x1074   :  { %5557 = vmatmul.msk.bf16.vlgmr.msra.gmra.mxu0 %vm651_vm8, %v7186_v21  ;;  %v3162_v24 = vsel %vm651_vm8, %v3157_v3, 0 }
0x107b   :  { %v3295_v25 = vpop.permute.xlu2 %3294 }
0x107c   :  { %v3300_v51 = vsel %vm942_vm9, %v3295_v25, 0 }
0x107d   :  { %v3013_v16 = vpop.permute.xlu0 %3012 }
0x107e   :  { %v3018_v12 = vsel %vm651_vm8, %v3013_v16, 0 }
0x107f   :  { %3027 = vmatpush.bf16.xpose.msra.mxu3 %v3018_v12 }
0x1083   :  { %v3085_v28 = vpop.permute.xlu1 %3084  ;;  %v3316_v30 = vpop.permute.xlu2 %3315 }
0x1084   :  { %v3090_v34 = vsel %vm651_vm8, %v3085_v28, 0  ;;  %v3321_v2 = vsel %vm942_vm9, %v3316_v30, 0 }
0x1085   :  { %3099 = vmatpush.bf16.xpose.msrb.mxu2 %v3090_v34  ;;  %v3109_v17 = vpop.permute.xlu0 %3108 }
0x1086   :  { %5556 = vmatmul.msk.bf16.vlgmr.msra.gmra.mxu3 %vm651_vm8, %v2970_v14  ;;  %v3114_v38 = vsel %vm651_vm8, %v3109_v17, 0 }
0x1087   :  { %3123 = vmatpush.bf16.xpose.msrb.mxu3 %v3114_v38 }
0x108b   :  { %v3061_v55 = vpop.permute.xlu1 %3060  ;;  %v3358_v32 = vpop.permute.xlu2 %3357 }
0x108c   :  { %v3066_v52 = vsel %vm651_vm8, %v3061_v55, 0  ;;  %5559 = vmatmul.msk.bf16.vlgmr.msrb.gmra.mxu2 %vm651_vm8, %v7196_v36  ;;  %v3363_v47 = vsel %vm942_vm9, %v3358_v32, 0 }
0x108d   :  { %3075 = vmatpush.bf16.xpose.msra.mxu1 %v3066_v52  ;;  %v3133_v9 = vpop.permute.xlu0 %3132 }
0x108e   :  { %v3138_v57 = vsel %vm651_vm8, %v3133_v9, 0 }
0x108f   :  { %3309 = vmatpush.bf16.msra.mxu3 %v3300_v51  ;;  %3147 = vmatpush.bf16.xpose.msrb.mxu0 %v3138_v57 }
0x1093   :  { %v3337_v8 = vpop.permute.xlu1 %3336  ;;  %v7211_v49 = vpop.permute.xlu2 %3500 }
0x1094   :  { %v3342_v61 = vsel %vm942_vm9, %v3337_v8, 0  ;;  %5558 = vmatmul.msk.bf16.vlgmr.msra.gmra.mxu1 %vm651_vm8, %v7207_v15 }
0x1095   :  { %3171 = vmatpush.bf16.xpose.msrb.mxu1 %v3162_v24  ;;  %v3274_v29 = vpop.permute.xlu0 %3273 }
0x1096   :  { %5560 = vmatmul.msk.bf16.vlgmr.msrb.gmra.mxu3 %vm651_vm8, %v7209_v42  ;;  %v3279_v46 = vsel %vm942_vm9, %v3274_v29, 0  ;;  %5561 = vmatmul.msk.bf16.vlgmr.msrb.gmra.mxu0 %vm651_vm8, %v7213_v35 }
0x1097   :  { %3330 = vmatpush.bf16.msra.mxu0 %v3321_v2  ;;  %3288 = vmatpush.bf16.msra.mxu2 %v3279_v46 }
0x109b   :  { %3372 = vmatpush.bf16.msrb.mxu2 %v3363_v47  ;;  %v3379_v26 = vpop.permute.xlu2 %3378  ;;  %v7261_v8 = vpop.permute.xlu1 %3472 }
0x109c   :  { %v3384_v33 = vsel %vm942_vm9, %v3379_v26, 0 }
0x109d   :  { %3351 = vmatpush.bf16.msra.mxu1 %v3342_v61  ;;  %v7225_v27 = vpop.permute.xlu0 %3474  ;;  %3393 = vmatpush.bf16.msrb.mxu3 %v3384_v33 }
0x10a4   :  { %5562 = vmatmul.msk.bf16.vlgmr.msrb.gmra.mxu1 %vm651_vm8, %v7228_v40 }
0x10a5   :  { %v7232_v60 = vpop.permute.xlu0 %3498 }
0x10ad   :  { %v7234_v56 = vpop.permute.xlu0 %3526 }
0x10b5   :  { %v3400_v11 = vpop.permute.xlu0 %3399 }
0x10b6   :  { %v3405_v37 = vsel %vm942_vm9, %v3400_v11, 0 }
0x10b7   :  { %3414 = vmatpush.bf16.msrb.mxu0 %v3405_v37 }
0x10bd   :  { %v3421_v59 = vpop.permute.xlu0 %3420 }
0x10be   :  { %v3426_v44 = vsel %vm942_vm9, %v3421_v59, 0 }
0x10bf   :  { %3435 = vmatpush.bf16.msrb.mxu1 %v3426_v44 }
0x10ef   :  { %v3005_v14 = vpop.f32.mrf.mxu2 }
0x10f0   :  { %v3177_v31 = vsel %vm839_vm10, %v3005_v14, -inf }
0x10f1   :  { %v3053_v62 = vpop.f32.mrf.mxu0 }
0x10f2   :  { %v3183_v58 = vsel %vm839_vm10, %v3053_v62, -inf }
0x10f3   :  { %3184 = vmax.xlane.f32.xlu2 %v3183_v58 }
0x10f7   :  { %v3007_v10 = vpop.f32.mrf.mxu2 }
0x10f9   :  { %v3055_v45 = vpop.f32.mrf.mxu0 }
0x1109   :  { %v7239_v13 = vpop.f32.mrf.mxu3 }
0x110a   :  { %v3180_v20 = vsel %vm839_vm10, %v7239_v13, -inf }
0x110b   :  { %3181 = vmax.xlane.f32.xlu0 %v3180_v20 }
0x110f   :  { %v3101_v19 = vpop.f32.mrf.mxu2 }
0x1110   :  { %v3189_v9 = vsel %vm839_vm10, %v3101_v19, -inf }
0x1111   :  { %v3031_v3 = vpop.f32.mrf.mxu3  ;;  %v3077_v25 = vpop.f32.mrf.mxu1 }
0x1112   :  { %v3186_v16 = vsel %vm839_vm10, %v3077_v25, -inf  ;;  %v3522_v3 = vunpack.c.l.b16 %v7186_v21 }
0x1113   :  { %3187 = vmax.xlane.f32.xlu1 %v3186_v16  ;;  %v7244_v12 = vpop.f32.mrf.mxu0 }
0x1114   :  { %v3195_v32 = vsel %vm839_vm10, %v7244_v12, -inf }
0x1117   :  { %v3103_v28 = vpop.f32.mrf.mxu2 }
0x1119   :  { %v7246_v30 = vpop.f32.mrf.mxu3  ;;  %v3079_v34 = vpop.f32.mrf.mxu1 }
0x111a   :  { %v3192_v17 = vsel %vm839_vm10, %v7246_v30, -inf }
0x111b   :  { %3193 = vmax.xlane.f32.xlu2 %v3192_v17  ;;  %3178 = vmax.xlane.f32.xlu1 %v3177_v31  ;;  %v3151_v38 = vpop.f32.mrf.mxu0  ;;  %v3626_v31 = vunpack.c.l.b16 %v7213_v35 }
0x1121   :  { %v3127_v51 = vpop.f32.mrf.mxu3  ;;  %v3173_v55 = vpop.f32.mrf.mxu1 }
0x1122   :  { %v3198_v52 = vsel %vm839_vm10, %v3173_v55, -inf  ;;  %v7292_v51 = vpack.c.b16 %v3626_v31, %v3626_v31 }
0x1123   :  { %3196 = vmax.xlane.f32.xlu1 %v3195_v32  ;;  %3199 = vmax.xlane.f32.xlu0 %v3198_v52 }
0x1129   :  { %v3175_v24 = vpop.f32.mrf.mxu1 }
0x112b   :  { %3190 = vmax.xlane.f32.xlu0 %v3189_v9 }
0x113f   :  { %3552 = vrot.lane.b32.xlu0 %v7140_v23, %s6162_s30 }
0x1166   :  { %v3185_v43 = vpop.xlane.xlu2 %3184 }
0x1167   :  { %v3203_v57 = vsub.f32 %v3053_v62, %v3185_v43 }
0x1169   :  { %v3213_v63 = vmul.f32 1.442695, %v3203_v57 }
0x116b   :  { %5908 = vpow2.f32 %v3213_v63 }
0x1171   :  { %v7257_v2 = vpop.eup %5908 }
0x1172   :  { %v3231_v50 = vsel %vm839_vm10, %v7257_v2, 0.0 }
0x1173   :  { %3232 = vadd.xlane.f32.xlu1 %v3231_v50 }
0x117e   :  { %v3182_v47 = vpop.xlane.xlu0 %3181 }
0x117f   :  { %v3202_v16 = vsub.f32 %v7239_v13, %v3182_v47 }
0x1181   :  { %v3211_v17 = vmul.f32 1.442695, %v3202_v16 }
0x1186   :  { %v3188_v61 = vpop.xlane.xlu1 %3187 }
0x1187   :  { %v3204_v29 = vsub.f32 %v3077_v25, %v3188_v61  ;;  %v7280_v25 = vpack.c.b16 %v3522_v3, %v3522_v3 }
0x1189   :  { %v3215_v46 = vmul.f32 1.442695, %v3204_v29 }
0x118b   :  { %5910 = vpow2.f32 %v3215_v46  ;;  %v3548_v46 = vunpack.c.l.b16 %v7207_v15  ;;  %v3652_v15 = vunpack.c.l.b16 %v7228_v40 }
0x118e   :  { %v3179_v26 = vpop.xlane.xlu1 %3178  ;;  %v3194_v13 = vpop.xlane.xlu2 %3193 }
0x118f   :  { %v3201_v33 = vsub.f32 %v3005_v14, %v3179_v26  ;;  %v3206_v24 = vsub.f32 %v7246_v30, %v3194_v13  ;;  %v3532_v26 = vsel %vm651_vm8, %v7234_v56, 0  ;;  %v7334_v56 = vpack.c.b16 %v3652_v15, %v3652_v15 }
0x1191   :  { %v7263_v54 = vpop.eup %5910  ;;  %v3209_v11 = vmul.f32 1.442695, %v3201_v33  ;;  %v7322_v33 = vpack.c.b16 %v3548_v46, %v3548_v46 }
0x1192   :  { %v3234_v37 = vsel %vm839_vm10, %v7263_v54, 0.0 }
0x1193   :  { %5912 = vpow2.f32 %v3209_v11  ;;  %3235 = vadd.xlane.f32.xlu1 %v3234_v37  ;;  %v3574_v11 = vunpack.c.l.b16 %v7196_v36 }
0x1196   :  { %v3200_v59 = vpop.xlane.xlu0 %3199  ;;  %v3197_v34 = vpop.xlane.xlu1 %3196 }
0x1197   :  { %v3207_v21 = vsub.f32 %v7244_v12, %v3197_v34  ;;  %v3208_v38 = vsub.f32 %v3173_v55, %v3200_v59  ;;  %v3219_v55 = vmul.f32 1.442695, %v3206_v24 }
0x1199   :  { %v7267_v44 = vpop.eup %5912  ;;  %v3221_v32 = vmul.f32 1.442695, %v3207_v21 }
0x119a   :  { %v3225_v62 = vsel %vm839_vm10, %v7267_v44, 0.0 }
0x119b   :  { %3226 = vadd.xlane.f32.xlu2 %v3225_v62 }
0x119e   :  { %v3191_v58 = vpop.xlane.xlu0 %3190 }
0x119f   :  { %v3205_v10 = vsub.f32 %v3101_v19, %v3191_v58  ;;  %v3600_v19 = vunpack.c.l.b16 %v7209_v42  ;;  %v3223_v42 = vmul.f32 1.442695, %v3208_v38 }
0x11a1   :  { %v3217_v45 = vmul.f32 1.442695, %v3205_v10  ;;  %v7286_v28 = vpack.c.b16 %v3600_v19, %v3600_v19  ;;  %v3480_v19 = vsel %vm651_vm8, %v7225_v27, 0 }
0x11a3   :  { %5914 = vpow2.f32 %v3217_v45 }
0x11a4   :  { %5916 = vpow2.f32 %v3211_v17 }
0x11a5   :  { %5918 = vpow2.f32 %v3221_v32 }
0x11a6   :  { %5920 = vpow2.f32 %v3223_v42 }
0x11a7   :  { %5922 = vpow2.f32 %v3219_v55 }
0x11a9   :  { %v7271_v14 = vpop.eup %5914 }
0x11aa   :  { %v3237_v20 = vsel %vm839_vm10, %v7271_v14, 0.0  ;;  %v7296_v52 = vpop.eup %5916 }
0x11ab   :  { %3238 = vadd.xlane.f32.xlu0 %v3237_v20  ;;  %v3228_v35 = vsel %vm839_vm10, %v7296_v52, 0.0  ;;  %v7303_v12 = vpop.eup %5918 }
0x11ac   :  { %3604 = vrot.lane.b32.xlu1 %v7132_v22, %s6162_s30  ;;  %v7305_v9 = vpop.eup %5920  ;;  %v3243_v43 = vsel %vm839_vm10, %v7303_v12, 0.0 }
0x11ad   :  { %v3246_v30 = vsel %vm839_vm10, %v7305_v9, 0.0  ;;  %v7313_v57 = vpop.eup %5922 }
0x11ae   :  { %v3240_v63 = vsel %vm839_vm10, %v7313_v57, 0.0 }
0x11b1   :  { %v3553_v58 = vpop.permute.xlu0 %3552 }
0x11b2   :  { %v3558_v10 = vsel %vm651_vm8, %v3553_v58, 0 }
0x11b3   :  { %3578 = vrot.lane.b32.xlu2 %v7128_v5, %s6162_s30 }
0x11bf   :  { %3524 = vrot.lane.b32.xlu0 %v7280_v25, %s6163_s6 }
0x11c7   :  { %3602 = vrot.lane.b32.xlu0 %v7286_v28, %s6163_s6 }
0x11cf   :  { %3628 = vrot.lane.b32.xlu0 %v7292_v51, %s6163_s6 }
0x11d6   :  { %3229 = vadd.xlane.f32.xlu1 %v3228_v35  ;;  %v3506_v35 = vsel %vm651_vm8, %v7211_v49, 0 }
0x11d7   :  { %3794 = vrot.lane.b32.xlu0 %v7099_v18, %s6164_s12 }
0x11dc   :  { %3244 = vadd.xlane.f32.xlu2 %v3243_v43 }
0x11de   :  { %3247 = vadd.xlane.f32.xlu1 %v3246_v30 }
0x11df   :  { %3836 = vrot.lane.b32.xlu0 %v7140_v23, %s6164_s12 }
0x11e6   :  { %v3233_v50 = vpop.xlane.xlu1 %3232  ;;  %3241 = vadd.xlane.f32.xlu1 %v3240_v63 }
0x11e7   :  { %5924 = vrcp.f32 %v3233_v50 }
0x11ed   :  { %v5925_v61 = vpop.eup %5924 }
0x11ee   :  { %v3259_v29 = vmul.f32 %v5925_v61, %v7257_v2  ;;  %v7329_v2 = vpack.c.b16 %v3574_v11, %v3574_v11 }
0x11f0   :  { %v3267_v47 = vpack.c.bf16 %v3259_v29, %v3259_v29 }
0x11f2   :  { %5565 = vmatmul.msk.bf16.vlgmr.msra.gmra.mxu0 %vm938_vm11, %v3267_v47 }
0x11f3   :  { %3541 = vmatpush.bf16.xpose.msra.mxu0 %v3532_v26 }
0x11f4   :  { %3550 = vrot.lane.b32.xlu2 %v7322_v33, %s6163_s6 }
0x11fc   :  { %3630 = vrot.lane.b32.xlu2 %v7144_v6, %s6162_s30 }
0x11ff   :  { %3576 = vrot.lane.b32.xlu1 %v7329_v2, %s6163_s6 }
0x1204   :  { %3654 = vrot.lane.b32.xlu2 %v7334_v56, %s6163_s6 }
0x1206   :  { %v3236_v37 = vpop.xlane.xlu1 %3235 }
0x1207   :  { %5926 = vrcp.f32 %v3236_v37  ;;  %3656 = vrot.lane.b32.xlu1 %v7142_v39, %s6162_s30 }
0x120d   :  { %v5927_v36 = vpop.eup %5926 }
0x120e   :  { %v3260_v59 = vmul.f32 %v5927_v36, %v7263_v54  ;;  %v3227_v62 = vpop.xlane.xlu2 %3226 }
0x120f   :  { %5928 = vrcp.f32 %v3227_v62 }
0x1210   :  { %v3268_v40 = vpack.c.bf16 %v3260_v59, %v3260_v59 }
0x1212   :  { %5566 = vmatmul.msk.bf16.vlgmr.msra.gmra.mxu1 %vm938_vm11, %v3268_v40 }
0x1213   :  { %3567 = vmatpush.bf16.xpose.msra.mxu1 %v3558_v10 }
0x1215   :  { %v5929_v45 = vpop.eup %5928 }
0x1216   :  { %v3257_v20 = vmul.f32 %v5929_v45, %v7267_v44  ;;  %v3579_v17 = vpop.permute.xlu2 %3578 }
0x1217   :  { %v3584_v21 = vsel %vm651_vm8, %v3579_v17, 0 }
0x1218   :  { %v3265_v3 = vpack.c.bf16 %v3257_v20, %v3257_v20 }
0x121a   :  { %5563 = vmatmul.msk.bf16.vlgmr.msra.gmra.mxu2 %vm938_vm11, %v3265_v3 }
0x121b   :  { %3489 = vmatpush.bf16.xpose.msra.mxu2 %v3480_v19 }
0x121e   :  { %v3239_v54 = vpop.xlane.xlu0 %3238  ;;  %v3605_v44 = vpop.permute.xlu1 %3604 }
0x121f   :  { %5930 = vrcp.f32 %v3239_v54  ;;  %v3610_v15 = vsel %vm651_vm8, %v3605_v44, 0 }
0x1225   :  { %v5931_v16 = vpop.eup %5930 }
0x1226   :  { %v3261_v34 = vmul.f32 %v5931_v16, %v7271_v14 }
0x1228   :  { %v3269_v31 = vpack.c.bf16 %v3261_v34, %v3261_v34 }
0x122a   :  { %5567 = vmatmul.msk.bf16.vlgmr.msrb.gmra.mxu2 %vm938_vm11, %v3269_v31 }
0x122b   :  { %3593 = vmatpush.bf16.xpose.msrb.mxu2 %v3584_v21 }
0x1231   :  { %v3525_v42 = vpop.permute.xlu0 %3524 }
0x1239   :  { %v3603_v29 = vpop.permute.xlu0 %3602 }
0x123a   :  { %5571 = vmatmul.msk.bf16.vlgmr.msra.gmra.mxu2 %vm651_vm8, %v7261_v8 }
0x1241   :  { %v3629_v11 = vpop.permute.xlu0 %3628 }
0x1249   :  { %v3230_v27 = vpop.xlane.xlu1 %3229 }
0x124a   :  { %5932 = vrcp.f32 %v3230_v27 }
0x124f   :  { %v3245_v38 = vpop.xlane.xlu2 %3244 }
0x1250   :  { %v5933_v32 = vpop.eup %5932  ;;  %5934 = vrcp.f32 %v3245_v38 }
0x1251   :  { %v3258_v13 = vmul.f32 %v5933_v32, %v7296_v52  ;;  %v3248_v14 = vpop.xlane.xlu1 %3247 }
0x1252   :  { %5936 = vrcp.f32 %v3248_v14 }
0x1253   :  { %v3266_v24 = vpack.c.bf16 %v3258_v13, %v3258_v13 }
0x1255   :  { %5564 = vmatmul.msk.bf16.vlgmr.msra.gmra.mxu3 %vm938_vm11, %v3266_v24 }
0x1256   :  { %v5935_v55 = vpop.eup %5934  ;;  %3515 = vmatpush.bf16.xpose.msra.mxu3 %v3506_v35 }
0x1257   :  { %v3263_v8 = vmul.f32 %v5935_v55, %v7303_v12  ;;  %v3551_v43 = vpop.permute.xlu2 %3550 }
0x1258   :  { %v5937_v30 = vpop.eup %5936 }
0x1259   :  { %v3271_v63 = vpack.c.bf16 %v3263_v8, %v3263_v8  ;;  %v3264_v50 = vmul.f32 %v5937_v30, %v7305_v9  ;;  %v3242_v61 = vpop.xlane.xlu1 %3241  ;;  %v3795_v9 = vpop.permute.xlu0 %3794 }
0x125a   :  { %5938 = vrcp.f32 %v3242_v61 }
0x125b   :  { %v3272_v52 = vpack.c.bf16 %v3264_v50, %v3264_v50  ;;  %5569 = vmatmul.msk.bf16.vlgmr.msrb.gmra.mxu0 %vm938_vm11, %v3271_v63 }
0x125d   :  { %5570 = vmatmul.msk.bf16.vlgmr.msrb.gmra.mxu1 %vm938_vm11, %v3272_v52 }
0x125f   :  { %v3631_v49 = vpop.permute.xlu2 %3630 }
0x1260   :  { %v5939_v46 = vpop.eup %5938  ;;  %v3636_v47 = vsel %vm651_vm8, %v3631_v49, 0 }
0x1261   :  { %v3262_v26 = vmul.f32 %v5939_v46, %v7313_v57  ;;  %3645 = vmatpush.bf16.xpose.msrb.mxu0 %v3636_v47  ;;  %v3800_v57 = vsel %vm942_vm9, %v3795_v9, 0  ;;  %v3837_v62 = vpop.permute.xlu0 %3836 }
0x1262   :  { %v3842_v10 = vsel %vm942_vm9, %v3837_v62, 0 }
0x1263   :  { %v3270_v12 = vpack.c.bf16 %v3262_v26, %v3262_v26 }
0x1265   :  { %5568 = vmatmul.msk.bf16.vlgmr.msrb.gmra.mxu3 %vm938_vm11, %v3270_v12 }
0x1266   :  { %3619 = vmatpush.bf16.xpose.msrb.mxu3 %v3610_v15 }
0x1267   :  { %v3655_v45 = vpop.permute.xlu2 %3654 }
0x126b   :  { %5573 = vmatmul.msk.bf16.vlgmr.msra.gmra.mxu0 %vm651_vm8, %v3525_v42 }
0x126d   :  { %5574 = vmatmul.msk.bf16.vlgmr.msra.gmra.mxu1 %vm651_vm8, %v3551_v43 }
0x126f   :  { %v3332_v37 = vpop.f32.mrf.mxu0 }
0x1270   :  { %3453 = vst [vmem:[#allocation1 + $0x2] ss:$4 sm:$0xff] %v3332_v37 }
0x1271   :  { %v3577_v36 = vpop.permute.xlu1 %3576 }
0x1272   :  { %5575 = vmatmul.msk.bf16.vlgmr.msrb.gmra.mxu2 %vm651_vm8, %v3577_v36 }
0x1275   :  { %5572 = vmatmul.msk.bf16.vlgmr.msra.gmra.mxu3 %vm651_vm8, %v7232_v60 }
0x1276   :  { %3809 = vmatpush.bf16.msra.mxu3 %v3800_v57 }
0x1277   :  { %v3334_v59 = vpop.f32.mrf.mxu0 }
0x1279   :  { %v3657_v58 = vpop.permute.xlu1 %3656 }
0x127a   :  { %v3662_v40 = vsel %vm651_vm8, %v3657_v58, 0 }
0x127b   :  { %5577 = vmatmul.msk.bf16.vlgmr.msrb.gmra.mxu0 %vm651_vm8, %v3629_v11  ;;  %3671 = vmatpush.bf16.xpose.msrb.mxu1 %v3662_v40 }
0x1282   :  { %5578 = vmatmul.msk.bf16.vlgmr.msrb.gmra.mxu1 %vm651_vm8, %v3655_v45 }
0x1283   :  { %3851 = vmatpush.bf16.msra.mxu1 %v3842_v10 }
0x1285   :  { %5576 = vmatmul.msk.bf16.vlgmr.msrb.gmra.mxu3 %vm651_vm8, %v3603_v29 }
0x128f   :  { %v3353_v20 = vpop.f32.mrf.mxu1 }
0x1290   :  { %3455 = vst [vmem:[#allocation1 + $0x3] ss:$4 sm:$0xff] %v3353_v20 }
0x1297   :  { %v3355_v60 = vpop.f32.mrf.mxu1 }
0x129d   :  { %v3290_v3 = vpop.f32.mrf.mxu2 }
0x129e   :  { %3449 = vst [vmem:[#allocation1] ss:$4 sm:$0xff] %v3290_v3 }
0x12a5   :  { %v3292_v19 = vpop.f32.mrf.mxu2 }
0x12ad   :  { %v3374_v54 = vpop.f32.mrf.mxu2 }
0x12ae   :  { %3457 = vst [vmem:[#allocation1 + $0x20] ss:$4 sm:$0xff] %v3374_v54 }
0x12b5   :  { %v3376_v16 = vpop.f32.mrf.mxu2 }
0x12bd   :  { %v3491_v34 = vpop.f32.mrf.mxu2 }
0x12be   :  { %v3677_v30 = vsel %vm839_vm10, %v3491_v34, -inf }
0x12c5   :  { %v3493_v17 = vpop.f32.mrf.mxu2 }
0x12d8   :  { %v3311_v31 = vpop.f32.mrf.mxu3  ;;  %v3416_v21 = vpop.f32.mrf.mxu0 }
0x12d9   :  { %3451 = vst [vmem:[#allocation1 + $0x1] ss:$4 sm:$0xff] %v3311_v31 }
0x12da   :  { %3461 = vst [vmem:[#allocation1 + $0x22] ss:$4 sm:$0xff] %v3416_v21  ;;  %v3437_v44 = vpop.f32.mrf.mxu1 }
0x12db   :  { %3463 = vst [vmem:[#allocation1 + $0x23] ss:$4 sm:$0xff] %v3437_v44 }
0x12e0   :  { %v3313_v27 = vpop.f32.mrf.mxu3  ;;  %v3418_v38 = vpop.f32.mrf.mxu0 }
0x12e2   :  { %v3439_v32 = vpop.f32.mrf.mxu1 }
0x12e8   :  { %v3395_v42 = vpop.f32.mrf.mxu3  ;;  %v3543_v13 = vpop.f32.mrf.mxu0 }
0x12e9   :  { %3459 = vst [vmem:[#allocation1 + $0x21] ss:$4 sm:$0xff] %v3395_v42  ;;  %v3683_v14 = vsel %vm839_vm10, %v3543_v13, -inf }
0x12ea   :  { %3684 = vmax.xlane.f32.xlu2 %v3683_v14  ;;  %v3569_v24 = vpop.f32.mrf.mxu1 }
0x12eb   :  { %v3686_v35 = vsel %vm839_vm10, %v3569_v24, -inf }
0x12ec   :  { %3687 = vmax.xlane.f32.xlu1 %v3686_v35 }
0x12f0   :  { %v3397_v55 = vpop.f32.mrf.mxu3  ;;  %v3545_v8 = vpop.f32.mrf.mxu0 }
0x12f2   :  { %v3571_v43 = vpop.f32.mrf.mxu1 }
0x12f4   :  { %3678 = vmax.xlane.f32.xlu1 %v3677_v30 }
0x12f5   :  { %v3595_v63 = vpop.f32.mrf.mxu2 }
0x12f6   :  { %v3689_v15 = vsel %vm839_vm10, %v3595_v63, -inf }
0x12f8   :  { %v3517_v50 = vpop.f32.mrf.mxu3  ;;  %v7378_v61 = vpop.f32.mrf.mxu0 }
0x12f9   :  { %v3680_v29 = vsel %vm839_vm10, %v3517_v50, -inf  ;;  %v3695_v36 = vsel %vm839_vm10, %v7378_v61, -inf }
0x12fa   :  { %3681 = vmax.xlane.f32.xlu0 %v3680_v29 }
0x12fd   :  { %v3597_v52 = vpop.f32.mrf.mxu2 }
0x12ff   :  { %v3673_v49 = vpop.f32.mrf.mxu1 }
0x1300   :  { %v3519_v46 = vpop.f32.mrf.mxu3  ;;  %v3649_v47 = vpop.f32.mrf.mxu0  ;;  %v3698_v26 = vsel %vm839_vm10, %v3673_v49, -inf }
0x1302   :  { %3815 = vrot.lane.b32.xlu2 %v7124_v4, %s6164_s12  ;;  %3699 = vmax.xlane.f32.xlu0 %v3698_v26 }
0x1307   :  { %v3675_v12 = vpop.f32.mrf.mxu1 }
0x1308   :  { %v3621_v11 = vpop.f32.mrf.mxu3 }
0x1309   :  { %v3692_v37 = vsel %vm839_vm10, %v3621_v11, -inf }
0x130a   :  { %3690 = vmax.xlane.f32.xlu0 %v3689_v15 }
0x130d   :  { %3773 = vrot.lane.b32.xlu1 %v7097_v1, %s6164_s12 }
0x1310   :  { %v3623_v9 = vpop.f32.mrf.mxu3 }
0x132b   :  { %3693 = vmax.xlane.f32.xlu2 %v3692_v37 }
0x1337   :  { %3696 = vmax.xlane.f32.xlu1 %v3695_v36 }
0x135d   :  { %v3685_v57 = vpop.xlane.xlu2 %3684 }
0x135e   :  { %v3703_v59 = vsub.f32 %v3543_v13, %v3685_v57 }
0x135f   :  { %v3688_v62 = vpop.xlane.xlu1 %3687 }
0x1360   :  { %v3713_v58 = vmul.f32 1.442695, %v3703_v59  ;;  %v3704_v40 = vsub.f32 %v3569_v24, %v3688_v62 }
0x1362   :  { %5940 = vpow2.f32 %v3713_v58  ;;  %v3715_v10 = vmul.f32 1.442695, %v3704_v40 }
0x1364   :  { %5942 = vpow2.f32 %v3715_v10 }
0x1365   :  { %v3816_v45 = vpop.permute.xlu2 %3815 }
0x1366   :  { %v3821_v20 = vsel %vm942_vm9, %v3816_v45, 0 }
0x1367   :  { %v3679_v60 = vpop.xlane.xlu1 %3678  ;;  %3830 = vmatpush.bf16.msra.mxu0 %v3821_v20 }
0x1368   :  { %v7391_v3 = vpop.eup %5940  ;;  %v3701_v19 = vsub.f32 %v3491_v34, %v3679_v60 }
0x1369   :  { %v3731_v54 = vsel %vm839_vm10, %v7391_v3, 0.0 }
0x136a   :  { %v7395_v16 = vpop.eup %5942  ;;  %v3709_v17 = vmul.f32 1.442695, %v3701_v19  ;;  %3732 = vadd.xlane.f32.xlu0 %v3731_v54 }
0x136b   :  { %v3734_v31 = vsel %vm839_vm10, %v7395_v16, 0.0 }
0x136c   :  { %5944 = vpow2.f32 %v3709_v17  ;;  %3735 = vadd.xlane.f32.xlu2 %v3734_v31 }
0x136d   :  { %v3682_v21 = vpop.xlane.xlu0 %3681 }
0x136e   :  { %v3702_v44 = vsub.f32 %v3517_v50, %v3682_v21 }
0x1370   :  { %v3711_v27 = vmul.f32 1.442695, %v3702_v44 }
0x1372   :  { %v7399_v38 = vpop.eup %5944  ;;  %5946 = vpow2.f32 %v3711_v27  ;;  %v5524_v27 = vld [vmem:[%s7836_s15 + $0x14] sm:$0xf] }
0x1373   :  { %v3725_v34 = vsel %vm839_vm10, %v7399_v38, 0.0 }
0x1374   :  { %3726 = vadd.xlane.f32.xlu2 %v3725_v34 }
0x1375   :  { %v3700_v32 = vpop.xlane.xlu0 %3699 }
0x1376   :  { %v3708_v42 = vsub.f32 %v3673_v49, %v3700_v32  ;;  %v3973_v32 = vsel %vm300_vm0, %v5524_v27, 0 }
0x1378   :  { %v7403_v13 = vpop.eup %5946  ;;  %v3723_v14 = vmul.f32 1.442695, %v3708_v42 }
0x1379   :  { %v3728_v24 = vsel %vm839_vm10, %v7403_v13, 0.0 }
0x137a   :  { %5948 = vpow2.f32 %v3723_v14  ;;  %3729 = vadd.xlane.f32.xlu1 %v3728_v24 }
0x137d   :  { %v3691_v35 = vpop.xlane.xlu0 %3690 }
0x137e   :  { %v3705_v55 = vsub.f32 %v3595_v63, %v3691_v35 }
0x137f   :  { %v3774_v8 = vpop.permute.xlu1 %3773 }
0x1380   :  { %v7407_v43 = vpop.eup %5948  ;;  %v3717_v30 = vmul.f32 1.442695, %v3705_v55  ;;  %v3779_v50 = vsel %vm942_vm9, %v3774_v8, 0 }
0x1381   :  { %3788 = vmatpush.bf16.msra.mxu2 %v3779_v50  ;;  %v3746_v29 = vsel %vm839_vm10, %v7407_v43, 0.0 }
0x1382   :  { %5950 = vpow2.f32 %v3717_v30  ;;  %3747 = vadd.xlane.f32.xlu2 %v3746_v29 }
0x1388   :  { %v7412_v52 = vpop.eup %5950 }
0x1389   :  { %v3737_v49 = vsel %vm839_vm10, %v7412_v52, 0.0 }
0x138a   :  { %3738 = vadd.xlane.f32.xlu1 %v3737_v49 }
0x139e   :  { %v3694_v46 = vpop.xlane.xlu2 %3693 }
0x139f   :  { %v3706_v63 = vsub.f32 %v3621_v11, %v3694_v46 }
0x13a1   :  { %v3719_v47 = vmul.f32 1.442695, %v3706_v63 }
0x13a3   :  { %5952 = vpow2.f32 %v3719_v47  ;;  %3857 = vrot.lane.b32.xlu1 %v7128_v5, %s6164_s12 }
0x13a9   :  { %v7418_v26 = vpop.eup %5952 }
0x13aa   :  { %v3697_v12 = vpop.xlane.xlu1 %3696  ;;  %v3740_v15 = vsel %vm839_vm10, %v7418_v26, 0.0 }
0x13ab   :  { %v3707_v9 = vsub.f32 %v7378_v61, %v3697_v12  ;;  %4057 = vrot.lane.b32.xlu1 %v7124_v4, %s6165_s20  ;;  %3741 = vadd.xlane.f32.xlu2 %v3740_v15 }
0x13ad   :  { %v3721_v37 = vmul.f32 1.442695, %v3707_v9 }
0x13af   :  { %5954 = vpow2.f32 %v3721_v37 }
0x13b3   :  { %4078 = vrot.lane.b32.xlu1 %v7322_v33, %s6166_s27 }
0x13b5   :  { %v7427_v11 = vpop.eup %5954 }
0x13b6   :  { %v3743_v36 = vsel %vm839_vm10, %v7427_v11, 0.0 }
0x13b7   :  { %3744 = vadd.xlane.f32.xlu0 %v3743_v36  ;;  %v5523_v36 = vld [vmem:[%s7836_s15 + $0x10] sm:$0xf] }
0x13bb   :  { %4149 = vrot.lane.b32.xlu1 %v7144_v6, %s6165_s20 }
0x13c3   :  { %4032 = vrot.lane.b32.xlu1 %v7168_v0, %s6166_s27  ;;  %3899 = vrot.lane.b32.xlu2 %v7144_v6, %s6164_s12 }
0x13cb   :  { %3878 = vrot.lane.b32.xlu0 %v7132_v22, %s6164_s12  ;;  %4103 = vrot.lane.b32.xlu1 %v7128_v5, %s6165_s20 }
0x13cc   :  { %4080 = vrot.lane.b32.xlu2 %v7140_v23, %s6165_s20 }
0x13d3   :  { %3920 = vrot.lane.b32.xlu0 %v7142_v39, %s6164_s12  ;;  %4124 = vrot.lane.b32.xlu1 %v7286_v28, %s6166_s27 }
0x13d4   :  { %4011 = vrot.lane.b32.xlu2 %v7097_v1, %s6165_s20 }
0x13db   :  { %4055 = vrot.lane.b32.xlu0 %v7280_v25, %s6166_s27 }
0x13dc   :  { %4172 = vrot.lane.b32.xlu2 %v7142_v39, %s6165_s20 }
0x13dd   :  { %v3733_v61 = vpop.xlane.xlu0 %3732 }
0x13de   :  { %5956 = vrcp.f32 %v3733_v61 }
0x13df   :  { %v3736_v57 = vpop.xlane.xlu2 %3735 }
0x13e0   :  { %5958 = vrcp.f32 %v3736_v57 }
0x13e3   :  { %4034 = vrot.lane.b32.xlu0 %v7099_v18, %s6165_s20 }
0x13e4   :  { %v5957_v59 = vpop.eup %5956  ;;  %4147 = vrot.lane.b32.xlu2 %v7292_v51, %s6166_s27 }
0x13e5   :  { %v3759_v62 = vmul.f32 %v5957_v59, %v7391_v3 }
0x13e6   :  { %v5959_v58 = vpop.eup %5958 }
0x13e7   :  { %v3767_v40 = vpack.c.bf16 %v3759_v62, %v3759_v62  ;;  %v3760_v10 = vmul.f32 %v5959_v58, %v7395_v16  ;;  %v3727_v45 = vpop.xlane.xlu2 %3726  ;;  %v3993_v62 = vsel %vm300_vm0, %v5523_v36, 0 }
0x13e8   :  { %5960 = vrcp.f32 %v3727_v45 }
0x13e9   :  { %v3768_v20 = vpack.c.bf16 %v3760_v10, %v3760_v10  ;;  %5581 = vmatmul.msk.bf16.vlgmr.msra.gmra.mxu0 %vm938_vm11, %v3767_v40 }
0x13eb   :  { %4009 = vrot.lane.b32.xlu0 %v7158_v48, %s6166_s27  ;;  %5582 = vmatmul.msk.bf16.vlgmr.msra.gmra.mxu1 %vm938_vm11, %v3768_v20 }
0x13ec   :  { %4126 = vrot.lane.b32.xlu2 %v7132_v22, %s6165_s20 }
0x13ed   :  { %v3730_v60 = vpop.xlane.xlu1 %3729 }
0x13ee   :  { %v5961_v3 = vpop.eup %5960  ;;  %5962 = vrcp.f32 %v3730_v60 }
0x13ef   :  { %v3757_v19 = vmul.f32 %v5961_v3, %v7399_v38 }
0x13f1   :  { %v3765_v54 = vpack.c.bf16 %v3757_v19, %v3757_v19 }
0x13f3   :  { %4170 = vrot.lane.b32.xlu0 %v7334_v56, %s6166_s27  ;;  %5579 = vmatmul.msk.bf16.vlgmr.msra.gmra.mxu2 %vm938_vm11, %v3765_v54 }
0x13f4   :  { %v5963_v16 = vpop.eup %5962 }
0x13f5   :  { %v3758_v17 = vmul.f32 %v5963_v16, %v7403_v13  ;;  %v3748_v42 = vpop.xlane.xlu2 %3747  ;;  %v3465_v16 = vld.sshfl [vmem:[#allocation1 + $0x20] sm:$0xff pattern:$0x73625140] }
0x13f7   :  { %v3766_v31 = vpack.c.bf16 %v3758_v17, %v3758_v17 }
0x13f9   :  { %5580 = vmatmul.msk.bf16.vlgmr.msra.gmra.mxu3 %vm938_vm11, %v3766_v31  ;;  %v3464_v31 = vld.sshfl [vmem:[#allocation1] sm:$0xff pattern:$0x73625140] }
0x13fb   :  { %4101 = vrot.lane.b32.xlu0 %v7329_v2, %s6166_s27 }
0x13fd   :  { %v3739_v21 = vpop.xlane.xlu1 %3738 }
0x13fe   :  { %5964 = vrcp.f32 %v3739_v21  ;;  %v3468_v21 = vpack.c.bf16 %v3465_v16, %v3464_v31 }
0x1404   :  { %v5965_v44 = vpop.eup %5964 }
0x1405   :  { %v3761_v38 = vmul.f32 %v5965_v44, %v7412_v52 }
0x1407   :  { %v3769_v13 = vpack.c.bf16 %v3761_v38, %v3761_v38 }
0x1415   :  { %v3858_v34 = vpop.permute.xlu1 %3857 }
0x1416   :  { %v3863_v14 = vsel %vm942_vm9, %v3858_v34, 0 }
0x1417   :  { %3872 = vmatpush.bf16.msrb.mxu2 %v3863_v14 }
0x141a   :  { %5583 = vmatmul.msk.bf16.vlgmr.msrb.gmra.mxu2 %vm938_vm11, %v3769_v13 }
0x141b   :  { %3982 = vmatpush.bf16.msra.mxu2 %v3973_v32 }
0x141d   :  { %v4058_v24 = vpop.permute.xlu1 %4057 }
0x141e   :  { %v4063_v35 = vsel %vm651_vm8, %v4058_v24, 0  ;;  %v3742_v55 = vpop.xlane.xlu2 %3741 }
0x141f   :  { %4072 = vmatpush.bf16.xpose.msrb.mxu2 %v4063_v35 }
0x1425   :  { %v4079_v8 = vpop.permute.xlu1 %4078 }
0x1426   :  { %v3900_v30 = vpop.permute.xlu2 %3899 }
0x1427   :  { %v3905_v50 = vsel %vm942_vm9, %v3900_v30, 0 }
0x1428   :  { %3914 = vmatpush.bf16.msrb.mxu0 %v3905_v50 }
0x142a   :  { %v3745_v29 = vpop.xlane.xlu0 %3744 }
0x142b   :  { %5966 = vrcp.f32 %v3745_v29 }
0x142c   :  { %5968 = vrcp.f32 %v3742_v55 }
0x142d   :  { %v7480_v52 = vpop.permute.xlu1 %4149  ;;  %5970 = vrcp.f32 %v3748_v42 }
0x142e   :  { %v4081_v49 = vpop.permute.xlu2 %4080 }
0x142f   :  { %v4086_v20 = vsel %vm651_vm8, %v4081_v49, 0 }
0x1431   :  { %v5967_v46 = vpop.eup %5966 }
0x1432   :  { %v3763_v63 = vmul.f32 %v5967_v46, %v7427_v11  ;;  %v5969_v37 = vpop.eup %5968 }
0x1433   :  { %v3762_v61 = vmul.f32 %v5969_v37, %v7418_v26  ;;  %v5971_v45 = vpop.eup %5970 }
0x1434   :  { %v3771_v47 = vpack.c.bf16 %v3763_v63, %v3763_v63  ;;  %v3764_v26 = vmul.f32 %v5971_v45, %v7407_v43 }
0x1435   :  { %v4033_v12 = vpop.permute.xlu1 %4032  ;;  %v3770_v40 = vpack.c.bf16 %v3762_v61, %v3762_v61 }
0x1436   :  { %5585 = vmatmul.msk.bf16.vlgmr.msrb.gmra.mxu0 %vm938_vm11, %v3771_v47  ;;  %v4012_v15 = vpop.permute.xlu2 %4011  ;;  %v3772_v19 = vpack.c.bf16 %v3764_v26, %v3764_v26 }
0x1437   :  { %v4017_v9 = vsel %vm651_vm8, %v4012_v15, 0 }
0x1438   :  { %4026 = vmatpush.bf16.xpose.msra.mxu0 %v4017_v9 }
0x143d   :  { %v4104_v57 = vpop.permute.xlu1 %4103  ;;  %v3879_v59 = vpop.permute.xlu0 %3878 }
0x143e   :  { %v4109_v11 = vsel %vm651_vm8, %v4104_v57, 0  ;;  %v3884_v58 = vsel %vm942_vm9, %v3879_v59, 0  ;;  %v4173_v10 = vpop.permute.xlu2 %4172 }
0x143f   :  { %3893 = vmatpush.bf16.msrb.mxu3 %v3884_v58  ;;  %v4178_v44 = vsel %vm651_vm8, %v4173_v10, 0 }
0x1440   :  { %4118 = vmatpush.bf16.xpose.msrb.mxu0 %v4109_v11 }
0x1442   :  { %5584 = vmatmul.msk.bf16.vlgmr.msrb.gmra.mxu3 %vm938_vm11, %v3770_v40 }
0x1443   :  { %4002 = vmatpush.bf16.msra.mxu3 %v3993_v62  ;;  %v4155_v62 = vsel %vm651_vm8, %v7480_v52, 0 }
0x1445   :  { %v3921_v60 = vpop.permute.xlu0 %3920  ;;  %v4125_v24 = vpop.permute.xlu1 %4124 }
0x1446   :  { %v3926_v3 = vsel %vm942_vm9, %v3921_v60, 0  ;;  %v7494_v54 = vpop.permute.xlu2 %4147 }
0x1447   :  { %4095 = vmatpush.bf16.xpose.msrb.mxu3 %v4086_v20  ;;  %3935 = vmatpush.bf16.msrb.mxu1 %v3926_v3 }
0x144a   :  { %5586 = vmatmul.msk.bf16.vlgmr.msrb.gmra.mxu1 %vm938_vm11, %v3772_v19 }
0x144d   :  { %v4056_v17 = vpop.permute.xlu0 %4055 }
0x144e   :  { %v4127_v27 = vpop.permute.xlu2 %4126 }
0x144f   :  { %v4132_v34 = vsel %vm651_vm8, %v4127_v27, 0 }
0x1452   :  { %5588 = vmatmul.msk.bf16.vlgmr.msra.gmra.mxu3 %vm651_vm8, %v3468_v21 }
0x1453   :  { %4187 = vmatpush.bf16.xpose.msra.mxu3 %v4178_v44 }
0x1455   :  { %v4035_v43 = vpop.permute.xlu0 %4034 }
0x1456   :  { %v4040_v38 = vsel %vm651_vm8, %v4035_v43, 0 }
0x1457   :  { %4049 = vmatpush.bf16.xpose.msra.mxu1 %v4040_v38 }
0x145d   :  { %v4010_v32 = vpop.permute.xlu0 %4009 }
0x145e   :  { %5589 = vmatmul.msk.bf16.vlgmr.msra.gmra.mxu0 %vm651_vm8, %v4010_v32  ;;  %5590 = vmatmul.msk.bf16.vlgmr.msra.gmra.mxu1 %vm651_vm8, %v4033_v12 }
0x145f   :  { %4141 = vmatpush.bf16.xpose.msrb.mxu1 %v4132_v34 }
0x1462   :  { %5592 = vmatmul.msk.bf16.vlgmr.msrb.gmra.mxu3 %vm651_vm8, %v4079_v8 }
0x1465   :  { %v4171_v42 = vpop.permute.xlu0 %4170 }
0x1466   :  { %v3832_v14 = vpop.f32.mrf.mxu0 }
0x1467   :  { %3953 = vst [vmem:[#allocation1 + $0x2] ss:$4 sm:$0xff] %v3832_v14 }
0x1468   :  { %v3853_v13 = vpop.f32.mrf.mxu1 }
0x1469   :  { %3955 = vst [vmem:[#allocation1 + $0x3] ss:$4 sm:$0xff] %v3853_v13 }
0x146d   :  { %v4102_v35 = vpop.permute.xlu0 %4101 }
0x146e   :  { %v3834_v55 = vpop.f32.mrf.mxu0  ;;  %5593 = vmatmul.msk.bf16.vlgmr.msrb.gmra.mxu0 %vm651_vm8, %v4102_v35  ;;  %5594 = vmatmul.msk.bf16.vlgmr.msrb.gmra.mxu1 %vm651_vm8, %v4125_v24 }
0x1470   :  { %v3855_v30 = vpop.f32.mrf.mxu1 }
0x1472   :  { %5596 = vmatmul.msk.bf16.vlgmr.msra.gmra.mxu3 %vm651_vm8, %v4171_v42 }
0x1476   :  { %v3790_v50 = vpop.f32.mrf.mxu2 }
0x1477   :  { %3949 = vst [vmem:[#allocation1] ss:$4 sm:$0xff] %v3790_v50 }
0x147c   :  { %v3811_v29 = vpop.f32.mrf.mxu3 }
0x147d   :  { %3951 = vst [vmem:[#allocation1 + $0x1] ss:$4 sm:$0xff] %v3811_v29 }
0x147e   :  { %v3792_v8 = vpop.f32.mrf.mxu2 }
0x1484   :  { %v3813_v49 = vpop.f32.mrf.mxu3  ;;  %v3964_v61 = vld.sshfl [vmem:[#allocation1] sm:$0xff pattern:$0x73625140] }
0x149d   :  { %v3874_v46 = vpop.f32.mrf.mxu2 }
0x149e   :  { %3957 = vst [vmem:[#allocation1 + $0x20] ss:$4 sm:$0xff] %v3874_v46 }
0x14a5   :  { %v3876_v63 = vpop.f32.mrf.mxu2 }
0x14b3   :  { %v3916_v47 = vpop.f32.mrf.mxu0 }
0x14b4   :  { %3961 = vst [vmem:[#allocation1 + $0x22] ss:$4 sm:$0xff] %v3916_v47 }
0x14bb   :  { %v3918_v12 = vpop.f32.mrf.mxu0 }
0x14c5   :  { %v3895_v15 = vpop.f32.mrf.mxu3 }
0x14c6   :  { %3959 = vst [vmem:[#allocation1 + $0x21] ss:$4 sm:$0xff] %v3895_v15 }
0x14c7   :  { %v3937_v9 = vpop.f32.mrf.mxu1 }
0x14c8   :  { %3963 = vst [vmem:[#allocation1 + $0x23] ss:$4 sm:$0xff] %v3937_v9 }
0x14cd   :  { %v3897_v37 = vpop.f32.mrf.mxu3 }
0x14cf   :  { %v3939_v36 = vpop.f32.mrf.mxu1  ;;  %v3965_v57 = vld.sshfl [vmem:[#allocation1 + $0x20] sm:$0xff pattern:$0x73625140] }
0x14d0   :  { %v3968_v59 = vpack.c.bf16 %v3965_v57, %v3964_v61 }
0x14d2   :  { %5587 = vmatmul.msk.bf16.vlgmr.msra.gmra.mxu2 %vm651_vm8, %v3968_v59 }
0x14d3   :  { %4164 = vmatpush.bf16.xpose.msra.mxu2 %v4155_v62 }
0x14d5   :  { %v7510_v11 = vpop.f32.mrf.mxu3 }
0x14db   :  { %v4028_v58 = vpop.f32.mrf.mxu0  ;;  %v4051_v40 = vpop.f32.mrf.mxu1 }
0x14dc   :  { %v4196_v10 = vsel %vm839_vm10, %v4051_v40, -inf  ;;  %v4193_v45 = vsel %vm839_vm10, %v4028_v58, -inf }
0x14dd   :  { %4197 = vmax.xlane.f32.xlu2 %v4196_v10  ;;  %4194 = vmax.xlane.f32.xlu1 %v4193_v45  ;;  %v7514_v20 = vpop.f32.mrf.mxu3 }
0x14e2   :  { %5591 = vmatmul.msk.bf16.vlgmr.msrb.gmra.mxu2 %vm651_vm8, %v4056_v17 }
0x14e3   :  { %v4030_v26 = vpop.f32.mrf.mxu0  ;;  %v4053_v60 = vpop.f32.mrf.mxu1 }
0x14e5   :  { %v4097_v52 = vpop.f32.mrf.mxu3 }
0x14e6   :  { %v4202_v17 = vsel %vm839_vm10, %v4097_v52, -inf }
0x14eb   :  { %v7517_v3 = vpop.f32.mrf.mxu0  ;;  %v4143_v19 = vpop.f32.mrf.mxu1 }
0x14ec   :  { %v4205_v16 = vsel %vm839_vm10, %v7517_v3, -inf  ;;  %v4208_v31 = vsel %vm839_vm10, %v4143_v19, -inf }
0x14ed   :  { %4206 = vmax.xlane.f32.xlu2 %v4205_v16  ;;  %4209 = vmax.xlane.f32.xlu0 %v4208_v31  ;;  %v4099_v21 = vpop.f32.mrf.mxu3 }
0x14f2   :  { %5595 = vmatmul.msk.bf16.vlgmr.msra.gmra.mxu2 %vm651_vm8, %v7494_v54 }
0x14f3   :  { %v4122_v44 = vpop.f32.mrf.mxu0  ;;  %v4145_v27 = vpop.f32.mrf.mxu1 }
0x14f5   :  { %4203 = vmax.xlane.f32.xlu0 %v4202_v17  ;;  %v4189_v43 = vpop.f32.mrf.mxu3 }
0x14f6   :  { %v4214_v38 = vsel %vm839_vm10, %v4189_v43, -inf }
0x14f7   :  { %4215 = vmax.xlane.f32.xlu1 %v4214_v38 }
0x14fd   :  { %v4191_v34 = vpop.f32.mrf.mxu3 }
0x1550   :  { %v4195_v32 = vpop.xlane.xlu1 %4194  ;;  %v4198_v42 = vpop.xlane.xlu2 %4197 }
0x1551   :  { %v4217_v14 = vsub.f32 %v4028_v58, %v4195_v32  ;;  %v4218_v13 = vsub.f32 %v4051_v40, %v4198_v42 }
0x1553   :  { %v4225_v24 = vmul.f32 1.442695, %v4217_v14  ;;  %v4227_v35 = vmul.f32 1.442695, %v4218_v13 }
0x1555   :  { %5972 = vpow2.f32 %v4225_v24  ;;  %v7526_v55 = vpop.f32.mrf.mxu2 }
0x1556   :  { %5974 = vpow2.f32 %v4227_v35 }
0x155b   :  { %v7528_v54 = vpop.eup %5972 }
0x155c   :  { %v7530_v30 = vpop.eup %5974  ;;  %v4241_v50 = vsel %vm839_vm10, %v7528_v54, 0.0 }
0x155d   :  { %v7534_v29 = vpop.f32.mrf.mxu2  ;;  %4242 = vadd.xlane.f32.xlu0 %v4241_v50  ;;  %v4244_v8 = vsel %vm839_vm10, %v7530_v30, 0.0 }
0x155e   :  { %4245 = vadd.xlane.f32.xlu1 %v4244_v8 }
0x1560   :  { %v4210_v15 = vpop.xlane.xlu0 %4209  ;;  %v4207_v16 = vpop.xlane.xlu2 %4206 }
0x1561   :  { %v4222_v40 = vsub.f32 %v4143_v19, %v4210_v15  ;;  %v4221_v31 = vsub.f32 %v7517_v3, %v4207_v16 }
0x1563   :  { %v4235_v45 = vmul.f32 1.442695, %v4222_v40  ;;  %v4233_v21 = vmul.f32 1.442695, %v4221_v31 }
0x1565   :  { %v4074_v49 = vpop.f32.mrf.mxu2 }
0x1566   :  { %v4199_v46 = vsel %vm839_vm10, %v4074_v49, -inf }
0x1567   :  { %4200 = vmax.xlane.f32.xlu2 %v4199_v46 }
0x1568   :  { %v4204_v36 = vpop.xlane.xlu0 %4203 }
0x1569   :  { %v4220_v57 = vsub.f32 %v4097_v52, %v4204_v36 }
0x156a   :  { %v4216_v9 = vpop.xlane.xlu1 %4215 }
0x156b   :  { %v4224_v37 = vsub.f32 %v4189_v43, %v4216_v9  ;;  %v4231_v59 = vmul.f32 1.442695, %v4220_v57 }
0x156d   :  { %v4076_v63 = vpop.f32.mrf.mxu2  ;;  %v4239_v61 = vmul.f32 1.442695, %v4224_v37 }
0x156f   :  { %5976 = vpow2.f32 %v4239_v61 }
0x1570   :  { %5978 = vpow2.f32 %v4231_v59 }
0x1571   :  { %4352 = vrot.lane.b32.xlu0 %v7140_v23, %s6167_s11  ;;  %5980 = vpow2.f32 %v4235_v45 }
0x1572   :  { %5982 = vpow2.f32 %v4233_v21 }
0x1575   :  { %v7541_v47 = vpop.f32.mrf.mxu2  ;;  %v7549_v58 = vpop.eup %5976 }
0x1576   :  { %v4211_v62 = vsel %vm839_vm10, %v7541_v47, -inf  ;;  %v4262_v10 = vsel %vm839_vm10, %v7549_v58, 0.0  ;;  %v7553_v26 = vpop.eup %5978 }
0x1577   :  { %4289 = vrot.lane.b32.xlu1 %v7097_v1, %s6167_s11  ;;  %v4250_v60 = vsel %vm839_vm10, %v7553_v26, 0.0  ;;  %v7557_v52 = vpop.eup %5980 }
0x1578   :  { %v4256_v19 = vsel %vm839_vm10, %v7557_v52, 0.0  ;;  %v7564_v44 = vpop.eup %5982 }
0x1579   :  { %v4253_v27 = vsel %vm839_vm10, %v7564_v44, 0.0 }
0x157d   :  { %v4168_v12 = vpop.f32.mrf.mxu2 }
0x157f   :  { %4331 = vrot.lane.b32.xlu2 %v7124_v4, %s6167_s11 }
0x159b   :  { %4212 = vmax.xlane.f32.xlu0 %v4211_v62 }
0x15a1   :  { %4263 = vadd.xlane.f32.xlu1 %v4262_v10 }
0x15a8   :  { %4251 = vadd.xlane.f32.xlu2 %v4250_v60 }
0x15af   :  { %4310 = vrot.lane.b32.xlu0 %v7099_v18, %s6167_s11 }
0x15b0   :  { %4257 = vadd.xlane.f32.xlu2 %v4256_v19 }
0x15d0   :  { %v4243_v43 = vpop.xlane.xlu0 %4242 }
0x15d1   :  { %5984 = vrcp.f32 %v4243_v43  ;;  %v4246_v32 = vpop.xlane.xlu1 %4245 }
0x15d7   :  { %v5985_v3 = vpop.eup %5984 }
0x15d8   :  { %v4273_v8 = vmul.f32 %v5985_v3, %v7528_v54 }
0x15d9   :  { %4254 = vadd.xlane.f32.xlu0 %v4253_v27 }
0x15da   :  { %v4201_v17 = vpop.xlane.xlu2 %4200  ;;  %v4281_v63 = vpack.c.bf16 %v4273_v8, %v4273_v8 }
0x15db   :  { %v4219_v38 = vsub.f32 %v4074_v49, %v4201_v17 }
0x15dd   :  { %v4229_v34 = vmul.f32 1.442695, %v4219_v38 }
0x15df   :  { %5986 = vpow2.f32 %v4229_v34 }
0x15e2   :  { %v4332_v42 = vpop.permute.xlu2 %4331 }
0x15e3   :  { %v4337_v14 = vsel %vm942_vm9, %v4332_v42, 0  ;;  %v4353_v13 = vpop.permute.xlu0 %4352 }
0x15e4   :  { %v4358_v24 = vsel %vm942_vm9, %v4353_v13, 0  ;;  %4346 = vmatpush.bf16.msrb.mxu2 %v4337_v14 }
0x15e5   :  { %v7570_v35 = vpop.eup %5986  ;;  %4367 = vmatpush.bf16.msrb.mxu3 %v4358_v24 }
0x15e6   :  { %v4247_v50 = vsel %vm839_vm10, %v7570_v35, 0.0 }
0x15e7   :  { %4248 = vadd.xlane.f32.xlu1 %v4247_v50 }
0x15e9   :  { %v4290_v49 = vpop.permute.xlu1 %4289 }
0x15ea   :  { %v4295_v46 = vsel %vm942_vm9, %v4290_v49, 0 }
0x15eb   :  { %4304 = vmatpush.bf16.msra.mxu0 %v4295_v46 }
0x15ed   :  { %4436 = vrot.lane.b32.xlu0 %v7142_v39, %s6167_s11 }
0x15ee   :  { %5597 = vmatmul.msk.bf16.vlgmr.msra.gmra.mxu0 %vm938_vm11, %v4281_v63 }
0x15f5   :  { %4394 = vrot.lane.b32.xlu0 %v7132_v22, %s6167_s11 }
0x15fd   :  { %4530 = vrot.lane.b32.xlu0 %v7168_v0, %s6169_s18 }
0x1600   :  { %4415 = vrot.lane.b32.xlu1 %v7144_v6, %s6167_s11 }
0x1605   :  { %4578 = vrot.lane.b32.xlu0 %v7140_v23, %s6168_s16 }
0x1608   :  { %4532 = vrot.lane.b32.xlu1 %v7099_v18, %s6168_s16 }
0x160d   :  { %4507 = vrot.lane.b32.xlu0 %v7158_v48, %s6169_s18 }
0x160e   :  { %v4213_v54 = vpop.xlane.xlu0 %4212 }
0x160f   :  { %v4223_v12 = vsub.f32 %v7541_v47, %v4213_v54 }
0x1610   :  { %4553 = vrot.lane.b32.xlu1 %v7280_v25, %s6169_s18 }
0x1611   :  { %v4237_v15 = vmul.f32 1.442695, %v4223_v12 }
0x1613   :  { %5988 = vpow2.f32 %v4237_v15 }
0x1614   :  { %5990 = vrcp.f32 %v4246_v32 }
0x1615   :  { %4645 = vrot.lane.b32.xlu0 %v7292_v51, %s6169_s18 }
0x1618   :  { %4624 = vrot.lane.b32.xlu1 %v7132_v22, %s6168_s16 }
0x1619   :  { %v7598_v0 = vpop.eup %5988 }
0x161a   :  { %v4259_v48 = vsel %vm839_vm10, %v7598_v0, 0.0  ;;  %v5991_v47 = vpop.eup %5990 }
0x161b   :  { %v4252_v9 = vpop.xlane.xlu2 %4251  ;;  %4260 = vadd.xlane.f32.xlu2 %v4259_v48  ;;  %v4274_v25 = vmul.f32 %v5991_v47, %v7530_v30 }
0x161c   :  { %5992 = vrcp.f32 %v4252_v9 }
0x161d   :  { %4599 = vrot.lane.b32.xlu0 %v7329_v2, %s6169_s18  ;;  %v4282_v57 = vpack.c.bf16 %v4274_v25, %v4274_v25 }
0x1620   :  { %4576 = vrot.lane.b32.xlu1 %v7322_v33, %s6169_s18  ;;  %v4264_v33 = vpop.xlane.xlu1 %4263 }
0x1621   :  { %v4311_v51 = vpop.permute.xlu0 %4310  ;;  %5994 = vrcp.f32 %v4264_v33 }
0x1622   :  { %v5993_v37 = vpop.eup %5992  ;;  %v4316_v36 = vsel %vm942_vm9, %v4311_v51, 0 }
0x1623   :  { %v4276_v61 = vmul.f32 %v5993_v37, %v7553_v26  ;;  %4325 = vmatpush.bf16.msra.mxu1 %v4316_v36  ;;  %v4258_v30 = vpop.xlane.xlu2 %4257 }
0x1625   :  { %v4284_v59 = vpack.c.bf16 %v4276_v61, %v4276_v61 }
0x1626   :  { %5598 = vmatmul.msk.bf16.vlgmr.msra.gmra.mxu1 %vm938_vm11, %v4282_v57 }
0x1627   :  { %5600 = vmatmul.msk.bf16.vlgmr.msrb.gmra.mxu3 %vm938_vm11, %v4284_v59  ;;  %v5995_v62 = vpop.eup %5994 }
0x1628   :  { %4601 = vrot.lane.b32.xlu1 %v7128_v5, %s6168_s16  ;;  %v4280_v40 = vmul.f32 %v5995_v62, %v7549_v58 }
0x162a   :  { %v4288_v60 = vpack.c.bf16 %v4280_v40, %v4280_v40 }
0x1630   :  { %4668 = vrot.lane.b32.xlu1 %v7334_v56, %s6169_s18 }
0x1633   :  { %4373 = vrot.lane.b32.xlu2 %v7128_v5, %s6167_s11 }
0x163b   :  { %4555 = vrot.lane.b32.xlu2 %v7124_v4, %s6168_s16 }
0x1643   :  { %4509 = vrot.lane.b32.xlu2 %v7097_v1, %s6168_s16 }
0x164b   :  { %4647 = vrot.lane.b32.xlu2 %v7144_v6, %s6168_s16 }
0x164c   :  { %v4255_v2 = vpop.xlane.xlu0 %4254 }
0x1653   :  { %4622 = vrot.lane.b32.xlu2 %v7286_v28, %s6169_s18 }
0x165a   :  { %v4249_v56 = vpop.xlane.xlu1 %4248 }
0x165b   :  { %5996 = vrcp.f32 %v4249_v56  ;;  %4670 = vrot.lane.b32.xlu2 %v7142_v39, %s6168_s16 }
0x165c   :  { %5998 = vrcp.f32 %v4258_v30 }
0x165d   :  { %6000 = vrcp.f32 %v4255_v2 }
0x165f   :  { %v4437_v10 = vpop.permute.xlu0 %4436 }
0x1660   :  { %v4442_v45 = vsel %vm942_vm9, %v4437_v10, 0 }
0x1661   :  { %v5997_v26 = vpop.eup %5996  ;;  %4451 = vmatpush.bf16.msra.mxu3 %v4442_v45 }
0x1662   :  { %v4275_v28 = vmul.f32 %v5997_v26, %v7570_v35  ;;  %v5999_v19 = vpop.eup %5998  ;;  %v5525_v35 = vld [vmem:[%s7836_s15 + $0x18] sm:$0xf] }
0x1663   :  { %v4278_v31 = vmul.f32 %v5999_v19, %v7557_v52  ;;  %v6001_v24 = vpop.eup %6000  ;;  %v4489_v63 = vsel %vm300_vm0, %v5525_v35, 0 }
0x1664   :  { %v4283_v16 = vpack.c.bf16 %v4275_v28, %v4275_v28  ;;  %5604 = vmatmul.msk.bf16.vlgmr.msra.gmra.mxu3 %vm938_vm11, %v4288_v60  ;;  %v4277_v8 = vmul.f32 %v6001_v24, %v7564_v44 }
0x1665   :  { %v4286_v58 = vpack.c.bf16 %v4278_v31, %v4278_v31 }
0x1666   :  { %5599 = vmatmul.msk.bf16.vlgmr.msrb.gmra.mxu2 %vm938_vm11, %v4283_v16  ;;  %v4285_v48 = vpack.c.bf16 %v4277_v8, %v4277_v8 }
0x1667   :  { %v4395_v21 = vpop.permute.xlu0 %4394 }
0x1668   :  { %v4400_v27 = vsel %vm942_vm9, %v4395_v21, 0 }
0x1669   :  { %4409 = vmatpush.bf16.msrb.mxu1 %v4400_v27 }
0x166b   :  { %v4306_v17 = vpop.f32.mrf.mxu0 }
0x166c   :  { %4465 = vst [vmem:[#allocation1] ss:$4 sm:$0xff] %v4306_v17  ;;  %5602 = vmatmul.msk.bf16.vlgmr.msrb.gmra.mxu1 %vm938_vm11, %v4286_v58 }
0x166f   :  { %v4531_v14 = vpop.permute.xlu0 %4530 }
0x1672   :  { %v4416_v43 = vpop.permute.xlu1 %4415 }
0x1673   :  { %v4308_v38 = vpop.f32.mrf.mxu0  ;;  %v4421_v34 = vsel %vm942_vm9, %v4416_v43, 0 }
0x1674   :  { %4430 = vmatpush.bf16.msra.mxu2 %v4421_v34 }
0x1677   :  { %v4579_v12 = vpop.permute.xlu0 %4578 }
0x1678   :  { %v4584_v47 = vsel %vm651_vm8, %v4579_v12, 0 }
0x167a   :  { %v4533_v32 = vpop.permute.xlu1 %4532 }
0x167b   :  { %v4538_v52 = vsel %vm651_vm8, %v4533_v32, 0 }
0x167c   :  { %4547 = vmatpush.bf16.xpose.msrb.mxu2 %v4538_v52 }
0x167f   :  { %v4508_v59 = vpop.permute.xlu0 %4507 }
0x1682   :  { %v4554_v42 = vpop.permute.xlu1 %4553 }
0x1687   :  { %v4646_v40 = vpop.permute.xlu0 %4645 }
0x168a   :  { %v4625_v3 = vpop.permute.xlu1 %4624 }
0x168b   :  { %v4630_v9 = vsel %vm651_vm8, %v4625_v3, 0 }
0x168e   :  { %v4261_v13 = vpop.xlane.xlu2 %4260 }
0x168f   :  { %6002 = vrcp.f32 %v4261_v13  ;;  %v4600_v45 = vpop.permute.xlu0 %4599 }
0x1692   :  { %v7645_v25 = vpop.permute.xlu1 %4576 }
0x1695   :  { %v6003_v50 = vpop.eup %6002 }
0x1696   :  { %v4279_v49 = vmul.f32 %v6003_v50, %v7598_v0  ;;  %v4374_v46 = vpop.permute.xlu2 %4373 }
0x1697   :  { %v4379_v54 = vsel %vm942_vm9, %v4374_v46, 0 }
0x1698   :  { %v4287_v15 = vpack.c.bf16 %v4279_v49, %v4279_v49  ;;  %4388 = vmatpush.bf16.msrb.mxu0 %v4379_v54 }
0x169a   :  { %5603 = vmatmul.msk.bf16.vlgmr.msra.gmra.mxu2 %vm938_vm11, %v4287_v15  ;;  %v4602_v37 = vpop.permute.xlu1 %4601 }
0x169b   :  { %4639 = vmatpush.bf16.xpose.msra.mxu2 %v4630_v9  ;;  %5601 = vmatmul.msk.bf16.vlgmr.msrb.gmra.mxu0 %vm938_vm11, %v4285_v48  ;;  %v4607_v57 = vsel %vm651_vm8, %v4602_v37, 0 }
0x169c   :  { %4498 = vmatpush.bf16.msra.mxu0 %v4489_v63 }
0x169e   :  { %v4556_v44 = vpop.permute.xlu2 %4555 }
0x169f   :  { %v4561_v0 = vsel %vm651_vm8, %v4556_v44, 0 }
0x16a0   :  { %4593 = vmatpush.bf16.xpose.msrb.mxu0 %v4584_v47  ;;  %4570 = vmatpush.bf16.xpose.msrb.mxu3 %v4561_v0 }
0x16a2   :  { %v4669_v44 = vpop.permute.xlu1 %4668 }
0x16a3   :  { %v4327_v51 = vpop.f32.mrf.mxu1 }
0x16a4   :  { %4467 = vst [vmem:[#allocation1 + $0x1] ss:$4 sm:$0xff] %v4327_v51 }
0x16a6   :  { %v4510_v36 = vpop.permute.xlu2 %4509 }
0x16a7   :  { %v4515_v61 = vsel %vm651_vm8, %v4510_v36, 0  ;;  %5608 = vmatmul.msk.bf16.vlgmr.msrb.gmra.mxu3 %vm651_vm8, %v4554_v42 }
0x16a8   :  { %4524 = vmatpush.bf16.xpose.msra.mxu1 %v4515_v61  ;;  %v4005_v61 = vadd.f32 %v7510_v11, %v7526_v55 }
0x16aa   :  { %v4369_v33 = vpop.f32.mrf.mxu3  ;;  %5607 = vmatmul.msk.bf16.vlgmr.msrb.gmra.mxu2 %vm651_vm8, %v4531_v14 }
0x16ab   :  { %4471 = vst [vmem:[#allocation1 + $0x3] ss:$4 sm:$0xff] %v4369_v33  ;;  %v4329_v2 = vpop.f32.mrf.mxu1 }
0x16ae   :  { %v4648_v30 = vpop.permute.xlu2 %4647 }
0x16af   :  { %v4653_v56 = vsel %vm651_vm8, %v4648_v30, 0  ;;  %5606 = vmatmul.msk.bf16.vlgmr.msra.gmra.mxu1 %vm651_vm8, %v4508_v59 }
0x16b0   :  { %4616 = vmatpush.bf16.xpose.msrb.mxu1 %v4607_v57  ;;  %4662 = vmatpush.bf16.xpose.msra.mxu3 %v4653_v56 }
0x16b2   :  { %v4371_v62 = vpop.f32.mrf.mxu3 }
0x16b3   :  { %v4007_v62 = vadd.f32 %v7514_v20, %v7534_v29 }
0x16b6   :  { %v4623_v10 = vpop.permute.xlu2 %4622 }
0x16b7   :  { %5612 = vmatmul.msk.bf16.vlgmr.msra.gmra.mxu3 %vm651_vm8, %v4646_v40 }
0x16ba   :  { %5611 = vmatmul.msk.bf16.vlgmr.msra.gmra.mxu2 %vm651_vm8, %v4623_v10 }
0x16be   :  { %v4671_v17 = vpop.permute.xlu2 %4670 }
0x16bf   :  { %5610 = vmatmul.msk.bf16.vlgmr.msrb.gmra.mxu1 %vm651_vm8, %v4600_v45  ;;  %v4676_v52 = vsel %vm651_vm8, %v4671_v17, 0 }
0x16e7   :  { %v4453_v26 = vpop.f32.mrf.mxu3 }
0x16e8   :  { %4479 = vst [vmem:[#allocation1 + $0x23] ss:$4 sm:$0xff] %v4453_v26 }
0x16e9   :  { %v4348_v60 = vpop.f32.mrf.mxu2  ;;  %v4411_v28 = vpop.f32.mrf.mxu1 }
0x16ea   :  { %4469 = vst [vmem:[#allocation1 + $0x2] ss:$4 sm:$0xff] %v4348_v60 }
0x16eb   :  { %4475 = vst [vmem:[#allocation1 + $0x21] ss:$4 sm:$0xff] %v4411_v28 }
0x16ef   :  { %v4455_v19 = vpop.f32.mrf.mxu3 }
0x16f1   :  { %v4350_v16 = vpop.f32.mrf.mxu2  ;;  %v4413_v31 = vpop.f32.mrf.mxu1  ;;  %v4480_v38 = vld.sshfl [vmem:[#allocation1] sm:$0xff pattern:$0x73625140] }
0x1718   :  { %v4390_v21 = vpop.f32.mrf.mxu0 }
0x1719   :  { %4473 = vst [vmem:[#allocation1 + $0x20] ss:$4 sm:$0xff] %v4390_v21 }
0x171d   :  { %v4432_v27 = vpop.f32.mrf.mxu2 }
0x171e   :  { %4477 = vst [vmem:[#allocation1 + $0x22] ss:$4 sm:$0xff] %v4432_v27 }
0x1720   :  { %v4392_v58 = vpop.f32.mrf.mxu0 }
0x1725   :  { %v4434_v43 = vpop.f32.mrf.mxu2  ;;  %v4481_v34 = vld.sshfl [vmem:[#allocation1 + $0x20] sm:$0xff pattern:$0x73625140] }
0x1726   :  { %v4484_v32 = vpack.c.bf16 %v4481_v34, %v4480_v38 }
0x1728   :  { %5605 = vmatmul.msk.bf16.vlgmr.msra.gmra.mxu0 %vm651_vm8, %v4484_v32 }
0x1729   :  { %4685 = vmatpush.bf16.xpose.msra.mxu0 %v4676_v52 }
0x172a   :  { %v4572_v42 = vpop.f32.mrf.mxu3 }
0x172b   :  { %v4697_v14 = vsel %vm839_vm10, %v4572_v42, -inf }
0x172c   :  { %v4526_v13 = vpop.f32.mrf.mxu1  ;;  %4698 = vmax.xlane.f32.xlu0 %v4697_v14 }
0x172d   :  { %v4549_v3 = vpop.f32.mrf.mxu2  ;;  %v4691_v24 = vsel %vm839_vm10, %v4526_v13, -inf }
0x172e   :  { %4692 = vmax.xlane.f32.xlu1 %v4691_v24  ;;  %v4694_v47 = vsel %vm839_vm10, %v4549_v3, -inf }
0x1732   :  { %v4574_v35 = vpop.f32.mrf.mxu3 }
0x1734   :  { %v4528_v50 = vpop.f32.mrf.mxu1 }
0x1735   :  { %v4551_v8 = vpop.f32.mrf.mxu2 }
0x1738   :  { %5609 = vmatmul.msk.bf16.vlgmr.msrb.gmra.mxu0 %vm651_vm8, %v7645_v25 }
0x173a   :  { %v7664_v49 = vpop.f32.mrf.mxu3 }
0x173b   :  { %v4709_v46 = vsel %vm839_vm10, %v7664_v49, -inf }
0x173c   :  { %v4618_v63 = vpop.f32.mrf.mxu1  ;;  %4710 = vmax.xlane.f32.xlu1 %v4709_v46 }
0x173d   :  { %v7668_v54 = vpop.f32.mrf.mxu2  ;;  %v4703_v12 = vsel %vm839_vm10, %v4618_v63, -inf }
0x173e   :  { %4704 = vmax.xlane.f32.xlu2 %v4703_v12  ;;  %v4706_v26 = vsel %vm839_vm10, %v7668_v54, -inf }
0x1742   :  { %v4666_v15 = vpop.f32.mrf.mxu3 }
0x1744   :  { %v4620_v48 = vpop.f32.mrf.mxu1 }
0x1745   :  { %v4643_v9 = vpop.f32.mrf.mxu2 }
0x1746   :  { %4695 = vmax.xlane.f32.xlu2 %v4694_v47 }
0x1748   :  { %5613 = vmatmul.msk.bf16.vlgmr.msra.gmra.mxu0 %vm651_vm8, %v4669_v44 }
0x179f   :  { %v4699_v25 = vpop.xlane.xlu0 %4698 }
0x17a0   :  { %v4717_v0 = vsub.f32 %v4572_v42, %v4699_v25 }
0x17a1   :  { %v4693_v51 = vpop.xlane.xlu1 %4692 }
0x17a2   :  { %v4727_v37 = vmul.f32 1.442695, %v4717_v0  ;;  %v4715_v36 = vsub.f32 %v4526_v13, %v4693_v51 }
0x17a4   :  { %6004 = vpow2.f32 %v4727_v37  ;;  %v4723_v57 = vmul.f32 1.442695, %v4715_v36 }
0x17a5   :  { %v4500_v59 = vpop.f32.mrf.mxu0 }
0x17a6   :  { %6006 = vpow2.f32 %v4723_v57  ;;  %v7675_v33 = vadd.f32 %v4500_v59, %v4005_v61 }
0x17aa   :  { %v7677_v2 = vpop.eup %6004 }
0x17ab   :  { %v4745_v30 = vsel %vm839_vm10, %v7677_v2, 0.0 }
0x17ac   :  { %v7681_v56 = vpop.eup %6006  ;;  %4746 = vadd.xlane.f32.xlu2 %v4745_v30 }
0x17ad   :  { %v4502_v40 = vpop.f32.mrf.mxu0  ;;  %v4739_v11 = vsel %vm839_vm10, %v7681_v56, 0.0 }
0x17ae   :  { %v7687_v55 = vadd.f32 %v4502_v40, %v4007_v62  ;;  %4740 = vadd.xlane.f32.xlu0 %v4739_v11 }
0x17b1   :  { %v4705_v10 = vpop.xlane.xlu2 %4704 }
0x17b2   :  { %v4719_v17 = vsub.f32 %v4618_v63, %v4705_v10 }
0x17b4   :  { %v4731_v43 = vmul.f32 1.442695, %v4719_v17 }
0x17b5   :  { %v4595_v45 = vpop.f32.mrf.mxu0 }
0x17b6   :  { %4707 = vmax.xlane.f32.xlu0 %v4706_v26  ;;  %v4700_v60 = vsel %vm839_vm10, %v4595_v45, -inf }
0x17b7   :  { %4701 = vmax.xlane.f32.xlu2 %v4700_v60 }
0x17b9   :  { %v4696_v28 = vpop.xlane.xlu2 %4695 }
0x17ba   :  { %v4716_v19 = vsub.f32 %v4549_v3, %v4696_v28 }
0x17bc   :  { %v4725_v20 = vmul.f32 1.442695, %v4716_v19 }
0x17bd   :  { %v4597_v29 = vpop.f32.mrf.mxu0 }
0x17be   :  { %6008 = vpow2.f32 %v4725_v20 }
0x17bf   :  { %6010 = vpow2.f32 %v4731_v43 }
0x17c4   :  { %v6009_v16 = vpop.eup %6008 }
0x17c5   :  { %v7692_v31 = vpop.f32.mrf.mxu0  ;;  %v4742_v21 = vsel %vm839_vm10, %v6009_v16, 0.0  ;;  %v7703_v38 = vpop.eup %6010 }
0x17c6   :  { %4743 = vadd.xlane.f32.xlu1 %v4742_v21  ;;  %v4712_v58 = vsel %vm839_vm10, %v7692_v31, -inf }
0x17ca   :  { %4829 = vrot.lane.b32.xlu0 %v7124_v4, %s6170_s22  ;;  %v4751_v4 = vsel %vm839_vm10, %v7703_v38, 0.0 }
0x17cd   :  { %v4689_v27 = vpop.f32.mrf.mxu0 }
0x17cf   :  { %4808 = vrot.lane.b32.xlu2 %v7099_v18, %s6170_s22  ;;  %v4711_v18 = vpop.xlane.xlu1 %4710 }
0x17d0   :  { %v4721_v34 = vsub.f32 %v7664_v49, %v4711_v18 }
0x17d2   :  { %v4735_v52 = vmul.f32 1.442695, %v4721_v34 }
0x17d4   :  { %6012 = vpow2.f32 %v4735_v52 }
0x17da   :  { %v6013_v50 = vpop.eup %6012 }
0x17df   :  { %4787 = vrot.lane.b32.xlu1 %v7097_v1, %s6170_s22 }
0x17f4   :  { %4713 = vmax.xlane.f32.xlu0 %v4712_v58 }
0x1808   :  { %4850 = vrot.lane.b32.xlu0 %v7140_v23, %s6170_s22  ;;  %v4757_v23 = vsel %vm839_vm10, %v6013_v50, 0.0 }
0x1809   :  { %4752 = vadd.xlane.f32.xlu1 %v4751_v4 }
0x181f   :  { %v4747_v32 = vpop.xlane.xlu2 %4746 }
0x1821   :  { %v4741_v1 = vpop.xlane.xlu0 %4740 }
0x1829   :  { %v4708_v42 = vpop.xlane.xlu0 %4707 }
0x182a   :  { %v4720_v14 = vsub.f32 %v7668_v54, %v4708_v42  ;;  %v4702_v13 = vpop.xlane.xlu2 %4701 }
0x182b   :  { %v4718_v3 = vsub.f32 %v4595_v45, %v4702_v13 }
0x182c   :  { %v4733_v24 = vmul.f32 1.442695, %v4720_v14 }
0x182d   :  { %v4729_v35 = vmul.f32 1.442695, %v4718_v3 }
0x182e   :  { %6014 = vpow2.f32 %v4733_v24 }
0x182f   :  { %6016 = vpow2.f32 %v4729_v35 }
0x1830   :  { %6018 = vrcp.f32 %v4747_v32 }
0x1832   :  { %v4809_v8 = vpop.permute.xlu2 %4808  ;;  %4758 = vadd.xlane.f32.xlu0 %v4757_v23 }
0x1833   :  { %v4814_v49 = vsel %vm942_vm9, %v4809_v8, 0 }
0x1834   :  { %v7713_v46 = vpop.eup %6014  ;;  %4823 = vmatpush.bf16.msrb.mxu2 %v4814_v49 }
0x1835   :  { %v6017_v63 = vpop.eup %6016  ;;  %v4754_v54 = vsel %vm839_vm10, %v7713_v46, 0.0 }
0x1836   :  { %4755 = vadd.xlane.f32.xlu2 %v4754_v54  ;;  %v4748_v12 = vsel %vm839_vm10, %v6017_v63, 0.0  ;;  %v6019_v15 = vpop.eup %6018 }
0x1837   :  { %4749 = vadd.xlane.f32.xlu1 %v4748_v12  ;;  %v4773_v9 = vmul.f32 %v6019_v15, %v7677_v2 }
0x1839   :  { %v4744_v48 = vpop.xlane.xlu1 %4743  ;;  %v4781_v25 = vpack.c.bf16 %v4773_v9, %v4773_v9  ;;  %v5526_v9 = vld [vmem:[%s7836_s15 + $0x1c] sm:$0xf] }
0x183a   :  { %6020 = vrcp.f32 %v4744_v48 }
0x183b   :  { %6022 = vrcp.f32 %v4741_v1 }
0x183c   :  { %v4830_v47 = vpop.permute.xlu0 %4829 }
0x183d   :  { %v4835_v44 = vsel %vm942_vm9, %v4830_v47, 0  ;;  %v4987_v47 = vsel %vm300_vm0, %v5526_v9, 0  ;;  %v5690_v9 = vld [vmem:[%s7841_s1 + $0x28] sm:$0xff] }
0x183e   :  { %4844 = vmatpush.bf16.msrb.mxu3 %v4835_v44 }
0x1840   :  { %v6021_v0 = vpop.eup %6020 }
0x1841   :  { %v4772_v51 = vmul.f32 %v6021_v0, %v6009_v16  ;;  %5616 = vmatmul.msk.bf16.vlgmr.msrb.gmra.mxu3 %vm938_vm11, %v4781_v25  ;;  %v6023_v36 = vpop.eup %6022 }
0x1842   :  { %v4771_v61 = vmul.f32 %v6023_v36, %v7681_v56 }
0x1843   :  { %v4780_v37 = vpack.c.bf16 %v4772_v51, %v4772_v51 }
0x1844   :  { %v4779_v2 = vpack.c.bf16 %v4771_v61, %v4771_v61 }
0x1845   :  { %5615 = vmatmul.msk.bf16.vlgmr.msrb.gmra.mxu2 %vm938_vm11, %v4780_v37 }
0x1846   :  { %4913 = vrot.lane.b32.xlu0 %v7144_v6, %s6170_s22 }
0x184e   :  { %4934 = vrot.lane.b32.xlu0 %v7142_v39, %s6170_s22 }
0x1850   :  { %4871 = vrot.lane.b32.xlu1 %v7128_v5, %s6170_s22 }
0x1851   :  { %v4788_v57 = vpop.permute.xlu1 %4787 }
0x1852   :  { %v4793_v59 = vsel %vm942_vm9, %v4788_v57, 0  ;;  %v5762_v57 = vld [vmem:[%s7837_s23 + $0x1] ss:$0 sm:$0xff] }
0x1853   :  { %4802 = vmatpush.bf16.msra.mxu1 %v4793_v59 }
0x1856   :  { %5614 = vmatmul.msk.bf16.vlgmr.msra.gmra.mxu1 %vm938_vm11, %v4779_v2 }
0x1867   :  { %v4714_v30 = vpop.xlane.xlu0 %4713 }
0x1868   :  { %v4722_v6 = vsub.f32 %v7692_v31, %v4714_v30 }
0x186a   :  { %v4737_v62 = vmul.f32 1.442695, %v4722_v6 }
0x186c   :  { %6024 = vpow2.f32 %v4737_v62 }
0x1872   :  { %v6025_v40 = vpop.eup %6024 }
0x1873   :  { %v4760_v39 = vsel %vm839_vm10, %v6025_v40, 0.0 }
0x1874   :  { %4761 = vadd.xlane.f32.xlu2 %v4760_v39 }
0x187a   :  { %v4851_v56 = vpop.permute.xlu0 %4850 }
0x187b   :  { %v4856_v11 = vsel %vm942_vm9, %v4851_v56, 0 }
0x187c   :  { %4865 = vmatpush.bf16.msrb.mxu0 %v4856_v11  ;;  %v4753_v5 = vpop.xlane.xlu1 %4752 }
0x188c   :  { %4892 = vrot.lane.b32.xlu2 %v7132_v22, %s6170_s22 }
0x18a5   :  { %v4759_v45 = vpop.xlane.xlu0 %4758 }
0x18aa   :  { %v4750_v10 = vpop.xlane.xlu1 %4749 }
0x18ab   :  { %6026 = vrcp.f32 %v4750_v10 }
0x18ac   :  { %6028 = vrcp.f32 %v4759_v45 }
0x18ad   :  { %6030 = vrcp.f32 %v4753_v5 }
0x18b1   :  { %v6027_v26 = vpop.eup %6026 }
0x18b2   :  { %v4774_v60 = vmul.f32 %v6027_v26, %v6017_v63  ;;  %v6029_v28 = vpop.eup %6028 }
0x18b3   :  { %v4777_v20 = vmul.f32 %v6029_v28, %v6013_v50  ;;  %v6031_v22 = vpop.eup %6030 }
0x18b4   :  { %v4782_v19 = vpack.c.bf16 %v4774_v60, %v4774_v60  ;;  %v4775_v27 = vmul.f32 %v6031_v22, %v7703_v38  ;;  %v4756_v38 = vpop.xlane.xlu2 %4755  ;;  %v5687_v22 = vld [vmem:[%s7838_s26 + $0x10] sm:$0xff] }
0x18b5   :  { %v4785_v31 = vpack.c.bf16 %v4777_v20, %v4777_v20  ;;  %6032 = vrcp.f32 %v4756_v38 }
0x18b6   :  { %5617 = vmatmul.msk.bf16.vlgmr.msrb.gmra.mxu0 %vm938_vm11, %v4782_v19  ;;  %v4783_v18 = vpack.c.bf16 %v4775_v27, %v4775_v27 }
0x18b8   :  { %v4914_v29 = vpop.permute.xlu0 %4913 }
0x18b9   :  { %v4919_v16 = vsel %vm942_vm9, %v4914_v29, 0 }
0x18ba   :  { %4928 = vmatpush.bf16.msra.mxu3 %v4919_v16 }
0x18bb   :  { %v6033_v13 = vpop.eup %6032 }
0x18bc   :  { %v4776_v24 = vmul.f32 %v6033_v13, %v7713_v46 }
0x18bd   :  { %5620 = vmatmul.msk.bf16.vlgmr.msra.gmra.mxu3 %vm938_vm11, %v4785_v31 }
0x18be   :  { %v4784_v49 = vpack.c.bf16 %v4776_v24, %v4776_v24 }
0x18c0   :  { %v4935_v21 = vpop.permute.xlu0 %4934 }
0x18c1   :  { %v4940_v58 = vsel %vm942_vm9, %v4935_v21, 0 }
0x18c2   :  { %4949 = vmatpush.bf16.msra.mxu0 %v4940_v58  ;;  %v4872_v17 = vpop.permute.xlu1 %4871 }
0x18c3   :  { %v4877_v43 = vsel %vm942_vm9, %v4872_v17, 0 }
0x18c4   :  { %v4846_v4 = vpop.f32.mrf.mxu3  ;;  %4886 = vmatpush.bf16.msrb.mxu1 %v4877_v43 }
0x18c5   :  { %4967 = vst [vmem:[#allocation1 + $0x2] ss:$4 sm:$0xff] %v4846_v4 }
0x18c7   :  { %5618 = vmatmul.msk.bf16.vlgmr.msrb.gmra.mxu1 %vm938_vm11, %v4783_v18 }
0x18c8   :  { %v4825_v34 = vpop.f32.mrf.mxu2  ;;  %4996 = vmatpush.bf16.msra.mxu1 %v4987_v47  ;;  %v5689_v47 = vld [vmem:[%s7841_s1 + $0x20] sm:$0xff] }
0x18c9   :  { %4965 = vst [vmem:[#allocation1 + $0x1] ss:$4 sm:$0xff] %v4825_v34 }
0x18cc   :  { %v4848_v1 = vpop.f32.mrf.mxu3 }
0x18d0   :  { %v4827_v32 = vpop.f32.mrf.mxu2 }
0x18d3   :  { %v4804_v52 = vpop.f32.mrf.mxu1 }
0x18d4   :  { %4963 = vst [vmem:[#allocation1] ss:$4 sm:$0xff] %v4804_v52 }
0x18db   :  { %v4806_v42 = vpop.f32.mrf.mxu1 }
0x18e7   :  { %v4762_v14 = vpop.xlane.xlu2 %4761 }
0x18e8   :  { %6034 = vrcp.f32 %v4762_v14 }
0x18ee   :  { %v6035_v3 = vpop.eup %6034 }
0x18ef   :  { %v4778_v35 = vmul.f32 %v6035_v3, %v6025_v40  ;;  %v4893_v50 = vpop.permute.xlu2 %4892  ;;  %v5763_v3 = vld [vmem:[%s7839_s28 + $0x1] ss:$0 sm:$0xff] }
0x18f0   :  { %v4898_v23 = vsel %vm942_vm9, %v4893_v50, 0 }
0x18f1   :  { %v4786_v8 = vpack.c.bf16 %v4778_v35, %v4778_v35  ;;  %4907 = vmatpush.bf16.msra.mxu2 %v4898_v23  ;;  %v5764_v23 = vld [vmem:[%s7840_s0 + $0x1] ss:$0 sm:$0xff] }
0x18f3   :  { %5621 = vmatmul.msk.bf16.vlgmr.msra.gmra.mxu0 %vm938_vm11, %v4786_v8 }
0x18f4   :  { %5619 = vmatmul.msk.bf16.vlgmr.msra.gmra.mxu2 %vm938_vm11, %v4784_v49 }
0x1933   :  { %v4867_v63 = vpop.f32.mrf.mxu0 }
0x1934   :  { %4969 = vst [vmem:[#allocation1 + $0x3] ss:$4 sm:$0xff] %v4867_v63 }
0x193b   :  { %v4869_v54 = vpop.f32.mrf.mxu0  ;;  %v4978_v37 = vld.sshfl [vmem:[#allocation1] sm:$0xff pattern:$0x73625140] }
0x1940   :  { %v4930_v12 = vpop.f32.mrf.mxu3 }
0x1941   :  { %4975 = vst [vmem:[#allocation1 + $0x22] ss:$4 sm:$0xff] %v4930_v12 }
0x1944   :  { %v4888_v15 = vpop.f32.mrf.mxu1 }
0x1945   :  { %4971 = vst [vmem:[#allocation1 + $0x20] ss:$4 sm:$0xff] %v4888_v15 }
0x1948   :  { %v4932_v46 = vpop.f32.mrf.mxu3 }
0x1949   :  { %v5692_v46 = vld [vmem:[%s7841_s1 + $0x38] sm:$0xff] }
0x194a   :  { %5136 = vmatpush.bf16.msrb.mxu3 %v5692_v46 }
0x194c   :  { %v4890_v48 = vpop.f32.mrf.mxu1 }
0x194d   :  { %v5691_v48 = vld [vmem:[%s7841_s1 + $0x30] sm:$0xff] }
0x194e   :  { %5137 = vmatpush.bf16.msrb.mxu3 %v5691_v48 }
0x1952   :  { %5138 = vmatpush.bf16.msrb.mxu3 %v5690_v9 }
0x1956   :  { %5139 = vmatpush.bf16.msrb.mxu3 %v5689_v47 }
0x1970   :  { %v4951_v44 = vpop.f32.mrf.mxu0 }
0x1971   :  { %4977 = vst [vmem:[#allocation1 + $0x23] ss:$4 sm:$0xff] %v4951_v44 }
0x1977   :  { %v4909_v25 = vpop.f32.mrf.mxu2 }
0x1978   :  { %4973 = vst [vmem:[#allocation1 + $0x21] ss:$4 sm:$0xff] %v4909_v25  ;;  %v4953_v0 = vpop.f32.mrf.mxu0  ;;  %v5765_v25 = vld [vmem:[%s7842_s2 + $0x1] ss:$0 sm:$0xff] }
0x197f   :  { %v4911_v51 = vpop.f32.mrf.mxu2  ;;  %v4979_v36 = vld.sshfl [vmem:[#allocation1 + $0x20] sm:$0xff pattern:$0x73625140] }
0x1980   :  { %v4982_v61 = vpack.c.bf16 %v4979_v36, %v4978_v37 }
0x1982   :  { %5622 = vmatmul.msk.bf16.vlgmr.msra.gmra.mxu1 %vm651_vm8, %v4982_v61 }
0x19ff   :  { %v4998_v59 = vpop.f32.mrf.mxu1 }
0x1a00   :  { %v5003_v2 = vadd.f32 %v4998_v59, %v7675_v33  ;;  %v5766_v59 = vld [vmem:[%s7843_s7 + $0x1] ss:$0 sm:$0xff] }
0x1a02   :  { %v5008_v30 = vadd.f32 %v5762_v57, %v5003_v2 }
0x1a04   :  { %v5010_v6 = vadd.f32 %v5008_v30, %v7085_v41 }
0x1a06   :  { %v5012_v62 = vsel %vm339_vm4, %v5010_v6, 0.0 }
0x1a07   :  { %v5000_v40 = vpop.f32.mrf.mxu1  ;;  %5013 = vadd.xlane.f32.xlu2 %v5012_v62 }
0x1a08   :  { %v5004_v39 = vadd.f32 %v5000_v40, %v7687_v55 }
0x1a0a   :  { %v5009_v56 = vadd.f32 %v5762_v57, %v5004_v39 }
0x1a0c   :  { %v5011_v11 = vadd.f32 %v5009_v56, %v7087_v53  ;;  %v5688_v53 = vld [vmem:[%s7838_s26 + $0x18] sm:$0xff] }
0x1a0d   :  { %5091 = vmatpush.bf16.msrb.mxu2 %v5688_v53 }
0x1a0e   :  { %v5015_v5 = vsel %vm339_vm4, %v5011_v11, 0.0 }
0x1a0f   :  { %5016 = vadd.xlane.f32.xlu1 %v5015_v5 }
0x1a11   :  { %5092 = vmatpush.bf16.msrb.mxu2 %v5687_v22 }
0x1a7a   :  { %v5014_v10 = vpop.xlane.xlu2 %5013 }
0x1a7b   :  { %v5018_v45 = vmul.f32 %v5014_v10, %v7053_v7 }
0x1a7d   :  { %v5020_v33 = vsub.f32 %v5010_v6, %v5018_v45 }
0x1a7f   :  { %v5022_v26 = vmul.f32 %v5020_v33, %v5020_v33 }
0x1a81   :  { %v5024_v41 = vsel %vm339_vm4, %v5022_v26, 0.0 }
0x1a82   :  { %v5017_v60 = vpop.xlane.xlu1 %5016  ;;  %5025 = vadd.xlane.f32.xlu0 %v5024_v41 }
0x1a83   :  { %v5019_v28 = vmul.f32 %v5017_v60, %v7053_v7 }
0x1a85   :  { %v5021_v55 = vsub.f32 %v5011_v11, %v5019_v28 }
0x1a87   :  { %v5023_v19 = vmul.f32 %v5021_v55, %v5021_v55 }
0x1a89   :  { %v5027_v20 = vsel %vm339_vm4, %v5023_v19, 0.0 }
0x1a8a   :  { %5028 = vadd.xlane.f32.xlu2 %v5027_v20 }
0x1af5   :  { %v5026_v29 = vpop.xlane.xlu0 %5025 }
0x1af6   :  { %v5030_v16 = vmul.f32 %v5026_v29, %v7053_v7 }
0x1af8   :  { %v5032_v31 = vadd.f32 1e-05, %v5030_v16  ;;  %v5694_v16 = vld [vmem:[%s6342_s24 + $0x8] sm:$0xff] }
0x1af9   :  { %5270 = vmatpush.bf16.msrb.mxu0 %v5694_v16 }
0x1afa   :  { %6036 = vrsqrt.f32 %v5032_v31  ;;  %vm5040_vm8 = vweird.f32 %v5032_v31 }
0x1afd   :  { %v5029_v21 = vpop.xlane.xlu2 %5028 }
0x1afe   :  { %v5031_v27 = vmul.f32 %v5029_v21, %v7053_v7  ;;  %v5693_v21 = vld [vmem:[%s6342_s24] sm:$0xff] }
0x1aff   :  { %5271 = vmatpush.bf16.msrb.mxu0 %v5693_v21 }
0x1b00   :  { %v6037_v58 = vpop.eup %6036  ;;  %v5033_v17 = vadd.f32 1e-05, %v5031_v27 }
0x1b01   :  { %v5035_v43 = vmul.f32 %v6037_v58, %v5032_v31  ;;  %vm5041_vm0 = vweird.f32 %v6037_v58 }
0x1b02   :  { %6038 = vrsqrt.f32 %v5033_v17  ;;  %vm5042_vm9 = vmor %vm5040_vm8, %vm5041_vm0  ;;  %vm5050_vm11 = vweird.f32 %v5033_v17 }
0x1b03   :  { %v5036_v4 = vmul.f32 %v6037_v58, %v5035_v43 }
0x1b05   :  { %v5037_v18 = vmul.f32 0.5, %v5036_v4 }
0x1b07   :  { %v5038_v34 = vsub.f32 1.5, %v5037_v18  ;;  %v6172_v18 = vmov 8.0  }
0x1b08   :  { %v6039_v1 = vpop.eup %6038 }
0x1b09   :  { %v5039_v32 = vmul.f32 %v6037_v58, %v5038_v34  ;;  %v5045_v52 = vmul.f32 %v6039_v1, %v5033_v17  ;;  %vm5051_vm10 = vweird.f32 %v6039_v1 }
0x1b0a   :  { %vm5052_vm1 = vmor %vm5050_vm11, %vm5051_vm10 }
0x1b0b   :  { %v5046_v42 = vmul.f32 %v6039_v1, %v5045_v52  ;;  %v5043_v38 = vsel %vm5042_vm9, %v6037_v58, %v5039_v32 }
0x1b0c   :  { %v5054_v24 = vmul.f32 %v5043_v38, %v5020_v33 }
0x1b0d   :  { %v5047_v14 = vmul.f32 0.5, %v5046_v42 }
0x1b0e   :  { %v5059_v8 = vmul.f32 %v5763_v3, %v5054_v24 }
0x1b0f   :  { %v5048_v13 = vsub.f32 1.5, %v5047_v14 }
0x1b10   :  { %v5064_v54 = vadd.f32 %v5764_v23, %v5059_v8 }
0x1b11   :  { %v5049_v35 = vmul.f32 %v6039_v1, %v5048_v13  ;;  %v5768_v13 = vld [vmem:[%s6337_s14 + $0x1] ss:$0 sm:$0xff]  ;;  %s6173_s14 = smov [#allocation7]  }
0x1b12   :  { %s5284_s24 = sshll.u32 %s6173_s14, 4  ;;  %s5285_s24 = int_to_ptr.vmem [resolvable:$true] %s5284_s24 }
0x1b13   :  { %v5053_v50 = vsel %vm5052_vm1, %v6039_v1, %v5049_v35 }
0x1b14   :  { %v5055_v49 = vmul.f32 %v5053_v50, %v5021_v55 }
0x1b16   :  { %v5060_v63 = vmul.f32 %v5763_v3, %v5055_v49 }
0x1b18   :  { %v5065_v12 = vadd.f32 %v5764_v23, %v5060_v63 }
0x1b1a   :  { %v5066_v15 = vpack.c.bf16 %v5065_v12, %v5064_v54 }
0x1b1c   :  { %5631 = vmatmul.msk.bf16.vlgmr.msrb.gmra.mxu2 %vm339_vm4, %v5066_v15 }
0x1b9f   :  { %v5094_v44 = vpop.f32.mrf.mxu2 }
0x1ba0   :  { %v5095_v0 = vadd.f32 %v5765_v25, %v5094_v44 }
0x1ba2   :  { %v5099_v36 = vmax.f32 %v5095_v0, 0.0 }
0x1ba7   :  { %v5096_v51 = vpop.f32.mrf.mxu2 }
0x1ba8   :  { %v5097_v37 = vadd.f32 %v5765_v25, %v5096_v51 }
0x1baa   :  { %v5100_v61 = vmax.f32 %v5097_v37, 0.0 }
0x1bac   :  { %v5101_v57 = vpack.c.bf16 %v5100_v61, %v5099_v36 }
0x1bae   :  { %5648 = vmatmul.msk.bf16.vlgmr.msrb.gmra.mxu3 %vm260_vm5, %v5101_v57 }
0x1c31   :  { %v5141_v2 = vpop.f32.mrf.mxu3 }
0x1c32   :  { %v5142_v30 = vadd.f32 %v5766_v59, %v5141_v2 }
0x1c34   :  { %v5146_v6 = vadd.f32 %v5142_v30, %v5064_v54 }
0x1c36   :  { %v5148_v62 = vsel %vm339_vm4, %v5146_v6, 0.0 }
0x1c37   :  { %5149 = vadd.xlane.f32.xlu1 %v5148_v62 }
0x1c39   :  { %v5143_v40 = vpop.f32.mrf.mxu3 }
0x1c3a   :  { %v5144_v39 = vadd.f32 %v5766_v59, %v5143_v40 }
0x1c3c   :  { %v5147_v56 = vadd.f32 %v5144_v39, %v5065_v12 }
0x1c3e   :  { %v5151_v11 = vsel %vm339_vm4, %v5147_v56, 0.0 }
0x1c3f   :  { %5152 = vadd.xlane.f32.xlu0 %v5151_v11 }
0x1caa   :  { %v5150_v5 = vpop.xlane.xlu1 %5149 }
0x1cab   :  { %v5154_v10 = vmul.f32 %v5150_v5, %v7053_v7 }
0x1cad   :  { %v5156_v45 = vsub.f32 %v5146_v6, %v5154_v10 }
0x1caf   :  { %v5158_v33 = vmul.f32 %v5156_v45, %v5156_v45 }
0x1cb1   :  { %v5160_v26 = vsel %vm339_vm4, %v5158_v33, 0.0 }
0x1cb2   :  { %v5153_v41 = vpop.xlane.xlu0 %5152  ;;  %5161 = vadd.xlane.f32.xlu2 %v5160_v26 }
0x1cb3   :  { %v5155_v60 = vmul.f32 %v5153_v41, %v7053_v7 }
0x1cb5   :  { %v5157_v28 = vsub.f32 %v5147_v56, %v5155_v60  ;;  %v5769_v60 = vld [vmem:[#allocation5] ss:$0 sm:$0xff] }
0x1cb7   :  { %v5159_v55 = vmul.f32 %v5157_v28, %v5157_v28 }
0x1cb9   :  { %v5163_v19 = vsel %vm339_vm4, %v5159_v55, 0.0 }
0x1cba   :  { %5164 = vadd.xlane.f32.xlu1 %v5163_v19 }
0x1d25   :  { %v5162_v20 = vpop.xlane.xlu2 %5161 }
0x1d26   :  { %v5166_v53 = vmul.f32 %v5162_v20, %v7053_v7 }
0x1d28   :  { %v5168_v29 = vadd.f32 1e-05, %v5166_v53 }
0x1d2a   :  { %6040 = vrsqrt.f32 %v5168_v29  ;;  %vm5176_vm2 = vweird.f32 %v5168_v29 }
0x1d2d   :  { %v5165_v31 = vpop.xlane.xlu1 %5164 }
0x1d2e   :  { %v5167_v22 = vmul.f32 %v5165_v31, %v7053_v7  ;;  %v5767_v7 = vld [vmem:[%s7844_s10 + $0x1] ss:$0 sm:$0xff] }
0x1d30   :  { %v6041_v27 = vpop.eup %6040  ;;  %v5169_v58 = vadd.f32 1e-05, %v5167_v22 }
0x1d31   :  { %v5171_v17 = vmul.f32 %v6041_v27, %v5168_v29  ;;  %vm5177_vm5 = vweird.f32 %v6041_v27 }
0x1d32   :  { %6042 = vrsqrt.f32 %v5169_v58  ;;  %vm5178_vm3 = vmor %vm5176_vm2, %vm5177_vm5  ;;  %vm5186_vm12 = vweird.f32 %v5169_v58 }
0x1d33   :  { %v5172_v43 = vmul.f32 %v6041_v27, %v5171_v17  ;;  %6044 = vrcp.f32 %v6172_v18 }
0x1d35   :  { %v5173_v4 = vmul.f32 0.5, %v5172_v43 }
0x1d37   :  { %v5174_v34 = vsub.f32 1.5, %v5173_v4 }
0x1d38   :  { %v6043_v1 = vpop.eup %6042 }
0x1d39   :  { %v5175_v32 = vmul.f32 %v6041_v27, %v5174_v34  ;;  %v5181_v52 = vmul.f32 %v6043_v1, %v5169_v58  ;;  %v6045_v14 = vpop.eup %6044  ;;  %vm5187_vm6 = vweird.f32 %v6043_v1 }
0x1d3a   :  { %v5233_v23 = vmul.f32 8.0, %v6045_v14  ;;  %vm5188_vm13 = vmor %vm5186_vm12, %vm5187_vm6  ;;  %vm5237_vm14 = vweird.f32 %v6045_v14 }
0x1d3b   :  { %v5179_v42 = vsel %vm5178_vm3, %v6041_v27, %v5175_v32  ;;  %v5182_v38 = vmul.f32 %v6043_v1, %v5181_v52 }
0x1d3c   :  { %v5190_v3 = vmul.f32 %v5179_v42, %v5156_v45  ;;  %v5234_v15 = vsub.f32 1.0, %v5233_v23 }
0x1d3d   :  { %v5183_v24 = vmul.f32 0.5, %v5182_v38 }
0x1d3e   :  { %v5195_v35 = vmul.f32 %v5767_v7, %v5190_v3  ;;  %v5235_v61 = vmul.f32 %v6045_v14, %v5234_v15 }
0x1d3f   :  { %v5184_v50 = vsub.f32 1.5, %v5183_v24 }
0x1d40   :  { %v5200_v8 = vadd.f32 %v5768_v13, %v5195_v35  ;;  %v5236_v39 = vadd.f32 %v6045_v14, %v5235_v61 }
0x1d41   :  { %v5185_v49 = vmul.f32 %v6043_v1, %v5184_v50 }
0x1d42   :  { %v5204_v63 = vrot.slane %v5200_v8, 2  ;;  %v5205_v54 = vrot.slane %v5200_v8, 4  ;;  %v5206_v46 = vrot.slane %v5200_v8, 6  ;;  %v5217_v48 = vsel %vm5216_vm7, %v5200_v8, 0.0 }
0x1d43   :  { %v5189_v12 = vsel %vm5188_vm13, %v6043_v1, %v5185_v49  ;;  %v5238_v45 = vsel %vm5237_vm14, %v6045_v14, %v5236_v39 }
0x1d44   :  { %v5218_v9 = vsel %vm5216_vm7, %v5204_v63, 0.0  ;;  %v5191_v47 = vmul.f32 %v5189_v12, %v5157_v28  ;;  %v5220_v25 = vsel %vm5216_vm7, %v5205_v54, 0.0  ;;  %v5222_v37 = vsel %vm5216_vm7, %v5206_v46, 0.0 }
0x1d45   :  { %v5219_v44 = vadd.f32 %v5218_v9, %v5217_v48 }
0x1d46   :  { %v5196_v0 = vmul.f32 %v5767_v7, %v5191_v47 }
0x1d47   :  { %v5221_v51 = vadd.f32 %v5220_v25, %v5219_v44 }
0x1d48   :  { %v5201_v36 = vadd.f32 %v5768_v13, %v5196_v0 }
0x1d49   :  { %v5223_v57 = vadd.f32 %v5222_v37, %v5221_v51 }
0x1d4a   :  { %v5207_v59 = vrot.slane %v5201_v36, 2  ;;  %v5208_v2 = vrot.slane %v5201_v36, 4  ;;  %v5224_v30 = vsel %vm5216_vm7, %v5201_v36, 0.0  ;;  %v5209_v62 = vrot.slane %v5201_v36, 6 }
0x1d4b   :  { %v5225_v6 = vadd.f32 %v5224_v30, %v5223_v57 }
0x1d4c   :  { %v5226_v40 = vsel %vm5216_vm7, %v5207_v59, 0.0  ;;  %v5228_v11 = vsel %vm5216_vm7, %v5208_v2, 0.0  ;;  %v5230_v10 = vsel %vm5216_vm7, %v5209_v62, 0.0 }
0x1d4d   :  { %v5227_v56 = vadd.f32 %v5226_v40, %v5225_v6 }
0x1d4f   :  { %v5229_v5 = vadd.f32 %v5228_v11, %v5227_v56 }
0x1d51   :  { %v5231_v33 = vadd.f32 %v5230_v10, %v5229_v5 }
0x1d53   :  { %v5239_v26 = vmul.f32 %v5238_v45, %v5231_v33 }
0x1d55   :  { %v5240_v41 = vpack.c.bf16 %v5239_v26, %v5239_v26 }
0x1d57   :  { %5657 = vmatmul.msk.bf16.vlgmr.msrb.gmra.mxu0 %vm339_vm4, %v5240_v41 }
0x1dd4   :  { %v5273_v28 = vpop.f32.mrf.mxu0 }
0x1dd5   :  { %v5274_v55 = vadd.f32 %v5769_v60, %v5273_v28 }
0x1dd7   :  { %5278 = vst.msk [vmem:[#allocation7] sm:$0x3] %vm5277_vm15, %v5274_v55 }
0x1dd8   :  { %6117 = shalt.err (!%p6114_p0)
}
0x1dd9   :  { %5289 = dma.vmem_to_hbm [thread:$0]  %s5285_s24, 32, %s5287_s5, [#allocation4]  }
0x1ddc   :  { %v5275_v19 = vpop.f32.mrf.mxu0 }
0x1ddd   :  { %6122 = dma.done.wait [#allocation4], 32  }
0x1dde   :  { %6123 = vsyncadd [#allocation4], 4294967264 }
0x1ddf   :  { %5294 = vsyncpa [#allocation3], 1 }
0x1de0   :  { %5295 = vsyncpa [#allocation6], 1 }
0x1de1   :  { %5296 = vsyncpa [#allocation4], 1 }

</bundles_post_ra>
